<compile_context>
chip_gen: v6e
topology: v6e:2x2x1
jax: 0.10.0
libtpu: 0.0.40
codegen_flags: <defaults>
</compile_context>

<pallas_src>
import functools

import jax
import jax.numpy as jnp
import numpy as np
from jax.experimental import pallas as pl
from jax.experimental.pallas import tpu as pltpu

BN_EPS = 1e-5
LANE = 128


def _cpad(c):
    return ((c + LANE - 1) // LANE) * LANE


def _vmem_limit_bytes():
    # Generation-aware VMEM budget (don't cap 128-MiB chips at a v7x-sized 32 MiB).
    try:
        cap = int(pltpu.get_tpu_info().vmem_capacity_bytes)
        return int(min(cap // 2, 96 * 1024 * 1024))
    except Exception:
        return 32 * 1024 * 1024


_VMEM_LIMIT = _vmem_limit_bytes()


def _apply_act(y, act):
    if act == "leaky_relu":
        return jnp.where(y >= 0.0, y, 0.2 * y)
    if act == "relu":
        return jnp.maximum(y, 0.0)
    if act == "tanh":
        return jnp.tanh(y)
    return y


# -----------------------------------------------------------------------------
# Fused conv / deconv-phase GEMM kernel.  One grid step = one batch element.
#   x_ref            : (H, W, Cp)   bf16 raw input image (un-padded)
#   w_ref            : (KT*KT*Cp, Nout) bf16 GEMM weight
#   sc_ref / sh_ref  : (1, 1, Cp)   f32 fused-BN scale / shift for the INPUT (opt.)
#   b_ref            : (1, Nout)    f32 conv bias (opt.)
#   y_ref            : (Hout*Wout, Nout) bf16 output (raw pre-BN if with_stats)
#   sum_ref/ssq_ref  : (1, Nout)    f32 per-image BN partial stats (opt.)
#   xs_ref           : (Hp, Wp, Cp) f32 VMEM scratch: zero-padded, BN-applied input
# -----------------------------------------------------------------------------
def _conv_gemm_kernel(*refs, KT, stride, Hout, Wout, pad_lo, in_act, out_act,
                      has_bn_in, has_bias, with_stats, zero_border):
    it = iter(refs)
    x_ref = next(it)
    w_ref = next(it)
    sc_ref = sh_ref = b_ref = None
    if has_bn_in:
        sc_ref = next(it)
        sh_ref = next(it)
    if has_bias:
        b_ref = next(it)
    y_ref = next(it)
    if with_stats:
        sum_ref = next(it)
        ssq_ref = next(it)
    xs_ref = next(it)

    H, W, Cp = x_ref.shape

    # Stage the (optionally BN+activated) input into a zero-padded VMEM scratch.
    # Doing the spatial padding here (instead of XLA) avoids any padded HBM copy
    # and keeps the fused-BN apply from touching the zero border.
    if zero_border:
        xs_ref[...] = jnp.zeros(xs_ref.shape, xs_ref.dtype)
    xv = x_ref[...].astype(jnp.float32)
    if has_bn_in:
        xv = _apply_act(xv * sc_ref[...] + sh_ref[...], in_act)
    xs_ref[pl.ds(pad_lo, H), pl.ds(pad_lo, W), :] = xv

    # Tap gather: KT*KT unit- or strided- offset windows, concatenated on the lane
    # axis -> one (M, KT*KT*Cp) bf16 patch, one MXU GEMM with f32 accumulation.
    taps = []
    for kh in range(KT):
        for kw in range(KT):
            if stride > 1:
                v = xs_ref[pl.ds(kh, Hout, stride=stride),
                           pl.ds(kw, Wout, stride=stride), :]
            else:
                v = xs_ref[pl.ds(kh, Hout), pl.ds(kw, Wout), :]
            taps.append(v.astype(jnp.bfloat16))
    patch = jnp.concatenate(taps, axis=-1).reshape(Hout * Wout, KT * KT * Cp)
    y = jnp.dot(patch, w_ref[...], preferred_element_type=jnp.float32)
    if has_bias:
        y = y + b_ref[...]

    if with_stats:
        # Raw pre-BN output; batch statistics are finished in XLA and the BN apply
        # (+ activation) is fused into the NEXT layer's kernel.
        y_ref[...] = y.astype(y_ref.dtype)
        sum_ref[...] = jnp.sum(y, axis=0, keepdims=True)
        ssq_ref[...] = jnp.sum(y * y, axis=0, keepdims=True)
    else:
        y_ref[...] = _apply_act(y, out_act).astype(y_ref.dtype)


def _conv_gemm(x, wmat, bias, bn_in, in_act, *, KT, stride, pad_lo, Hout, Wout,
               out_act, with_stats):
    N, H, W, Cp = x.shape
    KC, Nout = wmat.shape
    assert KC == KT * KT * Cp, (KC, KT, Cp)
    Hp = max((Hout - 1) * stride + KT, pad_lo + H)
    Wp = max((Wout - 1) * stride + KT, pad_lo + W)
    zero_border = (pad_lo > 0) or (Hp > H) or (Wp > W)
    has_bn_in = bn_in is not None
    has_bias = bias is not None

    inputs = [x, wmat]
    in_specs = [
        pl.BlockSpec((None, H, W, Cp), lambda n: (n, 0, 0, 0)),
        pl.BlockSpec((KC, Nout), lambda n: (0, 0)),
    ]
    if has_bn_in:
        inputs += [bn_in[0], bn_in[1]]
        in_specs += [pl.BlockSpec((1, 1, Cp), lambda n: (0, 0, 0)),
                     pl.BlockSpec((1, 1, Cp), lambda n: (0, 0, 0))]
    if has_bias:
        inputs.append(bias)
        in_specs.append(pl.BlockSpec((1, Nout), lambda n: (0, 0)))

    M = Hout * Wout
    y_shape = jax.ShapeDtypeStruct((N, M, Nout), jnp.bfloat16)
    y_spec = pl.BlockSpec((None, M, Nout), lambda n: (n, 0, 0))
    if with_stats:
        st_shape = jax.ShapeDtypeStruct((N, 1, Nout), jnp.float32)
        st_spec = pl.BlockSpec((None, 1, Nout), lambda n: (n, 0, 0))
        out_shape = (y_shape, st_shape, st_shape)
        out_specs = (y_spec, st_spec, st_spec)
    else:
        out_shape = y_shape
        out_specs = y_spec

    kernel = functools.partial(
        _conv_gemm_kernel, KT=KT, stride=stride, Hout=Hout, Wout=Wout,
        pad_lo=pad_lo, in_act=in_act, out_act=out_act, has_bn_in=has_bn_in,
        has_bias=has_bias, with_stats=with_stats, zero_border=zero_border)

    return pl.pallas_call(
        kernel,
        out_shape=out_shape,
        grid=(N,),
        in_specs=in_specs,
        out_specs=out_specs,
        scratch_shapes=[pltpu.VMEM((Hp, Wp, Cp), jnp.float32)],
        compiler_params=pltpu.CompilerParams(
            dimension_semantics=("parallel",),
            vmem_limit_bytes=_VMEM_LIMIT),
    )(*inputs)


# -----------------------------------------------------------------------------
# Layer forward (wrapper-side glue: weight prep done at build time, here only
# cheap reshapes/transposes and the batch-wide BN reduction between kernels).
# -----------------------------------------------------------------------------
def layer_forward(x, layer, pending):
    N, H, W, _ = x.shape
    bn_in = in_act = None
    if pending is not None:
        bn_in = (pending[0], pending[1])
        in_act = pending[2]
    Cout_p = layer["Cout_pad"]
    with_stats = layer["bn"] is not None

    if layer["type"] == "conv":
        K, s, p = layer["K"], layer["stride"], layer["pad"]
        Hout = (H + 2 * p - K) // s + 1
        Wout = (W + 2 * p - K) // s + 1
        outs = _conv_gemm(x, layer["wmat"], layer["bias"], bn_in, in_act,
                          KT=K, stride=s, pad_lo=p, Hout=Hout, Wout=Wout,
                          out_act=layer["act"], with_stats=with_stats)
        n_phase = 1
        M_total = N * Hout * Wout

        def to_spatial(yflat):
            return yflat.reshape(N, Hout, Wout, Cout_p)
    else:  # output-phase decomposed transposed conv (stride > 1)
        s, U, pad_lo, K, p = (layer["stride"], layer["U"], layer["pad_lo"],
                              layer["K"], layer["pad"])
        assert (H - 1) * s - 2 * p + K == s * H, "unsupported deconv geometry"
        outs = _conv_gemm(x, layer["wmat"], layer["bias"], bn_in, in_act,
                          KT=U, stride=1, pad_lo=pad_lo, Hout=H, Wout=W,
                          out_act=layer["act"], with_stats=with_stats)
        n_phase = s * s
        M_total = N * H * W * n_phase

        def to_spatial(yflat):
            y6 = yflat.reshape(N, H, W, s, s, Cout_p)
            y6 = jnp.transpose(y6, (0, 1, 3, 2, 4, 5))   # interleave phases
            return y6.reshape(N, H * s, W * s, Cout_p)

    if not with_stats:
        return to_spatial(outs), None

    y, sums, ssqs = outs
    tot_s = jnp.sum(sums, axis=(0, 1))
    tot_q = jnp.sum(ssqs, axis=(0, 1))
    if n_phase > 1:
        tot_s = tot_s.reshape(n_phase, Cout_p).sum(axis=0)
        tot_q = tot_q.reshape(n_phase, Cout_p).sum(axis=0)
    mean = tot_s / M_total
    # TODO(synk): one-pass E[x^2]-E[x]^2 can cancel for large activations; switch
    # to a Welford / mean-subtracted second pass if BN accuracy matters at scale.
    var = jnp.maximum(tot_q / M_total - mean * mean, 0.0)
    gamma, beta = layer["bn"]
    scale = gamma * jax.lax.rsqrt(var + BN_EPS)
    shift = beta - mean * scale
    pending_out = (scale.reshape(1, 1, Cout_p), shift.reshape(1, 1, Cout_p),
                   layer["act"])
    return to_spatial(y), pending_out


def _flush_pending(x, pending):
    if pending is None:
        return x
    scale, shift, act = pending
    y = x.astype(jnp.float32) * scale.reshape(1, 1, 1, -1) + shift.reshape(1, 1, 1, -1)
    return _apply_act(y, act).astype(x.dtype)


def apply_layers(x, layers):
    pending = None
    for layer in layers:
        x, pending = layer_forward(x, layer, pending)
    return _flush_pending(x, pending)   # no-op for these nets (they end act-only)


# -----------------------------------------------------------------------------
# Parameter construction mirroring the PyTorch __init__ logic.
# -----------------------------------------------------------------------------
def _make_bn(cout):
    cp = _cpad(cout)
    # NOTE: gamma is ZERO-padded (not one-padded) so padded output channels get
    # scale == 0 and stay exactly zero through the fused BN + activation.
    gamma = jnp.pad(jnp.ones((cout,), jnp.float32), (0, cp - cout))
    beta = jnp.zeros((cp,), jnp.float32)
    return (gamma, beta)


def _conv_wmat(w_conv):
    """(Cout, Cin, K, K) -> (K*K*Cin_pad, Cout_pad) bf16, taps ordered (kh, kw, ci)."""
    Cout, Cin, K, _ = w_conv.shape
    Cin_p, Cout_p = _cpad(Cin), _cpad(Cout)
    wt = jnp.transpose(w_conv, (2, 3, 1, 0))                 # (K, K, Cin, Cout)
    wt = jnp.pad(wt, ((0, 0), (0, 0), (0, Cin_p - Cin), (0, Cout_p - Cout)))
    return wt.reshape(K * K * Cin_p, Cout_p).astype(jnp.bfloat16)


def _deconv_phase_wmat(w_t, s, p, Cin_pad, Cout_pad):
    """Phase-stacked GEMM weight for a stride-s ConvTranspose2d.

    Output phase (a, b) at (s*i+a, s*j+b) = sum over union-taps (uh, uw) of
    x_pad[i+uh, j+uw] . W[:, :, kh, kw] with kh = a + p - s*(uh + d_min).
    """
    Cin, Cout, K, _ = w_t.shape
    ds_all = [(a + p - k) // s for a in range(s) for k in range(K)
              if (a + p - k) % s == 0]
    d_min, d_max = min(ds_all), max(ds_all)
    assert d_min <= 0 <= d_max
    U = d_max - d_min + 1
    w_np = np.asarray(w_t, dtype=np.float32)
    Wg = np.zeros((U, U, Cin_pad, s, s, Cout_pad), np.float32)
    for a in range(s):
        for kh in range(K):
            if (a + p - kh) % s:
                continue
            uh = (a + p - kh) // s - d_min
            for b in range(s):
                for kw in range(K):
                    if (b + p - kw) % s:
                        continue
                    uw = (b + p - kw) // s - d_min
                    Wg[uh, uw, :Cin, a, b, :Cout] = w_np[:, :, kh, kw]
    wmat = jnp.asarray(Wg.reshape(U * U * Cin_pad, s * s * Cout_pad),
                       dtype=jnp.bfloat16)
    return wmat, U, -d_min


def _make_conv_layer(key, Cin, Cout, K, stride, pad, bn, act, bias):
    kw_, kb = jax.random.split(key)
    w = 0.05 * jax.random.normal(kw_, (Cout, Cin, K, K), jnp.float32)
    b = None
    if bias:
        b = 0.05 * jax.random.normal(kb, (Cout,), jnp.float32)
        b = jnp.pad(b, (0, _cpad(Cout) - Cout)).reshape(1, -1)
    return {"type": "conv", "K": K, "stride": stride, "pad": pad,
            "wmat": _conv_wmat(w), "bias": b, "Cout_pad": _cpad(Cout),
            "bn": _make_bn(Cout) if bn else None, "act": act}


def _make_deconv_layer(key, Cin, Cout, K, stride, pad, bn, act):
    w_t = 0.05 * jax.random.normal(key, (Cin, Cout, K, K), jnp.float32)
    if stride == 1:
        # stride-1 transposed conv == stride-1 conv with flipped, swapped kernel.
        w_conv = jnp.transpose(w_t[:, :, ::-1, ::-1], (1, 0, 2, 3))
        return {"type": "conv", "K": K, "stride": 1, "pad": K - 1 - pad,
                "wmat": _conv_wmat(w_conv), "bias": None, "Cout_pad": _cpad(Cout),
                "bn": _make_bn(Cout) if bn else None, "act": act}
    wmat, U, pad_lo = _deconv_phase_wmat(w_t, stride, pad, _cpad(Cin), _cpad(Cout))
    return {"type": "deconv", "K": K, "stride": stride, "pad": pad, "U": U,
            "pad_lo": pad_lo, "wmat": wmat, "bias": None, "Cout_pad": _cpad(Cout),
            "bn": _make_bn(Cout) if bn else None, "act": act}


def make_encoder_params(key, input_height, in_chans, out_chans, latent_dim):
    assert input_height % 16 == 0
    layers = []
    key, k = jax.random.split(key)
    layers.append(_make_conv_layer(k, in_chans, out_chans, 4, 2, 1,
                                   bn=False, act="leaky_relu", bias=False))
    h, oc = input_height // 2, out_chans
    while h > 4:
        key, k = jax.random.split(key)
        layers.append(_make_conv_layer(k, oc, oc * 2, 4, 2, 1,
                                       bn=True, act="leaky_relu", bias=False))
        oc *= 2
        h //= 2
    key, k = jax.random.split(key)
    # PyTorch's final latent Conv2d keeps its default bias=True.
    layers.append(_make_conv_layer(k, oc, latent_dim, 4, 1, 0,
                                   bn=False, act=None, bias=True))
    return layers


def make_decoder_params(key, input_height, in_chans, out_chans, latent_dim):
    assert input_height % 16 == 0
    oc, ts = out_chans // 2, 4
    while ts != input_height:
        oc *= 2
        ts *= 2
    layers = []
    key, k = jax.random.split(key)
    layers.append(_make_deconv_layer(k, latent_dim, oc, 4, 1, 0, bn=True, act="relu"))
    ts = 4
    while ts < input_height // 2:
        key, k = jax.random.split(key)
        layers.append(_make_deconv_layer(k, oc, oc // 2, 4, 2, 1, bn=True, act="relu"))
        oc //= 2
        ts *= 2
    key, k = jax.random.split(key)
    layers.append(_make_deconv_layer(k, oc, in_chans, 4, 2, 1, bn=False, act="tanh"))
    return layers


# -----------------------------------------------------------------------------
# Generator forward (Encoder1 -> Decoder -> Encoder2), NCHW only at the boundary.
# -----------------------------------------------------------------------------
def generator_forward(x_nchw, enc1, dec, enc2, in_chans, latent_dim):
    N, C, H, W = x_nchw.shape
    x = jnp.transpose(x_nchw, (0, 2, 3, 1))
    x = jnp.pad(x, ((0, 0), (0, 0), (0, 0), (0, _cpad(C) - C))).astype(jnp.bfloat16)
    lat1 = apply_layers(x, enc1)        # (N, 1, 1, 128)   padded channels == 0
    xhat = apply_layers(lat1, dec)      # (N, H, W, 128)
    lat2 = apply_layers(xhat, enc2)     # (N, 1, 1, 128)
    x_hat = jnp.transpose(xhat[..., :in_chans], (0, 3, 1, 2)).astype(jnp.float32)
    latent1 = jnp.transpose(lat1[..., :latent_dim], (0, 3, 1, 2)).astype(jnp.float32)
    latent2 = jnp.transpose(lat2[..., :latent_dim], (0, 3, 1, 2)).astype(jnp.float32)
    return x_hat, latent1, latent2


# -----------------------------------------------------------------------------
# Example run
# -----------------------------------------------------------------------------
if __name__ == "__main__":
    input_height = 16
    in_chans = 4
    generator_feature_dim = 8
    latent_dim = 16
    batch = 2

    key = jax.random.PRNGKey(0)
    kx, k1, k2, k3 = jax.random.split(key, 4)

    x = jax.random.normal(kx, (batch, in_chans, input_height, input_height),
                          dtype=jnp.float32)

    enc1 = make_encoder_params(k1, input_height, in_chans, generator_feature_dim, latent_dim)
    dec = make_decoder_params(k2, input_height, in_chans, generator_feature_dim, latent_dim)
    enc2 = make_encoder_params(k3, input_height, in_chans, generator_feature_dim, latent_dim)

    fwd = jax.jit(lambda inp: generator_forward(inp, enc1, dec, enc2, in_chans, latent_dim))
    x_hat, latent1, latent2 = fwd(x)
    jax.block_until_ready((x_hat, latent1, latent2))

    assert x_hat.shape == (batch, in_chans, input_height, input_height), x_hat.shape
    assert latent1.shape == (batch, latent_dim, 1, 1), latent1.shape
    assert latent2.shape == (batch, latent_dim, 1, 1), latent2.shape
    assert bool(jnp.all(jnp.isfinite(x_hat)))
    assert bool(jnp.all(jnp.isfinite(latent1)))
    assert bool(jnp.all(jnp.isfinite(latent2)))

    print("KERNEL_OK")
</pallas_src>

<mosaic_0001>
module attributes {stable_mosaic.version = 11 : i64} {
  func.func @_conv_gemm_kernel(%arg0: i32, %arg1: memref<1x16x16x128xbf16, #tpu.memory_space<vmem>>, %arg2: memref<2048x128xbf16, #tpu.memory_space<vmem>>, %arg3: memref<1x64x128xbf16, #tpu.memory_space<vmem>>, %arg4: memref<18x18x128xf32, #tpu.memory_space<vmem>>) attributes {dimension_semantics = [#tpu.dimension_semantics<parallel>], iteration_bounds = array<i64: 2>, scalar_prefetch = 0 : i64, scratch_operands = 1 : i64, tpu.core_type = #tpu.core_type<tc>, window_params = [{transform_indices = @transform_0, window_bounds = array<i64: 1, 16, 16, 128>}, {pipeline_mode = #tpu.pipeline_mode<synchronous>, transform_indices = @transform_1, window_bounds = array<i64: 2048, 128>}, {transform_indices = @transform_2, window_bounds = array<i64: 1, 64, 128>}]} {
    %cst = arith.constant 0.000000e+00 : f32
    %0 = vector.broadcast %cst : f32 to vector<18x18x128xf32>
    %c0 = arith.constant 0 : index
    %c0_0 = arith.constant 0 : index
    %c0_1 = arith.constant 0 : index
    %1 = vector.load %arg4[%c0, %c0_0, %c0_1] : memref<18x18x128xf32, #tpu.memory_space<vmem>>, vector<18x18x128xf32>
    tpu.vector_store %arg4[%c0, %c0_0, %c0_1], %0 {strides = array<i32>} : memref<18x18x128xf32, #tpu.memory_space<vmem>>, vector<18x18x128xf32>,
    %c0_2 = arith.constant 0 : index
    %c0_3 = arith.constant 0 : index
    %c0_4 = arith.constant 0 : index
    %c0_5 = arith.constant 0 : index
    %2 = vector.load %arg1[%c0_2, %c0_3, %c0_4, %c0_5] : memref<1x16x16x128xbf16, #tpu.memory_space<vmem>>, vector<1x16x16x128xbf16>
    %3 = vector.shape_cast %2 : vector<1x16x16x128xbf16> to vector<16x16x128xbf16>
    %4 = arith.extf %3 : vector<16x16x128xbf16> to vector<16x16x128xf32>
    %c1 = arith.constant 1 : index
    %c1_6 = arith.constant 1 : index
    %c0_7 = arith.constant 0 : index
    %5 = vector.load %arg4[%c1, %c1_6, %c0_7] : memref<18x18x128xf32, #tpu.memory_space<vmem>>, vector<16x16x128xf32>
    tpu.vector_store %arg4[%c1, %c1_6, %c0_7], %4 {strides = array<i32>} : memref<18x18x128xf32, #tpu.memory_space<vmem>>, vector<16x16x128xf32>,
    %c0_8 = arith.constant 0 : index
    %c0_9 = arith.constant 0 : index
    %c0_10 = arith.constant 0 : index
    %6 = tpu.strided_load %arg4[%c0_8, %c0_9, %c0_10] {strides = array<i32: 2, 2, 1>} : memref<18x18x128xf32, #tpu.memory_space<vmem>>, vector<8x8x128xf32>
    %7 = arith.truncf %6 : vector<8x8x128xf32> to vector<8x8x128xbf16>
    %c0_11 = arith.constant 0 : index
    %c1_12 = arith.constant 1 : index
    %c0_13 = arith.constant 0 : index
    %8 = tpu.strided_load %arg4[%c0_11, %c1_12, %c0_13] {strides = array<i32: 2, 2, 1>} : memref<18x18x128xf32, #tpu.memory_space<vmem>>, vector<8x8x128xf32>
    %9 = arith.truncf %8 : vector<8x8x128xf32> to vector<8x8x128xbf16>
    %c0_14 = arith.constant 0 : index
    %c2 = arith.constant 2 : index
    %c0_15 = arith.constant 0 : index
    %10 = tpu.strided_load %arg4[%c0_14, %c2, %c0_15] {strides = array<i32: 2, 2, 1>} : memref<18x18x128xf32, #tpu.memory_space<vmem>>, vector<8x8x128xf32>
    %11 = arith.truncf %10 : vector<8x8x128xf32> to vector<8x8x128xbf16>
    %c0_16 = arith.constant 0 : index
    %c3 = arith.constant 3 : index
    %c0_17 = arith.constant 0 : index
    %12 = tpu.strided_load %arg4[%c0_16, %c3, %c0_17] {strides = array<i32: 2, 2, 1>} : memref<18x18x128xf32, #tpu.memory_space<vmem>>, vector<8x8x128xf32>
    %13 = arith.truncf %12 : vector<8x8x128xf32> to vector<8x8x128xbf16>
    %c1_18 = arith.constant 1 : index
    %c0_19 = arith.constant 0 : index
    %c0_20 = arith.constant 0 : index
    %14 = tpu.strided_load %arg4[%c1_18, %c0_19, %c0_20] {strides = array<i32: 2, 2, 1>} : memref<18x18x128xf32, #tpu.memory_space<vmem>>, vector<8x8x128xf32>
    %15 = arith.truncf %14 : vector<8x8x128xf32> to vector<8x8x128xbf16>
    %c1_21 = arith.constant 1 : index
    %c1_22 = arith.constant 1 : index
    %c0_23 = arith.constant 0 : index
    %16 = tpu.strided_load %arg4[%c1_21, %c1_22, %c0_23] {strides = array<i32: 2, 2, 1>} : memref<18x18x128xf32, #tpu.memory_space<vmem>>, vector<8x8x128xf32>
    %17 = arith.truncf %16 : vector<8x8x128xf32> to vector<8x8x128xbf16>
    %c1_24 = arith.constant 1 : index
    %c2_25 = arith.constant 2 : index
    %c0_26 = arith.constant 0 : index
    %18 = tpu.strided_load %arg4[%c1_24, %c2_25, %c0_26] {strides = array<i32: 2, 2, 1>} : memref<18x18x128xf32, #tpu.memory_space<vmem>>, vector<8x8x128xf32>
    %19 = arith.truncf %18 : vector<8x8x128xf32> to vector<8x8x128xbf16>
    %c1_27 = arith.constant 1 : index
    %c3_28 = arith.constant 3 : index
    %c0_29 = arith.constant 0 : index
    %20 = tpu.strided_load %arg4[%c1_27, %c3_28, %c0_29] {strides = array<i32: 2, 2, 1>} : memref<18x18x128xf32, #tpu.memory_space<vmem>>, vector<8x8x128xf32>
    %21 = arith.truncf %20 : vector<8x8x128xf32> to vector<8x8x128xbf16>
    %c2_30 = arith.constant 2 : index
    %c0_31 = arith.constant 0 : index
    %c0_32 = arith.constant 0 : index
    %22 = tpu.strided_load %arg4[%c2_30, %c0_31, %c0_32] {strides = array<i32: 2, 2, 1>} : memref<18x18x128xf32, #tpu.memory_space<vmem>>, vector<8x8x128xf32>
    %23 = arith.truncf %22 : vector<8x8x128xf32> to vector<8x8x128xbf16>
    %c2_33 = arith.constant 2 : index
    %c1_34 = arith.constant 1 : index
    %c0_35 = arith.constant 0 : index
    %24 = tpu.strided_load %arg4[%c2_33, %c1_34, %c0_35] {strides = array<i32: 2, 2, 1>} : memref<18x18x128xf32, #tpu.memory_space<vmem>>, vector<8x8x128xf32>
    %25 = arith.truncf %24 : vector<8x8x128xf32> to vector<8x8x128xbf16>
    %c2_36 = arith.constant 2 : index
    %c2_37 = arith.constant 2 : index
    %c0_38 = arith.constant 0 : index
    %26 = tpu.strided_load %arg4[%c2_36, %c2_37, %c0_38] {strides = array<i32: 2, 2, 1>} : memref<18x18x128xf32, #tpu.memory_space<vmem>>, vector<8x8x128xf32>
    %27 = arith.truncf %26 : vector<8x8x128xf32> to vector<8x8x128xbf16>
    %c2_39 = arith.constant 2 : index
    %c3_40 = arith.constant 3 : index
    %c0_41 = arith.constant 0 : index
    %28 = tpu.strided_load %arg4[%c2_39, %c3_40, %c0_41] {strides = array<i32: 2, 2, 1>} : memref<18x18x128xf32, #tpu.memory_space<vmem>>, vector<8x8x128xf32>
    %29 = arith.truncf %28 : vector<8x8x128xf32> to vector<8x8x128xbf16>
    %c3_42 = arith.constant 3 : index
    %c0_43 = arith.constant 0 : index
    %c0_44 = arith.constant 0 : index
    %30 = tpu.strided_load %arg4[%c3_42, %c0_43, %c0_44] {strides = array<i32: 2, 2, 1>} : memref<18x18x128xf32, #tpu.memory_space<vmem>>, vector<8x8x128xf32>
    %31 = arith.truncf %30 : vector<8x8x128xf32> to vector<8x8x128xbf16>
    %c3_45 = arith.constant 3 : index
    %c1_46 = arith.constant 1 : index
    %c0_47 = arith.constant 0 : index
    %32 = tpu.strided_load %arg4[%c3_45, %c1_46, %c0_47] {strides = array<i32: 2, 2, 1>} : memref<18x18x128xf32, #tpu.memory_space<vmem>>, vector<8x8x128xf32>
    %33 = arith.truncf %32 : vector<8x8x128xf32> to vector<8x8x128xbf16>
    %c3_48 = arith.constant 3 : index
    %c2_49 = arith.constant 2 : index
    %c0_50 = arith.constant 0 : index
    %34 = tpu.strided_load %arg4[%c3_48, %c2_49, %c0_50] {strides = array<i32: 2, 2, 1>} : memref<18x18x128xf32, #tpu.memory_space<vmem>>, vector<8x8x128xf32>
    %35 = arith.truncf %34 : vector<8x8x128xf32> to vector<8x8x128xbf16>
    %c3_51 = arith.constant 3 : index
    %c3_52 = arith.constant 3 : index
    %c0_53 = arith.constant 0 : index
    %36 = tpu.strided_load %arg4[%c3_51, %c3_52, %c0_53] {strides = array<i32: 2, 2, 1>} : memref<18x18x128xf32, #tpu.memory_space<vmem>>, vector<8x8x128xf32>
    %37 = arith.truncf %36 : vector<8x8x128xf32> to vector<8x8x128xbf16>
    %38 = tpu.concatenate %7, %9, %11, %13, %15, %17, %19, %21, %23, %25, %27, %29, %31, %33, %35, %37 in 2 : vector<8x8x128xbf16>, vector<8x8x128xbf16>, vector<8x8x128xbf16>, vector<8x8x128xbf16>, vector<8x8x128xbf16>, vector<8x8x128xbf16>, vector<8x8x128xbf16>, vector<8x8x128xbf16>, vector<8x8x128xbf16>, vector<8x8x128xbf16>, vector<8x8x128xbf16>, vector<8x8x128xbf16>, vector<8x8x128xbf16>, vector<8x8x128xbf16>, vector<8x8x128xbf16>, vector<8x8x128xbf16> -> vector<8x8x2048xbf16>
    %39 = vector.shape_cast %38 : vector<8x8x2048xbf16> to vector<64x2048xbf16>
    %c0_54 = arith.constant 0 : index
    %c0_55 = arith.constant 0 : index
    %40 = vector.load %arg2[%c0_54, %c0_55] : memref<2048x128xbf16, #tpu.memory_space<vmem>>, vector<2048x128xbf16>
    %cst_56 = arith.constant dense<0.000000e+00> : vector<64x128xf32>
    %41 = tpu.matmul %39, %40, %cst_56 {dimension_numbers = #tpu.dot_dimension_numbers<[1], [0], [0], [1], [0, 0, 1, 1], [], []>} : vector<64x2048xbf16>, vector<2048x128xbf16>, vector<64x128xf32> -> vector<64x128xf32>
    %cst_57 = arith.constant 0.000000e+00 : f32
    %42 = vector.broadcast %cst_57 : f32 to vector<64x128xf32>
    %43 = arith.cmpf oge, %41, %42 : vector<64x128xf32>
    %cst_58 = arith.constant 2.000000e-01 : f32
    %44 = vector.broadcast %cst_58 : f32 to vector<64x128xf32>
    %45 = arith.mulf %44, %41 : vector<64x128xf32>
    %46 = arith.select %43, %41, %45 : vector<64x128xi1>, vector<64x128xf32>
    %47 = arith.truncf %46 : vector<64x128xf32> to vector<64x128xbf16>
    %c0_59 = arith.constant 0 : index
    %c0_60 = arith.constant 0 : index
    %c0_61 = arith.constant 0 : index
    %48 = vector.load %arg3[%c0_59, %c0_60, %c0_61] : memref<1x64x128xbf16, #tpu.memory_space<vmem>>, vector<1x64x128xbf16>
    %49 = vector.shape_cast %48 : vector<1x64x128xbf16> to vector<64x128xbf16>
    %50 = vector.shape_cast %47 : vector<64x128xbf16> to vector<1x64x128xbf16>
    tpu.vector_store %arg3[%c0_59, %c0_60, %c0_61], %50 {strides = array<i32>} : memref<1x64x128xbf16, #tpu.memory_space<vmem>>, vector<1x64x128xbf16>,
    return
  }
  func.func @transform_0(%arg0: i32) -> (i32, i32, i32, i32) {
    %c0_i32 = arith.constant 0 : i32
    %c0_i32_0 = arith.constant 0 : i32
    %c0_i32_1 = arith.constant 0 : i32
    %c0_i32_2 = arith.constant 0 : i32
    return %arg0, %c0_i32, %c0_i32_0, %c0_i32_1 : i32, i32, i32, i32
  }
  func.func @transform_1(%arg0: i32) -> (i32, i32) {
    %c0_i32 = arith.constant 0 : i32
    %c0_i32_0 = arith.constant 0 : i32
    %c0_i32_1 = arith.constant 0 : i32
    return %c0_i32, %c0_i32_0 : i32, i32
  }
  func.func @transform_2(%arg0: i32) -> (i32, i32, i32) {
    %c0_i32 = arith.constant 0 : i32
    %c0_i32_0 = arith.constant 0 : i32
    %c0_i32_1 = arith.constant 0 : i32
    return %arg0, %c0_i32, %c0_i32_0 : i32, i32, i32
  }
}

module attributes {stable_mosaic.version = 11 : i64} {
  func.func @_conv_gemm_kernel(%arg0: i32, %arg1: memref<1x8x8x128xbf16, #tpu.memory_space<vmem>>, %arg2: memref<2048x128xbf16, #tpu.memory_space<vmem>>, %arg3: memref<1x16x128xbf16, #tpu.memory_space<vmem>>, %arg4: memref<1x1x128xf32, #tpu.memory_space<vmem>>, %arg5: memref<1x1x128xf32, #tpu.memory_space<vmem>>, %arg6: memref<10x10x128xf32, #tpu.memory_space<vmem>>) attributes {dimension_semantics = [#tpu.dimension_semantics<parallel>], iteration_bounds = array<i64: 2>, scalar_prefetch = 0 : i64, scratch_operands = 1 : i64, tpu.core_type = #tpu.core_type<tc>, window_params = [{transform_indices = @transform_0, window_bounds = array<i64: 1, 8, 8, 128>}, {pipeline_mode = #tpu.pipeline_mode<synchronous>, transform_indices = @transform_1, window_bounds = array<i64: 2048, 128>}, {transform_indices = @transform_2, window_bounds = array<i64: 1, 16, 128>}, {transform_indices = @transform_3, window_bounds = array<i64: 1, 1, 128>}, {transform_indices = @transform_4, window_bounds = array<i64: 1, 1, 128>}]} {
    %cst = arith.constant 0.000000e+00 : f32
    %0 = vector.broadcast %cst : f32 to vector<10x10x128xf32>
    %c0 = arith.constant 0 : index
    %c0_0 = arith.constant 0 : index
    %c0_1 = arith.constant 0 : index
    %1 = vector.load %arg6[%c0, %c0_0, %c0_1] : memref<10x10x128xf32, #tpu.memory_space<vmem>>, vector<10x10x128xf32>
    tpu.vector_store %arg6[%c0, %c0_0, %c0_1], %0 {strides = array<i32>} : memref<10x10x128xf32, #tpu.memory_space<vmem>>, vector<10x10x128xf32>,
    %c0_2 = arith.constant 0 : index
    %c0_3 = arith.constant 0 : index
    %c0_4 = arith.constant 0 : index
    %c0_5 = arith.constant 0 : index
    %2 = vector.load %arg1[%c0_2, %c0_3, %c0_4, %c0_5] : memref<1x8x8x128xbf16, #tpu.memory_space<vmem>>, vector<1x8x8x128xbf16>
    %3 = vector.shape_cast %2 : vector<1x8x8x128xbf16> to vector<8x8x128xbf16>
    %4 = arith.extf %3 : vector<8x8x128xbf16> to vector<8x8x128xf32>
    %c1 = arith.constant 1 : index
    %c1_6 = arith.constant 1 : index
    %c0_7 = arith.constant 0 : index
    %5 = vector.load %arg6[%c1, %c1_6, %c0_7] : memref<10x10x128xf32, #tpu.memory_space<vmem>>, vector<8x8x128xf32>
    tpu.vector_store %arg6[%c1, %c1_6, %c0_7], %4 {strides = array<i32>} : memref<10x10x128xf32, #tpu.memory_space<vmem>>, vector<8x8x128xf32>,
    %c0_8 = arith.constant 0 : index
    %c0_9 = arith.constant 0 : index
    %c0_10 = arith.constant 0 : index
    %6 = tpu.strided_load %arg6[%c0_8, %c0_9, %c0_10] {strides = array<i32: 2, 2, 1>} : memref<10x10x128xf32, #tpu.memory_space<vmem>>, vector<4x4x128xf32>
    %7 = arith.truncf %6 : vector<4x4x128xf32> to vector<4x4x128xbf16>
    %c0_11 = arith.constant 0 : index
    %c1_12 = arith.constant 1 : index
    %c0_13 = arith.constant 0 : index
    %8 = tpu.strided_load %arg6[%c0_11, %c1_12, %c0_13] {strides = array<i32: 2, 2, 1>} : memref<10x10x128xf32, #tpu.memory_space<vmem>>, vector<4x4x128xf32>
    %9 = arith.truncf %8 : vector<4x4x128xf32> to vector<4x4x128xbf16>
    %c0_14 = arith.constant 0 : index
    %c2 = arith.constant 2 : index
    %c0_15 = arith.constant 0 : index
    %10 = tpu.strided_load %arg6[%c0_14, %c2, %c0_15] {strides = array<i32: 2, 2, 1>} : memref<10x10x128xf32, #tpu.memory_space<vmem>>, vector<4x4x128xf32>
    %11 = arith.truncf %10 : vector<4x4x128xf32> to vector<4x4x128xbf16>
    %c0_16 = arith.constant 0 : index
    %c3 = arith.constant 3 : index
    %c0_17 = arith.constant 0 : index
    %12 = tpu.strided_load %arg6[%c0_16, %c3, %c0_17] {strides = array<i32: 2, 2, 1>} : memref<10x10x128xf32, #tpu.memory_space<vmem>>, vector<4x4x128xf32>
    %13 = arith.truncf %12 : vector<4x4x128xf32> to vector<4x4x128xbf16>
    %c1_18 = arith.constant 1 : index
    %c0_19 = arith.constant 0 : index
    %c0_20 = arith.constant 0 : index
    %14 = tpu.strided_load %arg6[%c1_18, %c0_19, %c0_20] {strides = array<i32: 2, 2, 1>} : memref<10x10x128xf32, #tpu.memory_space<vmem>>, vector<4x4x128xf32>
    %15 = arith.truncf %14 : vector<4x4x128xf32> to vector<4x4x128xbf16>
    %c1_21 = arith.constant 1 : index
    %c1_22 = arith.constant 1 : index
    %c0_23 = arith.constant 0 : index
    %16 = tpu.strided_load %arg6[%c1_21, %c1_22, %c0_23] {strides = array<i32: 2, 2, 1>} : memref<10x10x128xf32, #tpu.memory_space<vmem>>, vector<4x4x128xf32>
    %17 = arith.truncf %16 : vector<4x4x128xf32> to vector<4x4x128xbf16>
    %c1_24 = arith.constant 1 : index
    %c2_25 = arith.constant 2 : index
    %c0_26 = arith.constant 0 : index
    %18 = tpu.strided_load %arg6[%c1_24, %c2_25, %c0_26] {strides = array<i32: 2, 2, 1>} : memref<10x10x128xf32, #tpu.memory_space<vmem>>, vector<4x4x128xf32>
    %19 = arith.truncf %18 : vector<4x4x128xf32> to vector<4x4x128xbf16>
    %c1_27 = arith.constant 1 : index
    %c3_28 = arith.constant 3 : index
    %c0_29 = arith.constant 0 : index
    %20 = tpu.strided_load %arg6[%c1_27, %c3_28, %c0_29] {strides = array<i32: 2, 2, 1>} : memref<10x10x128xf32, #tpu.memory_space<vmem>>, vector<4x4x128xf32>
    %21 = arith.truncf %20 : vector<4x4x128xf32> to vector<4x4x128xbf16>
    %c2_30 = arith.constant 2 : index
    %c0_31 = arith.constant 0 : index
    %c0_32 = arith.constant 0 : index
    %22 = tpu.strided_load %arg6[%c2_30, %c0_31, %c0_32] {strides = array<i32: 2, 2, 1>} : memref<10x10x128xf32, #tpu.memory_space<vmem>>, vector<4x4x128xf32>
    %23 = arith.truncf %22 : vector<4x4x128xf32> to vector<4x4x128xbf16>
    %c2_33 = arith.constant 2 : index
    %c1_34 = arith.constant 1 : index
    %c0_35 = arith.constant 0 : index
    %24 = tpu.strided_load %arg6[%c2_33, %c1_34, %c0_35] {strides = array<i32: 2, 2, 1>} : memref<10x10x128xf32, #tpu.memory_space<vmem>>, vector<4x4x128xf32>
    %25 = arith.truncf %24 : vector<4x4x128xf32> to vector<4x4x128xbf16>
    %c2_36 = arith.constant 2 : index
    %c2_37 = arith.constant 2 : index
    %c0_38 = arith.constant 0 : index
    %26 = tpu.strided_load %arg6[%c2_36, %c2_37, %c0_38] {strides = array<i32: 2, 2, 1>} : memref<10x10x128xf32, #tpu.memory_space<vmem>>, vector<4x4x128xf32>
    %27 = arith.truncf %26 : vector<4x4x128xf32> to vector<4x4x128xbf16>
    %c2_39 = arith.constant 2 : index
    %c3_40 = arith.constant 3 : index
    %c0_41 = arith.constant 0 : index
    %28 = tpu.strided_load %arg6[%c2_39, %c3_40, %c0_41] {strides = array<i32: 2, 2, 1>} : memref<10x10x128xf32, #tpu.memory_space<vmem>>, vector<4x4x128xf32>
    %29 = arith.truncf %28 : vector<4x4x128xf32> to vector<4x4x128xbf16>
    %c3_42 = arith.constant 3 : index
    %c0_43 = arith.constant 0 : index
    %c0_44 = arith.constant 0 : index
    %30 = tpu.strided_load %arg6[%c3_42, %c0_43, %c0_44] {strides = array<i32: 2, 2, 1>} : memref<10x10x128xf32, #tpu.memory_space<vmem>>, vector<4x4x128xf32>
    %31 = arith.truncf %30 : vector<4x4x128xf32> to vector<4x4x128xbf16>
    %c3_45 = arith.constant 3 : index
    %c1_46 = arith.constant 1 : index
    %c0_47 = arith.constant 0 : index
    %32 = tpu.strided_load %arg6[%c3_45, %c1_46, %c0_47] {strides = array<i32: 2, 2, 1>} : memref<10x10x128xf32, #tpu.memory_space<vmem>>, vector<4x4x128xf32>
    %33 = arith.truncf %32 : vector<4x4x128xf32> to vector<4x4x128xbf16>
    %c3_48 = arith.constant 3 : index
    %c2_49 = arith.constant 2 : index
    %c0_50 = arith.constant 0 : index
    %34 = tpu.strided_load %arg6[%c3_48, %c2_49, %c0_50] {strides = array<i32: 2, 2, 1>} : memref<10x10x128xf32, #tpu.memory_space<vmem>>, vector<4x4x128xf32>
    %35 = arith.truncf %34 : vector<4x4x128xf32> to vector<4x4x128xbf16>
    %c3_51 = arith.constant 3 : index
    %c3_52 = arith.constant 3 : index
    %c0_53 = arith.constant 0 : index
    %36 = tpu.strided_load %arg6[%c3_51, %c3_52, %c0_53] {strides = array<i32: 2, 2, 1>} : memref<10x10x128xf32, #tpu.memory_space<vmem>>, vector<4x4x128xf32>
    %37 = arith.truncf %36 : vector<4x4x128xf32> to vector<4x4x128xbf16>
    %38 = tpu.concatenate %7, %9, %11, %13, %15, %17, %19, %21, %23, %25, %27, %29, %31, %33, %35, %37 in 2 : vector<4x4x128xbf16>, vector<4x4x128xbf16>, vector<4x4x128xbf16>, vector<4x4x128xbf16>, vector<4x4x128xbf16>, vector<4x4x128xbf16>, vector<4x4x128xbf16>, vector<4x4x128xbf16>, vector<4x4x128xbf16>, vector<4x4x128xbf16>, vector<4x4x128xbf16>, vector<4x4x128xbf16>, vector<4x4x128xbf16>, vector<4x4x128xbf16>, vector<4x4x128xbf16>, vector<4x4x128xbf16> -> vector<4x4x2048xbf16>
    %39 = vector.shape_cast %38 : vector<4x4x2048xbf16> to vector<16x2048xbf16>
    %c0_54 = arith.constant 0 : index
    %c0_55 = arith.constant 0 : index
    %40 = vector.load %arg2[%c0_54, %c0_55] : memref<2048x128xbf16, #tpu.memory_space<vmem>>, vector<2048x128xbf16>
    %cst_56 = arith.constant dense<0.000000e+00> : vector<16x128xf32>
    %41 = tpu.matmul %39, %40, %cst_56 {dimension_numbers = #tpu.dot_dimension_numbers<[1], [0], [0], [1], [0, 0, 1, 1], [], []>} : vector<16x2048xbf16>, vector<2048x128xbf16>, vector<16x128xf32> -> vector<16x128xf32>
    %42 = arith.truncf %41 : vector<16x128xf32> to vector<16x128xbf16>
    %c0_57 = arith.constant 0 : index
    %c0_58 = arith.constant 0 : index
    %c0_59 = arith.constant 0 : index
    %43 = vector.load %arg3[%c0_57, %c0_58, %c0_59] : memref<1x16x128xbf16, #tpu.memory_space<vmem>>, vector<1x16x128xbf16>
    %44 = vector.shape_cast %43 : vector<1x16x128xbf16> to vector<16x128xbf16>
    %45 = vector.shape_cast %42 : vector<16x128xbf16> to vector<1x16x128xbf16>
    tpu.vector_store %arg3[%c0_57, %c0_58, %c0_59], %45 {strides = array<i32>} : memref<1x16x128xbf16, #tpu.memory_space<vmem>>, vector<1x16x128xbf16>,
    %cst_60 = arith.constant dense<0.000000e+00> : vector<128xf32>
    %46 = vector.multi_reduction <add>, %41, %cst_60 [0] : vector<16x128xf32> to vector<128xf32>
    %47 = vector.shape_cast %46 : vector<128xf32> to vector<1x128xf32>
    %c0_61 = arith.constant 0 : index
    %c0_62 = arith.constant 0 : index
    %c0_63 = arith.constant 0 : index
    %48 = vector.load %arg4[%c0_61, %c0_62, %c0_63] : memref<1x1x128xf32, #tpu.memory_space<vmem>>, vector<1x1x128xf32>
    %49 = vector.shape_cast %48 : vector<1x1x128xf32> to vector<1x128xf32>
    %50 = vector.shape_cast %47 : vector<1x128xf32> to vector<1x1x128xf32>
    tpu.vector_store %arg4[%c0_61, %c0_62, %c0_63], %50 {strides = array<i32>} : memref<1x1x128xf32, #tpu.memory_space<vmem>>, vector<1x1x128xf32>,
    %51 = arith.mulf %41, %41 : vector<16x128xf32>
    %cst_64 = arith.constant dense<0.000000e+00> : vector<128xf32>
    %52 = vector.multi_reduction <add>, %51, %cst_64 [0] : vector<16x128xf32> to vector<128xf32>
    %53 = vector.shape_cast %52 : vector<128xf32> to vector<1x128xf32>
    %c0_65 = arith.constant 0 : index
    %c0_66 = arith.constant 0 : index
    %c0_67 = arith.constant 0 : index
    %54 = vector.load %arg5[%c0_65, %c0_66, %c0_67] : memref<1x1x128xf32, #tpu.memory_space<vmem>>, vector<1x1x128xf32>
    %55 = vector.shape_cast %54 : vector<1x1x128xf32> to vector<1x128xf32>
    %56 = vector.shape_cast %53 : vector<1x128xf32> to vector<1x1x128xf32>
    tpu.vector_store %arg5[%c0_65, %c0_66, %c0_67], %56 {strides = array<i32>} : memref<1x1x128xf32, #tpu.memory_space<vmem>>, vector<1x1x128xf32>,
    return
  }
  func.func @transform_0(%arg0: i32) -> (i32, i32, i32, i32) {
    %c0_i32 = arith.constant 0 : i32
    %c0_i32_0 = arith.constant 0 : i32
    %c0_i32_1 = arith.constant 0 : i32
    %c0_i32_2 = arith.constant 0 : i32
    return %arg0, %c0_i32, %c0_i32_0, %c0_i32_1 : i32, i32, i32, i32
  }
  func.func @transform_1(%arg0: i32) -> (i32, i32) {
    %c0_i32 = arith.constant 0 : i32
    %c0_i32_0 = arith.constant 0 : i32
    %c0_i32_1 = arith.constant 0 : i32
    return %c0_i32, %c0_i32_0 : i32, i32
  }
  func.func @transform_2(%arg0: i32) -> (i32, i32, i32) {
    %c0_i32 = arith.constant 0 : i32
    %c0_i32_0 = arith.constant 0 : i32
    %c0_i32_1 = arith.constant 0 : i32
    return %arg0, %c0_i32, %c0_i32_0 : i32, i32, i32
  }
  func.func @transform_3(%arg0: i32) -> (i32, i32, i32) {
    %c0_i32 = arith.constant 0 : i32
    %c0_i32_0 = arith.constant 0 : i32
    %c0_i32_1 = arith.constant 0 : i32
    return %arg0, %c0_i32, %c0_i32_0 : i32, i32, i32
  }
  func.func @transform_4(%arg0: i32) -> (i32, i32, i32) {
    %c0_i32 = arith.constant 0 : i32
    %c0_i32_0 = arith.constant 0 : i32
    %c0_i32_1 = arith.constant 0 : i32
    return %arg0, %c0_i32, %c0_i32_0 : i32, i32, i32
  }
}

module attributes {stable_mosaic.version = 11 : i64} {
  func.func @_conv_gemm_kernel(%arg0: i32, %arg1: memref<1x4x4x128xbf16, #tpu.memory_space<vmem>>, %arg2: memref<2048x128xbf16, #tpu.memory_space<vmem>>, %arg3: memref<1x1x128xf32, #tpu.memory_space<vmem>>, %arg4: memref<1x1x128xf32, #tpu.memory_space<vmem>>, %arg5: memref<1x128xf32, #tpu.memory_space<vmem>>, %arg6: memref<1x1x128xbf16, #tpu.memory_space<vmem>>, %arg7: memref<4x4x128xf32, #tpu.memory_space<vmem>>) attributes {dimension_semantics = [#tpu.dimension_semantics<parallel>], iteration_bounds = array<i64: 2>, scalar_prefetch = 0 : i64, scratch_operands = 1 : i64, tpu.core_type = #tpu.core_type<tc>, window_params = [{transform_indices = @transform_0, window_bounds = array<i64: 1, 4, 4, 128>}, {pipeline_mode = #tpu.pipeline_mode<synchronous>, transform_indices = @transform_1, window_bounds = array<i64: 2048, 128>}, {pipeline_mode = #tpu.pipeline_mode<synchronous>, transform_indices = @transform_2, window_bounds = array<i64: 1, 1, 128>}, {pipeline_mode = #tpu.pipeline_mode<synchronous>, transform_indices = @transform_3, window_bounds = array<i64: 1, 1, 128>}, {pipeline_mode = #tpu.pipeline_mode<synchronous>, transform_indices = @transform_4, window_bounds = array<i64: 1, 128>}, {transform_indices = @transform_5, window_bounds = array<i64: 1, 1, 128>}]} {
    %c0 = arith.constant 0 : index
    %c0_0 = arith.constant 0 : index
    %c0_1 = arith.constant 0 : index
    %c0_2 = arith.constant 0 : index
    %0 = vector.load %arg1[%c0, %c0_0, %c0_1, %c0_2] : memref<1x4x4x128xbf16, #tpu.memory_space<vmem>>, vector<1x4x4x128xbf16>
    %1 = vector.shape_cast %0 : vector<1x4x4x128xbf16> to vector<4x4x128xbf16>
    %2 = arith.extf %1 : vector<4x4x128xbf16> to vector<4x4x128xf32>
    %c0_3 = arith.constant 0 : index
    %c0_4 = arith.constant 0 : index
    %c0_5 = arith.constant 0 : index
    %3 = vector.load %arg3[%c0_3, %c0_4, %c0_5] : memref<1x1x128xf32, #tpu.memory_space<vmem>>, vector<1x1x128xf32>
    %4 = vector.broadcast %3 : vector<1x1x128xf32> to vector<4x4x128xf32>
    %5 = arith.mulf %2, %4 : vector<4x4x128xf32>
    %c0_6 = arith.constant 0 : index
    %c0_7 = arith.constant 0 : index
    %c0_8 = arith.constant 0 : index
    %6 = vector.load %arg4[%c0_6, %c0_7, %c0_8] : memref<1x1x128xf32, #tpu.memory_space<vmem>>, vector<1x1x128xf32>
    %7 = vector.broadcast %6 : vector<1x1x128xf32> to vector<4x4x128xf32>
    %8 = arith.addf %5, %7 : vector<4x4x128xf32>
    %cst = arith.constant 0.000000e+00 : f32
    %9 = vector.broadcast %cst : f32 to vector<4x4x128xf32>
    %10 = arith.cmpf oge, %8, %9 : vector<4x4x128xf32>
    %cst_9 = arith.constant 2.000000e-01 : f32
    %11 = vector.broadcast %cst_9 : f32 to vector<4x4x128xf32>
    %12 = arith.mulf %11, %8 : vector<4x4x128xf32>
    %13 = arith.select %10, %8, %12 : vector<4x4x128xi1>, vector<4x4x128xf32>
    %c0_10 = arith.constant 0 : index
    %c0_11 = arith.constant 0 : index
    %c0_12 = arith.constant 0 : index
    %14 = vector.load %arg7[%c0_10, %c0_11, %c0_12] : memref<4x4x128xf32, #tpu.memory_space<vmem>>, vector<4x4x128xf32>
    tpu.vector_store %arg7[%c0_10, %c0_11, %c0_12], %13 {strides = array<i32>} : memref<4x4x128xf32, #tpu.memory_space<vmem>>, vector<4x4x128xf32>,
    %c0_13 = arith.constant 0 : index
    %c0_14 = arith.constant 0 : index
    %c0_15 = arith.constant 0 : index
    %15 = vector.load %arg7[%c0_13, %c0_14, %c0_15] : memref<4x4x128xf32, #tpu.memory_space<vmem>>, vector<1x1x128xf32>
    %16 = arith.truncf %15 : vector<1x1x128xf32> to vector<1x1x128xbf16>
    %c0_16 = arith.constant 0 : index
    %c1 = arith.constant 1 : index
    %c0_17 = arith.constant 0 : index
    %17 = vector.load %arg7[%c0_16, %c1, %c0_17] : memref<4x4x128xf32, #tpu.memory_space<vmem>>, vector<1x1x128xf32>
    %18 = arith.truncf %17 : vector<1x1x128xf32> to vector<1x1x128xbf16>
    %c0_18 = arith.constant 0 : index
    %c2 = arith.constant 2 : index
    %c0_19 = arith.constant 0 : index
    %19 = vector.load %arg7[%c0_18, %c2, %c0_19] : memref<4x4x128xf32, #tpu.memory_space<vmem>>, vector<1x1x128xf32>
    %20 = arith.truncf %19 : vector<1x1x128xf32> to vector<1x1x128xbf16>
    %c0_20 = arith.constant 0 : index
    %c3 = arith.constant 3 : index
    %c0_21 = arith.constant 0 : index
    %21 = vector.load %arg7[%c0_20, %c3, %c0_21] : memref<4x4x128xf32, #tpu.memory_space<vmem>>, vector<1x1x128xf32>
    %22 = arith.truncf %21 : vector<1x1x128xf32> to vector<1x1x128xbf16>
    %c1_22 = arith.constant 1 : index
    %c0_23 = arith.constant 0 : index
    %c0_24 = arith.constant 0 : index
    %23 = vector.load %arg7[%c1_22, %c0_23, %c0_24] : memref<4x4x128xf32, #tpu.memory_space<vmem>>, vector<1x1x128xf32>
    %24 = arith.truncf %23 : vector<1x1x128xf32> to vector<1x1x128xbf16>
    %c1_25 = arith.constant 1 : index
    %c1_26 = arith.constant 1 : index
    %c0_27 = arith.constant 0 : index
    %25 = vector.load %arg7[%c1_25, %c1_26, %c0_27] : memref<4x4x128xf32, #tpu.memory_space<vmem>>, vector<1x1x128xf32>
    %26 = arith.truncf %25 : vector<1x1x128xf32> to vector<1x1x128xbf16>
    %c1_28 = arith.constant 1 : index
    %c2_29 = arith.constant 2 : index
    %c0_30 = arith.constant 0 : index
    %27 = vector.load %arg7[%c1_28, %c2_29, %c0_30] : memref<4x4x128xf32, #tpu.memory_space<vmem>>, vector<1x1x128xf32>
    %28 = arith.truncf %27 : vector<1x1x128xf32> to vector<1x1x128xbf16>
    %c1_31 = arith.constant 1 : index
    %c3_32 = arith.constant 3 : index
    %c0_33 = arith.constant 0 : index
    %29 = vector.load %arg7[%c1_31, %c3_32, %c0_33] : memref<4x4x128xf32, #tpu.memory_space<vmem>>, vector<1x1x128xf32>
    %30 = arith.truncf %29 : vector<1x1x128xf32> to vector<1x1x128xbf16>
    %c2_34 = arith.constant 2 : index
    %c0_35 = arith.constant 0 : index
    %c0_36 = arith.constant 0 : index
    %31 = vector.load %arg7[%c2_34, %c0_35, %c0_36] : memref<4x4x128xf32, #tpu.memory_space<vmem>>, vector<1x1x128xf32>
    %32 = arith.truncf %31 : vector<1x1x128xf32> to vector<1x1x128xbf16>
    %c2_37 = arith.constant 2 : index
    %c1_38 = arith.constant 1 : index
    %c0_39 = arith.constant 0 : index
    %33 = vector.load %arg7[%c2_37, %c1_38, %c0_39] : memref<4x4x128xf32, #tpu.memory_space<vmem>>, vector<1x1x128xf32>
    %34 = arith.truncf %33 : vector<1x1x128xf32> to vector<1x1x128xbf16>
    %c2_40 = arith.constant 2 : index
    %c2_41 = arith.constant 2 : index
    %c0_42 = arith.constant 0 : index
    %35 = vector.load %arg7[%c2_40, %c2_41, %c0_42] : memref<4x4x128xf32, #tpu.memory_space<vmem>>, vector<1x1x128xf32>
    %36 = arith.truncf %35 : vector<1x1x128xf32> to vector<1x1x128xbf16>
    %c2_43 = arith.constant 2 : index
    %c3_44 = arith.constant 3 : index
    %c0_45 = arith.constant 0 : index
    %37 = vector.load %arg7[%c2_43, %c3_44, %c0_45] : memref<4x4x128xf32, #tpu.memory_space<vmem>>, vector<1x1x128xf32>
    %38 = arith.truncf %37 : vector<1x1x128xf32> to vector<1x1x128xbf16>
    %c3_46 = arith.constant 3 : index
    %c0_47 = arith.constant 0 : index
    %c0_48 = arith.constant 0 : index
    %39 = vector.load %arg7[%c3_46, %c0_47, %c0_48] : memref<4x4x128xf32, #tpu.memory_space<vmem>>, vector<1x1x128xf32>
    %40 = arith.truncf %39 : vector<1x1x128xf32> to vector<1x1x128xbf16>
    %c3_49 = arith.constant 3 : index
    %c1_50 = arith.constant 1 : index
    %c0_51 = arith.constant 0 : index
    %41 = vector.load %arg7[%c3_49, %c1_50, %c0_51] : memref<4x4x128xf32, #tpu.memory_space<vmem>>, vector<1x1x128xf32>
    %42 = arith.truncf %41 : vector<1x1x128xf32> to vector<1x1x128xbf16>
    %c3_52 = arith.constant 3 : index
    %c2_53 = arith.constant 2 : index
    %c0_54 = arith.constant 0 : index
    %43 = vector.load %arg7[%c3_52, %c2_53, %c0_54] : memref<4x4x128xf32, #tpu.memory_space<vmem>>, vector<1x1x128xf32>
    %44 = arith.truncf %43 : vector<1x1x128xf32> to vector<1x1x128xbf16>
    %c3_55 = arith.constant 3 : index
    %c3_56 = arith.constant 3 : index
    %c0_57 = arith.constant 0 : index
    %45 = vector.load %arg7[%c3_55, %c3_56, %c0_57] : memref<4x4x128xf32, #tpu.memory_space<vmem>>, vector<1x1x128xf32>
    %46 = arith.truncf %45 : vector<1x1x128xf32> to vector<1x1x128xbf16>
    %47 = tpu.concatenate %16, %18, %20, %22, %24, %26, %28, %30, %32, %34, %36, %38, %40, %42, %44, %46 in 2 : vector<1x1x128xbf16>, vector<1x1x128xbf16>, vector<1x1x128xbf16>, vector<1x1x128xbf16>, vector<1x1x128xbf16>, vector<1x1x128xbf16>, vector<1x1x128xbf16>, vector<1x1x128xbf16>, vector<1x1x128xbf16>, vector<1x1x128xbf16>, vector<1x1x128xbf16>, vector<1x1x128xbf16>, vector<1x1x128xbf16>, vector<1x1x128xbf16>, vector<1x1x128xbf16>, vector<1x1x128xbf16> -> vector<1x1x2048xbf16>
    %48 = vector.shape_cast %47 : vector<1x1x2048xbf16> to vector<1x2048xbf16>
    %c0_58 = arith.constant 0 : index
    %c0_59 = arith.constant 0 : index
    %49 = vector.load %arg2[%c0_58, %c0_59] : memref<2048x128xbf16, #tpu.memory_space<vmem>>, vector<2048x128xbf16>
    %cst_60 = arith.constant dense<0.000000e+00> : vector<1x128xf32>
    %50 = tpu.matmul %48, %49, %cst_60 {dimension_numbers = #tpu.dot_dimension_numbers<[1], [0], [0], [1], [0, 0, 1, 1], [], []>} : vector<1x2048xbf16>, vector<2048x128xbf16>, vector<1x128xf32> -> vector<1x128xf32>
    %c0_61 = arith.constant 0 : index
    %c0_62 = arith.constant 0 : index
    %51 = vector.load %arg5[%c0_61, %c0_62] : memref<1x128xf32, #tpu.memory_space<vmem>>, vector<1x128xf32>
    %52 = arith.addf %50, %51 : vector<1x128xf32>
    %53 = arith.truncf %52 : vector<1x128xf32> to vector<1x128xbf16>
    %c0_63 = arith.constant 0 : index
    %c0_64 = arith.constant 0 : index
    %c0_65 = arith.constant 0 : index
    %54 = vector.load %arg6[%c0_63, %c0_64, %c0_65] : memref<1x1x128xbf16, #tpu.memory_space<vmem>>, vector<1x1x128xbf16>
    %55 = vector.shape_cast %54 : vector<1x1x128xbf16> to vector<1x128xbf16>
    %56 = vector.shape_cast %53 : vector<1x128xbf16> to vector<1x1x128xbf16>
    tpu.vector_store %arg6[%c0_63, %c0_64, %c0_65], %56 {strides = array<i32>} : memref<1x1x128xbf16, #tpu.memory_space<vmem>>, vector<1x1x128xbf16>,
    return
  }
  func.func @transform_0(%arg0: i32) -> (i32, i32, i32, i32) {
    %c0_i32 = arith.constant 0 : i32
    %c0_i32_0 = arith.constant 0 : i32
    %c0_i32_1 = arith.constant 0 : i32
    %c0_i32_2 = arith.constant 0 : i32
    return %arg0, %c0_i32, %c0_i32_0, %c0_i32_1 : i32, i32, i32, i32
  }
  func.func @transform_1(%arg0: i32) -> (i32, i32) {
    %c0_i32 = arith.constant 0 : i32
    %c0_i32_0 = arith.constant 0 : i32
    %c0_i32_1 = arith.constant 0 : i32
    return %c0_i32, %c0_i32_0 : i32, i32
  }
  func.func @transform_2(%arg0: i32) -> (i32, i32, i32) {
    %c0_i32 = arith.constant 0 : i32
    %c0_i32_0 = arith.constant 0 : i32
    %c0_i32_1 = arith.constant 0 : i32
    %c0_i32_2 = arith.constant 0 : i32
    return %c0_i32, %c0_i32_0, %c0_i32_1 : i32, i32, i32
  }
  func.func @transform_3(%arg0: i32) -> (i32, i32, i32) {
    %c0_i32 = arith.constant 0 : i32
    %c0_i32_0 = arith.constant 0 : i32
    %c0_i32_1 = arith.constant 0 : i32
    %c0_i32_2 = arith.constant 0 : i32
    return %c0_i32, %c0_i32_0, %c0_i32_1 : i32, i32, i32
  }
  func.func @transform_4(%arg0: i32) -> (i32, i32) {
    %c0_i32 = arith.constant 0 : i32
    %c0_i32_0 = arith.constant 0 : i32
    %c0_i32_1 = arith.constant 0 : i32
    return %c0_i32, %c0_i32_0 : i32, i32
  }
  func.func @transform_5(%arg0: i32) -> (i32, i32, i32) {
    %c0_i32 = arith.constant 0 : i32
    %c0_i32_0 = arith.constant 0 : i32
    %c0_i32_1 = arith.constant 0 : i32
    return %arg0, %c0_i32, %c0_i32_0 : i32, i32, i32
  }
}

module attributes {stable_mosaic.version = 11 : i64} {
  func.func @_conv_gemm_kernel(%arg0: i32, %arg1: memref<1x1x1x128xbf16, #tpu.memory_space<vmem>>, %arg2: memref<2048x128xbf16, #tpu.memory_space<vmem>>, %arg3: memref<1x16x128xbf16, #tpu.memory_space<vmem>>, %arg4: memref<1x1x128xf32, #tpu.memory_space<vmem>>, %arg5: memref<1x1x128xf32, #tpu.memory_space<vmem>>, %arg6: memref<7x7x128xf32, #tpu.memory_space<vmem>>) attributes {dimension_semantics = [#tpu.dimension_semantics<parallel>], iteration_bounds = array<i64: 2>, scalar_prefetch = 0 : i64, scratch_operands = 1 : i64, tpu.core_type = #tpu.core_type<tc>, window_params = [{transform_indices = @transform_0, window_bounds = array<i64: 1, 1, 1, 128>}, {pipeline_mode = #tpu.pipeline_mode<synchronous>, transform_indices = @transform_1, window_bounds = array<i64: 2048, 128>}, {transform_indices = @transform_2, window_bounds = array<i64: 1, 16, 128>}, {transform_indices = @transform_3, window_bounds = array<i64: 1, 1, 128>}, {transform_indices = @transform_4, window_bounds = array<i64: 1, 1, 128>}]} {
    %cst = arith.constant 0.000000e+00 : f32
    %0 = vector.broadcast %cst : f32 to vector<7x7x128xf32>
    %c0 = arith.constant 0 : index
    %c0_0 = arith.constant 0 : index
    %c0_1 = arith.constant 0 : index
    %1 = vector.load %arg6[%c0, %c0_0, %c0_1] : memref<7x7x128xf32, #tpu.memory_space<vmem>>, vector<7x7x128xf32>
    tpu.vector_store %arg6[%c0, %c0_0, %c0_1], %0 {strides = array<i32>} : memref<7x7x128xf32, #tpu.memory_space<vmem>>, vector<7x7x128xf32>,
    %c0_2 = arith.constant 0 : index
    %c0_3 = arith.constant 0 : index
    %c0_4 = arith.constant 0 : index
    %c0_5 = arith.constant 0 : index
    %2 = vector.load %arg1[%c0_2, %c0_3, %c0_4, %c0_5] : memref<1x1x1x128xbf16, #tpu.memory_space<vmem>>, vector<1x1x1x128xbf16>
    %3 = vector.shape_cast %2 : vector<1x1x1x128xbf16> to vector<1x1x128xbf16>
    %4 = arith.extf %3 : vector<1x1x128xbf16> to vector<1x1x128xf32>
    %c3 = arith.constant 3 : index
    %c3_6 = arith.constant 3 : index
    %c0_7 = arith.constant 0 : index
    %5 = vector.load %arg6[%c3, %c3_6, %c0_7] : memref<7x7x128xf32, #tpu.memory_space<vmem>>, vector<1x1x128xf32>
    tpu.vector_store %arg6[%c3, %c3_6, %c0_7], %4 {strides = array<i32>} : memref<7x7x128xf32, #tpu.memory_space<vmem>>, vector<1x1x128xf32>,
    %c0_8 = arith.constant 0 : index
    %c0_9 = arith.constant 0 : index
    %c0_10 = arith.constant 0 : index
    %6 = vector.load %arg6[%c0_8, %c0_9, %c0_10] : memref<7x7x128xf32, #tpu.memory_space<vmem>>, vector<4x4x128xf32>
    %7 = arith.truncf %6 : vector<4x4x128xf32> to vector<4x4x128xbf16>
    %c0_11 = arith.constant 0 : index
    %c1 = arith.constant 1 : index
    %c0_12 = arith.constant 0 : index
    %8 = vector.load %arg6[%c0_11, %c1, %c0_12] : memref<7x7x128xf32, #tpu.memory_space<vmem>>, vector<4x4x128xf32>
    %9 = arith.truncf %8 : vector<4x4x128xf32> to vector<4x4x128xbf16>
    %c0_13 = arith.constant 0 : index
    %c2 = arith.constant 2 : index
    %c0_14 = arith.constant 0 : index
    %10 = vector.load %arg6[%c0_13, %c2, %c0_14] : memref<7x7x128xf32, #tpu.memory_space<vmem>>, vector<4x4x128xf32>
    %11 = arith.truncf %10 : vector<4x4x128xf32> to vector<4x4x128xbf16>
    %c0_15 = arith.constant 0 : index
    %c3_16 = arith.constant 3 : index
    %c0_17 = arith.constant 0 : index
    %12 = vector.load %arg6[%c0_15, %c3_16, %c0_17] : memref<7x7x128xf32, #tpu.memory_space<vmem>>, vector<4x4x128xf32>
    %13 = arith.truncf %12 : vector<4x4x128xf32> to vector<4x4x128xbf16>
    %c1_18 = arith.constant 1 : index
    %c0_19 = arith.constant 0 : index
    %c0_20 = arith.constant 0 : index
    %14 = vector.load %arg6[%c1_18, %c0_19, %c0_20] : memref<7x7x128xf32, #tpu.memory_space<vmem>>, vector<4x4x128xf32>
    %15 = arith.truncf %14 : vector<4x4x128xf32> to vector<4x4x128xbf16>
    %c1_21 = arith.constant 1 : index
    %c1_22 = arith.constant 1 : index
    %c0_23 = arith.constant 0 : index
    %16 = vector.load %arg6[%c1_21, %c1_22, %c0_23] : memref<7x7x128xf32, #tpu.memory_space<vmem>>, vector<4x4x128xf32>
    %17 = arith.truncf %16 : vector<4x4x128xf32> to vector<4x4x128xbf16>
    %c1_24 = arith.constant 1 : index
    %c2_25 = arith.constant 2 : index
    %c0_26 = arith.constant 0 : index
    %18 = vector.load %arg6[%c1_24, %c2_25, %c0_26] : memref<7x7x128xf32, #tpu.memory_space<vmem>>, vector<4x4x128xf32>
    %19 = arith.truncf %18 : vector<4x4x128xf32> to vector<4x4x128xbf16>
    %c1_27 = arith.constant 1 : index
    %c3_28 = arith.constant 3 : index
    %c0_29 = arith.constant 0 : index
    %20 = vector.load %arg6[%c1_27, %c3_28, %c0_29] : memref<7x7x128xf32, #tpu.memory_space<vmem>>, vector<4x4x128xf32>
    %21 = arith.truncf %20 : vector<4x4x128xf32> to vector<4x4x128xbf16>
    %c2_30 = arith.constant 2 : index
    %c0_31 = arith.constant 0 : index
    %c0_32 = arith.constant 0 : index
    %22 = vector.load %arg6[%c2_30, %c0_31, %c0_32] : memref<7x7x128xf32, #tpu.memory_space<vmem>>, vector<4x4x128xf32>
    %23 = arith.truncf %22 : vector<4x4x128xf32> to vector<4x4x128xbf16>
    %c2_33 = arith.constant 2 : index
    %c1_34 = arith.constant 1 : index
    %c0_35 = arith.constant 0 : index
    %24 = vector.load %arg6[%c2_33, %c1_34, %c0_35] : memref<7x7x128xf32, #tpu.memory_space<vmem>>, vector<4x4x128xf32>
    %25 = arith.truncf %24 : vector<4x4x128xf32> to vector<4x4x128xbf16>
    %c2_36 = arith.constant 2 : index
    %c2_37 = arith.constant 2 : index
    %c0_38 = arith.constant 0 : index
    %26 = vector.load %arg6[%c2_36, %c2_37, %c0_38] : memref<7x7x128xf32, #tpu.memory_space<vmem>>, vector<4x4x128xf32>
    %27 = arith.truncf %26 : vector<4x4x128xf32> to vector<4x4x128xbf16>
    %c2_39 = arith.constant 2 : index
    %c3_40 = arith.constant 3 : index
    %c0_41 = arith.constant 0 : index
    %28 = vector.load %arg6[%c2_39, %c3_40, %c0_41] : memref<7x7x128xf32, #tpu.memory_space<vmem>>, vector<4x4x128xf32>
    %29 = arith.truncf %28 : vector<4x4x128xf32> to vector<4x4x128xbf16>
    %c3_42 = arith.constant 3 : index
    %c0_43 = arith.constant 0 : index
    %c0_44 = arith.constant 0 : index
    %30 = vector.load %arg6[%c3_42, %c0_43, %c0_44] : memref<7x7x128xf32, #tpu.memory_space<vmem>>, vector<4x4x128xf32>
    %31 = arith.truncf %30 : vector<4x4x128xf32> to vector<4x4x128xbf16>
    %c3_45 = arith.constant 3 : index
    %c1_46 = arith.constant 1 : index
    %c0_47 = arith.constant 0 : index
    %32 = vector.load %arg6[%c3_45, %c1_46, %c0_47] : memref<7x7x128xf32, #tpu.memory_space<vmem>>, vector<4x4x128xf32>
    %33 = arith.truncf %32 : vector<4x4x128xf32> to vector<4x4x128xbf16>
    %c3_48 = arith.constant 3 : index
    %c2_49 = arith.constant 2 : index
    %c0_50 = arith.constant 0 : index
    %34 = vector.load %arg6[%c3_48, %c2_49, %c0_50] : memref<7x7x128xf32, #tpu.memory_space<vmem>>, vector<4x4x128xf32>
    %35 = arith.truncf %34 : vector<4x4x128xf32> to vector<4x4x128xbf16>
    %c3_51 = arith.constant 3 : index
    %c3_52 = arith.constant 3 : index
    %c0_53 = arith.constant 0 : index
    %36 = vector.load %arg6[%c3_51, %c3_52, %c0_53] : memref<7x7x128xf32, #tpu.memory_space<vmem>>, vector<4x4x128xf32>
    %37 = arith.truncf %36 : vector<4x4x128xf32> to vector<4x4x128xbf16>
    %38 = tpu.concatenate %7, %9, %11, %13, %15, %17, %19, %21, %23, %25, %27, %29, %31, %33, %35, %37 in 2 : vector<4x4x128xbf16>, vector<4x4x128xbf16>, vector<4x4x128xbf16>, vector<4x4x128xbf16>, vector<4x4x128xbf16>, vector<4x4x128xbf16>, vector<4x4x128xbf16>, vector<4x4x128xbf16>, vector<4x4x128xbf16>, vector<4x4x128xbf16>, vector<4x4x128xbf16>, vector<4x4x128xbf16>, vector<4x4x128xbf16>, vector<4x4x128xbf16>, vector<4x4x128xbf16>, vector<4x4x128xbf16> -> vector<4x4x2048xbf16>
    %39 = vector.shape_cast %38 : vector<4x4x2048xbf16> to vector<16x2048xbf16>
    %c0_54 = arith.constant 0 : index
    %c0_55 = arith.constant 0 : index
    %40 = vector.load %arg2[%c0_54, %c0_55] : memref<2048x128xbf16, #tpu.memory_space<vmem>>, vector<2048x128xbf16>
    %cst_56 = arith.constant dense<0.000000e+00> : vector<16x128xf32>
    %41 = tpu.matmul %39, %40, %cst_56 {dimension_numbers = #tpu.dot_dimension_numbers<[1], [0], [0], [1], [0, 0, 1, 1], [], []>} : vector<16x2048xbf16>, vector<2048x128xbf16>, vector<16x128xf32> -> vector<16x128xf32>
    %42 = arith.truncf %41 : vector<16x128xf32> to vector<16x128xbf16>
    %c0_57 = arith.constant 0 : index
    %c0_58 = arith.constant 0 : index
    %c0_59 = arith.constant 0 : index
    %43 = vector.load %arg3[%c0_57, %c0_58, %c0_59] : memref<1x16x128xbf16, #tpu.memory_space<vmem>>, vector<1x16x128xbf16>
    %44 = vector.shape_cast %43 : vector<1x16x128xbf16> to vector<16x128xbf16>
    %45 = vector.shape_cast %42 : vector<16x128xbf16> to vector<1x16x128xbf16>
    tpu.vector_store %arg3[%c0_57, %c0_58, %c0_59], %45 {strides = array<i32>} : memref<1x16x128xbf16, #tpu.memory_space<vmem>>, vector<1x16x128xbf16>,
    %cst_60 = arith.constant dense<0.000000e+00> : vector<128xf32>
    %46 = vector.multi_reduction <add>, %41, %cst_60 [0] : vector<16x128xf32> to vector<128xf32>
    %47 = vector.shape_cast %46 : vector<128xf32> to vector<1x128xf32>
    %c0_61 = arith.constant 0 : index
    %c0_62 = arith.constant 0 : index
    %c0_63 = arith.constant 0 : index
    %48 = vector.load %arg4[%c0_61, %c0_62, %c0_63] : memref<1x1x128xf32, #tpu.memory_space<vmem>>, vector<1x1x128xf32>
    %49 = vector.shape_cast %48 : vector<1x1x128xf32> to vector<1x128xf32>
    %50 = vector.shape_cast %47 : vector<1x128xf32> to vector<1x1x128xf32>
    tpu.vector_store %arg4[%c0_61, %c0_62, %c0_63], %50 {strides = array<i32>} : memref<1x1x128xf32, #tpu.memory_space<vmem>>, vector<1x1x128xf32>,
    %51 = arith.mulf %41, %41 : vector<16x128xf32>
    %cst_64 = arith.constant dense<0.000000e+00> : vector<128xf32>
    %52 = vector.multi_reduction <add>, %51, %cst_64 [0] : vector<16x128xf32> to vector<128xf32>
    %53 = vector.shape_cast %52 : vector<128xf32> to vector<1x128xf32>
    %c0_65 = arith.constant 0 : index
    %c0_66 = arith.constant 0 : index
    %c0_67 = arith.constant 0 : index
    %54 = vector.load %arg5[%c0_65, %c0_66, %c0_67] : memref<1x1x128xf32, #tpu.memory_space<vmem>>, vector<1x1x128xf32>
    %55 = vector.shape_cast %54 : vector<1x1x128xf32> to vector<1x128xf32>
    %56 = vector.shape_cast %53 : vector<1x128xf32> to vector<1x1x128xf32>
    tpu.vector_store %arg5[%c0_65, %c0_66, %c0_67], %56 {strides = array<i32>} : memref<1x1x128xf32, #tpu.memory_space<vmem>>, vector<1x1x128xf32>,
    return
  }
  func.func @transform_0(%arg0: i32) -> (i32, i32, i32, i32) {
    %c0_i32 = arith.constant 0 : i32
    %c0_i32_0 = arith.constant 0 : i32
    %c0_i32_1 = arith.constant 0 : i32
    %c0_i32_2 = arith.constant 0 : i32
    return %arg0, %c0_i32, %c0_i32_0, %c0_i32_1 : i32, i32, i32, i32
  }
  func.func @transform_1(%arg0: i32) -> (i32, i32) {
    %c0_i32 = arith.constant 0 : i32
    %c0_i32_0 = arith.constant 0 : i32
    %c0_i32_1 = arith.constant 0 : i32
    return %c0_i32, %c0_i32_0 : i32, i32
  }
  func.func @transform_2(%arg0: i32) -> (i32, i32, i32) {
    %c0_i32 = arith.constant 0 : i32
    %c0_i32_0 = arith.constant 0 : i32
    %c0_i32_1 = arith.constant 0 : i32
    return %arg0, %c0_i32, %c0_i32_0 : i32, i32, i32
  }
  func.func @transform_3(%arg0: i32) -> (i32, i32, i32) {
    %c0_i32 = arith.constant 0 : i32
    %c0_i32_0 = arith.constant 0 : i32
    %c0_i32_1 = arith.constant 0 : i32
    return %arg0, %c0_i32, %c0_i32_0 : i32, i32, i32
  }
  func.func @transform_4(%arg0: i32) -> (i32, i32, i32) {
    %c0_i32 = arith.constant 0 : i32
    %c0_i32_0 = arith.constant 0 : i32
    %c0_i32_1 = arith.constant 0 : i32
    return %arg0, %c0_i32, %c0_i32_0 : i32, i32, i32
  }
}

module attributes {stable_mosaic.version = 11 : i64} {
  func.func @_conv_gemm_kernel(%arg0: i32, %arg1: memref<1x4x4x128xbf16, #tpu.memory_space<vmem>>, %arg2: memref<1152x512xbf16, #tpu.memory_space<vmem>>, %arg3: memref<1x1x128xf32, #tpu.memory_space<vmem>>, %arg4: memref<1x1x128xf32, #tpu.memory_space<vmem>>, %arg5: memref<1x16x512xbf16, #tpu.memory_space<vmem>>, %arg6: memref<1x1x512xf32, #tpu.memory_space<vmem>>, %arg7: memref<1x1x512xf32, #tpu.memory_space<vmem>>, %arg8: memref<6x6x128xf32, #tpu.memory_space<vmem>>) attributes {dimension_semantics = [#tpu.dimension_semantics<parallel>], iteration_bounds = array<i64: 2>, scalar_prefetch = 0 : i64, scratch_operands = 1 : i64, tpu.core_type = #tpu.core_type<tc>, window_params = [{transform_indices = @transform_0, window_bounds = array<i64: 1, 4, 4, 128>}, {pipeline_mode = #tpu.pipeline_mode<synchronous>, transform_indices = @transform_1, window_bounds = array<i64: 1152, 512>}, {pipeline_mode = #tpu.pipeline_mode<synchronous>, transform_indices = @transform_2, window_bounds = array<i64: 1, 1, 128>}, {pipeline_mode = #tpu.pipeline_mode<synchronous>, transform_indices = @transform_3, window_bounds = array<i64: 1, 1, 128>}, {transform_indices = @transform_4, window_bounds = array<i64: 1, 16, 512>}, {transform_indices = @transform_5, window_bounds = array<i64: 1, 1, 512>}, {transform_indices = @transform_6, window_bounds = array<i64: 1, 1, 512>}]} {
    %cst = arith.constant 0.000000e+00 : f32
    %0 = vector.broadcast %cst : f32 to vector<6x6x128xf32>
    %c0 = arith.constant 0 : index
    %c0_0 = arith.constant 0 : index
    %c0_1 = arith.constant 0 : index
    %1 = vector.load %arg8[%c0, %c0_0, %c0_1] : memref<6x6x128xf32, #tpu.memory_space<vmem>>, vector<6x6x128xf32>
    tpu.vector_store %arg8[%c0, %c0_0, %c0_1], %0 {strides = array<i32>} : memref<6x6x128xf32, #tpu.memory_space<vmem>>, vector<6x6x128xf32>,
    %c0_2 = arith.constant 0 : index
    %c0_3 = arith.constant 0 : index
    %c0_4 = arith.constant 0 : index
    %c0_5 = arith.constant 0 : index
    %2 = vector.load %arg1[%c0_2, %c0_3, %c0_4, %c0_5] : memref<1x4x4x128xbf16, #tpu.memory_space<vmem>>, vector<1x4x4x128xbf16>
    %3 = vector.shape_cast %2 : vector<1x4x4x128xbf16> to vector<4x4x128xbf16>
    %4 = arith.extf %3 : vector<4x4x128xbf16> to vector<4x4x128xf32>
    %c0_6 = arith.constant 0 : index
    %c0_7 = arith.constant 0 : index
    %c0_8 = arith.constant 0 : index
    %5 = vector.load %arg3[%c0_6, %c0_7, %c0_8] : memref<1x1x128xf32, #tpu.memory_space<vmem>>, vector<1x1x128xf32>
    %6 = vector.broadcast %5 : vector<1x1x128xf32> to vector<4x4x128xf32>
    %7 = arith.mulf %4, %6 : vector<4x4x128xf32>
    %c0_9 = arith.constant 0 : index
    %c0_10 = arith.constant 0 : index
    %c0_11 = arith.constant 0 : index
    %8 = vector.load %arg4[%c0_9, %c0_10, %c0_11] : memref<1x1x128xf32, #tpu.memory_space<vmem>>, vector<1x1x128xf32>
    %9 = vector.broadcast %8 : vector<1x1x128xf32> to vector<4x4x128xf32>
    %10 = arith.addf %7, %9 : vector<4x4x128xf32>
    %cst_12 = arith.constant 0.000000e+00 : f32
    %11 = vector.broadcast %cst_12 : f32 to vector<4x4x128xf32>
    %12 = arith.maximumf %10, %11 : vector<4x4x128xf32>
    %c1 = arith.constant 1 : index
    %c1_13 = arith.constant 1 : index
    %c0_14 = arith.constant 0 : index
    %13 = vector.load %arg8[%c1, %c1_13, %c0_14] : memref<6x6x128xf32, #tpu.memory_space<vmem>>, vector<4x4x128xf32>
    tpu.vector_store %arg8[%c1, %c1_13, %c0_14], %12 {strides = array<i32>} : memref<6x6x128xf32, #tpu.memory_space<vmem>>, vector<4x4x128xf32>,
    %c0_15 = arith.constant 0 : index
    %c0_16 = arith.constant 0 : index
    %c0_17 = arith.constant 0 : index
    %14 = vector.load %arg8[%c0_15, %c0_16, %c0_17] : memref<6x6x128xf32, #tpu.memory_space<vmem>>, vector<4x4x128xf32>
    %15 = arith.truncf %14 : vector<4x4x128xf32> to vector<4x4x128xbf16>
    %c0_18 = arith.constant 0 : index
    %c1_19 = arith.constant 1 : index
    %c0_20 = arith.constant 0 : index
    %16 = vector.load %arg8[%c0_18, %c1_19, %c0_20] : memref<6x6x128xf32, #tpu.memory_space<vmem>>, vector<4x4x128xf32>
    %17 = arith.truncf %16 : vector<4x4x128xf32> to vector<4x4x128xbf16>
    %c0_21 = arith.constant 0 : index
    %c2 = arith.constant 2 : index
    %c0_22 = arith.constant 0 : index
    %18 = vector.load %arg8[%c0_21, %c2, %c0_22] : memref<6x6x128xf32, #tpu.memory_space<vmem>>, vector<4x4x128xf32>
    %19 = arith.truncf %18 : vector<4x4x128xf32> to vector<4x4x128xbf16>
    %c1_23 = arith.constant 1 : index
    %c0_24 = arith.constant 0 : index
    %c0_25 = arith.constant 0 : index
    %20 = vector.load %arg8[%c1_23, %c0_24, %c0_25] : memref<6x6x128xf32, #tpu.memory_space<vmem>>, vector<4x4x128xf32>
    %21 = arith.truncf %20 : vector<4x4x128xf32> to vector<4x4x128xbf16>
    %c1_26 = arith.constant 1 : index
    %c1_27 = arith.constant 1 : index
    %c0_28 = arith.constant 0 : index
    %22 = vector.load %arg8[%c1_26, %c1_27, %c0_28] : memref<6x6x128xf32, #tpu.memory_space<vmem>>, vector<4x4x128xf32>
    %23 = arith.truncf %22 : vector<4x4x128xf32> to vector<4x4x128xbf16>
    %c1_29 = arith.constant 1 : index
    %c2_30 = arith.constant 2 : index
    %c0_31 = arith.constant 0 : index
    %24 = vector.load %arg8[%c1_29, %c2_30, %c0_31] : memref<6x6x128xf32, #tpu.memory_space<vmem>>, vector<4x4x128xf32>
    %25 = arith.truncf %24 : vector<4x4x128xf32> to vector<4x4x128xbf16>
    %c2_32 = arith.constant 2 : index
    %c0_33 = arith.constant 0 : index
    %c0_34 = arith.constant 0 : index
    %26 = vector.load %arg8[%c2_32, %c0_33, %c0_34] : memref<6x6x128xf32, #tpu.memory_space<vmem>>, vector<4x4x128xf32>
    %27 = arith.truncf %26 : vector<4x4x128xf32> to vector<4x4x128xbf16>
    %c2_35 = arith.constant 2 : index
    %c1_36 = arith.constant 1 : index
    %c0_37 = arith.constant 0 : index
    %28 = vector.load %arg8[%c2_35, %c1_36, %c0_37] : memref<6x6x128xf32, #tpu.memory_space<vmem>>, vector<4x4x128xf32>
    %29 = arith.truncf %28 : vector<4x4x128xf32> to vector<4x4x128xbf16>
    %c2_38 = arith.constant 2 : index
    %c2_39 = arith.constant 2 : index
    %c0_40 = arith.constant 0 : index
    %30 = vector.load %arg8[%c2_38, %c2_39, %c0_40] : memref<6x6x128xf32, #tpu.memory_space<vmem>>, vector<4x4x128xf32>
    %31 = arith.truncf %30 : vector<4x4x128xf32> to vector<4x4x128xbf16>
    %32 = tpu.concatenate %15, %17, %19, %21, %23, %25, %27, %29, %31 in 2 : vector<4x4x128xbf16>, vector<4x4x128xbf16>, vector<4x4x128xbf16>, vector<4x4x128xbf16>, vector<4x4x128xbf16>, vector<4x4x128xbf16>, vector<4x4x128xbf16>, vector<4x4x128xbf16>, vector<4x4x128xbf16> -> vector<4x4x1152xbf16>
    %33 = vector.shape_cast %32 : vector<4x4x1152xbf16> to vector<16x1152xbf16>
    %c0_41 = arith.constant 0 : index
    %c0_42 = arith.constant 0 : index
    %34 = vector.load %arg2[%c0_41, %c0_42] : memref<1152x512xbf16, #tpu.memory_space<vmem>>, vector<1152x512xbf16>
    %cst_43 = arith.constant dense<0.000000e+00> : vector<16x512xf32>
    %35 = tpu.matmul %33, %34, %cst_43 {dimension_numbers = #tpu.dot_dimension_numbers<[1], [0], [0], [1], [0, 0, 1, 1], [], []>} : vector<16x1152xbf16>, vector<1152x512xbf16>, vector<16x512xf32> -> vector<16x512xf32>
    %36 = arith.truncf %35 : vector<16x512xf32> to vector<16x512xbf16>
    %c0_44 = arith.constant 0 : index
    %c0_45 = arith.constant 0 : index
    %c0_46 = arith.constant 0 : index
    %37 = vector.load %arg5[%c0_44, %c0_45, %c0_46] : memref<1x16x512xbf16, #tpu.memory_space<vmem>>, vector<1x16x512xbf16>
    %38 = vector.shape_cast %37 : vector<1x16x512xbf16> to vector<16x512xbf16>
    %39 = vector.shape_cast %36 : vector<16x512xbf16> to vector<1x16x512xbf16>
    tpu.vector_store %arg5[%c0_44, %c0_45, %c0_46], %39 {strides = array<i32>} : memref<1x16x512xbf16, #tpu.memory_space<vmem>>, vector<1x16x512xbf16>,
    %cst_47 = arith.constant dense<0.000000e+00> : vector<512xf32>
    %40 = vector.multi_reduction <add>, %35, %cst_47 [0] : vector<16x512xf32> to vector<512xf32>
    %41 = vector.shape_cast %40 : vector<512xf32> to vector<1x512xf32>
    %c0_48 = arith.constant 0 : index
    %c0_49 = arith.constant 0 : index
    %c0_50 = arith.constant 0 : index
    %42 = vector.load %arg6[%c0_48, %c0_49, %c0_50] : memref<1x1x512xf32, #tpu.memory_space<vmem>>, vector<1x1x512xf32>
    %43 = vector.shape_cast %42 : vector<1x1x512xf32> to vector<1x512xf32>
    %44 = vector.shape_cast %41 : vector<1x512xf32> to vector<1x1x512xf32>
    tpu.vector_store %arg6[%c0_48, %c0_49, %c0_50], %44 {strides = array<i32>} : memref<1x1x512xf32, #tpu.memory_space<vmem>>, vector<1x1x512xf32>,
    %45 = arith.mulf %35, %35 : vector<16x512xf32>
    %cst_51 = arith.constant dense<0.000000e+00> : vector<512xf32>
    %46 = vector.multi_reduction <add>, %45, %cst_51 [0] : vector<16x512xf32> to vector<512xf32>
    %47 = vector.shape_cast %46 : vector<512xf32> to vector<1x512xf32>
    %c0_52 = arith.constant 0 : index
    %c0_53 = arith.constant 0 : index
    %c0_54 = arith.constant 0 : index
    %48 = vector.load %arg7[%c0_52, %c0_53, %c0_54] : memref<1x1x512xf32, #tpu.memory_space<vmem>>, vector<1x1x512xf32>
    %49 = vector.shape_cast %48 : vector<1x1x512xf32> to vector<1x512xf32>
    %50 = vector.shape_cast %47 : vector<1x512xf32> to vector<1x1x512xf32>
    tpu.vector_store %arg7[%c0_52, %c0_53, %c0_54], %50 {strides = array<i32>} : memref<1x1x512xf32, #tpu.memory_space<vmem>>, vector<1x1x512xf32>,
    return
  }
  func.func @transform_0(%arg0: i32) -> (i32, i32, i32, i32) {
    %c0_i32 = arith.constant 0 : i32
    %c0_i32_0 = arith.constant 0 : i32
    %c0_i32_1 = arith.constant 0 : i32
    %c0_i32_2 = arith.constant 0 : i32
    return %arg0, %c0_i32, %c0_i32_0, %c0_i32_1 : i32, i32, i32, i32
  }
  func.func @transform_1(%arg0: i32) -> (i32, i32) {
    %c0_i32 = arith.constant 0 : i32
    %c0_i32_0 = arith.constant 0 : i32
    %c0_i32_1 = arith.constant 0 : i32
    return %c0_i32, %c0_i32_0 : i32, i32
  }
  func.func @transform_2(%arg0: i32) -> (i32, i32, i32) {
    %c0_i32 = arith.constant 0 : i32
    %c0_i32_0 = arith.constant 0 : i32
    %c0_i32_1 = arith.constant 0 : i32
    %c0_i32_2 = arith.constant 0 : i32
    return %c0_i32, %c0_i32_0, %c0_i32_1 : i32, i32, i32
  }
  func.func @transform_3(%arg0: i32) -> (i32, i32, i32) {
    %c0_i32 = arith.constant 0 : i32
    %c0_i32_0 = arith.constant 0 : i32
    %c0_i32_1 = arith.constant 0 : i32
    %c0_i32_2 = arith.constant 0 : i32
    return %c0_i32, %c0_i32_0, %c0_i32_1 : i32, i32, i32
  }
  func.func @transform_4(%arg0: i32) -> (i32, i32, i32) {
    %c0_i32 = arith.constant 0 : i32
    %c0_i32_0 = arith.constant 0 : i32
    %c0_i32_1 = arith.constant 0 : i32
    return %arg0, %c0_i32, %c0_i32_0 : i32, i32, i32
  }
  func.func @transform_5(%arg0: i32) -> (i32, i32, i32) {
    %c0_i32 = arith.constant 0 : i32
    %c0_i32_0 = arith.constant 0 : i32
    %c0_i32_1 = arith.constant 0 : i32
    return %arg0, %c0_i32, %c0_i32_0 : i32, i32, i32
  }
  func.func @transform_6(%arg0: i32) -> (i32, i32, i32) {
    %c0_i32 = arith.constant 0 : i32
    %c0_i32_0 = arith.constant 0 : i32
    %c0_i32_1 = arith.constant 0 : i32
    return %arg0, %c0_i32, %c0_i32_0 : i32, i32, i32
  }
}

module attributes {stable_mosaic.version = 11 : i64} {
  func.func @_conv_gemm_kernel(%arg0: i32, %arg1: memref<1x8x8x128xbf16, #tpu.memory_space<vmem>>, %arg2: memref<1152x512xbf16, #tpu.memory_space<vmem>>, %arg3: memref<1x1x128xf32, #tpu.memory_space<vmem>>, %arg4: memref<1x1x128xf32, #tpu.memory_space<vmem>>, %arg5: memref<1x64x512xbf16, #tpu.memory_space<vmem>>, %arg6: memref<10x10x128xf32, #tpu.memory_space<vmem>>) attributes {dimension_semantics = [#tpu.dimension_semantics<parallel>], iteration_bounds = array<i64: 2>, scalar_prefetch = 0 : i64, scratch_operands = 1 : i64, tpu.core_type = #tpu.core_type<tc>, window_params = [{transform_indices = @transform_0, window_bounds = array<i64: 1, 8, 8, 128>}, {pipeline_mode = #tpu.pipeline_mode<synchronous>, transform_indices = @transform_1, window_bounds = array<i64: 1152, 512>}, {pipeline_mode = #tpu.pipeline_mode<synchronous>, transform_indices = @transform_2, window_bounds = array<i64: 1, 1, 128>}, {pipeline_mode = #tpu.pipeline_mode<synchronous>, transform_indices = @transform_3, window_bounds = array<i64: 1, 1, 128>}, {transform_indices = @transform_4, window_bounds = array<i64: 1, 64, 512>}]} {
    %cst = arith.constant 0.000000e+00 : f32
    %0 = vector.broadcast %cst : f32 to vector<10x10x128xf32>
    %c0 = arith.constant 0 : index
    %c0_0 = arith.constant 0 : index
    %c0_1 = arith.constant 0 : index
    %1 = vector.load %arg6[%c0, %c0_0, %c0_1] : memref<10x10x128xf32, #tpu.memory_space<vmem>>, vector<10x10x128xf32>
    tpu.vector_store %arg6[%c0, %c0_0, %c0_1], %0 {strides = array<i32>} : memref<10x10x128xf32, #tpu.memory_space<vmem>>, vector<10x10x128xf32>,
    %c0_2 = arith.constant 0 : index
    %c0_3 = arith.constant 0 : index
    %c0_4 = arith.constant 0 : index
    %c0_5 = arith.constant 0 : index
    %2 = vector.load %arg1[%c0_2, %c0_3, %c0_4, %c0_5] : memref<1x8x8x128xbf16, #tpu.memory_space<vmem>>, vector<1x8x8x128xbf16>
    %3 = vector.shape_cast %2 : vector<1x8x8x128xbf16> to vector<8x8x128xbf16>
    %4 = arith.extf %3 : vector<8x8x128xbf16> to vector<8x8x128xf32>
    %c0_6 = arith.constant 0 : index
    %c0_7 = arith.constant 0 : index
    %c0_8 = arith.constant 0 : index
    %5 = vector.load %arg3[%c0_6, %c0_7, %c0_8] : memref<1x1x128xf32, #tpu.memory_space<vmem>>, vector<1x1x128xf32>
    %6 = vector.broadcast %5 : vector<1x1x128xf32> to vector<8x8x128xf32>
    %7 = arith.mulf %4, %6 : vector<8x8x128xf32>
    %c0_9 = arith.constant 0 : index
    %c0_10 = arith.constant 0 : index
    %c0_11 = arith.constant 0 : index
    %8 = vector.load %arg4[%c0_9, %c0_10, %c0_11] : memref<1x1x128xf32, #tpu.memory_space<vmem>>, vector<1x1x128xf32>
    %9 = vector.broadcast %8 : vector<1x1x128xf32> to vector<8x8x128xf32>
    %10 = arith.addf %7, %9 : vector<8x8x128xf32>
    %cst_12 = arith.constant 0.000000e+00 : f32
    %11 = vector.broadcast %cst_12 : f32 to vector<8x8x128xf32>
    %12 = arith.maximumf %10, %11 : vector<8x8x128xf32>
    %c1 = arith.constant 1 : index
    %c1_13 = arith.constant 1 : index
    %c0_14 = arith.constant 0 : index
    %13 = vector.load %arg6[%c1, %c1_13, %c0_14] : memref<10x10x128xf32, #tpu.memory_space<vmem>>, vector<8x8x128xf32>
    tpu.vector_store %arg6[%c1, %c1_13, %c0_14], %12 {strides = array<i32>} : memref<10x10x128xf32, #tpu.memory_space<vmem>>, vector<8x8x128xf32>,
    %c0_15 = arith.constant 0 : index
    %c0_16 = arith.constant 0 : index
    %c0_17 = arith.constant 0 : index
    %14 = vector.load %arg6[%c0_15, %c0_16, %c0_17] : memref<10x10x128xf32, #tpu.memory_space<vmem>>, vector<8x8x128xf32>
    %15 = arith.truncf %14 : vector<8x8x128xf32> to vector<8x8x128xbf16>
    %c0_18 = arith.constant 0 : index
    %c1_19 = arith.constant 1 : index
    %c0_20 = arith.constant 0 : index
    %16 = vector.load %arg6[%c0_18, %c1_19, %c0_20] : memref<10x10x128xf32, #tpu.memory_space<vmem>>, vector<8x8x128xf32>
    %17 = arith.truncf %16 : vector<8x8x128xf32> to vector<8x8x128xbf16>
    %c0_21 = arith.constant 0 : index
    %c2 = arith.constant 2 : index
    %c0_22 = arith.constant 0 : index
    %18 = vector.load %arg6[%c0_21, %c2, %c0_22] : memref<10x10x128xf32, #tpu.memory_space<vmem>>, vector<8x8x128xf32>
    %19 = arith.truncf %18 : vector<8x8x128xf32> to vector<8x8x128xbf16>
    %c1_23 = arith.constant 1 : index
    %c0_24 = arith.constant 0 : index
    %c0_25 = arith.constant 0 : index
    %20 = vector.load %arg6[%c1_23, %c0_24, %c0_25] : memref<10x10x128xf32, #tpu.memory_space<vmem>>, vector<8x8x128xf32>
    %21 = arith.truncf %20 : vector<8x8x128xf32> to vector<8x8x128xbf16>
    %c1_26 = arith.constant 1 : index
    %c1_27 = arith.constant 1 : index
    %c0_28 = arith.constant 0 : index
    %22 = vector.load %arg6[%c1_26, %c1_27, %c0_28] : memref<10x10x128xf32, #tpu.memory_space<vmem>>, vector<8x8x128xf32>
    %23 = arith.truncf %22 : vector<8x8x128xf32> to vector<8x8x128xbf16>
    %c1_29 = arith.constant 1 : index
    %c2_30 = arith.constant 2 : index
    %c0_31 = arith.constant 0 : index
    %24 = vector.load %arg6[%c1_29, %c2_30, %c0_31] : memref<10x10x128xf32, #tpu.memory_space<vmem>>, vector<8x8x128xf32>
    %25 = arith.truncf %24 : vector<8x8x128xf32> to vector<8x8x128xbf16>
    %c2_32 = arith.constant 2 : index
    %c0_33 = arith.constant 0 : index
    %c0_34 = arith.constant 0 : index
    %26 = vector.load %arg6[%c2_32, %c0_33, %c0_34] : memref<10x10x128xf32, #tpu.memory_space<vmem>>, vector<8x8x128xf32>
    %27 = arith.truncf %26 : vector<8x8x128xf32> to vector<8x8x128xbf16>
    %c2_35 = arith.constant 2 : index
    %c1_36 = arith.constant 1 : index
    %c0_37 = arith.constant 0 : index
    %28 = vector.load %arg6[%c2_35, %c1_36, %c0_37] : memref<10x10x128xf32, #tpu.memory_space<vmem>>, vector<8x8x128xf32>
    %29 = arith.truncf %28 : vector<8x8x128xf32> to vector<8x8x128xbf16>
    %c2_38 = arith.constant 2 : index
    %c2_39 = arith.constant 2 : index
    %c0_40 = arith.constant 0 : index
    %30 = vector.load %arg6[%c2_38, %c2_39, %c0_40] : memref<10x10x128xf32, #tpu.memory_space<vmem>>, vector<8x8x128xf32>
    %31 = arith.truncf %30 : vector<8x8x128xf32> to vector<8x8x128xbf16>
    %32 = tpu.concatenate %15, %17, %19, %21, %23, %25, %27, %29, %31 in 2 : vector<8x8x128xbf16>, vector<8x8x128xbf16>, vector<8x8x128xbf16>, vector<8x8x128xbf16>, vector<8x8x128xbf16>, vector<8x8x128xbf16>, vector<8x8x128xbf16>, vector<8x8x128xbf16>, vector<8x8x128xbf16> -> vector<8x8x1152xbf16>
    %33 = vector.shape_cast %32 : vector<8x8x1152xbf16> to vector<64x1152xbf16>
    %c0_41 = arith.constant 0 : index
    %c0_42 = arith.constant 0 : index
    %34 = vector.load %arg2[%c0_41, %c0_42] : memref<1152x512xbf16, #tpu.memory_space<vmem>>, vector<1152x512xbf16>
    %cst_43 = arith.constant dense<0.000000e+00> : vector<64x512xf32>
    %35 = tpu.matmul %33, %34, %cst_43 {dimension_numbers = #tpu.dot_dimension_numbers<[1], [0], [0], [1], [0, 0, 1, 1], [], []>} : vector<64x1152xbf16>, vector<1152x512xbf16>, vector<64x512xf32> -> vector<64x512xf32>
    %36 = math.tanh %35 : vector<64x512xf32>
    %37 = arith.truncf %36 : vector<64x512xf32> to vector<64x512xbf16>
    %c0_44 = arith.constant 0 : index
    %c0_45 = arith.constant 0 : index
    %c0_46 = arith.constant 0 : index
    %38 = vector.load %arg5[%c0_44, %c0_45, %c0_46] : memref<1x64x512xbf16, #tpu.memory_space<vmem>>, vector<1x64x512xbf16>
    %39 = vector.shape_cast %38 : vector<1x64x512xbf16> to vector<64x512xbf16>
    %40 = vector.shape_cast %37 : vector<64x512xbf16> to vector<1x64x512xbf16>
    tpu.vector_store %arg5[%c0_44, %c0_45, %c0_46], %40 {strides = array<i32>} : memref<1x64x512xbf16, #tpu.memory_space<vmem>>, vector<1x64x512xbf16>,
    return
  }
  func.func @transform_0(%arg0: i32) -> (i32, i32, i32, i32) {
    %c0_i32 = arith.constant 0 : i32
    %c0_i32_0 = arith.constant 0 : i32
    %c0_i32_1 = arith.constant 0 : i32
    %c0_i32_2 = arith.constant 0 : i32
    return %arg0, %c0_i32, %c0_i32_0, %c0_i32_1 : i32, i32, i32, i32
  }
  func.func @transform_1(%arg0: i32) -> (i32, i32) {
    %c0_i32 = arith.constant 0 : i32
    %c0_i32_0 = arith.constant 0 : i32
    %c0_i32_1 = arith.constant 0 : i32
    return %c0_i32, %c0_i32_0 : i32, i32
  }
  func.func @transform_2(%arg0: i32) -> (i32, i32, i32) {
    %c0_i32 = arith.constant 0 : i32
    %c0_i32_0 = arith.constant 0 : i32
    %c0_i32_1 = arith.constant 0 : i32
    %c0_i32_2 = arith.constant 0 : i32
    return %c0_i32, %c0_i32_0, %c0_i32_1 : i32, i32, i32
  }
  func.func @transform_3(%arg0: i32) -> (i32, i32, i32) {
    %c0_i32 = arith.constant 0 : i32
    %c0_i32_0 = arith.constant 0 : i32
    %c0_i32_1 = arith.constant 0 : i32
    %c0_i32_2 = arith.constant 0 : i32
    return %c0_i32, %c0_i32_0, %c0_i32_1 : i32, i32, i32
  }
  func.func @transform_4(%arg0: i32) -> (i32, i32, i32) {
    %c0_i32 = arith.constant 0 : i32
    %c0_i32_0 = arith.constant 0 : i32
    %c0_i32_1 = arith.constant 0 : i32
    return %arg0, %c0_i32, %c0_i32_0 : i32, i32, i32
  }
}

module attributes {stable_mosaic.version = 11 : i64} {
  func.func @_conv_gemm_kernel(%arg0: i32, %arg1: memref<1x16x16x128xbf16, #tpu.memory_space<vmem>>, %arg2: memref<2048x128xbf16, #tpu.memory_space<vmem>>, %arg3: memref<1x64x128xbf16, #tpu.memory_space<vmem>>, %arg4: memref<18x18x128xf32, #tpu.memory_space<vmem>>) attributes {dimension_semantics = [#tpu.dimension_semantics<parallel>], iteration_bounds = array<i64: 2>, scalar_prefetch = 0 : i64, scratch_operands = 1 : i64, tpu.core_type = #tpu.core_type<tc>, window_params = [{transform_indices = @transform_0, window_bounds = array<i64: 1, 16, 16, 128>}, {pipeline_mode = #tpu.pipeline_mode<synchronous>, transform_indices = @transform_1, window_bounds = array<i64: 2048, 128>}, {transform_indices = @transform_2, window_bounds = array<i64: 1, 64, 128>}]} {
    %cst = arith.constant 0.000000e+00 : f32
    %0 = vector.broadcast %cst : f32 to vector<18x18x128xf32>
    %c0 = arith.constant 0 : index
    %c0_0 = arith.constant 0 : index
    %c0_1 = arith.constant 0 : index
    %1 = vector.load %arg4[%c0, %c0_0, %c0_1] : memref<18x18x128xf32, #tpu.memory_space<vmem>>, vector<18x18x128xf32>
    tpu.vector_store %arg4[%c0, %c0_0, %c0_1], %0 {strides = array<i32>} : memref<18x18x128xf32, #tpu.memory_space<vmem>>, vector<18x18x128xf32>,
    %c0_2 = arith.constant 0 : index
    %c0_3 = arith.constant 0 : index
    %c0_4 = arith.constant 0 : index
    %c0_5 = arith.constant 0 : index
    %2 = vector.load %arg1[%c0_2, %c0_3, %c0_4, %c0_5] : memref<1x16x16x128xbf16, #tpu.memory_space<vmem>>, vector<1x16x16x128xbf16>
    %3 = vector.shape_cast %2 : vector<1x16x16x128xbf16> to vector<16x16x128xbf16>
    %4 = arith.extf %3 : vector<16x16x128xbf16> to vector<16x16x128xf32>
    %c1 = arith.constant 1 : index
    %c1_6 = arith.constant 1 : index
    %c0_7 = arith.constant 0 : index
    %5 = vector.load %arg4[%c1, %c1_6, %c0_7] : memref<18x18x128xf32, #tpu.memory_space<vmem>>, vector<16x16x128xf32>
    tpu.vector_store %arg4[%c1, %c1_6, %c0_7], %4 {strides = array<i32>} : memref<18x18x128xf32, #tpu.memory_space<vmem>>, vector<16x16x128xf32>,
    %c0_8 = arith.constant 0 : index
    %c0_9 = arith.constant 0 : index
    %c0_10 = arith.constant 0 : index
    %6 = tpu.strided_load %arg4[%c0_8, %c0_9, %c0_10] {strides = array<i32: 2, 2, 1>} : memref<18x18x128xf32, #tpu.memory_space<vmem>>, vector<8x8x128xf32>
    %7 = arith.truncf %6 : vector<8x8x128xf32> to vector<8x8x128xbf16>
    %c0_11 = arith.constant 0 : index
    %c1_12 = arith.constant 1 : index
    %c0_13 = arith.constant 0 : index
    %8 = tpu.strided_load %arg4[%c0_11, %c1_12, %c0_13] {strides = array<i32: 2, 2, 1>} : memref<18x18x128xf32, #tpu.memory_space<vmem>>, vector<8x8x128xf32>
    %9 = arith.truncf %8 : vector<8x8x128xf32> to vector<8x8x128xbf16>
    %c0_14 = arith.constant 0 : index
    %c2 = arith.constant 2 : index
    %c0_15 = arith.constant 0 : index
    %10 = tpu.strided_load %arg4[%c0_14, %c2, %c0_15] {strides = array<i32: 2, 2, 1>} : memref<18x18x128xf32, #tpu.memory_space<vmem>>, vector<8x8x128xf32>
    %11 = arith.truncf %10 : vector<8x8x128xf32> to vector<8x8x128xbf16>
    %c0_16 = arith.constant 0 : index
    %c3 = arith.constant 3 : index
    %c0_17 = arith.constant 0 : index
    %12 = tpu.strided_load %arg4[%c0_16, %c3, %c0_17] {strides = array<i32: 2, 2, 1>} : memref<18x18x128xf32, #tpu.memory_space<vmem>>, vector<8x8x128xf32>
    %13 = arith.truncf %12 : vector<8x8x128xf32> to vector<8x8x128xbf16>
    %c1_18 = arith.constant 1 : index
    %c0_19 = arith.constant 0 : index
    %c0_20 = arith.constant 0 : index
    %14 = tpu.strided_load %arg4[%c1_18, %c0_19, %c0_20] {strides = array<i32: 2, 2, 1>} : memref<18x18x128xf32, #tpu.memory_space<vmem>>, vector<8x8x128xf32>
    %15 = arith.truncf %14 : vector<8x8x128xf32> to vector<8x8x128xbf16>
    %c1_21 = arith.constant 1 : index
    %c1_22 = arith.constant 1 : index
    %c0_23 = arith.constant 0 : index
    %16 = tpu.strided_load %arg4[%c1_21, %c1_22, %c0_23] {strides = array<i32: 2, 2, 1>} : memref<18x18x128xf32, #tpu.memory_space<vmem>>, vector<8x8x128xf32>
    %17 = arith.truncf %16 : vector<8x8x128xf32> to vector<8x8x128xbf16>
    %c1_24 = arith.constant 1 : index
    %c2_25 = arith.constant 2 : index
    %c0_26 = arith.constant 0 : index
    %18 = tpu.strided_load %arg4[%c1_24, %c2_25, %c0_26] {strides = array<i32: 2, 2, 1>} : memref<18x18x128xf32, #tpu.memory_space<vmem>>, vector<8x8x128xf32>
    %19 = arith.truncf %18 : vector<8x8x128xf32> to vector<8x8x128xbf16>
    %c1_27 = arith.constant 1 : index
    %c3_28 = arith.constant 3 : index
    %c0_29 = arith.constant 0 : index
    %20 = tpu.strided_load %arg4[%c1_27, %c3_28, %c0_29] {strides = array<i32: 2, 2, 1>} : memref<18x18x128xf32, #tpu.memory_space<vmem>>, vector<8x8x128xf32>
    %21 = arith.truncf %20 : vector<8x8x128xf32> to vector<8x8x128xbf16>
    %c2_30 = arith.constant 2 : index
    %c0_31 = arith.constant 0 : index
    %c0_32 = arith.constant 0 : index
    %22 = tpu.strided_load %arg4[%c2_30, %c0_31, %c0_32] {strides = array<i32: 2, 2, 1>} : memref<18x18x128xf32, #tpu.memory_space<vmem>>, vector<8x8x128xf32>
    %23 = arith.truncf %22 : vector<8x8x128xf32> to vector<8x8x128xbf16>
    %c2_33 = arith.constant 2 : index
    %c1_34 = arith.constant 1 : index
    %c0_35 = arith.constant 0 : index
    %24 = tpu.strided_load %arg4[%c2_33, %c1_34, %c0_35] {strides = array<i32: 2, 2, 1>} : memref<18x18x128xf32, #tpu.memory_space<vmem>>, vector<8x8x128xf32>
    %25 = arith.truncf %24 : vector<8x8x128xf32> to vector<8x8x128xbf16>
    %c2_36 = arith.constant 2 : index
    %c2_37 = arith.constant 2 : index
    %c0_38 = arith.constant 0 : index
    %26 = tpu.strided_load %arg4[%c2_36, %c2_37, %c0_38] {strides = array<i32: 2, 2, 1>} : memref<18x18x128xf32, #tpu.memory_space<vmem>>, vector<8x8x128xf32>
    %27 = arith.truncf %26 : vector<8x8x128xf32> to vector<8x8x128xbf16>
    %c2_39 = arith.constant 2 : index
    %c3_40 = arith.constant 3 : index
    %c0_41 = arith.constant 0 : index
    %28 = tpu.strided_load %arg4[%c2_39, %c3_40, %c0_41] {strides = array<i32: 2, 2, 1>} : memref<18x18x128xf32, #tpu.memory_space<vmem>>, vector<8x8x128xf32>
    %29 = arith.truncf %28 : vector<8x8x128xf32> to vector<8x8x128xbf16>
    %c3_42 = arith.constant 3 : index
    %c0_43 = arith.constant 0 : index
    %c0_44 = arith.constant 0 : index
    %30 = tpu.strided_load %arg4[%c3_42, %c0_43, %c0_44] {strides = array<i32: 2, 2, 1>} : memref<18x18x128xf32, #tpu.memory_space<vmem>>, vector<8x8x128xf32>
    %31 = arith.truncf %30 : vector<8x8x128xf32> to vector<8x8x128xbf16>
    %c3_45 = arith.constant 3 : index
    %c1_46 = arith.constant 1 : index
    %c0_47 = arith.constant 0 : index
    %32 = tpu.strided_load %arg4[%c3_45, %c1_46, %c0_47] {strides = array<i32: 2, 2, 1>} : memref<18x18x128xf32, #tpu.memory_space<vmem>>, vector<8x8x128xf32>
    %33 = arith.truncf %32 : vector<8x8x128xf32> to vector<8x8x128xbf16>
    %c3_48 = arith.constant 3 : index
    %c2_49 = arith.constant 2 : index
    %c0_50 = arith.constant 0 : index
    %34 = tpu.strided_load %arg4[%c3_48, %c2_49, %c0_50] {strides = array<i32: 2, 2, 1>} : memref<18x18x128xf32, #tpu.memory_space<vmem>>, vector<8x8x128xf32>
    %35 = arith.truncf %34 : vector<8x8x128xf32> to vector<8x8x128xbf16>
    %c3_51 = arith.constant 3 : index
    %c3_52 = arith.constant 3 : index
    %c0_53 = arith.constant 0 : index
    %36 = tpu.strided_load %arg4[%c3_51, %c3_52, %c0_53] {strides = array<i32: 2, 2, 1>} : memref<18x18x128xf32, #tpu.memory_space<vmem>>, vector<8x8x128xf32>
    %37 = arith.truncf %36 : vector<8x8x128xf32> to vector<8x8x128xbf16>
    %38 = tpu.concatenate %7, %9, %11, %13, %15, %17, %19, %21, %23, %25, %27, %29, %31, %33, %35, %37 in 2 : vector<8x8x128xbf16>, vector<8x8x128xbf16>, vector<8x8x128xbf16>, vector<8x8x128xbf16>, vector<8x8x128xbf16>, vector<8x8x128xbf16>, vector<8x8x128xbf16>, vector<8x8x128xbf16>, vector<8x8x128xbf16>, vector<8x8x128xbf16>, vector<8x8x128xbf16>, vector<8x8x128xbf16>, vector<8x8x128xbf16>, vector<8x8x128xbf16>, vector<8x8x128xbf16>, vector<8x8x128xbf16> -> vector<8x8x2048xbf16>
    %39 = vector.shape_cast %38 : vector<8x8x2048xbf16> to vector<64x2048xbf16>
    %c0_54 = arith.constant 0 : index
    %c0_55 = arith.constant 0 : index
    %40 = vector.load %arg2[%c0_54, %c0_55] : memref<2048x128xbf16, #tpu.memory_space<vmem>>, vector<2048x128xbf16>
    %cst_56 = arith.constant dense<0.000000e+00> : vector<64x128xf32>
    %41 = tpu.matmul %39, %40, %cst_56 {dimension_numbers = #tpu.dot_dimension_numbers<[1], [0], [0], [1], [0, 0, 1, 1], [], []>} : vector<64x2048xbf16>, vector<2048x128xbf16>, vector<64x128xf32> -> vector<64x128xf32>
    %cst_57 = arith.constant 0.000000e+00 : f32
    %42 = vector.broadcast %cst_57 : f32 to vector<64x128xf32>
    %43 = arith.cmpf oge, %41, %42 : vector<64x128xf32>
    %cst_58 = arith.constant 2.000000e-01 : f32
    %44 = vector.broadcast %cst_58 : f32 to vector<64x128xf32>
    %45 = arith.mulf %44, %41 : vector<64x128xf32>
    %46 = arith.select %43, %41, %45 : vector<64x128xi1>, vector<64x128xf32>
    %47 = arith.truncf %46 : vector<64x128xf32> to vector<64x128xbf16>
    %c0_59 = arith.constant 0 : index
    %c0_60 = arith.constant 0 : index
    %c0_61 = arith.constant 0 : index
    %48 = vector.load %arg3[%c0_59, %c0_60, %c0_61] : memref<1x64x128xbf16, #tpu.memory_space<vmem>>, vector<1x64x128xbf16>
    %49 = vector.shape_cast %48 : vector<1x64x128xbf16> to vector<64x128xbf16>
    %50 = vector.shape_cast %47 : vector<64x128xbf16> to vector<1x64x128xbf16>
    tpu.vector_store %arg3[%c0_59, %c0_60, %c0_61], %50 {strides = array<i32>} : memref<1x64x128xbf16, #tpu.memory_space<vmem>>, vector<1x64x128xbf16>,
    return
  }
  func.func @transform_0(%arg0: i32) -> (i32, i32, i32, i32) {
    %c0_i32 = arith.constant 0 : i32
    %c0_i32_0 = arith.constant 0 : i32
    %c0_i32_1 = arith.constant 0 : i32
    %c0_i32_2 = arith.constant 0 : i32
    return %arg0, %c0_i32, %c0_i32_0, %c0_i32_1 : i32, i32, i32, i32
  }
  func.func @transform_1(%arg0: i32) -> (i32, i32) {
    %c0_i32 = arith.constant 0 : i32
    %c0_i32_0 = arith.constant 0 : i32
    %c0_i32_1 = arith.constant 0 : i32
    return %c0_i32, %c0_i32_0 : i32, i32
  }
  func.func @transform_2(%arg0: i32) -> (i32, i32, i32) {
    %c0_i32 = arith.constant 0 : i32
    %c0_i32_0 = arith.constant 0 : i32
    %c0_i32_1 = arith.constant 0 : i32
    return %arg0, %c0_i32, %c0_i32_0 : i32, i32, i32
  }
}

</mosaic_0001>

<bundles_post_ra>
// kernel: _lambda_.10
= control target key start
LH: loop header
LB: loop body
LE: loop exit
PB: predicated region body
PF: predicated region fallthrough
CT: control target
= control target key end

     0   :  { %s3043_s15 = smov 0   ;;  %s3516_s0 = inlined_call_operand.vmem [shape: bf16[2,8,8,128], index: 0, kind: input, shape index: {}]   ;;  %s3517_s1 = inlined_call_operand.vmem [shape: bf16[2048,128], index: 1, kind: input, shape index: {}]   ;;  %s3518_s2 = inlined_call_operand.vmem [shape: bf16[2,16,128], index: 2, kind: output, shape index: {0}]   ;;  %s3519_s3 = inlined_call_operand.vmem [shape: f32[2,1,128], index: 3, kind: output, shape index: {1}]   ;;  %s3520_s4 = inlined_call_operand.vmem [shape: f32[2,1,128], index: 4, kind: output, shape index: {2}]  }
   0x1 LB: > { %s2477_s16 = sadd.s32 4294967295, %s3014_s15   ;;  %p2481_p0 = scmp.ge.s32.totalorder %s3014_s15, 1  ;;  %s3014_s15 = sphi %s3043_s15, %s15_s15  }
   0x2   : > { %p167_p1 = scmp.lt.s32.totalorder %s3014_s15, 3 }
   0x4   : > { %p168_p2 = pnand %p2481_p0, %p167_p1 }
   0x5   : > { %p199_p3 = scmp.lt.s32.totalorder (!%p168_p2), %s2477_s16, 1 }
   0x6   : > { %171 = sbr.rel (%p168_p2) target bundleno = 367 (0x16f), region = 28 }
   0xb   : > { %v2880_v0 = vld [vmem:[%s3517_s1 + $0x78] sm:$0xff]   ;;  %v3016_v3 = vmov 0.0   ;;  %v2884_v5 = vld [vmem:[%s3517_s1 + $0x70] sm:$0xff]   ;;  %v2888_v9 = vld [vmem:[%s3517_s1 + $0x68] sm:$0xff]   ;;  %s3522_s16 = smov (!%p199_p3, %s2477_s16), 1  ;;  %v520_v36 = vlaneseq }
   0xc   : > { %v2881_v1 = vld [vmem:[%s3517_s1 + $0xf8] sm:$0xff]   ;;  %2694 = vmatprep.subr.bf16.mxu0 %v2880_v0  ;;  %216 = vst [vmem:[#allocation2] sm:$0xff] %v3016_v3  ;;  %220 = vst [vmem:[#allocation2 + $0x20] sm:$0xff] %v3016_v3  ;;  %v2885_v6 = vld [vmem:[%s3517_s1 + $0xf0] sm:$0xff]   ;;  %s2666_s23 = sshll.u32 %s3522_s16, 5  ;;  %s2667_s13 = sshll.u32 %s3522_s16, 3 }
   0xd   : > { %v2882_v2 = vld [vmem:[%s3517_s1 + $0x38] sm:$0xff]   ;;  %221 = vst [vmem:[#allocation2 + $0x28] sm:$0x3] %v3016_v3  ;;  %224 = vst [vmem:[#allocation2 + $0x40] sm:$0xff] %v3016_v3  ;;  %2716 = vmatprep.subr.bf16.mxu1 %v2881_v1  ;;  %v2886_v7 = vld [vmem:[%s3517_s1 + $0x30] sm:$0xff]   ;;  %s3151_s6 = scalar_lea.vmem %s3516_s0, %s2666_s23  ;;  %v521_v49 = vshrl.u32 %v520_v36, 7  ;;  %s208_s18 = scalar_lea.vmem %s3518_s2, %s2667_s13 }
   0xe   : > { %225 = vst [vmem:[#allocation2 + $0x48] sm:$0x3] %v3016_v3  ;;  %228 = vst [vmem:[#allocation2 + $0x60] sm:$0xff] %v3016_v3  ;;  %v2883_v4 = vld [vmem:[%s3517_s1 + $0xb8] sm:$0xff]   ;;  %2695 = vmatpush3.bf16.msra.mxu0 %v2882_v2  ;;  %v2887_v8 = vld [vmem:[%s3517_s1 + $0xb0] sm:$0xff]   ;;  %s214_s23 = scalar_lea.vmem %s3520_s4, %s3522_s16 }
   0xf   : > { %229 = vst [vmem:[#allocation2 + $0x68] sm:$0x3] %v3016_v3  ;;  %217 = vst [vmem:[#allocation2 + $0x8] sm:$0x3] %v3016_v3  ;;  %2717 = vmatpush3.bf16.msra.mxu1 %v2883_v4  ;;  %2696 = vmatprep.subr.bf16.mxu0 %v2884_v5  ;;  %v2889_v10 = vld [vmem:[%s3517_s1 + $0xe8] sm:$0xff]   ;;  %v2892_v13 = vld [vmem:[%s3517_s1 + $0x60] sm:$0xff]  }
  0x10   : > { %218 = vst [vmem:[#allocation2 + $0x10] sm:$0xff] %v3016_v3  ;;  %219 = vst [vmem:[#allocation2 + $0x18] sm:$0x3] %v3016_v3  ;;  %2718 = vmatprep.subr.bf16.mxu1 %v2885_v6  ;;  %v2890_v11 = vld [vmem:[%s3517_s1 + $0x28] sm:$0xff]   ;;  %v2893_v14 = vld [vmem:[%s3517_s1 + $0xe0] sm:$0xff]  }
  0x11   : > { %222 = vst [vmem:[#allocation2 + $0x30] sm:$0xff] %v3016_v3  ;;  %223 = vst [vmem:[#allocation2 + $0x38] sm:$0x3] %v3016_v3  ;;  %v2891_v12 = vld [vmem:[%s3517_s1 + $0xa8] sm:$0xff]   ;;  %v2894_v15 = vld [vmem:[%s3517_s1 + $0x20] sm:$0xff]  }
  0x12   : > { %226 = vst [vmem:[#allocation2 + $0x50] sm:$0xff] %v3016_v3  ;;  %227 = vst [vmem:[#allocation2 + $0x58] sm:$0x3] %v3016_v3  ;;  %2697 = vmatpush3.bf16.msra.mxu0 %v2886_v7  ;;  %v2895_v16 = vld [vmem:[%s3517_s1 + $0xa0] sm:$0xff]   ;;  %v2896_v17 = vld [vmem:[%s3517_s1 + $0x58] sm:$0xff]  }
  0x13   : > { %230 = vst [vmem:[#allocation2 + $0x70] sm:$0xff] %v3016_v3  ;;  %231 = vst [vmem:[#allocation2 + $0x78] sm:$0x3] %v3016_v3  ;;  %2719 = vmatpush3.bf16.msra.mxu1 %v2887_v8  ;;  %2698 = vmatprep.subr.bf16.mxu0 %v2888_v9  ;;  %v2897_v18 = vld [vmem:[%s3517_s1 + $0xd8] sm:$0xff]   ;;  %v2900_v21 = vld [vmem:[%s3517_s1 + $0x50] sm:$0xff]  }
  0x14   : > { %232 = vst [vmem:[#allocation2 + $0x80] sm:$0xff] %v3016_v3  ;;  %233 = vst [vmem:[#allocation2 + $0x88] sm:$0x3] %v3016_v3  ;;  %2720 = vmatprep.subr.bf16.mxu1 %v2889_v10  ;;  %v2898_v19 = vld [vmem:[%s3517_s1 + $0x18] sm:$0xff]   ;;  %v2901_v22 = vld [vmem:[%s3517_s1 + $0xd0] sm:$0xff]  }
  0x15   : > { %234 = vst [vmem:[#allocation2 + $0x90] sm:$0xff] %v3016_v3  ;;  %235 = vst [vmem:[#allocation2 + $0x98] sm:$0x3] %v3016_v3  ;;  %v2899_v20 = vld [vmem:[%s3517_s1 + $0x98] sm:$0xff]   ;;  %v2902_v23 = vld [vmem:[%s3517_s1 + $0x10] sm:$0xff]  }
  0x16   : > { %2699 = vmatpush3.bf16.msra.mxu0 %v2890_v11  ;;  %v2903_v24 = vld [vmem:[%s3517_s1 + $0x90] sm:$0xff]   ;;  %v2904_v25 = vld [vmem:[%s3517_s1 + $0x48] sm:$0xff]   ;;  %v2908_v29 = vld [vmem:[%s3517_s1 + $0x40] sm:$0xff]   ;;  %v3017_v43 = vmov 1983009808  }
  0x17   : > { %2721 = vmatpush3.bf16.msra.mxu1 %v2891_v12  ;;  %2700 = vmatprep.subr.bf16.mxu0 %v2892_v13  ;;  %v2905_v26 = vld [vmem:[%s3517_s1 + $0xc8] sm:$0xff]   ;;  %v2909_v30 = vld [vmem:[%s3517_s1 + $0xc0] sm:$0xff]   ;;  %v2692_v35 = vld [vmem:[%s3151_s6 + $0x10] sm:$0xff]   ;;  %v518_v44 = vunpack.c.l.s4 %v3017_v43 }
  0x18   : > { %2722 = vmatprep.subr.bf16.mxu1 %v2893_v14  ;;  %v2906_v27 = vld [vmem:[%s3517_s1 + $0x8] sm:$0xff]   ;;  %v2910_v31 = vld [vmem:[%s3517_s1] sm:$0xff]   ;;  %v2680_v41 = vunpack.c.l.bf16 %v2692_v35  ;;  %v2681_v42 = vunpack.c.h.bf16 %v2692_v35  ;;  %v2912_v47 = vld [vmem:[%s3517_s1 + $0x178] sm:$0xff]  }
  0x19   : > { %v2907_v28 = vld [vmem:[%s3517_s1 + $0x88] sm:$0xff]   ;;  %v2911_v32 = vld [vmem:[%s3517_s1 + $0x80] sm:$0xff]   ;;  %v519_v48 = vunpack.c.0.s8 %v518_v44  ;;  %v2913_v50 = vld [vmem:[%s3517_s1 + $0x1f8] sm:$0xff]  }
  0x1a   : > { %2701 = vmatpush3.bf16.msra.mxu0 %v2894_v15  ;;  %v2671_v33 = vld [vmem:[%s3151_s6] sm:$0xff]   ;;  %v2691_v34 = vld [vmem:[%s3151_s6 + $0x8] sm:$0xff]   ;;  %258 = vst [vmem:[#allocation2 + $0x61] sm:$0xff] %v2681_v42  ;;  %257 = vst [vmem:[#allocation2 + $0x51] sm:$0xff] %v2680_v41 }
  0x1b   : > { %2723 = vmatpush3.bf16.msra.mxu1 %v2895_v16  ;;  %2702 = vmatprep.subr.bf16.mxu0 %v2896_v17  ;;  %v2672_v37 = vunpack.c.l.bf16 %v2671_v33  ;;  %v2673_v38 = vunpack.c.h.bf16 %v2671_v33  ;;  %v2676_v39 = vunpack.c.l.bf16 %v2691_v34  ;;  %v2677_v40 = vunpack.c.h.bf16 %v2691_v34  ;;  %v261_v45 = vld [vmem:[#allocation2] ss:$2 sm:$0xf]  ;;  %v273_v46 = vld [vmem:[#allocation2 + $0x1] ss:$2 sm:$0xf] }
  0x1c   : > { %2724 = vmatprep.subr.bf16.mxu1 %v2897_v18  ;;  %v285_v51 = vld [vmem:[#allocation2 + $0x2] ss:$2 sm:$0xf]  ;;  %v297_v52 = vld [vmem:[#allocation2 + $0x3] ss:$2 sm:$0xf]  ;;  %v2486_v53 = vpack.c.bf16 %v273_v46, %v261_v45  ;;  %v3168_v54 = vsub.s32 %v519_v48, %v521_v49 }
  0x1d   : > { %254 = vst [vmem:[#allocation2 + $0x21] sm:$0xff] %v2673_v38  ;;  %256 = vst [vmem:[#allocation2 + $0x41] sm:$0xff] %v2677_v40  ;;  %v2487_v59 = vpack.c.bf16 %v297_v52, %v285_v51  ;;  %v2917_v33 = vld [vmem:[%s3517_s1 + $0x1f0] sm:$0xff]   ;;  %v2920_v35 = vld [vmem:[%s3517_s1 + $0x168] sm:$0xff]  }
  0x1e   : > { %2703 = vmatpush3.bf16.msra.mxu0 %v2898_v19  ;;  %253 = vst [vmem:[#allocation2 + $0x11] sm:$0xff] %v2672_v37  ;;  %255 = vst [vmem:[#allocation2 + $0x31] sm:$0xff] %v2676_v39  ;;  %v523_v62 = vrot.slane %v2486_v53, %v3168_v54  ;;  %v2918_v34 = vld [vmem:[%s3517_s1 + $0x130] sm:$0xff]   ;;  %v2921_v37 = vld [vmem:[%s3517_s1 + $0x1e8] sm:$0xff]  }
  0x1f   : > { %2725 = vmatpush3.bf16.msra.mxu1 %v2899_v20  ;;  %2704 = vmatprep.subr.bf16.mxu0 %v2900_v21  ;;  %v530_v11 = vrot.slane %v2487_v59, %v3168_v54  ;;  %v2919_v36 = vld [vmem:[%s3517_s1 + $0x1b0] sm:$0xff]   ;;  %v2922_v38 = vld [vmem:[%s3517_s1 + $0x128] sm:$0xff]   ;;  %v2924_v39 = vld [vmem:[%s3517_s1 + $0x160] sm:$0xff]  }
  0x20   : > { %2726 = vmatprep.subr.bf16.mxu1 %v2901_v22  ;;  %v2923_v40 = vld [vmem:[%s3517_s1 + $0x1a8] sm:$0xff]   ;;  %v2925_v41 = vld [vmem:[%s3517_s1 + $0x1e0] sm:$0xff]   ;;  %v2928_v43 = vld [vmem:[%s3517_s1 + $0x158] sm:$0xff]  }
  0x21   : > { %v267_v57 = vld [vmem:[#allocation2 + $0x60] ss:$2 sm:$0xf]  ;;  %v279_v61 = vld [vmem:[#allocation2 + $0x61] ss:$2 sm:$0xf] }
  0x22   : > { %2705 = vmatpush3.bf16.msra.mxu0 %v2902_v23  ;;  %v2510_v1 = vpack.c.bf16 %v279_v61, %v267_v57  ;;  %v291_v5 = vld [vmem:[#allocation2 + $0x62] ss:$2 sm:$0xf]  ;;  %v303_v10 = vld [vmem:[#allocation2 + $0x63] ss:$2 sm:$0xf] }
  0x23   : > { %2727 = vmatpush3.bf16.msra.mxu1 %v2903_v24  ;;  %2706 = vmatprep.subr.bf16.mxu0 %v2904_v25  ;;  %v2511_v15 = vpack.c.bf16 %v303_v10, %v291_v5  ;;  %v2926_v42 = vld [vmem:[%s3517_s1 + $0x120] sm:$0xff]   ;;  %v2929_v45 = vld [vmem:[%s3517_s1 + $0x1d8] sm:$0xff]   ;;  %v2932_v48 = vld [vmem:[%s3517_s1 + $0x150] sm:$0xff]  }
  0x24   : > { %2728 = vmatprep.subr.bf16.mxu1 %v2905_v26  ;;  %v263_v55 = vld [vmem:[#allocation2 + $0x20] ss:$2 sm:$0xf]  ;;  %v275_v58 = vld [vmem:[#allocation2 + $0x21] ss:$2 sm:$0xf]  ;;  %v727_v8 = vrot.slane %v2510_v1, %v3168_v54 }
  0x25   : > { %v265_v56 = vld [vmem:[#allocation2 + $0x40] ss:$2 sm:$0xf]  ;;  %v277_v60 = vld [vmem:[#allocation2 + $0x41] ss:$2 sm:$0xf]  ;;  %v2494_v63 = vpack.c.bf16 %v275_v58, %v263_v55  ;;  %v734_v20 = vrot.slane %v2511_v15, %v3168_v54 }
  0x26   : > { %2707 = vmatpush3.bf16.msra.mxu0 %v2906_v27  ;;  %v2502_v0 = vpack.c.bf16 %v277_v60, %v265_v56  ;;  %v287_v2 = vld [vmem:[#allocation2 + $0x22] ss:$2 sm:$0xf]  ;;  %v299_v6 = vld [vmem:[#allocation2 + $0x23] ss:$2 sm:$0xf] }
  0x27   : > { %2729 = vmatpush3.bf16.msra.mxu1 %v2907_v28  ;;  %2708 = vmatprep.subr.bf16.mxu0 %v2908_v29  ;;  %v289_v3 = vld [vmem:[#allocation2 + $0x42] ss:$2 sm:$0xf]  ;;  %v591_v4 = vrot.slane %v2494_v63, %v3168_v54  ;;  %v301_v9 = vld [vmem:[#allocation2 + $0x43] ss:$2 sm:$0xf]  ;;  %v2495_v12 = vpack.c.bf16 %v299_v6, %v287_v2 }
  0x28   : > { %2730 = vmatprep.subr.bf16.mxu1 %v2909_v30  ;;  %v659_v7 = vrot.slane %v2502_v0, %v3168_v54  ;;  %v2503_v14 = vpack.c.bf16 %v301_v9, %v289_v3  ;;  %v2914_v27 = vld [vmem:[%s3517_s1 + $0x138] sm:$0xff]   ;;  %v2916_v29 = vld [vmem:[%s3517_s1 + $0x170] sm:$0xff]   ;;  %v2927_v44 = vld [vmem:[%s3517_s1 + $0x1a0] sm:$0xff]  }
  0x29   : > { %v2518_v13 = vcombine.low %v523_v62, %v591_v4  ;;  %v598_v17 = vrot.slane %v2495_v12, %v3168_v54  ;;  %v2915_v30 = vld [vmem:[%s3517_s1 + $0x1b8] sm:$0xff]   ;;  %v2933_v49 = vld [vmem:[%s3517_s1 + $0x1d0] sm:$0xff]   ;;  %v2936_v55 = vld [vmem:[%s3517_s1 + $0x148] sm:$0xff]  }
  0x2a   : > { %2709 = vmatpush3.bf16.msra.mxu0 %v2910_v31  ;;  %v2520_v16 = vcombine.low %v659_v7, %v727_v8  ;;  %v666_v19 = vrot.slane %v2503_v14, %v3168_v54  ;;  %v2930_v46 = vld [vmem:[%s3517_s1 + $0x118] sm:$0xff]   ;;  %v308_v52 = vld [vmem:[#allocation2 + $0x10] ss:$2 sm:$0xf]  ;;  %v2937_v59 = vld [vmem:[%s3517_s1 + $0x1c8] sm:$0xff]  }
  0x2b   : > { %2731 = vmatpush3.bf16.msra.mxu1 %v2911_v32  ;;  %2738 = vmatprep.subr.bf16.mxu0 %v2912_v47  ;;  %v1053_v18 = vrot.slane %v2518_v13, %v3168_v54  ;;  %v2519_v22 = vcombine.low %v530_v11, %v598_v17  ;;  %v2931_v47 = vld [vmem:[%s3517_s1 + $0x198] sm:$0xff]   ;;  %v2935_v53 = vld [vmem:[%s3517_s1 + $0x190] sm:$0xff]   ;;  %v2938_v60 = vld [vmem:[%s3517_s1 + $0x108] sm:$0xff]  }
  0x2c   : > { %2760 = vmatprep.subr.bf16.mxu1 %v2913_v50  ;;  %v1067_v21 = vrot.slane %v2520_v16, %v3168_v54  ;;  %v2521_v23 = vcombine.low %v666_v19, %v734_v20  ;;  %v2934_v50 = vld [vmem:[%s3517_s1 + $0x110] sm:$0xff]   ;;  %v2693_v51 = vld [vmem:[%s3151_s6 + $0x18] sm:$0xff]   ;;  %v2940_v0 = vld [vmem:[%s3517_s1 + $0x140] sm:$0xff]   ;;  %s211_s6 = scalar_lea.vmem %s3519_s3, %s3522_s16 }
  0x2d   : > { %v1060_v25 = vrot.slane %v2519_v22, %v3168_v54  ;;  %v2684_v56 = vunpack.c.l.bf16 %v2693_v51  ;;  %v310_v57 = vld [vmem:[#allocation2 + $0x30] ss:$2 sm:$0xf]  ;;  %v2685_v58 = vunpack.c.h.bf16 %v2693_v51  ;;  %v320_v62 = vld [vmem:[#allocation2 + $0x11] ss:$2 sm:$0xf] }
  0x2e   : > { %v1076_v24 = vcombine.high %v1053_v18, %v1067_v21  ;;  %v1075_v26 = vcombine.low %v1053_v18, %v1067_v21  ;;  %v1074_v28 = vrot.slane %v2521_v23, %v3168_v54  ;;  %v312_v61 = vld [vmem:[#allocation2 + $0x50] ss:$2 sm:$0xf]  ;;  %v322_v63 = vld [vmem:[#allocation2 + $0x31] ss:$2 sm:$0xf]  ;;  %v2488_v2 = vpack.c.bf16 %v320_v62, %v308_v52 }
  0x2f   : > { %259 = vst [vmem:[#allocation2 + $0x71] sm:$0xff] %v2684_v56  ;;  %v324_v1 = vld [vmem:[#allocation2 + $0x51] ss:$2 sm:$0xf]  ;;  %v2496_v3 = vpack.c.bf16 %v322_v63, %v310_v57  ;;  %260 = vst [vmem:[#allocation2 + $0x81] sm:$0xff] %v2685_v58  ;;  %v2939_v9 = vld [vmem:[%s3517_s1 + $0x188] sm:$0xff]  }
  0x30   : > { %2003 = vmatprep.mubr.bf16.mxu0 %v1076_v24  ;;  %v1078_v31 = vcombine.high %v1060_v25, %v1074_v28  ;;  %v1077_v32 = vcombine.low %v1060_v25, %v1074_v28  ;;  %v332_v4 = vld [vmem:[#allocation2 + $0x12] ss:$2 sm:$0xf]  ;;  %v344_v7 = vld [vmem:[#allocation2 + $0x13] ss:$2 sm:$0xf]  ;;  %v540_v14 = vrot.slane %v2488_v2, %v3168_v54  ;;  %v2504_v16 = vpack.c.bf16 %v324_v1, %v312_v61 }
  0x31   : > { %2004 = vmatmul.mubr.bf16.vlgmr.msra.gmra.mxu0 %v1075_v26  ;;  %v334_v5 = vld [vmem:[#allocation2 + $0x32] ss:$2 sm:$0xf]  ;;  %v346_v8 = vld [vmem:[#allocation2 + $0x33] ss:$2 sm:$0xf]  ;;  %v2489_v11 = vpack.c.bf16 %v344_v7, %v332_v4  ;;  %v608_v15 = vrot.slane %v2496_v3, %v3168_v54 }
  0x32   : > { %2739 = vmatpush3.bf16.msra.mxu0 %v2914_v27  ;;  %2044 = vmatprep.mubr.bf16.mxu1 %v1078_v31  ;;  %v336_v6 = vld [vmem:[#allocation2 + $0x52] ss:$2 sm:$0xf]  ;;  %v348_v10 = vld [vmem:[#allocation2 + $0x53] ss:$2 sm:$0xf]  ;;  %v2497_v12 = vpack.c.bf16 %v346_v8, %v334_v5  ;;  %v676_v25 = vrot.slane %v2504_v16, %v3168_v54 }
  0x33   : > { %2740 = vmatprep.subr.bf16.mxu0 %v2916_v29  ;;  %2045 = vmatmul.mubr.bf16.vlgmr.msra.gmra.mxu1 %v1077_v32  ;;  %v2941_v13 = vld [vmem:[%s3517_s1 + $0x1c0] sm:$0xff]   ;;  %v547_v18 = vrot.slane %v2489_v11, %v3168_v54  ;;  %v2505_v20 = vpack.c.bf16 %v348_v10, %v336_v6  ;;  %v2944_v22 = vld [vmem:[%s3517_s1 + $0x278] sm:$0xff]   ;;  %v2522_v27 = vcombine.low %v540_v14, %v608_v15  ;;  %v2951_v51 = vld [vmem:[%s3517_s1 + $0x2b0] sm:$0xff]  }
  0x34   : > { %2761 = vmatpush3.bf16.msra.mxu1 %v2915_v30  ;;  %v2942_v17 = vld [vmem:[%s3517_s1 + $0x100] sm:$0xff]   ;;  %v615_v19 = vrot.slane %v2497_v12, %v3168_v54  ;;  %v2952_v52 = vld [vmem:[%s3517_s1 + $0x268] sm:$0xff]   ;;  %v2960_v61 = vld [vmem:[%s3517_s1 + $0x258] sm:$0xff]  }
  0x35   : > { %2762 = vmatprep.subr.bf16.mxu1 %v2917_v33  ;;  %v2943_v21 = vld [vmem:[%s3517_s1 + $0x180] sm:$0xff]   ;;  %v683_v30 = vrot.slane %v2505_v20, %v3168_v54  ;;  %v2945_v33 = vld [vmem:[%s3517_s1 + $0x2f8] sm:$0xff]   ;;  %v2955_v56 = vld [vmem:[%s3517_s1 + $0x2a8] sm:$0xff]  }
  0x36   : > { %2741 = vmatpush3.bf16.msra.mxu0 %v2918_v34  ;;  %v314_v23 = vld [vmem:[#allocation2 + $0x70] ss:$2 sm:$0xf]  ;;  %v326_v24 = vld [vmem:[#allocation2 + $0x71] ss:$2 sm:$0xf]  ;;  %v2523_v32 = vcombine.low %v547_v18, %v615_v19 }
  0x37   : > { %2742 = vmatprep.subr.bf16.mxu0 %v2920_v35  ;;  %v2512_v26 = vpack.c.bf16 %v326_v24, %v314_v23  ;;  %v338_v28 = vld [vmem:[#allocation2 + $0x72] ss:$2 sm:$0xf]  ;;  %v350_v29 = vld [vmem:[#allocation2 + $0x73] ss:$2 sm:$0xf] }
  0x38   : > { %2763 = vmatpush3.bf16.msra.mxu1 %v2919_v36  ;;  %v2513_v31 = vpack.c.bf16 %v350_v29, %v338_v28  ;;  %v2956_v57 = vld [vmem:[%s3517_s1 + $0x260] sm:$0xff]   ;;  %v2961_v62 = vld [vmem:[%s3517_s1 + $0x2d8] sm:$0xff]   ;;  %v2964_v1 = vld [vmem:[%s3517_s1 + $0x250] sm:$0xff]  }
  0x39   : > { %2764 = vmatprep.subr.bf16.mxu1 %v2921_v37  ;;  %v744_v34 = vrot.slane %v2512_v26, %v3168_v54  ;;  %v1089_v37 = vrot.slane %v2522_v27, %v3168_v54  ;;  %v2957_v58 = vld [vmem:[%s3517_s1 + $0x2e0] sm:$0xff]   ;;  %v2962_v63 = vld [vmem:[%s3517_s1 + $0x218] sm:$0xff]   ;;  %v2965_v2 = vld [vmem:[%s3517_s1 + $0x2d0] sm:$0xff]  }
  0x3a   : > { %2743 = vmatpush3.bf16.msra.mxu0 %v2922_v38  ;;  %v751_v35 = vrot.slane %v2513_v31, %v3168_v54  ;;  %v2966_v3 = vld [vmem:[%s3517_s1 + $0x210] sm:$0xff]   ;;  %v2968_v5 = vld [vmem:[%s3517_s1 + $0x248] sm:$0xff]   ;;  %v356_v7 = vld [vmem:[#allocation2 + $0x20] ss:$2 sm:$0xf] }
  0x3b   : > { %2744 = vmatprep.subr.bf16.mxu0 %v2924_v39  ;;  %v2524_v36 = vcombine.low %v676_v25, %v744_v34  ;;  %v1096_v39 = vrot.slane %v2523_v32, %v3168_v54  ;;  %v2967_v4 = vld [vmem:[%s3517_s1 + $0x290] sm:$0xff]   ;;  %v2969_v6 = vld [vmem:[%s3517_s1 + $0x2c8] sm:$0xff]   ;;  %v358_v8 = vld [vmem:[#allocation2 + $0x40] ss:$2 sm:$0xf] }
  0x3c   : > { %2765 = vmatpush3.bf16.msra.mxu1 %v2923_v40  ;;  %v2525_v38 = vcombine.low %v683_v30, %v751_v35  ;;  %v360_v10 = vld [vmem:[#allocation2 + $0x60] ss:$2 sm:$0xf]  ;;  %v2971_v12 = vld [vmem:[%s3517_s1 + $0x288] sm:$0xff]  }
  0x3d   : > { %2766 = vmatprep.subr.bf16.mxu1 %v2925_v41  ;;  %v1103_v40 = vrot.slane %v2524_v36, %v3168_v54  ;;  %v2946_v41 = vld [vmem:[%s3517_s1 + $0x238] sm:$0xff]   ;;  %v362_v11 = vld [vmem:[#allocation2 + $0x80] ss:$2 sm:$0xf] }
  0x3e   : > { %2745 = vmatpush3.bf16.msra.mxu0 %v2926_v42  ;;  %v1110_v42 = vrot.slane %v2525_v38, %v3168_v54  ;;  %v368_v14 = vld [vmem:[#allocation2 + $0x21] ss:$2 sm:$0xf]  ;;  %v380_v23 = vld [vmem:[#allocation2 + $0x22] ss:$2 sm:$0xf] }
  0x3f   : > { %2746 = vmatprep.subr.bf16.mxu0 %v2928_v43  ;;  %v2947_v43 = vld [vmem:[%s3517_s1 + $0x2b8] sm:$0xff]   ;;  %v370_v15 = vld [vmem:[#allocation2 + $0x41] ss:$2 sm:$0xf]  ;;  %v2490_v19 = vpack.c.bf16 %v368_v14, %v356_v7 }
  0x40   : > { %2767 = vmatpush3.bf16.msra.mxu1 %v2927_v44  ;;  %v1112_v44 = vcombine.high %v1089_v37, %v1103_v40  ;;  %v2973_v16 = vld [vmem:[%s3517_s1 + $0x2c0] sm:$0xff]   ;;  %v2498_v20 = vpack.c.bf16 %v370_v15, %v358_v8  ;;  %v2995_v14 = vld [vmem:[%s3517_s1 + $0x398] sm:$0xff]   ;;  %v2997_v15 = vld [vmem:[%s3517_s1 + $0x3d0] sm:$0xff]  }
  0x41   : > { %2768 = vmatprep.subr.bf16.mxu1 %v2929_v45  ;;  %v1111_v45 = vcombine.low %v1089_v37, %v1103_v40  ;;  %v374_v18 = vld [vmem:[#allocation2 + $0x81] ss:$2 sm:$0xf]  ;;  %v382_v24 = vld [vmem:[#allocation2 + $0x42] ss:$2 sm:$0xf]  ;;  %v557_v26 = vrot.slane %v2490_v19, %v3168_v54 }
  0x42   : > { %2747 = vmatpush3.bf16.msra.mxu0 %v2930_v46  ;;  %v2948_v46 = vld [vmem:[%s3517_s1 + $0x270] sm:$0xff]   ;;  %2085 = vmatprep.mubr.bf16.mxu0 %v1112_v44  ;;  %v2974_v25 = vld [vmem:[%s3517_s1 + $0x200] sm:$0xff]   ;;  %v625_v27 = vrot.slane %v2498_v20, %v3168_v54  ;;  %v3001_v19 = vld [vmem:[%s3517_s1 + $0x3c8] sm:$0xff]  }
  0x43   : > { %2748 = vmatprep.subr.bf16.mxu0 %v2932_v48  ;;  %v1113_v48 = vcombine.low %v1096_v39, %v1110_v42  ;;  %v384_v28 = vld [vmem:[#allocation2 + $0x62] ss:$2 sm:$0xf]  ;;  %v394_v34 = vld [vmem:[#allocation2 + $0x43] ss:$2 sm:$0xf] }
  0x44   : > { %2769 = vmatpush3.bf16.msra.mxu1 %v2931_v47  ;;  %v1114_v47 = vcombine.high %v1096_v39, %v1110_v42  ;;  %v386_v29 = vld [vmem:[#allocation2 + $0x82] ss:$2 sm:$0xf]  ;;  %v2526_v35 = vcombine.low %v557_v26, %v625_v27  ;;  %v396_v36 = vld [vmem:[#allocation2 + $0x63] ss:$2 sm:$0xf]  ;;  %v2499_v39 = vpack.c.bf16 %v394_v34, %v382_v24 }
  0x45   : > { %2770 = vmatprep.subr.bf16.mxu1 %v2933_v49  ;;  %v2949_v49 = vld [vmem:[%s3517_s1 + $0x2f0] sm:$0xff]   ;;  %v2975_v30 = vld [vmem:[%s3517_s1 + $0x280] sm:$0xff]   ;;  %v3002_v20 = vld [vmem:[%s3517_s1 + $0x308] sm:$0xff]  }
  0x46   : > { %2749 = vmatpush3.bf16.msra.mxu0 %v2934_v50  ;;  %v2950_v50 = vld [vmem:[%s3517_s1 + $0x230] sm:$0xff]   ;;  %2126 = vmatprep.mubr.bf16.mxu1 %v1114_v47  ;;  %v398_v37 = vld [vmem:[#allocation2 + $0x83] ss:$2 sm:$0xf]  ;;  %v1125_v44 = vrot.slane %v2526_v35, %v3168_v54  ;;  %v2977_v47 = vld [vmem:[%s3517_s1 + $0x3f8] sm:$0xff]  }
  0x47   : > { %2750 = vmatprep.subr.bf16.mxu0 %v2936_v55  ;;  %v2954_v55 = vld [vmem:[%s3517_s1 + $0x228] sm:$0xff]   ;;  %v2515_v42 = vpack.c.bf16 %v398_v37, %v386_v29  ;;  %v2989_v7 = vld [vmem:[%s3517_s1 + $0x3e0] sm:$0xff]   ;;  %v406_v26 = vld [vmem:[#allocation2 + $0x50] ss:$2 sm:$0xf] }
  0x48   : > { %2771 = vmatpush3.bf16.msra.mxu1 %v2935_v53  ;;  %v2953_v53 = vld [vmem:[%s3517_s1 + $0x2e8] sm:$0xff]   ;;  %v2990_v8 = vld [vmem:[%s3517_s1 + $0x320] sm:$0xff]   ;;  %v408_v27 = vld [vmem:[#allocation2 + $0x70] ss:$2 sm:$0xf] }
  0x49   : > { %2772 = vmatprep.subr.bf16.mxu1 %v2937_v59  ;;  %v2958_v59 = vld [vmem:[%s3517_s1 + $0x220] sm:$0xff]  }
  0x4a   : > { %2751 = vmatpush3.bf16.msra.mxu0 %v2938_v60  ;;  %v2959_v60 = vld [vmem:[%s3517_s1 + $0x2a0] sm:$0xff]  }
  0x4b   : > { %2752 = vmatprep.subr.bf16.mxu0 %v2940_v0  ;;  %v2963_v0 = vld [vmem:[%s3517_s1 + $0x298] sm:$0xff]   ;;  %v3006_v24 = vld [vmem:[%s3517_s1 + $0x300] sm:$0xff]  }
  0x4c   : > { %2773 = vmatpush3.bf16.msra.mxu1 %v2939_v9  ;;  %v2970_v9 = vld [vmem:[%s3517_s1 + $0x208] sm:$0xff]   ;;  %v3007_v29 = vld [vmem:[%s3517_s1 + $0x380] sm:$0xff]  }
  0x4d   : > { %2774 = vmatprep.subr.bf16.mxu1 %v2941_v13  ;;  %v2972_v13 = vld [vmem:[%s3517_s1 + $0x240] sm:$0xff]  }
  0x4e   : > { %2753 = vmatpush3.bf16.msra.mxu0 %v2942_v17  ;;  %v372_v17 = vld [vmem:[#allocation2 + $0x61] ss:$2 sm:$0xf] }
  0x4f   : > { %2782 = vmatprep.subr.bf16.mxu0 %v2944_v22  ;;  %v2514_v22 = vpack.c.bf16 %v374_v18, %v362_v11  ;;  %v2993_v11 = vld [vmem:[%s3517_s1 + $0x3d8] sm:$0xff]   ;;  %v2999_v18 = vld [vmem:[%s3517_s1 + $0x390] sm:$0xff]  }
  0x50   : > { %2775 = vmatpush3.bf16.msra.mxu1 %v2943_v21  ;;  %v2506_v21 = vpack.c.bf16 %v372_v17, %v360_v10  ;;  %v2991_v10 = vld [vmem:[%s3517_s1 + $0x3a0] sm:$0xff]   ;;  %v3000_v17 = vld [vmem:[%s3517_s1 + $0x348] sm:$0xff]  }
  0x51   : > { %2804 = vmatprep.subr.bf16.mxu1 %v2945_v33  ;;  %2086 = vmatmul.mubr.bf16.vlgmr.msra.gmra.mxu0 %v1111_v45  ;;  %v761_v32 = vrot.slane %v2514_v22, %v3168_v54  ;;  %v392_v33 = vld [vmem:[#allocation2 + $0x23] ss:$2 sm:$0xf] }
  0x52   : > { %2783 = vmatpush3.bf16.msra.mxu0 %v2946_v41  ;;  %v693_v31 = vrot.slane %v2506_v21, %v3168_v54  ;;  %v2491_v38 = vpack.c.bf16 %v392_v33, %v380_v23  ;;  %v2507_v41 = vpack.c.bf16 %v396_v36, %v384_v28  ;;  %v3004_v21 = vld [vmem:[%s3517_s1 + $0x340] sm:$0xff]   ;;  %v3003_v22 = vld [vmem:[%s3517_s1 + $0x388] sm:$0xff]   ;;  %v410_v28 = vld [vmem:[#allocation2 + $0x90] ss:$2 sm:$0xf] }
  0x53   : > { %2127 = vmatmul.mubr.bf16.vlgmr.msra.gmra.mxu1 %v1113_v48  ;;  %2784 = vmatprep.subr.bf16.mxu0 %v2948_v46  ;;  %v632_v46 = vrot.slane %v2499_v39, %v3168_v54  ;;  %v3005_v23 = vld [vmem:[%s3517_s1 + $0x3c0] sm:$0xff]   ;;  %v422_v33 = vld [vmem:[#allocation2 + $0x91] ss:$2 sm:$0xf] }
  0x54   : > { %2805 = vmatpush3.bf16.msra.mxu1 %v2947_v43  ;;  %v2528_v40 = vcombine.low %v693_v31, %v761_v32  ;;  %v2976_v43 = vld [vmem:[%s3517_s1 + $0x378] sm:$0xff]   ;;  %v564_v45 = vrot.slane %v2491_v38, %v3168_v54  ;;  %v418_v31 = vld [vmem:[#allocation2 + $0x51] ss:$2 sm:$0xf]  ;;  %v2516_v37 = vpack.c.bf16 %v422_v33, %v410_v28 }
  0x55   : > { %2806 = vmatprep.subr.bf16.mxu1 %v2949_v49  ;;  %v700_v49 = vrot.slane %v2507_v41, %v3168_v54  ;;  %v420_v32 = vld [vmem:[#allocation2 + $0x71] ss:$2 sm:$0xf]  ;;  %v2500_v35 = vpack.c.bf16 %v418_v31, %v406_v26  ;;  %v428_v38 = vld [vmem:[#allocation2 + $0x32] ss:$2 sm:$0xf] }
  0x56   : > { %2785 = vmatpush3.bf16.msra.mxu0 %v2950_v50  ;;  %v1139_v48 = vrot.slane %v2528_v40, %v3168_v54  ;;  %v768_v50 = vrot.slane %v2515_v42, %v3168_v54  ;;  %v2508_v36 = vpack.c.bf16 %v420_v32, %v408_v27  ;;  %v430_v39 = vld [vmem:[#allocation2 + $0x52] ss:$2 sm:$0xf] }
  0x57   : > { %2786 = vmatprep.subr.bf16.mxu0 %v2952_v52  ;;  %v642_v41 = vrot.slane %v2500_v35, %v3168_v54  ;;  %v432_v42 = vld [vmem:[#allocation2 + $0x72] ss:$2 sm:$0xf] }
  0x58   : > { %2807 = vmatpush3.bf16.msra.mxu1 %v2951_v51  ;;  %v2527_v51 = vcombine.low %v564_v45, %v632_v46  ;;  %v1148_v52 = vcombine.high %v1125_v44, %v1139_v48  ;;  %v778_v45 = vrot.slane %v2516_v37, %v3168_v54  ;;  %v440_v46 = vld [vmem:[#allocation2 + $0x33] ss:$2 sm:$0xf] }
  0x59   : > { %2808 = vmatprep.subr.bf16.mxu1 %v2953_v53  ;;  %v2529_v53 = vcombine.low %v700_v49, %v768_v50  ;;  %v444_v49 = vld [vmem:[#allocation2 + $0x73] ss:$2 sm:$0xf] }
  0x5a   : > { %2787 = vmatpush3.bf16.msra.mxu0 %v2954_v55  ;;  %v1147_v55 = vcombine.low %v1125_v44, %v1139_v48  ;;  %2167 = vmatprep.mubr.bf16.mxu0 %v1148_v52  ;;  %v710_v44 = vrot.slane %v2508_v36, %v3168_v54  ;;  %v446_v50 = vld [vmem:[#allocation2 + $0x93] ss:$2 sm:$0xf] }
  0x5b   : > { %2788 = vmatprep.subr.bf16.mxu0 %v2956_v57  ;;  %v1132_v57 = vrot.slane %v2527_v51, %v3168_v54  ;;  %v2493_v51 = vpack.c.bf16 %v440_v46, %v428_v38 }
  0x5c   : > { %2809 = vmatpush3.bf16.msra.mxu1 %v2955_v56  ;;  %v2978_v56 = vld [vmem:[%s3517_s1 + $0x338] sm:$0xff]  }
  0x5d   : > { %2810 = vmatprep.subr.bf16.mxu1 %v2957_v58  ;;  %v2980_v58 = vld [vmem:[%s3517_s1 + $0x370] sm:$0xff]  }
  0x5e   : > { %2789 = vmatpush3.bf16.msra.mxu0 %v2958_v59  ;;  %v1146_v59 = vrot.slane %v2529_v53, %v3168_v54  ;;  %v2532_v53 = vcombine.low %v710_v44, %v778_v45 }
  0x5f   : > { %2790 = vmatprep.subr.bf16.mxu0 %v2960_v61  ;;  %v2981_v61 = vld [vmem:[%s3517_s1 + $0x3f0] sm:$0xff]  }
  0x60   : > { %2811 = vmatpush3.bf16.msra.mxu1 %v2959_v60  ;;  %v2979_v60 = vld [vmem:[%s3517_s1 + $0x3b8] sm:$0xff]  }
  0x61   : > { %2812 = vmatprep.subr.bf16.mxu1 %v2961_v62  ;;  %v1150_v62 = vcombine.high %v1132_v57, %v1146_v59 }
  0x62   : > { %2791 = vmatpush3.bf16.msra.mxu0 %v2962_v63  ;;  %v1149_v63 = vcombine.low %v1132_v57, %v1146_v59 }
  0x63   : > { %2792 = vmatprep.subr.bf16.mxu0 %v2964_v1  ;;  %v2984_v1 = vld [vmem:[%s3517_s1 + $0x368] sm:$0xff]   ;;  %2208 = vmatprep.mubr.bf16.mxu1 %v1150_v62 }
  0x64   : > { %2813 = vmatpush3.bf16.msra.mxu1 %v2963_v0  ;;  %v2982_v0 = vld [vmem:[%s3517_s1 + $0x330] sm:$0xff]  }
  0x65   : > { %2814 = vmatprep.subr.bf16.mxu1 %v2965_v2  ;;  %v2983_v2 = vld [vmem:[%s3517_s1 + $0x3b0] sm:$0xff]  }
  0x66   : > { %2793 = vmatpush3.bf16.msra.mxu0 %v2966_v3  ;;  %v2985_v3 = vld [vmem:[%s3517_s1 + $0x3e8] sm:$0xff]  }
  0x67   : > { %2794 = vmatprep.subr.bf16.mxu0 %v2968_v5  ;;  %v2988_v5 = vld [vmem:[%s3517_s1 + $0x360] sm:$0xff]  }
  0x68   : > { %2815 = vmatpush3.bf16.msra.mxu1 %v2967_v4  ;;  %v2986_v4 = vld [vmem:[%s3517_s1 + $0x328] sm:$0xff]  }
  0x69   : > { %2816 = vmatprep.subr.bf16.mxu1 %v2969_v6  ;;  %v2987_v6 = vld [vmem:[%s3517_s1 + $0x3a8] sm:$0xff]  }
  0x6a   : > { %2795 = vmatpush3.bf16.msra.mxu0 %v2970_v9  ;;  %v2992_v9 = vld [vmem:[%s3517_s1 + $0x358] sm:$0xff]  }
  0x6b   : > { %2796 = vmatprep.subr.bf16.mxu0 %v2972_v13  ;;  %v2996_v13 = vld [vmem:[%s3517_s1 + $0x350] sm:$0xff]  }
  0x6c   : > { %2817 = vmatpush3.bf16.msra.mxu1 %v2971_v12  ;;  %v2994_v12 = vld [vmem:[%s3517_s1 + $0x318] sm:$0xff]  }
  0x6d   : > { %2818 = vmatprep.subr.bf16.mxu1 %v2973_v16  ;;  %v2998_v16 = vld [vmem:[%s3517_s1 + $0x310] sm:$0xff]  }
  0x6e   : > { %2797 = vmatpush3.bf16.msra.mxu0 %v2974_v25  ;;  %v404_v25 = vld [vmem:[#allocation2 + $0x30] ss:$2 sm:$0xf] }
  0x6f   : > { %2826 = vmatprep.subr.bf16.mxu0 %v2976_v43  ;;  %v434_v43 = vld [vmem:[#allocation2 + $0x92] ss:$2 sm:$0xf] }
  0x70   : > { %2819 = vmatpush3.bf16.msra.mxu1 %v2975_v30  ;;  %v416_v30 = vld [vmem:[#allocation2 + $0x31] ss:$2 sm:$0xf] }
  0x71   : > { %2848 = vmatprep.subr.bf16.mxu1 %v2977_v47  ;;  %2168 = vmatmul.mubr.bf16.vlgmr.msra.gmra.mxu0 %v1147_v55  ;;  %v2492_v34 = vpack.c.bf16 %v416_v30, %v404_v25  ;;  %v442_v47 = vld [vmem:[#allocation2 + $0x53] ss:$2 sm:$0xf]  ;;  %v2509_v55 = vpack.c.bf16 %v444_v49, %v432_v42 }
  0x72   : > { %2827 = vmatpush3.bf16.msra.mxu0 %v2978_v56  ;;  %v2501_v52 = vpack.c.bf16 %v442_v47, %v430_v39  ;;  %v2517_v56 = vpack.c.bf16 %v446_v50, %v434_v43 }
  0x73   : > { %2828 = vmatprep.subr.bf16.mxu0 %v2980_v58  ;;  %2209 = vmatmul.mubr.bf16.vlgmr.msra.gmra.mxu1 %v1149_v63  ;;  %v574_v40 = vrot.slane %v2492_v34, %v3168_v54  ;;  %v581_v58 = vrot.slane %v2493_v51, %v3168_v54 }
  0x74   : > { %2849 = vmatpush3.bf16.msra.mxu1 %v2979_v60  ;;  %v649_v59 = vrot.slane %v2501_v52, %v3168_v54  ;;  %v1175_v60 = vrot.slane %v2532_v53, %v3168_v54  ;;  %v785_v62 = vrot.slane %v2517_v56, %v3168_v54 }
  0x75   : > { %2850 = vmatprep.subr.bf16.mxu1 %v2981_v61  ;;  %v2530_v48 = vcombine.low %v574_v40, %v642_v41  ;;  %v717_v61 = vrot.slane %v2509_v55, %v3168_v54 }
  0x76   : > { %2829 = vmatpush3.bf16.msra.mxu0 %v2982_v0  ;;  %v2531_v63 = vcombine.low %v581_v58, %v649_v59 }
  0x77   : > { %2830 = vmatprep.subr.bf16.mxu0 %v2984_v1  ;;  %v1161_v57 = vrot.slane %v2530_v48, %v3168_v54  ;;  %v2533_v1 = vcombine.low %v717_v61, %v785_v62 }
  0x78   : > { %2851 = vmatpush3.bf16.msra.mxu1 %v2983_v2 }
  0x79   : > { %2852 = vmatprep.subr.bf16.mxu1 %v2985_v3  ;;  %v1184_v0 = vcombine.high %v1161_v57, %v1175_v60  ;;  %v1183_v2 = vcombine.low %v1161_v57, %v1175_v60  ;;  %v1168_v3 = vrot.slane %v2531_v63, %v3168_v54 }
  0x7a   : > { %2831 = vmatpush3.bf16.msra.mxu0 %v2986_v4  ;;  %v1182_v4 = vrot.slane %v2533_v1, %v3168_v54 }
  0x7b   : > { %2832 = vmatprep.subr.bf16.mxu0 %v2988_v5  ;;  %2249 = vmatprep.mubr.bf16.mxu0 %v1184_v0 }
  0x7c   : > { %2853 = vmatpush3.bf16.msra.mxu1 %v2987_v6  ;;  %v1186_v5 = vcombine.high %v1168_v3, %v1182_v4  ;;  %v1185_v6 = vcombine.low %v1168_v3, %v1182_v4 }
  0x7d   : > { %2854 = vmatprep.subr.bf16.mxu1 %v2989_v7 }
  0x7e   : > { %2833 = vmatpush3.bf16.msra.mxu0 %v2990_v8  ;;  %2290 = vmatprep.mubr.bf16.mxu1 %v1186_v5 }
  0x7f   : > { %2834 = vmatprep.subr.bf16.mxu0 %v2992_v9 }
  0x80   : > { %2855 = vmatpush3.bf16.msra.mxu1 %v2991_v10 }
  0x81   : > { %2856 = vmatprep.subr.bf16.mxu1 %v2993_v11 }
  0x82   : > { %2835 = vmatpush3.bf16.msra.mxu0 %v2994_v12 }
  0x83   : > { %2836 = vmatprep.subr.bf16.mxu0 %v2996_v13 }
  0x84   : > { %2857 = vmatpush3.bf16.msra.mxu1 %v2995_v14 }
  0x85   : > { %2858 = vmatprep.subr.bf16.mxu1 %v2997_v15 }
  0x86   : > { %2837 = vmatpush3.bf16.msra.mxu0 %v2998_v16 }
  0x87   : > { %2838 = vmatprep.subr.bf16.mxu0 %v3000_v17 }
  0x88   : > { %2859 = vmatpush3.bf16.msra.mxu1 %v2999_v18 }
  0x89   : > { %2860 = vmatprep.subr.bf16.mxu1 %v3001_v19 }
  0x8a   : > { %2839 = vmatpush3.bf16.msra.mxu0 %v3002_v20 }
  0x8b   : > { %2840 = vmatprep.subr.bf16.mxu0 %v3004_v21 }
  0x8c   : > { %2861 = vmatpush3.bf16.msra.mxu1 %v3003_v22 }
  0x8d   : > { %2862 = vmatprep.subr.bf16.mxu1 %v3005_v23 }
  0x8e   : > { %2841 = vmatpush3.bf16.msra.mxu0 %v3006_v24 }
  0x90   : > { %2863 = vmatpush3.bf16.msra.mxu1 %v3007_v29 }
  0x91   : > { %2250 = vmatmul.mubr.bf16.vlgmr.msra.gmra.mxu0 %v1183_v2 }
  0x93   : > { %2291 = vmatmul.mubr.bf16.vlgmr.msra.gmra.mxu1 %v1185_v6 }
  0xf1   : > { %v2710_v7 = vpop.f32.mrf.mxu0 }
  0xf3   : > { %v2711_v8 = vpop.f32.mrf.mxu0  ;;  %v2732_v9 = vpop.f32.mrf.mxu1 }
  0xf4   : > { %v2712_v24 = vadd.f32 %v2711_v8, %v2710_v7 }
  0xf5   : > { %v2713_v10 = vpop.f32.mrf.mxu0  ;;  %v2733_v11 = vpop.f32.mrf.mxu1 }
  0xf6   : > { %v2734_v25 = vadd.f32 %v2733_v11, %v2732_v9 }
  0xf7   : > { %v2714_v12 = vpop.f32.mrf.mxu0  ;;  %v2735_v13 = vpop.f32.mrf.mxu1 }
  0xf8   : > { %v2715_v27 = vadd.f32 %v2714_v12, %v2713_v10  ;;  %v2047_v31 = vadd.f32 %v2734_v25, %v2712_v24 }
  0xf9   : > { %v2736_v15 = vpop.f32.mrf.mxu1 }
  0xfa   : > { %v2737_v28 = vadd.f32 %v2736_v15, %v2735_v13 }
  0xfc   : > { %v2050_v34 = vadd.f32 %v2737_v28, %v2715_v27 }
 0x111   : > { %v2754_v14 = vpop.f32.mrf.mxu0 }
 0x113   : > { %v2755_v16 = vpop.f32.mrf.mxu0  ;;  %v2776_v17 = vpop.f32.mrf.mxu1 }
 0x114   : > { %v2756_v29 = vadd.f32 %v2755_v16, %v2754_v14 }
 0x115   : > { %v2757_v18 = vpop.f32.mrf.mxu0  ;;  %v2777_v19 = vpop.f32.mrf.mxu1 }
 0x116   : > { %v2088_v35 = vadd.f32 %v2756_v29, %v2047_v31  ;;  %v2778_v36 = vadd.f32 %v2777_v19, %v2776_v17 }
 0x117   : > { %v2758_v20 = vpop.f32.mrf.mxu0  ;;  %v2779_v54 = vpop.f32.mrf.mxu1 }
 0x118   : > { %v2759_v32 = vadd.f32 %v2758_v20, %v2757_v18  ;;  %v2129_v41 = vadd.f32 %v2778_v36, %v2088_v35 }
 0x119   : > { %v2780_v22 = vpop.f32.mrf.mxu1 }
 0x11a   : > { %v2091_v38 = vadd.f32 %v2759_v32, %v2050_v34  ;;  %v2781_v42 = vadd.f32 %v2780_v22, %v2779_v54 }
 0x11c   : > { %v2132_v45 = vadd.f32 %v2781_v42, %v2091_v38 }
 0x131   : > { %v2798_v21 = vpop.f32.mrf.mxu0 }
 0x133   : > { %v2799_v23 = vpop.f32.mrf.mxu0  ;;  %v2820_v26 = vpop.f32.mrf.mxu1 }
 0x134   : > { %v2800_v39 = vadd.f32 %v2799_v23, %v2798_v21 }
 0x135   : > { %v2801_v30 = vpop.f32.mrf.mxu0  ;;  %v2821_v33 = vpop.f32.mrf.mxu1 }
 0x136   : > { %v2170_v46 = vadd.f32 %v2800_v39, %v2129_v41  ;;  %v2822_v47 = vadd.f32 %v2821_v33, %v2820_v26 }
 0x137   : > { %v2802_v37 = vpop.f32.mrf.mxu0  ;;  %v2823_v40 = vpop.f32.mrf.mxu1 }
 0x138   : > { %v2803_v43 = vadd.f32 %v2802_v37, %v2801_v30  ;;  %v2211_v55 = vadd.f32 %v2822_v47, %v2170_v46 }
 0x139   : > { %v2824_v48 = vpop.f32.mrf.mxu1 }
 0x13a   : > { %v2173_v50 = vadd.f32 %v2803_v43, %v2132_v45  ;;  %v2825_v56 = vadd.f32 %v2824_v48, %v2823_v40 }
 0x13c   : > { %v2214_v59 = vadd.f32 %v2825_v56, %v2173_v50 }
 0x151   : > { %v2842_v44 = vpop.f32.mrf.mxu0 }
 0x153   : > { %v2843_v49 = vpop.f32.mrf.mxu0  ;;  %v2864_v52 = vpop.f32.mrf.mxu1 }
 0x154   : > { %v2844_v51 = vadd.f32 %v2843_v49, %v2842_v44 }
 0x155   : > { %v2845_v53 = vpop.f32.mrf.mxu0  ;;  %v2865_v57 = vpop.f32.mrf.mxu1 }
 0x156   : > { %v2252_v60 = vadd.f32 %v2844_v51, %v2211_v55  ;;  %v2866_v63 = vadd.f32 %v2865_v57, %v2864_v52 }
 0x157   : > { %v2846_v58 = vpop.f32.mrf.mxu0  ;;  %v2867_v62 = vpop.f32.mrf.mxu1 }
 0x158   : > { %v2847_v61 = vadd.f32 %v2846_v58, %v2845_v53  ;;  %v2293_v2 = vadd.f32 %v2866_v63, %v2252_v60 }
 0x159   : > { %v2868_v1 = vpop.f32.mrf.mxu1 }
 0x15a   : > { %v2255_v0 = vadd.f32 %v2847_v61, %v2214_v59  ;;  %v2869_v3 = vadd.f32 %v2868_v1, %v2867_v62  ;;  %v2317_v5 = vmul.f32 %v2293_v2, %v2293_v2 }
 0x15c   : > { %v2296_v4 = vadd.f32 %v2869_v3, %v2255_v0 }
 0x15e   : > { %v2689_v6 = vpack.c.bf16 %v2296_v4, %v2293_v2  ;;  %v2309_v7 = vadd.f32 %v2296_v4, %v2293_v2  ;;  %v2318_v8 = vmul.f32 %v2296_v4, %v2296_v4 }
 0x160   : > { %2690 = vst [vmem:[%s208_s18] sm:$0xff] %v2689_v6   ;;  %v2310_v9 = vrot.slane %v2309_v7, 4  ;;  %v2319_v10 = vadd.f32 %v2318_v8, %v2317_v5 }
 0x162   : > { %v2311_v11 = vadd.f32 %v2310_v9, %v2309_v7  ;;  %v2320_v12 = vrot.slane %v2319_v10, 4 }
 0x164   : > { %v2312_v13 = vrot.slane %v2311_v11, 2  ;;  %v2321_v14 = vadd.f32 %v2320_v12, %v2319_v10 }
 0x166   : > { %v2313_v15 = vadd.f32 %v2312_v13, %v2311_v11  ;;  %v2322_v16 = vrot.slane %v2321_v14, 2 }
 0x168   : > { %v2314_v17 = vrot.slane %v2313_v15, 1  ;;  %v2323_v18 = vadd.f32 %v2322_v16, %v2321_v14 }
 0x16a   : > { %v2315_v19 = vadd.f32 %v2314_v17, %v2313_v15  ;;  %v2324_v20 = vrot.slane %v2323_v18, 1 }
 0x16c   : > { %2316 = vst [vmem:[%s211_s6] sm:$0x1] %v2315_v19  ;;  %v2325_v54 = vadd.f32 %v2324_v20, %v2323_v18 }
 0x16e   : > { %2326 = vst [vmem:[%s214_s23] sm:$0x1] %v2325_v54 }
 0x16f PF: > { %s15_s15 = sadd.s32 1, %s3014_s15  }
 0x170   : > { %p12_p4 = scmp.ge.s32.totalorder %s15_s15, 4  }
 0x172   :  { %14 = sbr.rel (!%p12_p4) target bundleno = 1 (0x1), region = 145 }

// kernel: _lambda_.11
= control target key start
LH: loop header
LB: loop body
LE: loop exit
PB: predicated region body
PF: predicated region fallthrough
CT: control target
= control target key end

     0   :  { %s2192_s18 = smov 0   ;;  %s2628_s0 = inlined_call_operand.vmem [shape: bf16[2,4,4,128], index: 0, kind: input, shape index: {}]   ;;  %s2629_s1 = inlined_call_operand.vmem [shape: bf16[2048,128], index: 1, kind: input, shape index: {}]   ;;  %s2630_s2 = inlined_call_operand.vmem [shape: f32[1,1,128], index: 2, kind: input, shape index: {}]   ;;  %s2631_s3 = inlined_call_operand.vmem [shape: f32[1,1,128], index: 3, kind: input, shape index: {}]   ;;  %s2632_s4 = inlined_call_operand.vmem [shape: f32[1,128], index: 4, kind: input, shape index: {}]   ;;  %s2633_s5 = inlined_call_operand.vmem [shape: bf16[2,1,128], index: 5, kind: output, shape index: {}]  }
   0x1 LB: > { %s1702_s19 = sadd.s32 4294967295, %s2160_s18   ;;  %p1706_p0 = scmp.ge.s32.totalorder %s2160_s18, 1  ;;  %s2160_s18 = sphi %s2192_s18, %s15_s18  }
   0x2   : > { %p187_p1 = scmp.lt.s32.totalorder %s2160_s18, 3 }
   0x4   : > { %p188_p2 = pnand %p1706_p0, %p187_p1 }
   0x5   : > { %p213_p3 = scmp.lt.s32.totalorder (!%p188_p2), %s1702_s19, 1 }
   0x6   : > { %191 = sbr.rel (%p188_p2) target bundleno = 346 (0x15a), region = 40 }
   0xb   : > { %v2026_v0 = vld [vmem:[%s2629_s1 + $0x78] sm:$0xff]   ;;  %v2030_v4 = vld [vmem:[%s2629_s1 + $0x70] sm:$0xff]   ;;  %v2034_v8 = vld [vmem:[%s2629_s1 + $0x68] sm:$0xff]   ;;  %s2635_s19 = smov (!%p213_p3, %s1702_s19), 1  ;;  %vm1649_vm4 = vcmask 1040384  }
   0xc   : > { %v2027_v1 = vld [vmem:[%s2629_s1 + $0xf8] sm:$0xff]   ;;  %1842 = vmatprep.subr.bf16.mxu0 %v2026_v0  ;;  %v2031_v5 = vld [vmem:[%s2629_s1 + $0xf0] sm:$0xff]   ;;  %v2035_v9 = vld [vmem:[%s2629_s1 + $0xe8] sm:$0xff]   ;;  %s1841_s28 = sshll.u32 %s2635_s19, 3  ;;  %s220_s20 = scalar_lea.vmem %s2633_s5, %s2635_s19  ;;  %vm1650_vm5 = vsmask.f32 256 }
   0xd   : > { %v2028_v2 = vld [vmem:[%s2629_s1 + $0x38] sm:$0xff]   ;;  %1864 = vmatprep.subr.bf16.mxu1 %v2027_v1  ;;  %v2032_v6 = vld [vmem:[%s2629_s1 + $0x30] sm:$0xff]   ;;  %v2036_v10 = vld [vmem:[%s2629_s1 + $0x28] sm:$0xff]   ;;  %s2300_s12 = scalar_lea.vmem %s2628_s0, %s1841_s28 }
   0xe   : > { %v2029_v3 = vld [vmem:[%s2629_s1 + $0xb8] sm:$0xff]   ;;  %1843 = vmatpush3.bf16.msra.mxu0 %v2028_v2  ;;  %v2033_v7 = vld [vmem:[%s2629_s1 + $0xb0] sm:$0xff]   ;;  %v2037_v11 = vld [vmem:[%s2629_s1 + $0xa8] sm:$0xff]  }
   0xf   : > { %1865 = vmatpush3.bf16.msra.mxu1 %v2029_v3  ;;  %1844 = vmatprep.subr.bf16.mxu0 %v2030_v4  ;;  %v2038_v12 = vld [vmem:[%s2629_s1 + $0x60] sm:$0xff]   ;;  %v2042_v16 = vld [vmem:[%s2629_s1 + $0x58] sm:$0xff]   ;;  %v2046_v20 = vld [vmem:[%s2629_s1 + $0x50] sm:$0xff]  }
  0x10   : > { %1866 = vmatprep.subr.bf16.mxu1 %v2031_v5  ;;  %v2039_v13 = vld [vmem:[%s2629_s1 + $0xe0] sm:$0xff]   ;;  %v2043_v17 = vld [vmem:[%s2629_s1 + $0xd8] sm:$0xff]   ;;  %v2047_v21 = vld [vmem:[%s2629_s1 + $0xd0] sm:$0xff]  }
  0x11   : > { %v2040_v14 = vld [vmem:[%s2629_s1 + $0x20] sm:$0xff]   ;;  %v2044_v18 = vld [vmem:[%s2629_s1 + $0x18] sm:$0xff]   ;;  %v2048_v22 = vld [vmem:[%s2629_s1 + $0x10] sm:$0xff]  }
  0x12   : > { %1845 = vmatpush3.bf16.msra.mxu0 %v2032_v6  ;;  %v2041_v15 = vld [vmem:[%s2629_s1 + $0xa0] sm:$0xff]   ;;  %v2045_v19 = vld [vmem:[%s2629_s1 + $0x98] sm:$0xff]   ;;  %v2049_v23 = vld [vmem:[%s2629_s1 + $0x90] sm:$0xff]  }
  0x13   : > { %1867 = vmatpush3.bf16.msra.mxu1 %v2033_v7  ;;  %1846 = vmatprep.subr.bf16.mxu0 %v2034_v8  ;;  %v2050_v24 = vld [vmem:[%s2629_s1 + $0x48] sm:$0xff]   ;;  %v2054_v28 = vld [vmem:[%s2629_s1 + $0x40] sm:$0xff]   ;;  %v2058_v36 = vld [vmem:[%s2629_s1 + $0x178] sm:$0xff]  }
  0x14   : > { %1868 = vmatprep.subr.bf16.mxu1 %v2035_v9  ;;  %v2051_v25 = vld [vmem:[%s2629_s1 + $0xc8] sm:$0xff]   ;;  %v2055_v29 = vld [vmem:[%s2629_s1 + $0xc0] sm:$0xff]   ;;  %v2059_v37 = vld [vmem:[%s2629_s1 + $0x1f8] sm:$0xff]  }
  0x15   : > { %v2052_v26 = vld [vmem:[%s2629_s1 + $0x8] sm:$0xff]   ;;  %v2056_v30 = vld [vmem:[%s2629_s1] sm:$0xff]   ;;  %v2060_v42 = vld [vmem:[%s2629_s1 + $0x138] sm:$0xff]  }
  0x16   : > { %1847 = vmatpush3.bf16.msra.mxu0 %v2036_v10  ;;  %v2053_v27 = vld [vmem:[%s2629_s1 + $0x88] sm:$0xff]   ;;  %v2057_v31 = vld [vmem:[%s2629_s1 + $0x80] sm:$0xff]   ;;  %v2061_v43 = vld [vmem:[%s2629_s1 + $0x1b8] sm:$0xff]  }
  0x17   : > { %1869 = vmatpush3.bf16.msra.mxu1 %v2037_v11  ;;  %1848 = vmatprep.subr.bf16.mxu0 %v2038_v12  ;;  %v222_v32 = vld [vmem:[%s2300_s12] sm:$0x3]  ;;  %v2062_v51 = vld [vmem:[%s2629_s1 + $0x170] sm:$0xff]   ;;  %v2066_v56 = vld [vmem:[%s2629_s1 + $0x168] sm:$0xff]  }
  0x18   : > { %1870 = vmatprep.subr.bf16.mxu1 %v2039_v13  ;;  %v2312_v33 = vld [vmem:[%s2630_s2] ss:$0 sm:$0xff]  ;;  %v226_v35 = vunpack.c.l.bf16 %v222_v32  ;;  %v2063_v53 = vld [vmem:[%s2629_s1 + $0x1f0] sm:$0xff]   ;;  %v2067_v57 = vld [vmem:[%s2629_s1 + $0x1e8] sm:$0xff]  }
  0x19   : > { %v2317_v34 = vld [vmem:[%s2631_s3] ss:$0 sm:$0xff]  ;;  %v2064_v54 = vld [vmem:[%s2629_s1 + $0x130] sm:$0xff]   ;;  %v2068_v58 = vld [vmem:[%s2629_s1 + $0x128] sm:$0xff]  }
  0x1a   : > { %1849 = vmatpush3.bf16.msra.mxu0 %v2040_v14  ;;  %v237_v38 = vmul.f32 %v2312_v33, %v226_v35  ;;  %v2065_v55 = vld [vmem:[%s2629_s1 + $0x1b0] sm:$0xff]   ;;  %v2069_v59 = vld [vmem:[%s2629_s1 + $0x1a8] sm:$0xff]   ;;  %v2070_v60 = vld [vmem:[%s2629_s1 + $0x160] sm:$0xff]  }
  0x1b   : > { %1871 = vmatpush3.bf16.msra.mxu1 %v2041_v15  ;;  %1850 = vmatprep.subr.bf16.mxu0 %v2042_v16  ;;  %v2071_v61 = vld [vmem:[%s2629_s1 + $0x1e0] sm:$0xff]   ;;  %v2074_v0 = vld [vmem:[%s2629_s1 + $0x158] sm:$0xff]   ;;  %v2078_v4 = vld [vmem:[%s2629_s1 + $0x150] sm:$0xff]  }
  0x1c   : > { %1872 = vmatprep.subr.bf16.mxu1 %v2043_v17  ;;  %v248_v39 = vadd.f32 %v2317_v34, %v237_v38  ;;  %v2072_v62 = vld [vmem:[%s2629_s1 + $0x120] sm:$0xff]   ;;  %v2075_v1 = vld [vmem:[%s2629_s1 + $0x1d8] sm:$0xff]   ;;  %v2079_v6 = vld [vmem:[%s2629_s1 + $0x1d0] sm:$0xff]  }
  0x1d   : > { %v2073_v63 = vld [vmem:[%s2629_s1 + $0x1a0] sm:$0xff]   ;;  %v2076_v2 = vld [vmem:[%s2629_s1 + $0x118] sm:$0xff]   ;;  %v2080_v8 = vld [vmem:[%s2629_s1 + $0x110] sm:$0xff]  }
  0x1e   : > { %1851 = vmatpush3.bf16.msra.mxu0 %v2044_v18  ;;  %vm252_vm0 = vcmp.ge.f32.partialorder %v248_v39, 0.0  ;;  %v256_v40 = vmul.f32 0.2, %v248_v39  ;;  %v2077_v3 = vld [vmem:[%s2629_s1 + $0x198] sm:$0xff]   ;;  %v223_v5 = vld [vmem:[%s2300_s12 + $0x2] sm:$0x3]  ;;  %vm1651_vm6 = vmand %vm1649_vm4, %vm1650_vm5 }
  0x1f   : > { %1873 = vmatpush3.bf16.msra.mxu1 %v2045_v19  ;;  %1852 = vmatprep.subr.bf16.mxu0 %v2046_v20  ;;  %v227_v7 = vunpack.c.l.bf16 %v223_v5  ;;  %v2081_v9 = vld [vmem:[%s2629_s1 + $0x190] sm:$0xff]   ;;  %v2082_v11 = vld [vmem:[%s2629_s1 + $0x148] sm:$0xff]   ;;  %v2086_v16 = vld [vmem:[%s2629_s1 + $0x140] sm:$0xff]  }
  0x20   : > { %1874 = vmatprep.subr.bf16.mxu1 %v2047_v21  ;;  %v260_v41 = vsel %vm252_vm0, %v248_v39, %v256_v40  ;;  %v2083_v12 = vld [vmem:[%s2629_s1 + $0x1c8] sm:$0xff]   ;;  %v2087_v18 = vld [vmem:[%s2629_s1 + $0x1c0] sm:$0xff]   ;;  %v2094_v35 = vld [vmem:[%s2629_s1 + $0x270] sm:$0xff]  }
  0x21   : > { %264 = vst [vmem:[#allocation2] sm:$0xf] %v260_v41  ;;  %v238_v10 = vmul.f32 %v2312_v33, %v227_v7  ;;  %v2084_v14 = vld [vmem:[%s2629_s1 + $0x108] sm:$0xff]   ;;  %v2088_v20 = vld [vmem:[%s2629_s1 + $0x100] sm:$0xff]   ;;  %v2096_v38 = vld [vmem:[%s2629_s1 + $0x230] sm:$0xff]  }
  0x22   : > { %1853 = vmatpush3.bf16.msra.mxu0 %v2048_v22  ;;  %v2085_v15 = vld [vmem:[%s2629_s1 + $0x188] sm:$0xff]   ;;  %v2089_v21 = vld [vmem:[%s2629_s1 + $0x180] sm:$0xff]   ;;  %v2090_v22 = vld [vmem:[%s2629_s1 + $0x278] sm:$0xff]  }
  0x23   : > { %1875 = vmatpush3.bf16.msra.mxu1 %v2049_v23  ;;  %1854 = vmatprep.subr.bf16.mxu0 %v2050_v24  ;;  %v249_v13 = vadd.f32 %v2317_v34, %v238_v10  ;;  %v2091_v23 = vld [vmem:[%s2629_s1 + $0x2f8] sm:$0xff]   ;;  %v2097_v39 = vld [vmem:[%s2629_s1 + $0x2b0] sm:$0xff]   ;;  %v2098_v40 = vld [vmem:[%s2629_s1 + $0x268] sm:$0xff]  }
  0x24   : > { %1876 = vmatprep.subr.bf16.mxu1 %v2051_v25  ;;  %v2092_v24 = vld [vmem:[%s2629_s1 + $0x238] sm:$0xff]   ;;  %v2099_v41 = vld [vmem:[%s2629_s1 + $0x2e8] sm:$0xff]   ;;  %v2121_v5 = vld [vmem:[%s2629_s1 + $0x280] sm:$0xff]  }
  0x25   : > { %vm253_vm1 = vcmp.ge.f32.partialorder %v249_v13, 0.0  ;;  %v257_v17 = vmul.f32 0.2, %v249_v13  ;;  %v2093_v25 = vld [vmem:[%s2629_s1 + $0x2b8] sm:$0xff]  }
  0x26   : > { %1855 = vmatpush3.bf16.msra.mxu0 %v2052_v26  ;;  %v2123_v7 = vld [vmem:[%s2629_s1 + $0x3f8] sm:$0xff]  }
  0x27   : > { %1877 = vmatpush3.bf16.msra.mxu1 %v2053_v27  ;;  %1856 = vmatprep.subr.bf16.mxu0 %v2054_v28  ;;  %v261_v19 = vsel %vm253_vm1, %v249_v13, %v257_v17  ;;  %v2126_v17 = vld [vmem:[%s2629_s1 + $0x370] sm:$0xff]  }
  0x28   : > { %1878 = vmatprep.subr.bf16.mxu1 %v2055_v29  ;;  %v270_v44 = vld [vmem:[#allocation2 + $0x1] sm:$0x1]  ;;  %v274_v45 = vld [vmem:[#allocation2 + $0x3] sm:$0x1]  ;;  %v268_v46 = vld [vmem:[#allocation2] sm:$0x1] }
  0x29   : > { %v271_v47 = vpack.c.bf16 %v270_v44, %v270_v44  ;;  %v275_v48 = vpack.c.bf16 %v274_v45, %v274_v45  ;;  %v269_v49 = vpack.c.bf16 %v268_v46, %v268_v46  ;;  %v272_v50 = vld [vmem:[#allocation2 + $0x2] sm:$0x1]  ;;  %265 = vst [vmem:[#allocation2 + $0x4] sm:$0xf] %v261_v19  ;;  %v2127_v19 = vld [vmem:[%s2629_s1 + $0x3f0] sm:$0xff]  }
  0x2a   : > { %1857 = vmatpush3.bf16.msra.mxu0 %v2056_v30  ;;  %v273_v52 = vpack.c.bf16 %v272_v50, %v272_v50  ;;  %v2102_v44 = vld [vmem:[%s2629_s1 + $0x260] sm:$0xff]   ;;  %v2108_v50 = vld [vmem:[%s2629_s1 + $0x218] sm:$0xff]  }
  0x2b   : > { %1879 = vmatpush3.bf16.msra.mxu1 %v2057_v31  ;;  %1886 = vmatprep.subr.bf16.mxu0 %v2058_v36  ;;  %v2103_v45 = vld [vmem:[%s2629_s1 + $0x2e0] sm:$0xff]  }
  0x2c   : > { %1908 = vmatprep.subr.bf16.mxu1 %v2059_v37  ;;  %1360 = vmatprep.mubr.bf16.mxu0 %v271_v47  ;;  %v2095_v37 = vld [vmem:[%s2629_s1 + $0x2f0] sm:$0xff]   ;;  %v2104_v46 = vld [vmem:[%s2629_s1 + $0x220] sm:$0xff]  }
  0x2d   : > { %1400 = vmatprep.mubr.bf16.mxu1 %v275_v48  ;;  %1361 = vmatmul.mubr.bf16.vlgmr.msra.gmra.mxu0 %v269_v49  ;;  %v2105_v47 = vld [vmem:[%s2629_s1 + $0x2a0] sm:$0xff]   ;;  %v2106_v48 = vld [vmem:[%s2629_s1 + $0x258] sm:$0xff]  }
  0x2e   : > { %1401 = vmatmul.mubr.bf16.vlgmr.msra.gmra.mxu1 %v273_v52  ;;  %1887 = vmatpush3.bf16.msra.mxu0 %v2060_v42  ;;  %v2100_v42 = vld [vmem:[%s2629_s1 + $0x228] sm:$0xff]   ;;  %v2107_v49 = vld [vmem:[%s2629_s1 + $0x2d8] sm:$0xff]   ;;  %v2110_v52 = vld [vmem:[%s2629_s1 + $0x250] sm:$0xff]  }
  0x2f   : > { %1909 = vmatpush3.bf16.msra.mxu1 %v2061_v43  ;;  %1888 = vmatprep.subr.bf16.mxu0 %v2062_v51  ;;  %v2101_v43 = vld [vmem:[%s2629_s1 + $0x2a8] sm:$0xff]   ;;  %v2109_v51 = vld [vmem:[%s2629_s1 + $0x298] sm:$0xff]  }
  0x30   : > { %1910 = vmatprep.subr.bf16.mxu1 %v2063_v53  ;;  %v279_v26 = vld [vmem:[#allocation2 + $0x5] sm:$0x1]  ;;  %v283_v27 = vld [vmem:[#allocation2 + $0x7] sm:$0x1]  ;;  %v277_v28 = vld [vmem:[#allocation2 + $0x4] sm:$0x1] }
  0x31   : > { %v280_v29 = vpack.c.bf16 %v279_v26, %v279_v26  ;;  %v284_v30 = vpack.c.bf16 %v283_v27, %v283_v27  ;;  %v278_v31 = vpack.c.bf16 %v277_v28, %v277_v28  ;;  %v281_v32 = vld [vmem:[#allocation2 + $0x6] sm:$0x1]  ;;  %v224_v53 = vld [vmem:[%s2300_s12 + $0x4] sm:$0x3] }
  0x32   : > { %1889 = vmatpush3.bf16.msra.mxu0 %v2064_v54  ;;  %v282_v36 = vpack.c.bf16 %v281_v32, %v281_v32  ;;  %v2111_v54 = vld [vmem:[%s2629_s1 + $0x2d0] sm:$0xff]   ;;  %v2134_v26 = vld [vmem:[%s2629_s1 + $0x360] sm:$0xff]   ;;  %v2140_v32 = vld [vmem:[%s2629_s1 + $0x318] sm:$0xff]  }
  0x33   : > { %1911 = vmatpush3.bf16.msra.mxu1 %v2065_v55  ;;  %1890 = vmatprep.subr.bf16.mxu0 %v2066_v56  ;;  %v228_v55 = vunpack.c.l.bf16 %v224_v53  ;;  %v2112_v56 = vld [vmem:[%s2629_s1 + $0x210] sm:$0xff]   ;;  %v2135_v27 = vld [vmem:[%s2629_s1 + $0x3e0] sm:$0xff]  }
  0x34   : > { %1912 = vmatprep.subr.bf16.mxu1 %v2067_v57  ;;  %1440 = vmatprep.mubr.bf16.mxu0 %v280_v29  ;;  %v2113_v57 = vld [vmem:[%s2629_s1 + $0x290] sm:$0xff]   ;;  %v2136_v28 = vld [vmem:[%s2629_s1 + $0x320] sm:$0xff]  }
  0x35   : > { %1480 = vmatprep.mubr.bf16.mxu1 %v284_v30  ;;  %v2137_v29 = vld [vmem:[%s2629_s1 + $0x3a0] sm:$0xff]   ;;  %v2138_v30 = vld [vmem:[%s2629_s1 + $0x358] sm:$0xff]  }
  0x36   : > { %1891 = vmatpush3.bf16.msra.mxu0 %v2068_v58  ;;  %v239_v58 = vmul.f32 %v2312_v33, %v228_v55 }
  0x37   : > { %1913 = vmatpush3.bf16.msra.mxu1 %v2069_v59  ;;  %1892 = vmatprep.subr.bf16.mxu0 %v2070_v60  ;;  %v2114_v59 = vld [vmem:[%s2629_s1 + $0x248] sm:$0xff]  }
  0x38   : > { %1914 = vmatprep.subr.bf16.mxu1 %v2071_v61  ;;  %v2115_v60 = vld [vmem:[%s2629_s1 + $0x2c8] sm:$0xff]   ;;  %v250_v61 = vadd.f32 %v2317_v34, %v239_v58 }
  0x3a   : > { %1893 = vmatpush3.bf16.msra.mxu0 %v2072_v62  ;;  %v2116_v62 = vld [vmem:[%s2629_s1 + $0x208] sm:$0xff]   ;;  %vm254_vm2 = vcmp.ge.f32.partialorder %v250_v61, 0.0 }
  0x3b   : > { %1915 = vmatpush3.bf16.msra.mxu1 %v2073_v63  ;;  %1894 = vmatprep.subr.bf16.mxu0 %v2074_v0  ;;  %v2117_v63 = vld [vmem:[%s2629_s1 + $0x288] sm:$0xff]   ;;  %v2118_v0 = vld [vmem:[%s2629_s1 + $0x240] sm:$0xff]  }
  0x3c   : > { %1916 = vmatprep.subr.bf16.mxu1 %v2075_v1  ;;  %v258_v1 = vmul.f32 0.2, %v250_v61 }
  0x3e   : > { %1895 = vmatpush3.bf16.msra.mxu0 %v2076_v2  ;;  %v2119_v2 = vld [vmem:[%s2629_s1 + $0x2c0] sm:$0xff]  }
  0x3f   : > { %1917 = vmatpush3.bf16.msra.mxu1 %v2077_v3  ;;  %1896 = vmatprep.subr.bf16.mxu0 %v2078_v4  ;;  %v262_v3 = vsel %vm254_vm2, %v250_v61, %v258_v1  ;;  %v2120_v4 = vld [vmem:[%s2629_s1 + $0x200] sm:$0xff]  }
  0x40   : > { %1918 = vmatprep.subr.bf16.mxu1 %v2079_v6  ;;  %266 = vst [vmem:[#allocation2 + $0x8] sm:$0xf] %v262_v3  ;;  %v2122_v6 = vld [vmem:[%s2629_s1 + $0x378] sm:$0xff]  }
  0x42   : > { %1897 = vmatpush3.bf16.msra.mxu0 %v2080_v8  ;;  %v2124_v8 = vld [vmem:[%s2629_s1 + $0x338] sm:$0xff]  }
  0x43   : > { %1919 = vmatpush3.bf16.msra.mxu1 %v2081_v9  ;;  %1898 = vmatprep.subr.bf16.mxu0 %v2082_v11  ;;  %v2125_v9 = vld [vmem:[%s2629_s1 + $0x3b8] sm:$0xff]  }
  0x44   : > { %1920 = vmatprep.subr.bf16.mxu1 %v2083_v12 }
  0x46   : > { %1899 = vmatpush3.bf16.msra.mxu0 %v2084_v14 }
  0x47   : > { %1921 = vmatpush3.bf16.msra.mxu1 %v2085_v15  ;;  %1900 = vmatprep.subr.bf16.mxu0 %v2086_v16  ;;  %v288_v10 = vld [vmem:[#allocation2 + $0x9] sm:$0x1]  ;;  %v292_v11 = vld [vmem:[#allocation2 + $0xb] sm:$0x1]  ;;  %v286_v12 = vld [vmem:[#allocation2 + $0x8] sm:$0x1] }
  0x48   : > { %1922 = vmatprep.subr.bf16.mxu1 %v2087_v18  ;;  %v289_v13 = vpack.c.bf16 %v288_v10, %v288_v10  ;;  %v293_v14 = vpack.c.bf16 %v292_v11, %v292_v11  ;;  %v287_v15 = vpack.c.bf16 %v286_v12, %v286_v12  ;;  %v290_v16 = vld [vmem:[#allocation2 + $0xa] sm:$0x1] }
  0x49   : > { %v291_v18 = vpack.c.bf16 %v290_v16, %v290_v16 }
  0x4a   : > { %1901 = vmatpush3.bf16.msra.mxu0 %v2088_v20  ;;  %v2128_v20 = vld [vmem:[%s2629_s1 + $0x330] sm:$0xff]  }
  0x4b   : > { %1923 = vmatpush3.bf16.msra.mxu1 %v2089_v21  ;;  %1930 = vmatprep.subr.bf16.mxu0 %v2090_v22  ;;  %v2129_v21 = vld [vmem:[%s2629_s1 + $0x3b0] sm:$0xff]   ;;  %v2130_v22 = vld [vmem:[%s2629_s1 + $0x368] sm:$0xff]  }
  0x4c   : > { %1952 = vmatprep.subr.bf16.mxu1 %v2091_v23  ;;  %v2131_v23 = vld [vmem:[%s2629_s1 + $0x3e8] sm:$0xff]  }
  0x4d   : > { %1441 = vmatmul.mubr.bf16.vlgmr.msra.gmra.mxu0 %v278_v31  ;;  %v2139_v31 = vld [vmem:[%s2629_s1 + $0x3d8] sm:$0xff]  }
  0x4e   : > { %1481 = vmatmul.mubr.bf16.vlgmr.msra.gmra.mxu1 %v282_v36  ;;  %1931 = vmatpush3.bf16.msra.mxu0 %v2092_v24  ;;  %v2132_v24 = vld [vmem:[%s2629_s1 + $0x328] sm:$0xff]   ;;  %v225_v36 = vld [vmem:[%s2300_s12 + $0x6] sm:$0x3] }
  0x4f   : > { %1953 = vmatpush3.bf16.msra.mxu1 %v2093_v25  ;;  %1932 = vmatprep.subr.bf16.mxu0 %v2094_v35  ;;  %v2133_v25 = vld [vmem:[%s2629_s1 + $0x3a8] sm:$0xff]   ;;  %v2141_v35 = vld [vmem:[%s2629_s1 + $0x398] sm:$0xff]  }
  0x50   : > { %1954 = vmatprep.subr.bf16.mxu1 %v2095_v37  ;;  %1520 = vmatprep.mubr.bf16.mxu0 %v289_v13  ;;  %v2142_v37 = vld [vmem:[%s2629_s1 + $0x350] sm:$0xff]  }
  0x51   : > { %1560 = vmatprep.mubr.bf16.mxu1 %v293_v14 }
  0x52   : > { %1933 = vmatpush3.bf16.msra.mxu0 %v2096_v38  ;;  %v2143_v38 = vld [vmem:[%s2629_s1 + $0x3d0] sm:$0xff]  }
  0x53   : > { %1955 = vmatpush3.bf16.msra.mxu1 %v2097_v39  ;;  %1934 = vmatprep.subr.bf16.mxu0 %v2098_v40  ;;  %v229_v39 = vunpack.c.l.bf16 %v225_v36 }
  0x54   : > { %1956 = vmatprep.subr.bf16.mxu1 %v2099_v41  ;;  %v2144_v41 = vld [vmem:[%s2629_s1 + $0x310] sm:$0xff]  }
  0x55   : > { %v240_v40 = vmul.f32 %v2312_v33, %v229_v39  ;;  %v2147_v33 = vld [vmem:[%s2629_s1 + $0x3c8] sm:$0xff]  }
  0x56   : > { %1935 = vmatpush3.bf16.msra.mxu0 %v2100_v42  ;;  %v2145_v42 = vld [vmem:[%s2629_s1 + $0x390] sm:$0xff]  }
  0x57   : > { %1957 = vmatpush3.bf16.msra.mxu1 %v2101_v43  ;;  %1936 = vmatprep.subr.bf16.mxu0 %v2102_v44  ;;  %v2146_v43 = vld [vmem:[%s2629_s1 + $0x348] sm:$0xff]   ;;  %v251_v44 = vadd.f32 %v2317_v34, %v240_v40  ;;  %v2151_v34 = vld [vmem:[%s2629_s1 + $0x3c0] sm:$0xff]  }
  0x58   : > { %1958 = vmatprep.subr.bf16.mxu1 %v2103_v45 }
  0x59   : > { %vm255_vm3 = vcmp.ge.f32.partialorder %v251_v44, 0.0  ;;  %v259_v45 = vmul.f32 0.2, %v251_v44 }
  0x5a   : > { %1937 = vmatpush3.bf16.msra.mxu0 %v2104_v46  ;;  %v2148_v46 = vld [vmem:[%s2629_s1 + $0x308] sm:$0xff]  }
  0x5b   : > { %1959 = vmatpush3.bf16.msra.mxu1 %v2105_v47  ;;  %1938 = vmatprep.subr.bf16.mxu0 %v2106_v48  ;;  %v2149_v47 = vld [vmem:[%s2629_s1 + $0x388] sm:$0xff]   ;;  %v2150_v48 = vld [vmem:[%s2629_s1 + $0x340] sm:$0xff]  }
  0x5c   : > { %1960 = vmatprep.subr.bf16.mxu1 %v2107_v49  ;;  %v263_v49 = vsel %vm255_vm3, %v251_v44, %v259_v45 }
  0x5d   : > { %267 = vst [vmem:[#allocation2 + $0xc] sm:$0xf] %v263_v49 }
  0x5e   : > { %1939 = vmatpush3.bf16.msra.mxu0 %v2108_v50  ;;  %v2152_v50 = vld [vmem:[%s2629_s1 + $0x300] sm:$0xff]  }
  0x5f   : > { %1961 = vmatpush3.bf16.msra.mxu1 %v2109_v51  ;;  %1940 = vmatprep.subr.bf16.mxu0 %v2110_v52  ;;  %v2153_v51 = vld [vmem:[%s2629_s1 + $0x380] sm:$0xff]  }
  0x60   : > { %1962 = vmatprep.subr.bf16.mxu1 %v2111_v54 }
  0x62   : > { %1941 = vmatpush3.bf16.msra.mxu0 %v2112_v56 }
  0x63   : > { %1963 = vmatpush3.bf16.msra.mxu1 %v2113_v57  ;;  %1942 = vmatprep.subr.bf16.mxu0 %v2114_v59 }
  0x64   : > { %1964 = vmatprep.subr.bf16.mxu1 %v2115_v60  ;;  %v297_v52 = vld [vmem:[#allocation2 + $0xd] sm:$0x1]  ;;  %v301_v53 = vld [vmem:[#allocation2 + $0xf] sm:$0x1]  ;;  %v295_v54 = vld [vmem:[#allocation2 + $0xc] sm:$0x1] }
  0x65   : > { %v298_v55 = vpack.c.bf16 %v297_v52, %v297_v52  ;;  %v302_v56 = vpack.c.bf16 %v301_v53, %v301_v53  ;;  %v296_v57 = vpack.c.bf16 %v295_v54, %v295_v54  ;;  %v299_v58 = vld [vmem:[#allocation2 + $0xe] sm:$0x1] }
  0x66   : > { %1943 = vmatpush3.bf16.msra.mxu0 %v2116_v62  ;;  %v300_v59 = vpack.c.bf16 %v299_v58, %v299_v58  ;;  %v559_v62 = vld [vmem:[%s2632_s4] sm:$0x1] }
  0x67   : > { %1965 = vmatpush3.bf16.msra.mxu1 %v2117_v63  ;;  %1944 = vmatprep.subr.bf16.mxu0 %v2118_v0 }
  0x68   : > { %1966 = vmatprep.subr.bf16.mxu1 %v2119_v2 }
  0x6a   : > { %1945 = vmatpush3.bf16.msra.mxu0 %v2120_v4 }
  0x6b   : > { %1967 = vmatpush3.bf16.msra.mxu1 %v2121_v5  ;;  %1974 = vmatprep.subr.bf16.mxu0 %v2122_v6 }
  0x6c   : > { %1996 = vmatprep.subr.bf16.mxu1 %v2123_v7 }
  0x6d   : > { %1521 = vmatmul.mubr.bf16.vlgmr.msra.gmra.mxu0 %v287_v15 }
  0x6e   : > { %1561 = vmatmul.mubr.bf16.vlgmr.msra.gmra.mxu1 %v291_v18  ;;  %1975 = vmatpush3.bf16.msra.mxu0 %v2124_v8 }
  0x6f   : > { %1997 = vmatpush3.bf16.msra.mxu1 %v2125_v9  ;;  %1976 = vmatprep.subr.bf16.mxu0 %v2126_v17 }
  0x70   : > { %1998 = vmatprep.subr.bf16.mxu1 %v2127_v19  ;;  %1600 = vmatprep.mubr.bf16.mxu0 %v298_v55 }
  0x71   : > { %1640 = vmatprep.mubr.bf16.mxu1 %v302_v56 }
  0x72   : > { %1977 = vmatpush3.bf16.msra.mxu0 %v2128_v20 }
  0x73   : > { %1999 = vmatpush3.bf16.msra.mxu1 %v2129_v21  ;;  %1978 = vmatprep.subr.bf16.mxu0 %v2130_v22 }
  0x74   : > { %2000 = vmatprep.subr.bf16.mxu1 %v2131_v23 }
  0x76   : > { %1979 = vmatpush3.bf16.msra.mxu0 %v2132_v24 }
  0x77   : > { %2001 = vmatpush3.bf16.msra.mxu1 %v2133_v25  ;;  %1980 = vmatprep.subr.bf16.mxu0 %v2134_v26 }
  0x78   : > { %2002 = vmatprep.subr.bf16.mxu1 %v2135_v27 }
  0x7a   : > { %1981 = vmatpush3.bf16.msra.mxu0 %v2136_v28 }
  0x7b   : > { %2003 = vmatpush3.bf16.msra.mxu1 %v2137_v29  ;;  %1982 = vmatprep.subr.bf16.mxu0 %v2138_v30 }
  0x7c   : > { %2004 = vmatprep.subr.bf16.mxu1 %v2139_v31 }
  0x7e   : > { %1983 = vmatpush3.bf16.msra.mxu0 %v2140_v32 }
  0x7f   : > { %2005 = vmatpush3.bf16.msra.mxu1 %v2141_v35  ;;  %1984 = vmatprep.subr.bf16.mxu0 %v2142_v37 }
  0x80   : > { %2006 = vmatprep.subr.bf16.mxu1 %v2143_v38 }
  0x82   : > { %1985 = vmatpush3.bf16.msra.mxu0 %v2144_v41 }
  0x83   : > { %2007 = vmatpush3.bf16.msra.mxu1 %v2145_v42  ;;  %1986 = vmatprep.subr.bf16.mxu0 %v2146_v43 }
  0x84   : > { %2008 = vmatprep.subr.bf16.mxu1 %v2147_v33 }
  0x86   : > { %1987 = vmatpush3.bf16.msra.mxu0 %v2148_v46  ;;  %v1652_v46 = vld [vmem:[%s220_s20] sm:$0x1] }
  0x87   : > { %2009 = vmatpush3.bf16.msra.mxu1 %v2149_v47  ;;  %1988 = vmatprep.subr.bf16.mxu0 %v2150_v48 }
  0x88   : > { %2010 = vmatprep.subr.bf16.mxu1 %v2151_v34 }
  0x8a   : > { %1989 = vmatpush3.bf16.msra.mxu0 %v2152_v50 }
  0x8b   : > { %2011 = vmatpush3.bf16.msra.mxu1 %v2153_v51 }
  0x8d   : > { %1601 = vmatmul.mubr.bf16.vlgmr.msra.gmra.mxu0 %v296_v57 }
  0x8e   : > { %1641 = vmatmul.mubr.bf16.vlgmr.msra.gmra.mxu1 %v300_v59 }
  0xed   : > { %v1858_v60 = vpop.f32.mrf.mxu0 }
  0xee   : > { %v1880_v61 = vpop.f32.mrf.mxu1 }
  0xef   : > { %v1859_v63 = vpop.f32.mrf.mxu0 }
  0xf0   : > { %v1881_v0 = vpop.f32.mrf.mxu1  ;;  %v1860_v1 = vadd.f32 %v1859_v63, %v1858_v60 }
  0xf1   : > { %v1882_v2 = vadd.f32 %v1881_v0, %v1880_v61  ;;  %v1861_v3 = vpop.f32.mrf.mxu0 }
  0xf2   : > { %v1883_v4 = vpop.f32.mrf.mxu1  ;;  %v1363_v5 = vadd.f32 %v1860_v1, %v559_v62 }
  0xf3   : > { %v1862_v6 = vpop.f32.mrf.mxu0 }
  0xf4   : > { %v1884_v7 = vpop.f32.mrf.mxu1  ;;  %v1403_v8 = vadd.f32 %v1882_v2, %v1363_v5 }
 0x10d   : > { %v1902_v9 = vpop.f32.mrf.mxu0 }
 0x10e   : > { %v1924_v10 = vpop.f32.mrf.mxu1 }
 0x10f   : > { %v1903_v11 = vpop.f32.mrf.mxu0 }
 0x110   : > { %v1925_v12 = vpop.f32.mrf.mxu1  ;;  %v1904_v13 = vadd.f32 %v1903_v11, %v1902_v9 }
 0x111   : > { %v1926_v14 = vadd.f32 %v1925_v12, %v1924_v10  ;;  %v1905_v15 = vpop.f32.mrf.mxu0 }
 0x112   : > { %v1927_v16 = vpop.f32.mrf.mxu1  ;;  %v1443_v17 = vadd.f32 %v1904_v13, %v1403_v8 }
 0x113   : > { %v1906_v18 = vpop.f32.mrf.mxu0 }
 0x114   : > { %v1928_v19 = vpop.f32.mrf.mxu1  ;;  %v1483_v20 = vadd.f32 %v1926_v14, %v1443_v17 }
 0x12d   : > { %v1946_v21 = vpop.f32.mrf.mxu0 }
 0x12e   : > { %v1968_v22 = vpop.f32.mrf.mxu1 }
 0x12f   : > { %v1947_v23 = vpop.f32.mrf.mxu0 }
 0x130   : > { %v1969_v24 = vpop.f32.mrf.mxu1  ;;  %v1948_v29 = vadd.f32 %v1947_v23, %v1946_v21 }
 0x131   : > { %v1949_v25 = vpop.f32.mrf.mxu0  ;;  %v1970_v31 = vadd.f32 %v1969_v24, %v1968_v22 }
 0x132   : > { %v1971_v26 = vpop.f32.mrf.mxu1  ;;  %v1523_v30 = vadd.f32 %v1948_v29, %v1483_v20 }
 0x133   : > { %v1950_v27 = vpop.f32.mrf.mxu0 }
 0x134   : > { %v1972_v28 = vpop.f32.mrf.mxu1  ;;  %v1563_v38 = vadd.f32 %v1970_v31, %v1523_v30 }
 0x14d   : > { %v1990_v32 = vpop.f32.mrf.mxu0 }
 0x14e   : > { %v2012_v35 = vpop.f32.mrf.mxu1 }
 0x14f   : > { %v1991_v36 = vpop.f32.mrf.mxu0 }
 0x150   : > { %v2013_v37 = vpop.f32.mrf.mxu1  ;;  %v1992_v39 = vadd.f32 %v1991_v36, %v1990_v32 }
 0x151   : > { %v1993_v40 = vpop.f32.mrf.mxu0  ;;  %v2014_v43 = vadd.f32 %v2013_v37, %v2012_v35 }
 0x152   : > { %v2015_v41 = vpop.f32.mrf.mxu1  ;;  %v1603_v42 = vadd.f32 %v1992_v39, %v1563_v38 }
 0x153   : > { %v1994_v33 = vpop.f32.mrf.mxu0 }
 0x154   : > { %v2016_v44 = vpop.f32.mrf.mxu1  ;;  %v1643_v45 = vadd.f32 %v2014_v43, %v1603_v42 }
 0x156   : > { %v1648_v47 = vpack.c.bf16 %v1643_v45, %v1643_v45 }
 0x158   : > { %v1653_v48 = vsel %vm1651_vm6, %v1648_v47, %v1652_v46 }
 0x159   : > { %1654 = vst [vmem:[%s220_s20] sm:$0x1] %v1653_v48 }
 0x15a PF: > { %s15_s18 = sadd.s32 1, %s2160_s18  }
 0x15b   : > { %p12_p4 = scmp.ge.s32.totalorder %s15_s18, 4  }
 0x15d   :  { %14 = sbr.rel (!%p12_p4) target bundleno = 1 (0x1), region = 73 }

// kernel: _lambda_.9
= control target key start
LH: loop header
LB: loop body
LE: loop exit
PB: predicated region body
PF: predicated region fallthrough
CT: control target
= control target key end

     0   :  { %7 = vsyncpa [#allocation4], 0  ;;  %s3761_s9 = smov 0   ;;  %s3981_s0 = inlined_call_operand.vmem [shape: bf16[2,16,16,128], index: 0, kind: input, shape index: {}]   ;;  %s3982_s1 = inlined_call_operand.hbm [shape: bf16[2048,128], index: 1, kind: input, shape index: {}]   ;;  %s3983_s2 = inlined_call_operand.vmem [shape: bf16[2,64,128], index: 2, kind: output, shape index: {}]  }
   0x1 LB: > { %s3767_s10 = sadd.s32 4294967295, %s3740_s9   ;;  %p2847_p0 = scmp.ge.s32.totalorder %s3740_s9, 1  ;;  %s3740_s9 = sphi %s3761_s9, %s13_s9  }
   0x2   : > { %p91_p1 = scmp.lt.s32.totalorder %s3740_s9, 3  ;;  %s3742_s11 = smov [#allocation3]  }
   0x3   : > { %s103_s12 = sshll.u32 %s3742_s11, 4  ;;  %p3562_p3 = scmp.eq.s32.totalorder %s3767_s10, 0  ;;  %s104_s12 = int_to_ptr.vmem [resolvable:$true] %s103_s12 }
   0x4   : > { %p3771_p2 = pnand %p2847_p0, %p91_p1  ;;  %s3715_s14 = scalar_lea.vmem %s104_s12, 16384 }
   0x5   : > { %p3716_p7 = scmp.ne.s32.totalorder %s104_s12, %s3715_s14  ;;  %p3723_p10 = scmp.lt.s32.totalorder %s104_s12, %s104_s12 }
   0x6   : > { %p3558_p4 = pneg %p3771_p2  ;;  %p3724_p11 = scmp.lt.s32.totalorder %s3715_s14, %s3715_s14 }
   0x8   : > { %p3559_p5 = pnand %p3562_p3, %p3558_p4  ;;  %p3725_p12 = por %p3724_p11, %p3723_p10 }
   0xa   : > { %p3706_p6 = pneg %p3559_p5 }
   0xc   : > { %p3718_p8 = pnand %p3716_p7, %p3706_p6 }
   0xe   : > { %p3719_p9 = pneg %p3718_p8 }
  0x10   : > { %p3726_p13 = pnand %p3725_p12, %p3719_p9 }
  0x12   : > { %3729 = shalt.err (!%p3726_p13)
}
  0x13   : > { %s3743_s15 = smov 64   ;;  %s3744_s16 = smov 4  }
  0x14   : > { %3561 = dma.hbm_to_vmem [thread:$0]  (!%p3559_p5), %s3982_s1, 16384, %s104_s12, [#allocation4], %s3743_s15, %s3743_s15, %s3744_s16  }
  0x15   : > { %127 = sbr.rel (%p3771_p2) target bundleno = 397 (0x18d), region = 28 }
  0x1a   : > { %3735 = dma.done.wait (%p3562_p3), [#allocation4], 16384  }
  0x1b   : > { %3737 = vsyncadd (%p3562_p3), [#allocation4], 4294950912  ;;  %v3745_v0 = vmov 0.0   ;;  %v3576_v1 = vld [vmem:[#allocation3 + $0x78] sm:$0xff]   ;;  %v3580_v5 = vld [vmem:[#allocation3 + $0x70] sm:$0xff]   ;;  %p149_p0 = scmp.lt.s32.totalorder %s3767_s10, 1 }
  0x1c   : > { %160 = vst [vmem:[#allocation2] sm:$0xff] %v3745_v0  ;;  %161 = vst [vmem:[#allocation2 + $0x8] sm:$0xff] %v3745_v0  ;;  %v3577_v2 = vld [vmem:[#allocation3 + $0xf8] sm:$0xff]   ;;  %3234 = vmatprep.subr.bf16.mxu0 %v3576_v1  ;;  %v3581_v6 = vld [vmem:[#allocation3 + $0xf0] sm:$0xff]  }
  0x1d   : > { %166 = vst [vmem:[#allocation2 + $0x30] sm:$0xff] %v3745_v0  ;;  %167 = vst [vmem:[#allocation2 + $0x38] sm:$0xff] %v3745_v0  ;;  %v3578_v3 = vld [vmem:[#allocation3 + $0x38] sm:$0xff]   ;;  %3274 = vmatprep.subr.bf16.mxu1 %v3577_v2  ;;  %v3582_v7 = vld [vmem:[#allocation3 + $0x30] sm:$0xff]   ;;  %s4014_s10 = smov (!%p149_p0, %s3767_s10), 1 }
  0x1e   : > { %168 = vst [vmem:[#allocation2 + $0x40] sm:$0x3] %v3745_v0  ;;  %162 = vst [vmem:[#allocation2 + $0x10] sm:$0x3] %v3745_v0  ;;  %v3579_v4 = vld [vmem:[#allocation3 + $0xb8] sm:$0xff]   ;;  %3235 = vmatpush3.bf16.msra.mxu0 %v3578_v3  ;;  %v3583_v8 = vld [vmem:[#allocation3 + $0xb0] sm:$0xff]  }
  0x1f   : > { %163 = vst [vmem:[#allocation2 + $0x18] sm:$0xff] %v3745_v0  ;;  %164 = vst [vmem:[#allocation2 + $0x20] sm:$0xff] %v3745_v0  ;;  %3275 = vmatpush3.bf16.msra.mxu1 %v3579_v4  ;;  %3236 = vmatprep.subr.bf16.mxu0 %v3580_v5  ;;  %v3584_v9 = vld [vmem:[#allocation3 + $0x68] sm:$0xff]   ;;  %v3588_v13 = vld [vmem:[#allocation3 + $0x60] sm:$0xff]   ;;  %s3058_s19 = sshll.u32 %s4014_s10, 7  ;;  %s3059_s23 = sshll.u32 %s4014_s10, 5 }
  0x20   : > { %165 = vst [vmem:[#allocation2 + $0x28] sm:$0x3] %v3745_v0  ;;  %169 = vst [vmem:[#allocation2 + $0x48] sm:$0xff] %v3745_v0  ;;  %3276 = vmatprep.subr.bf16.mxu1 %v3581_v6  ;;  %v3585_v10 = vld [vmem:[#allocation3 + $0xe8] sm:$0xff]   ;;  %v3589_v14 = vld [vmem:[#allocation3 + $0xe0] sm:$0xff]   ;;  %s3797_s22 = scalar_lea.vmem %s3981_s0, %s3058_s19  ;;  %s3952_s26 = scalar_lea.vmem %s3983_s2, %s3059_s23 }
  0x21   : > { %170 = vst [vmem:[#allocation2 + $0x50] sm:$0xff] %v3745_v0  ;;  %171 = vst [vmem:[#allocation2 + $0x58] sm:$0x3] %v3745_v0  ;;  %v3586_v11 = vld [vmem:[#allocation3 + $0x28] sm:$0xff]   ;;  %v3590_v15 = vld [vmem:[#allocation3 + $0x20] sm:$0xff]  }
  0x22   : > { %172 = vst [vmem:[#allocation2 + $0x60] sm:$0xff] %v3745_v0  ;;  %173 = vst [vmem:[#allocation2 + $0x68] sm:$0xff] %v3745_v0  ;;  %3237 = vmatpush3.bf16.msra.mxu0 %v3582_v7  ;;  %v3587_v12 = vld [vmem:[#allocation3 + $0xa8] sm:$0xff]   ;;  %v3591_v16 = vld [vmem:[#allocation3 + $0xa0] sm:$0xff]  }
  0x23   : > { %174 = vst [vmem:[#allocation2 + $0x70] sm:$0x3] %v3745_v0  ;;  %175 = vst [vmem:[#allocation2 + $0x78] sm:$0xff] %v3745_v0  ;;  %3277 = vmatpush3.bf16.msra.mxu1 %v3583_v8  ;;  %3238 = vmatprep.subr.bf16.mxu0 %v3584_v9  ;;  %v3592_v17 = vld [vmem:[#allocation3 + $0x58] sm:$0xff]   ;;  %v3596_v21 = vld [vmem:[#allocation3 + $0x50] sm:$0xff]  }
  0x24   : > { %176 = vst [vmem:[#allocation2 + $0x80] sm:$0xff] %v3745_v0  ;;  %177 = vst [vmem:[#allocation2 + $0x88] sm:$0x3] %v3745_v0  ;;  %3278 = vmatprep.subr.bf16.mxu1 %v3585_v10  ;;  %v3593_v18 = vld [vmem:[#allocation3 + $0xd8] sm:$0xff]   ;;  %v3597_v22 = vld [vmem:[#allocation3 + $0xd0] sm:$0xff]  }
  0x25   : > { %178 = vst [vmem:[#allocation2 + $0x90] sm:$0xff] %v3745_v0  ;;  %179 = vst [vmem:[#allocation2 + $0x98] sm:$0xff] %v3745_v0  ;;  %v3594_v19 = vld [vmem:[#allocation3 + $0x18] sm:$0xff]   ;;  %v3598_v23 = vld [vmem:[#allocation3 + $0x10] sm:$0xff]  }
  0x26   : > { %180 = vst [vmem:[#allocation2 + $0xa0] sm:$0x3] %v3745_v0  ;;  %181 = vst [vmem:[#allocation2 + $0xa8] sm:$0xff] %v3745_v0  ;;  %3239 = vmatpush3.bf16.msra.mxu0 %v3586_v11  ;;  %v3595_v20 = vld [vmem:[#allocation3 + $0x98] sm:$0xff]   ;;  %v3599_v24 = vld [vmem:[#allocation3 + $0x90] sm:$0xff]  }
  0x27   : > { %182 = vst [vmem:[#allocation2 + $0xb0] sm:$0xff] %v3745_v0  ;;  %183 = vst [vmem:[#allocation2 + $0xb8] sm:$0x3] %v3745_v0  ;;  %3279 = vmatpush3.bf16.msra.mxu1 %v3587_v12  ;;  %3240 = vmatprep.subr.bf16.mxu0 %v3588_v13  ;;  %v3600_v25 = vld [vmem:[#allocation3 + $0x48] sm:$0xff]   ;;  %v3604_v29 = vld [vmem:[#allocation3 + $0x40] sm:$0xff]  }
  0x28   : > { %184 = vst [vmem:[#allocation2 + $0xc0] sm:$0xff] %v3745_v0  ;;  %185 = vst [vmem:[#allocation2 + $0xc8] sm:$0xff] %v3745_v0  ;;  %3280 = vmatprep.subr.bf16.mxu1 %v3589_v14  ;;  %v3601_v26 = vld [vmem:[#allocation3 + $0xc8] sm:$0xff]   ;;  %v3605_v30 = vld [vmem:[#allocation3 + $0xc0] sm:$0xff]  }
  0x29   : > { %186 = vst [vmem:[#allocation2 + $0xd0] sm:$0x3] %v3745_v0  ;;  %187 = vst [vmem:[#allocation2 + $0xd8] sm:$0xff] %v3745_v0  ;;  %v3602_v27 = vld [vmem:[#allocation3 + $0x8] sm:$0xff]   ;;  %v3606_v31 = vld [vmem:[#allocation3] sm:$0xff]  }
  0x2a   : > { %188 = vst [vmem:[#allocation2 + $0xe0] sm:$0xff] %v3745_v0  ;;  %189 = vst [vmem:[#allocation2 + $0xe8] sm:$0x3] %v3745_v0  ;;  %3241 = vmatpush3.bf16.msra.mxu0 %v3590_v15  ;;  %v3603_v28 = vld [vmem:[#allocation3 + $0x88] sm:$0xff]   ;;  %v3607_v32 = vld [vmem:[#allocation3 + $0x80] sm:$0xff]  }
  0x2b   : > { %190 = vst [vmem:[#allocation2 + $0xf0] sm:$0xff] %v3745_v0  ;;  %191 = vst [vmem:[#allocation2 + $0xf8] sm:$0xff] %v3745_v0  ;;  %3281 = vmatpush3.bf16.msra.mxu1 %v3591_v16  ;;  %3242 = vmatprep.subr.bf16.mxu0 %v3592_v17  ;;  %v3216_v33 = vld [vmem:[%s3797_s22 + $0x8] sm:$0xff]   ;;  %v3218_v44 = vld [vmem:[%s3797_s22 + $0x18] sm:$0xff]  }
  0x2c   : > { %192 = vst [vmem:[#allocation2 + $0x100] sm:$0x3] %v3745_v0  ;;  %193 = vst [vmem:[#allocation2 + $0x108] sm:$0xff] %v3745_v0  ;;  %3282 = vmatprep.subr.bf16.mxu1 %v3593_v18  ;;  %v3138_v34 = vunpack.c.l.bf16 %v3216_v33  ;;  %v3139_v35 = vunpack.c.h.bf16 %v3216_v33  ;;  %v3608_v36 = vld [vmem:[#allocation3 + $0x178] sm:$0xff]   ;;  %v3612_v48 = vld [vmem:[#allocation3 + $0x170] sm:$0xff]   ;;  %v3146_v49 = vunpack.c.l.bf16 %v3218_v44  ;;  %v3147_v50 = vunpack.c.h.bf16 %v3218_v44 }
  0x2d   : > { %194 = vst [vmem:[#allocation2 + $0x110] sm:$0xff] %v3745_v0  ;;  %195 = vst [vmem:[#allocation2 + $0x118] sm:$0x3] %v3745_v0  ;;  %v3609_v37 = vld [vmem:[#allocation3 + $0x1f8] sm:$0xff]   ;;  %v3613_v57 = vld [vmem:[#allocation3 + $0x1f0] sm:$0xff]  }
  0x2e   : > { %196 = vst [vmem:[#allocation2 + $0x120] sm:$0xff] %v3745_v0  ;;  %197 = vst [vmem:[#allocation2 + $0x128] sm:$0xff] %v3745_v0  ;;  %3243 = vmatpush3.bf16.msra.mxu0 %v3594_v19  ;;  %v335_v38 = vld [vmem:[#allocation2 + $0x1] ss:$2 sm:$0xff]  ;;  %v311_v40 = vld [vmem:[#allocation2] ss:$2 sm:$0xff] }
  0x2f   : > { %198 = vst [vmem:[#allocation2 + $0x130] sm:$0x3] %v3745_v0  ;;  %199 = vst [vmem:[#allocation2 + $0x138] sm:$0xff] %v3745_v0  ;;  %3283 = vmatpush3.bf16.msra.mxu1 %v3595_v20  ;;  %3244 = vmatprep.subr.bf16.mxu0 %v3596_v21  ;;  %v383_v39 = vld [vmem:[#allocation2 + $0x3] ss:$2 sm:$0xff]  ;;  %v3616_v62 = vld [vmem:[#allocation3 + $0x168] sm:$0xff]  }
  0x30   : > { %200 = vst [vmem:[#allocation2 + $0x140] sm:$0xff] %v3745_v0  ;;  %201 = vst [vmem:[#allocation2 + $0x148] sm:$0x3] %v3745_v0  ;;  %3284 = vmatprep.subr.bf16.mxu1 %v3597_v22  ;;  %v359_v41 = vld [vmem:[#allocation2 + $0x2] ss:$2 sm:$0xff]  ;;  %v3617_v63 = vld [vmem:[#allocation3 + $0x1e8] sm:$0xff]  }
  0x31   : > { %202 = vst [vmem:[#allocation2 + $0x150] sm:$0xff] %v3745_v0  ;;  %203 = vst [vmem:[#allocation2 + $0x158] sm:$0xff] %v3745_v0  ;;  %v3610_v42 = vld [vmem:[#allocation3 + $0x138] sm:$0xff]   ;;  %v3614_v60 = vld [vmem:[#allocation3 + $0x130] sm:$0xff]  }
  0x32   : > { %204 = vst [vmem:[#allocation2 + $0x160] sm:$0x3] %v3745_v0  ;;  %205 = vst [vmem:[#allocation2 + $0x168] sm:$0xff] %v3745_v0  ;;  %3245 = vmatpush3.bf16.msra.mxu0 %v3598_v23  ;;  %v3611_v43 = vld [vmem:[#allocation3 + $0x1b8] sm:$0xff]   ;;  %v3615_v61 = vld [vmem:[#allocation3 + $0x1b0] sm:$0xff]  }
  0x33   : > { %206 = vst [vmem:[#allocation2 + $0x170] sm:$0xff] %v3745_v0  ;;  %207 = vst [vmem:[#allocation2 + $0x178] sm:$0x3] %v3745_v0  ;;  %3285 = vmatpush3.bf16.msra.mxu1 %v3599_v24  ;;  %3246 = vmatprep.subr.bf16.mxu0 %v3600_v25  ;;  %v3220_v55 = vld [vmem:[%s3797_s22 + $0x28] sm:$0xff]   ;;  %v3619_v1 = vld [vmem:[#allocation3 + $0x1a8] sm:$0xff]  }
  0x34   : > { %208 = vst [vmem:[#allocation2 + $0x180] sm:$0xff] %v3745_v0  ;;  %209 = vst [vmem:[#allocation2 + $0x188] sm:$0xff] %v3745_v0  ;;  %3286 = vmatprep.subr.bf16.mxu1 %v3601_v26  ;;  %v3154_v58 = vunpack.c.l.bf16 %v3220_v55  ;;  %v3155_v59 = vunpack.c.h.bf16 %v3220_v55  ;;  %v3620_v6 = vld [vmem:[#allocation3 + $0x160] sm:$0xff]   ;;  %v3222_v17 = vld [vmem:[%s3797_s22 + $0x38] sm:$0xff]  }
  0x35   : > { %210 = vst [vmem:[#allocation2 + $0x190] sm:$0x3] %v3745_v0  ;;  %211 = vst [vmem:[#allocation2 + $0x198] sm:$0xff] %v3745_v0  ;;  %v3621_v7 = vld [vmem:[#allocation3 + $0x1e0] sm:$0xff]   ;;  %v3224_v18 = vld [vmem:[%s3797_s22 + $0x48] sm:$0xff]   ;;  %v3162_v20 = vunpack.c.l.bf16 %v3222_v17  ;;  %v3163_v21 = vunpack.c.h.bf16 %v3222_v17 }
  0x36   : > { %212 = vst [vmem:[#allocation2 + $0x1a0] sm:$0xff] %v3745_v0  ;;  %213 = vst [vmem:[#allocation2 + $0x1a8] sm:$0x3] %v3745_v0  ;;  %3247 = vmatpush3.bf16.msra.mxu0 %v3602_v27  ;;  %v3618_v0 = vld [vmem:[#allocation3 + $0x128] sm:$0xff]   ;;  %v3622_v11 = vld [vmem:[#allocation3 + $0x120] sm:$0xff]   ;;  %v3170_v22 = vunpack.c.l.bf16 %v3224_v18  ;;  %v3171_v24 = vunpack.c.h.bf16 %v3224_v18 }
  0x37   : > { %3287 = vmatpush3.bf16.msra.mxu1 %v3603_v28  ;;  %3248 = vmatprep.subr.bf16.mxu0 %v3604_v29  ;;  %281 = vst [vmem:[#allocation2 + $0x31] sm:$0xff] %v3138_v34  ;;  %282 = vst [vmem:[#allocation2 + $0x39] sm:$0xff] %v3139_v35  ;;  %v3623_v12 = vld [vmem:[#allocation3 + $0x1a0] sm:$0xff]   ;;  %v3624_v23 = vld [vmem:[#allocation3 + $0x158] sm:$0xff]  }
  0x38   : > { %3288 = vmatprep.subr.bf16.mxu1 %v3605_v30  ;;  %285 = vst [vmem:[#allocation2 + $0x61] sm:$0xff] %v3146_v49  ;;  %286 = vst [vmem:[#allocation2 + $0x69] sm:$0xff] %v3147_v50  ;;  %v3625_v25 = vld [vmem:[#allocation3 + $0x1d8] sm:$0xff]   ;;  %v3628_v28 = vld [vmem:[#allocation3 + $0x150] sm:$0xff]  }
  0x39   : > { %289 = vst [vmem:[#allocation2 + $0x91] sm:$0xff] %v3154_v58  ;;  %290 = vst [vmem:[#allocation2 + $0x99] sm:$0xff] %v3155_v59  ;;  %v3626_v26 = vld [vmem:[#allocation3 + $0x118] sm:$0xff]   ;;  %v3629_v29 = vld [vmem:[#allocation3 + $0x1d0] sm:$0xff]  }
  0x3a   : > { %3249 = vmatpush3.bf16.msra.mxu0 %v3606_v31  ;;  %293 = vst [vmem:[#allocation2 + $0xc1] sm:$0xff] %v3162_v20  ;;  %294 = vst [vmem:[#allocation2 + $0xc9] sm:$0xff] %v3163_v21  ;;  %v3627_v27 = vld [vmem:[#allocation3 + $0x198] sm:$0xff]   ;;  %v3630_v30 = vld [vmem:[#allocation3 + $0x110] sm:$0xff]  }
  0x3b   : > { %3289 = vmatpush3.bf16.msra.mxu1 %v3607_v32  ;;  %3314 = vmatprep.subr.bf16.mxu0 %v3608_v36  ;;  %297 = vst [vmem:[#allocation2 + $0xf1] sm:$0xff] %v3170_v22  ;;  %298 = vst [vmem:[#allocation2 + $0xf9] sm:$0xff] %v3171_v24  ;;  %v3631_v31 = vld [vmem:[#allocation3 + $0x190] sm:$0xff]   ;;  %v3226_v32 = vld [vmem:[%s3797_s22 + $0x58] sm:$0xff]  }
  0x3c   : > { %3354 = vmatprep.subr.bf16.mxu1 %v3609_v37  ;;  %v3228_v33 = vld [vmem:[%s3797_s22 + $0x68] sm:$0xff]   ;;  %v3178_v37 = vunpack.c.l.bf16 %v3226_v32  ;;  %v3632_v50 = vld [vmem:[#allocation3 + $0x148] sm:$0xff]   ;;  %v3637_v55 = vld [vmem:[#allocation3 + $0x1c0] sm:$0xff]  }
  0x3d   : > { %v3221_v18 = vld [vmem:[%s3797_s22 + $0x30] sm:$0xff]   ;;  %v3643_v22 = vld [vmem:[#allocation3 + $0x2b8] sm:$0xff]  }
  0x3e   : > { %v337_v45 = vld [vmem:[#allocation2 + $0x31] ss:$2 sm:$0xff]  ;;  %v313_v47 = vld [vmem:[#allocation2 + $0x30] ss:$2 sm:$0xff]  ;;  %301 = vst [vmem:[#allocation2 + $0x121] sm:$0xff] %v3178_v37  ;;  %v3159_v24 = vunpack.c.h.bf16 %v3221_v18  ;;  %v3647_v37 = vld [vmem:[#allocation3 + $0x2b0] sm:$0xff]  }
  0x3f   : > { %v385_v46 = vld [vmem:[#allocation2 + $0x33] ss:$2 sm:$0xff]  ;;  %v3061_v51 = vpack.c.bf16 %v337_v45, %v335_v38  ;;  %v3060_v53 = vpack.c.bf16 %v313_v47, %v311_v40  ;;  %v361_v54 = vld [vmem:[#allocation2 + $0x32] ss:$2 sm:$0xff]  ;;  %v387_v3 = vld [vmem:[#allocation2 + $0x63] ss:$2 sm:$0xff]  ;;  %v3179_v38 = vunpack.c.h.bf16 %v3226_v32  ;;  %v3187_v40 = vunpack.c.h.bf16 %v3228_v33 }
  0x40   : > { %v3063_v52 = vpack.c.bf16 %v385_v46, %v383_v39  ;;  %v3062_v56 = vpack.c.bf16 %v361_v54, %v359_v41  ;;  %v339_v2 = vld [vmem:[#allocation2 + $0x61] ss:$2 sm:$0xff]  ;;  %v315_v4 = vld [vmem:[#allocation2 + $0x60] ss:$2 sm:$0xff]  ;;  %v341_v8 = vld [vmem:[#allocation2 + $0x91] ss:$2 sm:$0xff]  ;;  %v3186_v39 = vunpack.c.l.bf16 %v3228_v33 }
  0x41   : > { %2133 = vmatprep.mubr.bf16.mxu0 %v3061_v51  ;;  %v363_v5 = vld [vmem:[#allocation2 + $0x62] ss:$2 sm:$0xff]  ;;  %v389_v9 = vld [vmem:[#allocation2 + $0x93] ss:$2 sm:$0xff]  ;;  %v3077_v13 = vpack.c.bf16 %v341_v8, %v339_v2  ;;  %v365_v16 = vld [vmem:[#allocation2 + $0x92] ss:$2 sm:$0xff] }
  0x42   : > { %2198 = vmatprep.mubr.bf16.mxu1 %v3063_v52  ;;  %2134 = vmatmul.mubr.bf16.vlgmr.msra.gmra.mxu0 %v3060_v53  ;;  %v317_v10 = vld [vmem:[#allocation2 + $0x90] ss:$2 sm:$0xff]  ;;  %v3079_v14 = vpack.c.bf16 %v389_v9, %v387_v3  ;;  %v3078_v19 = vpack.c.bf16 %v365_v16, %v363_v5  ;;  %v343_v34 = vld [vmem:[#allocation2 + $0xc1] ss:$2 sm:$0xff]  ;;  %v319_v36 = vld [vmem:[#allocation2 + $0xc0] ss:$2 sm:$0xff] }
  0x43   : > { %2199 = vmatmul.mubr.bf16.vlgmr.msra.gmra.mxu1 %v3062_v56  ;;  %3315 = vmatpush3.bf16.msra.mxu0 %v3610_v42  ;;  %v3076_v15 = vpack.c.bf16 %v317_v10, %v315_v4  ;;  %v391_v35 = vld [vmem:[#allocation2 + $0xc3] ss:$2 sm:$0xff]  ;;  %v393_v42 = vld [vmem:[#allocation2 + $0xf3] ss:$2 sm:$0xff]  ;;  %v367_v47 = vld [vmem:[#allocation2 + $0xc2] ss:$2 sm:$0xff] }
  0x44   : > { %3355 = vmatpush3.bf16.msra.mxu1 %v3611_v43  ;;  %3316 = vmatprep.subr.bf16.mxu0 %v3612_v48  ;;  %v345_v41 = vld [vmem:[#allocation2 + $0xf1] ss:$2 sm:$0xff]  ;;  %v321_v43 = vld [vmem:[#allocation2 + $0xf0] ss:$2 sm:$0xff]  ;;  %v3095_v45 = vpack.c.bf16 %v393_v42, %v391_v35  ;;  %302 = vst [vmem:[#allocation2 + $0x129] sm:$0xff] %v3179_v38  ;;  %305 = vst [vmem:[#allocation2 + $0x151] sm:$0xff] %v3186_v39 }
  0x45   : > { %3356 = vmatprep.subr.bf16.mxu1 %v3613_v57  ;;  %2141 = vmatprep.mubr.bf16.mxu0 %v3077_v13  ;;  %v3093_v44 = vpack.c.bf16 %v345_v41, %v343_v34  ;;  %v3092_v46 = vpack.c.bf16 %v321_v43, %v319_v36  ;;  %v369_v48 = vld [vmem:[#allocation2 + $0xf2] ss:$2 sm:$0xff]  ;;  %306 = vst [vmem:[#allocation2 + $0x159] sm:$0xff] %v3187_v40  ;;  %v3641_v13 = vld [vmem:[#allocation3 + $0x2f8] sm:$0xff]   ;;  %292 = vst [vmem:[#allocation2 + $0xb1] sm:$0xff] %v3159_v24 }
  0x46   : > { %2206 = vmatprep.mubr.bf16.mxu1 %v3079_v14  ;;  %v3094_v49 = vpack.c.bf16 %v369_v48, %v367_v47  ;;  %v3633_v51 = vld [vmem:[#allocation3 + $0x1c8] sm:$0xff]   ;;  %v3636_v54 = vld [vmem:[#allocation3 + $0x140] sm:$0xff]   ;;  %v3219_v14 = vld [vmem:[%s3797_s22 + $0x20] sm:$0xff]  }
  0x47   : > { %3317 = vmatpush3.bf16.msra.mxu0 %v3614_v60  ;;  %v3634_v52 = vld [vmem:[#allocation3 + $0x108] sm:$0xff]   ;;  %v3638_v3 = vld [vmem:[#allocation3 + $0x100] sm:$0xff]   ;;  %v3150_v16 = vunpack.c.l.bf16 %v3219_v14  ;;  %v3151_v17 = vunpack.c.h.bf16 %v3219_v14  ;;  %v3644_v33 = vld [vmem:[#allocation3 + $0x270] sm:$0xff]  }
  0x48   : > { %3357 = vmatpush3.bf16.msra.mxu1 %v3615_v61  ;;  %3318 = vmatprep.subr.bf16.mxu0 %v3616_v62  ;;  %v3635_v53 = vld [vmem:[#allocation3 + $0x188] sm:$0xff]   ;;  %v3639_v5 = vld [vmem:[#allocation3 + $0x180] sm:$0xff]   ;;  %v3645_v35 = vld [vmem:[#allocation3 + $0x2f0] sm:$0xff]  }
  0x49   : > { %3358 = vmatprep.subr.bf16.mxu1 %v3617_v63  ;;  %287 = vst [vmem:[#allocation2 + $0x79] sm:$0xff] %v3150_v16  ;;  %288 = vst [vmem:[#allocation2 + $0x81] sm:$0xff] %v3151_v17  ;;  %v3646_v36 = vld [vmem:[#allocation3 + $0x230] sm:$0xff]   ;;  %v3648_v38 = vld [vmem:[#allocation3 + $0x268] sm:$0xff]  }
  0x4a   : > { %2142 = vmatmul.mubr.bf16.gmra.mxu0 %v3076_v15  ;;  %v3642_v15 = vld [vmem:[#allocation3 + $0x238] sm:$0xff]   ;;  %v3649_v39 = vld [vmem:[#allocation3 + $0x2e8] sm:$0xff]   ;;  %v3652_v48 = vld [vmem:[#allocation3 + $0x260] sm:$0xff]  }
  0x4b   : > { %3319 = vmatpush3.bf16.msra.mxu0 %v3618_v0  ;;  %2207 = vmatmul.mubr.bf16.gmra.mxu1 %v3078_v19  ;;  %v347_v56 = vld [vmem:[#allocation2 + $0x121] ss:$2 sm:$0xff]  ;;  %v323_v61 = vld [vmem:[#allocation2 + $0x120] ss:$2 sm:$0xff]  ;;  %v3650_v43 = vld [vmem:[#allocation3 + $0x228] sm:$0xff]  }
  0x4c   : > { %3359 = vmatpush3.bf16.msra.mxu1 %v3619_v1  ;;  %3320 = vmatprep.subr.bf16.mxu0 %v3620_v6  ;;  %v349_v57 = vld [vmem:[#allocation2 + $0x151] ss:$2 sm:$0xff]  ;;  %v325_v62 = vld [vmem:[#allocation2 + $0x150] ss:$2 sm:$0xff]  ;;  %v3133_v6 = vld [vmem:[%s3797_s22] sm:$0xff]  }
  0x4d   : > { %3360 = vmatprep.subr.bf16.mxu1 %v3621_v7  ;;  %2149 = vmatprep.mubr.bf16.mxu0 %v3093_v44  ;;  %v395_v58 = vld [vmem:[#allocation2 + $0x123] ss:$2 sm:$0xff]  ;;  %v3109_v59 = vpack.c.bf16 %v349_v57, %v347_v56  ;;  %v397_v60 = vld [vmem:[#allocation2 + $0x153] ss:$2 sm:$0xff]  ;;  %v3108_v0 = vpack.c.bf16 %v325_v62, %v323_v61  ;;  %v371_v1 = vld [vmem:[#allocation2 + $0x122] ss:$2 sm:$0xff]  ;;  %v3134_v8 = vunpack.c.l.bf16 %v3133_v6  ;;  %v3135_v9 = vunpack.c.h.bf16 %v3133_v6 }
  0x4e   : > { %2214 = vmatprep.mubr.bf16.mxu1 %v3095_v45  ;;  %v3111_v63 = vpack.c.bf16 %v397_v60, %v395_v58  ;;  %v373_v2 = vld [vmem:[#allocation2 + $0x152] ss:$2 sm:$0xff] }
  0x4f   : > { %3321 = vmatpush3.bf16.msra.mxu0 %v3622_v11  ;;  %v3110_v4 = vpack.c.bf16 %v373_v2, %v371_v1  ;;  %v3217_v7 = vld [vmem:[%s3797_s22 + $0x10] sm:$0xff]   ;;  %279 = vst [vmem:[#allocation2 + $0x19] sm:$0xff] %v3134_v8  ;;  %280 = vst [vmem:[#allocation2 + $0x21] sm:$0xff] %v3135_v9  ;;  %v3651_v44 = vld [vmem:[#allocation3 + $0x2a8] sm:$0xff]  }
  0x50   : > { %3361 = vmatpush3.bf16.msra.mxu1 %v3623_v12  ;;  %3322 = vmatprep.subr.bf16.mxu0 %v3624_v23  ;;  %v3142_v10 = vunpack.c.l.bf16 %v3217_v7  ;;  %v3143_v11 = vunpack.c.h.bf16 %v3217_v7  ;;  %v3640_v12 = vld [vmem:[#allocation3 + $0x278] sm:$0xff]   ;;  %v3158_v23 = vunpack.c.l.bf16 %v3221_v18  ;;  %v434_v40 = vld [vmem:[#allocation2 + $0x79] ss:$2 sm:$0xff]  ;;  %v410_v42 = vld [vmem:[#allocation2 + $0x78] ss:$2 sm:$0xff] }
  0x51   : > { %3362 = vmatprep.subr.bf16.mxu1 %v3625_v25  ;;  %v482_v41 = vld [vmem:[#allocation2 + $0x7b] ss:$2 sm:$0xff]  ;;  %v3654_v56 = vld [vmem:[#allocation3 + $0x220] sm:$0xff]  }
  0x52   : > { %2150 = vmatmul.mubr.bf16.gmra.mxu0 %v3092_v46  ;;  %283 = vst [vmem:[#allocation2 + $0x49] sm:$0xff] %v3142_v10  ;;  %284 = vst [vmem:[#allocation2 + $0x51] sm:$0xff] %v3143_v11  ;;  %v3655_v57 = vld [vmem:[#allocation3 + $0x2a0] sm:$0xff]   ;;  %v3223_v58 = vld [vmem:[%s3797_s22 + $0x40] sm:$0xff]  }
  0x53   : > { %3323 = vmatpush3.bf16.msra.mxu0 %v3626_v26  ;;  %2215 = vmatmul.mubr.bf16.gmra.mxu1 %v3094_v49  ;;  %291 = vst [vmem:[#allocation2 + $0xa9] sm:$0xff] %v3158_v23  ;;  %v3167_v60 = vunpack.c.h.bf16 %v3223_v58  ;;  %v3225_v61 = vld [vmem:[%s3797_s22 + $0x50] sm:$0xff]   ;;  %v3657_v1 = vld [vmem:[#allocation3 + $0x2d8] sm:$0xff]   ;;  %v3227_v6 = vld [vmem:[%s3797_s22 + $0x60] sm:$0xff]  }
  0x54   : > { %3363 = vmatpush3.bf16.msra.mxu1 %v3627_v27  ;;  %3324 = vmatprep.subr.bf16.mxu0 %v3628_v28  ;;  %v3174_v62 = vunpack.c.l.bf16 %v3225_v61  ;;  %v3658_v2 = vld [vmem:[#allocation3 + $0x218] sm:$0xff]   ;;  %v3229_v7 = vld [vmem:[%s3797_s22 + $0x70] sm:$0xff]   ;;  %v3662_v11 = vld [vmem:[#allocation3 + $0x210] sm:$0xff]   ;;  %v3183_v14 = vunpack.c.h.bf16 %v3227_v6 }
  0x55   : > { %3364 = vmatprep.subr.bf16.mxu1 %v3629_v29  ;;  %2157 = vmatprep.mubr.bf16.mxu0 %v3109_v59  ;;  %v3166_v59 = vunpack.c.l.bf16 %v3223_v58  ;;  %296 = vst [vmem:[#allocation2 + $0xe1] sm:$0xff] %v3167_v60  ;;  %v3191_v16 = vunpack.c.h.bf16 %v3229_v7  ;;  %v3673_v58 = vld [vmem:[#allocation3 + $0x3f8] sm:$0xff]  }
  0x56   : > { %2222 = vmatprep.mubr.bf16.mxu1 %v3111_v63  ;;  %v430_v19 = vld [vmem:[#allocation2 + $0x19] ss:$2 sm:$0xff]  ;;  %v406_v27 = vld [vmem:[#allocation2 + $0x18] ss:$2 sm:$0xff]  ;;  %v3175_v63 = vunpack.c.h.bf16 %v3225_v61  ;;  %299 = vst [vmem:[#allocation2 + $0x109] sm:$0xff] %v3174_v62  ;;  %304 = vst [vmem:[#allocation2 + $0x141] sm:$0xff] %v3183_v14 }
  0x57   : > { %3325 = vmatpush3.bf16.msra.mxu0 %v3630_v30  ;;  %v478_v21 = vld [vmem:[#allocation2 + $0x1b] ss:$2 sm:$0xff]  ;;  %295 = vst [vmem:[#allocation2 + $0xd9] sm:$0xff] %v3166_v59  ;;  %308 = vst [vmem:[#allocation2 + $0x171] sm:$0xff] %v3191_v16 }
  0x58   : > { %3365 = vmatpush3.bf16.msra.mxu1 %v3631_v31  ;;  %3326 = vmatprep.subr.bf16.mxu0 %v3632_v50  ;;  %v454_v31 = vld [vmem:[#allocation2 + $0x1a] ss:$2 sm:$0xff]  ;;  %300 = vst [vmem:[#allocation2 + $0x111] sm:$0xff] %v3175_v63 }
  0x59   : > { %3366 = vmatprep.subr.bf16.mxu1 %v3633_v51  ;;  %v432_v20 = vld [vmem:[#allocation2 + $0x49] ss:$2 sm:$0xff]  ;;  %v408_v28 = vld [vmem:[#allocation2 + $0x48] ss:$2 sm:$0xff]  ;;  %v3676_v62 = vld [vmem:[#allocation3 + $0x370] sm:$0xff]  }
  0x5a   : > { %2158 = vmatmul.mubr.bf16.gmra.mxu0 %v3108_v0  ;;  %v3065_v25 = vpack.c.bf16 %v432_v20, %v430_v19  ;;  %v480_v26 = vld [vmem:[#allocation2 + $0x4b] ss:$2 sm:$0xff]  ;;  %v3064_v30 = vpack.c.bf16 %v408_v28, %v406_v27  ;;  %v456_v32 = vld [vmem:[#allocation2 + $0x4a] ss:$2 sm:$0xff]  ;;  %v3677_v63 = vld [vmem:[#allocation3 + $0x3f0] sm:$0xff]  }
  0x5b   : > { %3327 = vmatpush3.bf16.msra.mxu0 %v3634_v52  ;;  %2223 = vmatmul.mubr.bf16.gmra.mxu1 %v3110_v4  ;;  %v3067_v29 = vpack.c.bf16 %v480_v26, %v478_v21  ;;  %v3066_v34 = vpack.c.bf16 %v456_v32, %v454_v31  ;;  %v436_v45 = vld [vmem:[#allocation2 + $0xa9] ss:$2 sm:$0xff]  ;;  %v412_v47 = vld [vmem:[#allocation2 + $0xa8] ss:$2 sm:$0xff]  ;;  %v3660_v4 = vld [vmem:[#allocation3 + $0x250] sm:$0xff]  }
  0x5c   : > { %3367 = vmatpush3.bf16.msra.mxu1 %v3635_v53  ;;  %3328 = vmatprep.subr.bf16.mxu0 %v3636_v54  ;;  %v484_v46 = vld [vmem:[#allocation2 + $0xab] ss:$2 sm:$0xff]  ;;  %v3081_v49 = vpack.c.bf16 %v436_v45, %v434_v40  ;;  %v3080_v51 = vpack.c.bf16 %v412_v47, %v410_v42  ;;  %v458_v52 = vld [vmem:[#allocation2 + $0x7a] ss:$2 sm:$0xff]  ;;  %v460_v53 = vld [vmem:[#allocation2 + $0xaa] ss:$2 sm:$0xff] }
  0x5d   : > { %3368 = vmatprep.subr.bf16.mxu1 %v3637_v55  ;;  %2263 = vmatprep.mubr.bf16.mxu0 %v3065_v25  ;;  %v3083_v50 = vpack.c.bf16 %v484_v46, %v482_v41  ;;  %v3082_v54 = vpack.c.bf16 %v460_v53, %v458_v52  ;;  %v3653_v55 = vld [vmem:[#allocation3 + $0x2e0] sm:$0xff]   ;;  %v3656_v0 = vld [vmem:[#allocation3 + $0x258] sm:$0xff]   ;;  %v3664_v26 = vld [vmem:[#allocation3 + $0x248] sm:$0xff]  }
  0x5e   : > { %2328 = vmatprep.mubr.bf16.mxu1 %v3067_v29  ;;  %v438_v8 = vld [vmem:[#allocation2 + $0xd9] ss:$2 sm:$0xff]  ;;  %v414_v10 = vld [vmem:[#allocation2 + $0xd8] ss:$2 sm:$0xff]  ;;  %v3669_v31 = vld [vmem:[#allocation3 + $0x2c0] sm:$0xff]  }
  0x5f   : > { %3329 = vmatpush3.bf16.msra.mxu0 %v3638_v3  ;;  %v3659_v3 = vld [vmem:[#allocation3 + $0x298] sm:$0xff]   ;;  %v3665_v27 = vld [vmem:[#allocation3 + $0x2c8] sm:$0xff]   ;;  %v3671_v45 = vld [vmem:[#allocation3 + $0x280] sm:$0xff]  }
  0x60   : > { %3369 = vmatpush3.bf16.msra.mxu1 %v3639_v5  ;;  %3394 = vmatprep.subr.bf16.mxu0 %v3640_v12  ;;  %v3661_v5 = vld [vmem:[#allocation3 + $0x2d0] sm:$0xff]   ;;  %v440_v17 = vld [vmem:[#allocation2 + $0x109] ss:$2 sm:$0xff]  ;;  %v416_v19 = vld [vmem:[#allocation2 + $0x108] ss:$2 sm:$0xff] }
  0x61   : > { %3434 = vmatprep.subr.bf16.mxu1 %v3641_v13  ;;  %v486_v9 = vld [vmem:[#allocation2 + $0xdb] ss:$2 sm:$0xff]  ;;  %v3182_v13 = vunpack.c.l.bf16 %v3227_v6  ;;  %v488_v18 = vld [vmem:[#allocation2 + $0x10b] ss:$2 sm:$0xff]  ;;  %v3097_v20 = vpack.c.bf16 %v440_v17, %v438_v8  ;;  %v462_v23 = vld [vmem:[#allocation2 + $0xda] ss:$2 sm:$0xff] }
  0x62   : > { %2264 = vmatmul.mubr.bf16.vlgmr.msra.gmra.mxu0 %v3064_v30  ;;  %v3663_v12 = vld [vmem:[#allocation3 + $0x290] sm:$0xff]   ;;  %v3099_v21 = vpack.c.bf16 %v488_v18, %v486_v9  ;;  %v464_v24 = vld [vmem:[#allocation2 + $0x10a] ss:$2 sm:$0xff]  ;;  %v526_v46 = vld [vmem:[#allocation2 + $0x31] ss:$2 sm:$0xff] }
  0x63   : > { %2329 = vmatmul.mubr.bf16.vlgmr.msra.gmra.mxu1 %v3066_v34  ;;  %3395 = vmatpush3.bf16.msra.mxu0 %v3642_v15  ;;  %v3190_v15 = vunpack.c.l.bf16 %v3229_v7  ;;  %303 = vst [vmem:[#allocation2 + $0x139] sm:$0xff] %v3182_v13  ;;  %v3098_v25 = vpack.c.bf16 %v464_v24, %v462_v23  ;;  %v3666_v28 = vld [vmem:[#allocation3 + $0x208] sm:$0xff]   ;;  %v3668_v30 = vld [vmem:[#allocation3 + $0x240] sm:$0xff]   ;;  %v528_v47 = vld [vmem:[#allocation2 + $0x61] ss:$2 sm:$0xff] }
  0x64   : > { %3435 = vmatpush3.bf16.msra.mxu1 %v3643_v22  ;;  %3396 = vmatprep.subr.bf16.mxu0 %v3644_v33  ;;  %v3096_v22 = vpack.c.bf16 %v416_v19, %v414_v10  ;;  %v3667_v29 = vld [vmem:[#allocation3 + $0x288] sm:$0xff]   ;;  %v504_v53 = vld [vmem:[#allocation2 + $0x60] ss:$2 sm:$0xff]  ;;  %v580_v6 = vld [vmem:[#allocation2 + $0xc3] ss:$2 sm:$0xff] }
  0x65   : > { %3436 = vmatprep.subr.bf16.mxu1 %v3645_v35  ;;  %2271 = vmatprep.mubr.bf16.mxu0 %v3081_v49  ;;  %307 = vst [vmem:[#allocation2 + $0x169] sm:$0xff] %v3190_v15  ;;  %v574_v49 = vld [vmem:[#allocation2 + $0x33] ss:$2 sm:$0xff]  ;;  %v3674_v60 = vld [vmem:[#allocation3 + $0x338] sm:$0xff]   ;;  %v506_v7 = vld [vmem:[#allocation2 + $0x90] ss:$2 sm:$0xff] }
  0x66   : > { %2336 = vmatprep.mubr.bf16.mxu1 %v3083_v50  ;;  %v576_v50 = vld [vmem:[#allocation2 + $0x63] ss:$2 sm:$0xff]  ;;  %v508_v8 = vld [vmem:[#allocation2 + $0xc0] ss:$2 sm:$0xff]  ;;  %v3680_v14 = vld [vmem:[#allocation3 + $0x368] sm:$0xff]  }
  0x67   : > { %3397 = vmatpush3.bf16.msra.mxu0 %v3646_v36  ;;  %v3071_v52 = vpack.c.bf16 %v576_v50, %v574_v49  ;;  %v3675_v61 = vld [vmem:[#allocation3 + $0x3b8] sm:$0xff]   ;;  %v3084_v10 = vpack.c.bf16 %v508_v8, %v506_v7  ;;  %v3681_v15 = vld [vmem:[#allocation3 + $0x3e8] sm:$0xff]   ;;  %v3684_v18 = vld [vmem:[#allocation3 + $0x360] sm:$0xff]  }
  0x68   : > { %3437 = vmatpush3.bf16.msra.mxu1 %v3647_v37  ;;  %3398 = vmatprep.subr.bf16.mxu0 %v3648_v38  ;;  %v3682_v16 = vld [vmem:[#allocation3 + $0x328] sm:$0xff]   ;;  %v3685_v19 = vld [vmem:[#allocation3 + $0x3e0] sm:$0xff]   ;;  %v536_v23 = vld [vmem:[#allocation2 + $0x121] ss:$2 sm:$0xff] }
  0x69   : > { %3438 = vmatprep.subr.bf16.mxu1 %v3649_v39  ;;  %v3683_v17 = vld [vmem:[#allocation3 + $0x3a8] sm:$0xff]   ;;  %v598_v7 = vld [vmem:[#allocation2 + $0x48] ss:$2 sm:$0xff] }
  0x6a   : > { %2272 = vmatmul.mubr.bf16.gmra.mxu0 %v3080_v51  ;;  %v442_v32 = vld [vmem:[#allocation2 + $0x139] ss:$2 sm:$0xff]  ;;  %v418_v37 = vld [vmem:[#allocation2 + $0x138] ss:$2 sm:$0xff] }
  0x6b   : > { %2337 = vmatmul.mubr.bf16.gmra.mxu1 %v3082_v54  ;;  %3399 = vmatpush3.bf16.msra.mxu0 %v3650_v43  ;;  %v490_v34 = vld [vmem:[#allocation2 + $0x13b] ss:$2 sm:$0xff]  ;;  %v466_v41 = vld [vmem:[#allocation2 + $0x13a] ss:$2 sm:$0xff] }
  0x6c   : > { %3439 = vmatpush3.bf16.msra.mxu1 %v3651_v44  ;;  %3400 = vmatprep.subr.bf16.mxu0 %v3652_v48  ;;  %v444_v33 = vld [vmem:[#allocation2 + $0x169] ss:$2 sm:$0xff]  ;;  %v420_v38 = vld [vmem:[#allocation2 + $0x168] ss:$2 sm:$0xff]  ;;  %v3069_v48 = vpack.c.bf16 %v528_v47, %v526_v46  ;;  %v3697_v46 = vld [vmem:[#allocation3 + $0x3c8] sm:$0xff]  }
  0x6d   : > { %3440 = vmatprep.subr.bf16.mxu1 %v3653_v55  ;;  %2279 = vmatprep.mubr.bf16.mxu0 %v3097_v20  ;;  %v3113_v35 = vpack.c.bf16 %v444_v33, %v442_v32  ;;  %v492_v36 = vld [vmem:[#allocation2 + $0x16b] ss:$2 sm:$0xff]  ;;  %v3112_v40 = vpack.c.bf16 %v420_v38, %v418_v37  ;;  %v468_v42 = vld [vmem:[#allocation2 + $0x16a] ss:$2 sm:$0xff]  ;;  %v3692_v38 = vld [vmem:[#allocation3 + $0x350] sm:$0xff]  }
  0x6e   : > { %2344 = vmatprep.mubr.bf16.mxu1 %v3099_v21  ;;  %v3115_v39 = vpack.c.bf16 %v492_v36, %v490_v34  ;;  %v3114_v43 = vpack.c.bf16 %v468_v42, %v466_v41  ;;  %v3670_v44 = vld [vmem:[#allocation3 + $0x200] sm:$0xff]   ;;  %v3688_v34 = vld [vmem:[#allocation3 + $0x358] sm:$0xff]   ;;  %v3695_v41 = vld [vmem:[#allocation3 + $0x390] sm:$0xff]  }
  0x6f   : > { %3401 = vmatpush3.bf16.msra.mxu0 %v3654_v56  ;;  %v502_v51 = vld [vmem:[#allocation2 + $0x30] ss:$2 sm:$0xff]  ;;  %v3672_v56 = vld [vmem:[#allocation3 + $0x378] sm:$0xff]   ;;  %v582_v24 = vld [vmem:[#allocation2 + $0xf3] ss:$2 sm:$0xff] }
  0x70   : > { %3441 = vmatpush3.bf16.msra.mxu1 %v3655_v57  ;;  %3402 = vmatprep.subr.bf16.mxu0 %v3656_v0  ;;  %v550_v54 = vld [vmem:[#allocation2 + $0x32] ss:$2 sm:$0xff]  ;;  %v552_v55 = vld [vmem:[#allocation2 + $0x62] ss:$2 sm:$0xff]  ;;  %v3068_v57 = vpack.c.bf16 %v504_v53, %v502_v51  ;;  %v538_v49 = vld [vmem:[#allocation2 + $0x151] ss:$2 sm:$0xff] }
  0x71   : > { %3442 = vmatprep.subr.bf16.mxu1 %v3657_v1  ;;  %v3070_v59 = vpack.c.bf16 %v552_v55, %v550_v54  ;;  %v3678_v0 = vld [vmem:[#allocation3 + $0x330] sm:$0xff]   ;;  %v3686_v20 = vld [vmem:[#allocation3 + $0x320] sm:$0xff]   ;;  %v3690_v36 = vld [vmem:[#allocation3 + $0x318] sm:$0xff]  }
  0x72   : > { %2280 = vmatmul.mubr.bf16.gmra.mxu0 %v3096_v22  ;;  %v3679_v1 = vld [vmem:[#allocation3 + $0x3b0] sm:$0xff]   ;;  %v3687_v21 = vld [vmem:[#allocation3 + $0x3a0] sm:$0xff]   ;;  %v3691_v37 = vld [vmem:[#allocation3 + $0x398] sm:$0xff]  }
  0x73   : > { %3403 = vmatpush3.bf16.msra.mxu0 %v3658_v2  ;;  %2345 = vmatmul.mubr.bf16.gmra.mxu1 %v3098_v25  ;;  %v530_v2 = vld [vmem:[#allocation2 + $0x91] ss:$2 sm:$0xff]  ;;  %v560_v32 = vld [vmem:[#allocation2 + $0x122] ss:$2 sm:$0xff]  ;;  %v562_v53 = vld [vmem:[#allocation2 + $0x152] ss:$2 sm:$0xff] }
  0x74   : > { %3443 = vmatpush3.bf16.msra.mxu1 %v3659_v3  ;;  %3404 = vmatprep.subr.bf16.mxu0 %v3660_v4  ;;  %v532_v3 = vld [vmem:[#allocation2 + $0xc1] ss:$2 sm:$0xff]  ;;  %v534_v22 = vld [vmem:[#allocation2 + $0xf1] ss:$2 sm:$0xff]  ;;  %v514_v51 = vld [vmem:[#allocation2 + $0x150] ss:$2 sm:$0xff] }
  0x75   : > { %3444 = vmatprep.subr.bf16.mxu1 %v3661_v5  ;;  %2287 = vmatprep.mubr.bf16.mxu0 %v3113_v35  ;;  %v578_v4 = vld [vmem:[#allocation2 + $0x93] ss:$2 sm:$0xff]  ;;  %v3085_v5 = vpack.c.bf16 %v532_v3, %v530_v2  ;;  %v584_v25 = vld [vmem:[#allocation2 + $0x123] ss:$2 sm:$0xff]  ;;  %v600_v8 = vld [vmem:[#allocation2 + $0x78] ss:$2 sm:$0xff] }
  0x76   : > { %2352 = vmatprep.mubr.bf16.mxu1 %v3115_v39  ;;  %v3087_v9 = vpack.c.bf16 %v580_v6, %v578_v4  ;;  %v3689_v35 = vld [vmem:[#allocation3 + $0x3d8] sm:$0xff]   ;;  %v3693_v39 = vld [vmem:[#allocation3 + $0x3d0] sm:$0xff]   ;;  %v3230_v42 = vld [vmem:[%s3797_s22 + $0x78] sm:$0xff]  }
  0x77   : > { %3405 = vmatpush3.bf16.msra.mxu0 %v3662_v11  ;;  %v554_v11 = vld [vmem:[#allocation2 + $0x92] ss:$2 sm:$0xff]  ;;  %v586_v50 = vld [vmem:[#allocation2 + $0x153] ss:$2 sm:$0xff] }
  0x78   : > { %3445 = vmatpush3.bf16.msra.mxu1 %v3663_v12  ;;  %3406 = vmatprep.subr.bf16.mxu0 %v3664_v26  ;;  %v556_v12 = vld [vmem:[#allocation2 + $0xc2] ss:$2 sm:$0xff]  ;;  %v3101_v26 = vpack.c.bf16 %v536_v23, %v534_v22  ;;  %v3698_v47 = vld [vmem:[#allocation3 + $0x308] sm:$0xff]   ;;  %v630_v23 = vld [vmem:[#allocation2 + $0x109] ss:$2 sm:$0xff] }
  0x79   : > { %3446 = vmatprep.subr.bf16.mxu1 %v3665_v27  ;;  %v3086_v13 = vpack.c.bf16 %v556_v12, %v554_v11  ;;  %v3103_v27 = vpack.c.bf16 %v584_v25, %v582_v24  ;;  %v3701_v54 = vld [vmem:[#allocation3 + $0x3c0] sm:$0xff]   ;;  %v628_v12 = vld [vmem:[#allocation2 + $0xd9] ss:$2 sm:$0xff]  ;;  %v652_v22 = vld [vmem:[#allocation2 + $0xda] ss:$2 sm:$0xff] }
  0x7a   : > { %2288 = vmatmul.mubr.bf16.gmra.mxu0 %v3112_v40  ;;  %v3694_v40 = vld [vmem:[#allocation3 + $0x310] sm:$0xff]   ;;  %v3702_v55 = vld [vmem:[#allocation3 + $0x300] sm:$0xff]  }
  0x7b   : > { %3407 = vmatpush3.bf16.msra.mxu0 %v3666_v28  ;;  %2353 = vmatmul.mubr.bf16.gmra.mxu1 %v3114_v43  ;;  %v510_v28 = vld [vmem:[#allocation2 + $0xf0] ss:$2 sm:$0xff]  ;;  %v3194_v43 = vunpack.c.l.bf16 %v3230_v42  ;;  %v670_v4 = vld [vmem:[#allocation2 + $0x4b] ss:$2 sm:$0xff] }
  0x7c   : > { %3447 = vmatpush3.bf16.msra.mxu1 %v3667_v29  ;;  %3408 = vmatprep.subr.bf16.mxu0 %v3668_v30  ;;  %v512_v29 = vld [vmem:[#allocation2 + $0x120] ss:$2 sm:$0xff]  ;;  %v626_v11 = vld [vmem:[#allocation2 + $0xa9] ss:$2 sm:$0xff]  ;;  %v632_v24 = vld [vmem:[#allocation2 + $0x139] ss:$2 sm:$0xff] }
  0x7d   : > { %3448 = vmatprep.subr.bf16.mxu1 %v3669_v31  ;;  %2393 = vmatprep.mubr.bf16.mxu0 %v3069_v48  ;;  %v558_v30 = vld [vmem:[#allocation2 + $0xf2] ss:$2 sm:$0xff]  ;;  %v3100_v31 = vpack.c.bf16 %v512_v29, %v510_v28  ;;  %309 = vst [vmem:[#allocation2 + $0x181] sm:$0xff] %v3194_v43  ;;  %v678_v25 = vld [vmem:[#allocation2 + $0x10b] ss:$2 sm:$0xff]  ;;  %v3105_v29 = vpack.c.bf16 %v632_v24, %v630_v23 }
  0x7e   : > { %2458 = vmatprep.mubr.bf16.mxu1 %v3071_v52  ;;  %v3102_v33 = vpack.c.bf16 %v560_v32, %v558_v30  ;;  %v3699_v48 = vld [vmem:[#allocation3 + $0x388] sm:$0xff]   ;;  %v3700_v52 = vld [vmem:[#allocation3 + $0x340] sm:$0xff]  }
  0x7f   : > { %3409 = vmatpush3.bf16.msra.mxu0 %v3670_v44  ;;  %v3195_v44 = vunpack.c.h.bf16 %v3230_v42  ;;  %v608_v32 = vld [vmem:[#allocation2 + $0x138] ss:$2 sm:$0xff]  ;;  %v610_v43 = vld [vmem:[#allocation2 + $0x168] ss:$2 sm:$0xff] }
  0x80   : > { %3449 = vmatpush3.bf16.msra.mxu1 %v3671_v45  ;;  %3474 = vmatprep.subr.bf16.mxu0 %v3672_v56  ;;  %v3696_v45 = vld [vmem:[#allocation3 + $0x348] sm:$0xff]   ;;  %v3703_v56 = vld [vmem:[#allocation3 + $0x380] sm:$0xff]  }
  0x81   : > { %3514 = vmatprep.subr.bf16.mxu1 %v3673_v58  ;;  %310 = vst [vmem:[#allocation2 + $0x189] sm:$0xff] %v3195_v44  ;;  %v612_v44 = vld [vmem:[#allocation2 + $0x198] ss:$2 sm:$0xff] }
  0x82   : > { %2394 = vmatmul.mubr.bf16.vlgmr.msra.gmra.mxu0 %v3068_v57 }
  0x83   : > { %2459 = vmatmul.mubr.bf16.vlgmr.msra.gmra.mxu1 %v3070_v59  ;;  %3475 = vmatpush3.bf16.msra.mxu0 %v3674_v60 }
  0x84   : > { %3515 = vmatpush3.bf16.msra.mxu1 %v3675_v61  ;;  %3476 = vmatprep.subr.bf16.mxu0 %v3676_v62 }
  0x85   : > { %3516 = vmatprep.subr.bf16.mxu1 %v3677_v63  ;;  %2401 = vmatprep.mubr.bf16.mxu0 %v3085_v5  ;;  %v672_v5 = vld [vmem:[#allocation2 + $0x7b] ss:$2 sm:$0xff] }
  0x86   : > { %2466 = vmatprep.mubr.bf16.mxu1 %v3087_v9  ;;  %v3075_v6 = vpack.c.bf16 %v672_v5, %v670_v4  ;;  %v646_v9 = vld [vmem:[#allocation2 + $0x4a] ss:$2 sm:$0xff] }
  0x87   : > { %3477 = vmatpush3.bf16.msra.mxu0 %v3678_v0  ;;  %v622_v0 = vld [vmem:[#allocation2 + $0x49] ss:$2 sm:$0xff] }
  0x88   : > { %3517 = vmatpush3.bf16.msra.mxu1 %v3679_v1  ;;  %3478 = vmatprep.subr.bf16.mxu0 %v3680_v14  ;;  %v540_v57 = vld [vmem:[#allocation2 + $0x181] ss:$2 sm:$0xff]  ;;  %v516_v59 = vld [vmem:[#allocation2 + $0x180] ss:$2 sm:$0xff] }
  0x89   : > { %3518 = vmatprep.subr.bf16.mxu1 %v3681_v15  ;;  %v588_v58 = vld [vmem:[#allocation2 + $0x183] ss:$2 sm:$0xff]  ;;  %v3117_v60 = vpack.c.bf16 %v540_v57, %v538_v49  ;;  %v3116_v62 = vpack.c.bf16 %v516_v59, %v514_v51  ;;  %v564_v63 = vld [vmem:[#allocation2 + $0x182] ss:$2 sm:$0xff]  ;;  %v3072_v15 = vpack.c.bf16 %v600_v8, %v598_v7 }
  0x8a   : > { %2402 = vmatmul.mubr.bf16.gmra.mxu0 %v3084_v10  ;;  %v3119_v61 = vpack.c.bf16 %v588_v58, %v586_v50  ;;  %v624_v1 = vld [vmem:[#allocation2 + $0x79] ss:$2 sm:$0xff]  ;;  %v3118_v2 = vpack.c.bf16 %v564_v63, %v562_v53  ;;  %v648_v10 = vld [vmem:[#allocation2 + $0x7a] ss:$2 sm:$0xff] }
  0x8b   : > { %2467 = vmatmul.mubr.bf16.gmra.mxu1 %v3086_v13  ;;  %3479 = vmatpush3.bf16.msra.mxu0 %v3682_v16  ;;  %v3073_v3 = vpack.c.bf16 %v624_v1, %v622_v0  ;;  %v674_v13 = vld [vmem:[#allocation2 + $0xab] ss:$2 sm:$0xff]  ;;  %v676_v14 = vld [vmem:[#allocation2 + $0xdb] ss:$2 sm:$0xff]  ;;  %v3074_v16 = vpack.c.bf16 %v648_v10, %v646_v9 }
  0x8c   : > { %3519 = vmatpush3.bf16.msra.mxu1 %v3683_v17  ;;  %3480 = vmatprep.subr.bf16.mxu0 %v3684_v18  ;;  %v3089_v17 = vpack.c.bf16 %v628_v12, %v626_v11  ;;  %v3091_v18 = vpack.c.bf16 %v676_v14, %v674_v13 }
  0x8d   : > { %3520 = vmatprep.subr.bf16.mxu1 %v3685_v19  ;;  %2409 = vmatprep.mubr.bf16.mxu0 %v3101_v26  ;;  %v602_v19 = vld [vmem:[#allocation2 + $0xa8] ss:$2 sm:$0xff]  ;;  %v680_v26 = vld [vmem:[#allocation2 + $0x13b] ss:$2 sm:$0xff] }
  0x8e   : > { %2474 = vmatprep.mubr.bf16.mxu1 %v3103_v27  ;;  %v3107_v30 = vpack.c.bf16 %v680_v26, %v678_v25 }
  0x8f   : > { %3481 = vmatpush3.bf16.msra.mxu0 %v3686_v20  ;;  %v604_v20 = vld [vmem:[#allocation2 + $0xd8] ss:$2 sm:$0xff] }
  0x90   : > { %3521 = vmatpush3.bf16.msra.mxu1 %v3687_v21  ;;  %3482 = vmatprep.subr.bf16.mxu0 %v3688_v34  ;;  %v650_v21 = vld [vmem:[#allocation2 + $0xaa] ss:$2 sm:$0xff]  ;;  %v3088_v27 = vpack.c.bf16 %v604_v20, %v602_v19  ;;  %v656_v34 = vld [vmem:[#allocation2 + $0x13a] ss:$2 sm:$0xff] }
  0x91   : > { %3522 = vmatprep.subr.bf16.mxu1 %v3689_v35  ;;  %v3090_v28 = vpack.c.bf16 %v652_v22, %v650_v21  ;;  %v634_v35 = vld [vmem:[#allocation2 + $0x169] ss:$2 sm:$0xff] }
  0x92   : > { %2410 = vmatmul.mubr.bf16.gmra.mxu0 %v3100_v31  ;;  %v606_v31 = vld [vmem:[#allocation2 + $0x108] ss:$2 sm:$0xff] }
  0x93   : > { %2475 = vmatmul.mubr.bf16.gmra.mxu1 %v3102_v33  ;;  %3483 = vmatpush3.bf16.msra.mxu0 %v3690_v36  ;;  %v654_v33 = vld [vmem:[#allocation2 + $0x10a] ss:$2 sm:$0xff]  ;;  %v636_v36 = vld [vmem:[#allocation2 + $0x199] ss:$2 sm:$0xff] }
  0x94   : > { %3523 = vmatpush3.bf16.msra.mxu1 %v3691_v37  ;;  %3484 = vmatprep.subr.bf16.mxu0 %v3692_v38  ;;  %v682_v37 = vld [vmem:[#allocation2 + $0x16b] ss:$2 sm:$0xff]  ;;  %v684_v38 = vld [vmem:[#allocation2 + $0x19b] ss:$2 sm:$0xff] }
  0x95   : > { %3524 = vmatprep.subr.bf16.mxu1 %v3693_v39  ;;  %2417 = vmatprep.mubr.bf16.mxu0 %v3117_v60  ;;  %v3104_v39 = vpack.c.bf16 %v608_v32, %v606_v31  ;;  %v3123_v42 = vpack.c.bf16 %v684_v38, %v682_v37 }
  0x96   : > { %2482 = vmatprep.mubr.bf16.mxu1 %v3119_v61 }
  0x97   : > { %3485 = vmatpush3.bf16.msra.mxu0 %v3694_v40  ;;  %v3106_v40 = vpack.c.bf16 %v656_v34, %v654_v33 }
  0x98   : > { %3525 = vmatpush3.bf16.msra.mxu1 %v3695_v41  ;;  %3486 = vmatprep.subr.bf16.mxu0 %v3696_v45  ;;  %v3121_v41 = vpack.c.bf16 %v636_v36, %v634_v35  ;;  %v658_v45 = vld [vmem:[#allocation2 + $0x16a] ss:$2 sm:$0xff] }
  0x99   : > { %3526 = vmatprep.subr.bf16.mxu1 %v3697_v46  ;;  %v660_v46 = vld [vmem:[#allocation2 + $0x19a] ss:$2 sm:$0xff] }
  0x9a   : > { %2418 = vmatmul.mubr.bf16.gmra.mxu0 %v3116_v62 }
  0x9b   : > { %3487 = vmatpush3.bf16.msra.mxu0 %v3698_v47  ;;  %2483 = vmatmul.mubr.bf16.gmra.mxu1 %v3118_v2  ;;  %v3120_v47 = vpack.c.bf16 %v612_v44, %v610_v43 }
  0x9c   : > { %3527 = vmatpush3.bf16.msra.mxu1 %v3699_v48  ;;  %3488 = vmatprep.subr.bf16.mxu0 %v3700_v52  ;;  %v3122_v48 = vpack.c.bf16 %v660_v46, %v658_v45 }
  0x9d   : > { %3528 = vmatprep.subr.bf16.mxu1 %v3701_v54  ;;  %2523 = vmatprep.mubr.bf16.mxu0 %v3073_v3 }
  0x9e   : > { %2588 = vmatprep.mubr.bf16.mxu1 %v3075_v6 }
  0x9f   : > { %3489 = vmatpush3.bf16.msra.mxu0 %v3702_v55 }
  0xa0   : > { %3529 = vmatpush3.bf16.msra.mxu1 %v3703_v56 }
  0xa2   : > { %2524 = vmatmul.mubr.bf16.vlgmr.msra.gmra.mxu0 %v3072_v15 }
  0xa3   : > { %2589 = vmatmul.mubr.bf16.vlgmr.msra.gmra.mxu1 %v3074_v16  ;;  %2531 = vmatprep.mubr.bf16.mxu0 %v3089_v17 }
  0xa4   : > { %2596 = vmatprep.mubr.bf16.mxu1 %v3091_v18 }
  0xaa   : > { %2532 = vmatmul.mubr.bf16.gmra.mxu0 %v3088_v27 }
  0xab   : > { %2597 = vmatmul.mubr.bf16.gmra.mxu1 %v3090_v28  ;;  %2539 = vmatprep.mubr.bf16.mxu0 %v3105_v29 }
  0xac   : > { %2604 = vmatprep.mubr.bf16.mxu1 %v3107_v30 }
  0xb2   : > { %2540 = vmatmul.mubr.bf16.gmra.mxu0 %v3104_v39 }
  0xb3   : > { %2605 = vmatmul.mubr.bf16.gmra.mxu1 %v3106_v40  ;;  %2547 = vmatprep.mubr.bf16.mxu0 %v3121_v41 }
  0xb4   : > { %2612 = vmatprep.mubr.bf16.mxu1 %v3123_v42 }
  0xba   : > { %2548 = vmatmul.mubr.bf16.gmra.mxu0 %v3120_v47 }
  0xbb   : > { %2613 = vmatmul.mubr.bf16.gmra.mxu1 %v3122_v48 }
 0x102   : > { %v3250_v49 = vpop.f32.mrf.mxu0 }
 0x103   : > { %v3290_v50 = vpop.f32.mrf.mxu1 }
 0x104   : > { %v3251_v51 = vpop.f32.mrf.mxu0 }
 0x105   : > { %v3291_v52 = vpop.f32.mrf.mxu1  ;;  %v3252_v53 = vadd.f32 %v3251_v51, %v3250_v49 }
 0x106   : > { %v3292_v54 = vadd.f32 %v3291_v52, %v3290_v50  ;;  %v3253_v55 = vpop.f32.mrf.mxu0 }
 0x107   : > { %v3293_v56 = vpop.f32.mrf.mxu1 }
 0x108   : > { %v3815_v57 = vadd.f32 %v3292_v54, %v3252_v53  ;;  %v3254_v58 = vpop.f32.mrf.mxu0 }
 0x109   : > { %v3294_v59 = vpop.f32.mrf.mxu1  ;;  %v3255_v60 = vadd.f32 %v3254_v58, %v3253_v55 }
 0x10a   : > { %v3295_v61 = vadd.f32 %v3294_v59, %v3293_v56  ;;  %v3256_v63 = vpop.f32.mrf.mxu0 }
 0x10b   : > { %v3296_v0 = vpop.f32.mrf.mxu1 }
 0x10c   : > { %v3817_v62 = vadd.f32 %v3295_v61, %v3255_v60  ;;  %v3257_v1 = vpop.f32.mrf.mxu0 }
 0x10d   : > { %v3297_v2 = vpop.f32.mrf.mxu1  ;;  %v3258_v3 = vadd.f32 %v3257_v1, %v3256_v63 }
 0x10e   : > { %v3298_v4 = vadd.f32 %v3297_v2, %v3296_v0  ;;  %v3259_v5 = vpop.f32.mrf.mxu0 }
 0x10f   : > { %v3299_v6 = vpop.f32.mrf.mxu1 }
 0x110   : > { %v3819_v7 = vadd.f32 %v3298_v4, %v3258_v3  ;;  %v3260_v8 = vpop.f32.mrf.mxu0 }
 0x111   : > { %v3300_v9 = vpop.f32.mrf.mxu1  ;;  %v3261_v10 = vadd.f32 %v3260_v8, %v3259_v5 }
 0x112   : > { %v3301_v11 = vadd.f32 %v3300_v9, %v3299_v6  ;;  %v3262_v13 = vpop.f32.mrf.mxu0 }
 0x113   : > { %v3302_v14 = vpop.f32.mrf.mxu1 }
 0x114   : > { %v3821_v12 = vadd.f32 %v3301_v11, %v3261_v10  ;;  %v3263_v15 = vpop.f32.mrf.mxu0 }
 0x115   : > { %v3303_v16 = vpop.f32.mrf.mxu1  ;;  %v3264_v17 = vadd.f32 %v3263_v15, %v3262_v13 }
 0x116   : > { %v3304_v18 = vadd.f32 %v3303_v16, %v3302_v14  ;;  %v3265_v19 = vpop.f32.mrf.mxu0 }
 0x117   : > { %v3305_v20 = vpop.f32.mrf.mxu1 }
 0x118   : > { %v3823_v21 = vadd.f32 %v3304_v18, %v3264_v17  ;;  %v3266_v22 = vpop.f32.mrf.mxu0 }
 0x119   : > { %v3306_v23 = vpop.f32.mrf.mxu1  ;;  %v3267_v24 = vadd.f32 %v3266_v22, %v3265_v19 }
 0x11a   : > { %v3307_v25 = vadd.f32 %v3306_v23, %v3305_v20  ;;  %v3268_v26 = vpop.f32.mrf.mxu0 }
 0x11b   : > { %v3308_v28 = vpop.f32.mrf.mxu1 }
 0x11c   : > { %v3825_v27 = vadd.f32 %v3307_v25, %v3267_v24  ;;  %v3269_v29 = vpop.f32.mrf.mxu0 }
 0x11d   : > { %v3270_v30 = vadd.f32 %v3269_v29, %v3268_v26  ;;  %v3309_v31 = vpop.f32.mrf.mxu1 }
 0x11e   : > { %v3310_v32 = vadd.f32 %v3309_v31, %v3308_v28  ;;  %v3271_v33 = vpop.f32.mrf.mxu0 }
 0x11f   : > { %v3311_v34 = vpop.f32.mrf.mxu1 }
 0x120   : > { %v3827_v35 = vadd.f32 %v3310_v32, %v3270_v30  ;;  %v3272_v36 = vpop.f32.mrf.mxu0 }
 0x121   : > { %v3273_v37 = vadd.f32 %v3272_v36, %v3271_v33  ;;  %v3312_v38 = vpop.f32.mrf.mxu1 }
 0x122   : > { %3985 = vst [vmem:[#allocation6_spill] sm:$0xff] %v3827_v35  ;;  %v3313_v39 = vadd.f32 %v3312_v38, %v3311_v34  ;;  %v3330_v41 = vpop.f32.mrf.mxu0 }
 0x123   : > { %v3370_v42 = vpop.f32.mrf.mxu1 }
 0x124   : > { %v3829_v40 = vadd.f32 %v3313_v39, %v3273_v37  ;;  %v3331_v43 = vpop.f32.mrf.mxu0 }
 0x125   : > { %v3371_v44 = vpop.f32.mrf.mxu1 }
 0x126   : > { %3986 = vst [vmem:[#allocation7_spill] sm:$0xff] %v3829_v40  ;;  %v3333_v45 = vpop.f32.mrf.mxu0 }
 0x127   : > { %v3831_v46 = vpop.f32.mrf.mxu1 }
 0x128   : > { %v3334_v47 = vpop.f32.mrf.mxu0 }
 0x129   : > { %v3833_v48 = vpop.f32.mrf.mxu1 }
 0x12a   : > { %v3336_v49 = vpop.f32.mrf.mxu0 }
 0x12b   : > { %v3835_v50 = vpop.f32.mrf.mxu1 }
 0x12c   : > { %v3337_v51 = vpop.f32.mrf.mxu0 }
 0x12d   : > { %v3837_v52 = vpop.f32.mrf.mxu1 }
 0x12e   : > { %v3839_v53 = vpop.f32.mrf.mxu0 }
 0x12f   : > { %v3841_v54 = vpop.f32.mrf.mxu1 }
 0x130   : > { %v3340_v55 = vpop.f32.mrf.mxu0 }
 0x131   : > { %v3843_v56 = vpop.f32.mrf.mxu1 }
 0x132   : > { %v3845_v58 = vpop.f32.mrf.mxu0 }
 0x133   : > { %v3847_v59 = vpop.f32.mrf.mxu1 }
 0x134   : > { %v3849_v60 = vpop.f32.mrf.mxu0 }
 0x135   : > { %v3851_v61 = vpop.f32.mrf.mxu1 }
 0x136   : > { %v3853_v63 = vpop.f32.mrf.mxu0 }
 0x137   : > { %v3855_v0 = vpop.f32.mrf.mxu1 }
 0x138   : > { %v3857_v1 = vpop.f32.mrf.mxu0 }
 0x139   : > { %v3859_v2 = vpop.f32.mrf.mxu1 }
 0x13a   : > { %v3861_v3 = vpop.f32.mrf.mxu0 }
 0x13b   : > { %v3863_v4 = vpop.f32.mrf.mxu1 }
 0x13c   : > { %3987 = vst [vmem:[#allocation8_spill] sm:$0xff] %v3863_v4  ;;  %v3865_v5 = vpop.f32.mrf.mxu0  ;;  %v3335_v4 = vadd.f32 %v3334_v47, %v3333_v45 }
 0x13d   : > { %v3867_v6 = vpop.f32.mrf.mxu1 }
 0x13e   : > { %3988 = vst [vmem:[#allocation9_spill] sm:$0xff] %v3867_v6  ;;  %v3869_v8 = vpop.f32.mrf.mxu0 }
 0x13f   : > { %3989 = vst [vmem:[#allocation10_spill] sm:$0xff] %v3869_v8  ;;  %v3871_v9 = vpop.f32.mrf.mxu1 }
 0x140   : > { %3990 = vst [vmem:[#allocation11_spill] sm:$0xff] %v3871_v9  ;;  %v3873_v10 = vpop.f32.mrf.mxu0 }
 0x141   : > { %3991 = vst [vmem:[#allocation12_spill] sm:$0xff] %v3873_v10  ;;  %v3875_v11 = vpop.f32.mrf.mxu1 }
 0x142   : > { %3992 = vst [vmem:[#allocation13_spill] sm:$0xff] %v3875_v11  ;;  %v3410_v13 = vpop.f32.mrf.mxu0  ;;  %v3332_v11 = vadd.f32 %v3331_v43, %v3330_v41  ;;  %v2269_v41 = vadd.f32 %v3335_v4, %v3817_v62  ;;  %v3338_v43 = vadd.f32 %v3337_v51, %v3336_v49  ;;  %v3378_v62 = vadd.f32 %v3837_v52, %v3835_v50 }
 0x143   : > { %v3450_v14 = vpop.f32.mrf.mxu1  ;;  %v3344_v49 = vadd.f32 %v3849_v60, %v3845_v58  ;;  %v3381_v50 = vadd.f32 %v3843_v56, %v3841_v54 }
 0x144   : > { %v3411_v15 = vpop.f32.mrf.mxu0  ;;  %v2266_v6 = vadd.f32 %v3332_v11, %v3815_v57  ;;  %v3375_v57 = vadd.f32 %v3833_v48, %v3831_v46 }
 0x145   : > { %v3451_v16 = vpop.f32.mrf.mxu1  ;;  %v3412_v8 = vadd.f32 %v3411_v15, %v3410_v13  ;;  %v2274_v15 = vadd.f32 %v3338_v43, %v3819_v7  ;;  %v2282_v52 = vadd.f32 %v3344_v49, %v3823_v21 }
 0x146   : > { %v3413_v17 = vpop.f32.mrf.mxu0  ;;  %v2334_v13 = vadd.f32 %v3375_v57, %v2269_v41 }
 0x147   : > { %v3453_v18 = vpop.f32.mrf.mxu1 }
 0x148   : > { %v3414_v19 = vpop.f32.mrf.mxu0 }
 0x149   : > { %v3454_v20 = vpop.f32.mrf.mxu1  ;;  %v3415_v47 = vadd.f32 %v3414_v19, %v3413_v17  ;;  %v2339_v19 = vadd.f32 %v3378_v62, %v2274_v15  ;;  %v3387_v62 = vadd.f32 %v3859_v2, %v3855_v0  ;;  %v4001_v2 = vld [vmem:[#allocation10_spill] sm:$0xff] }
 0x14a   : > { %v3416_v22 = vpop.f32.mrf.mxu0 }
 0x14b   : > { %v3877_v23 = vpop.f32.mrf.mxu1  ;;  %v2399_v46 = vadd.f32 %v3415_v47, %v2334_v13 }
 0x14c   : > { %v3417_v24 = vpop.f32.mrf.mxu0 }
 0x14d   : > { %v3879_v25 = vpop.f32.mrf.mxu1  ;;  %v3418_v48 = vadd.f32 %v3417_v24, %v3416_v22 }
 0x14e   : > { %v3419_v26 = vpop.f32.mrf.mxu0  ;;  %v3458_v54 = vadd.f32 %v3879_v25, %v3877_v23 }
 0x14f   : > { %v3881_v28 = vpop.f32.mrf.mxu1  ;;  %v2404_v43 = vadd.f32 %v3418_v48, %v2339_v19 }
 0x150   : > { %v3420_v29 = vpop.f32.mrf.mxu0 }
 0x151   : > { %v3883_v30 = vpop.f32.mrf.mxu1  ;;  %v3421_v58 = vadd.f32 %v3420_v29, %v3419_v26 }
 0x152   : > { %v3885_v31 = vpop.f32.mrf.mxu0  ;;  %v3461_v23 = vadd.f32 %v3883_v30, %v3881_v28 }
 0x153   : > { %v3887_v32 = vpop.f32.mrf.mxu1 }
 0x154   : > { %3993 = vst [vmem:[#allocation14_spill] sm:$0xff] %v3887_v32  ;;  %v3889_v33 = vpop.f32.mrf.mxu0 }
 0x155   : > { %v3891_v34 = vpop.f32.mrf.mxu1  ;;  %v3424_v47 = vadd.f32 %v3889_v33, %v3885_v31 }
 0x156   : > { %3994 = vst [vmem:[#allocation15_spill] sm:$0xff] %v3891_v34  ;;  %v3893_v36 = vpop.f32.mrf.mxu0  ;;  %v3372_v34 = vadd.f32 %v3371_v44, %v3370_v42  ;;  %v3341_v42 = vadd.f32 %v3340_v55, %v3839_v53 }
 0x157   : > { %v3895_v37 = vpop.f32.mrf.mxu1 }
 0x158   : > { %3995 = vst [vmem:[#allocation16_spill] sm:$0xff] %v3895_v37  ;;  %v3897_v38 = vpop.f32.mrf.mxu0  ;;  %v2277_v53 = vadd.f32 %v3341_v42, %v3821_v12  ;;  %v3384_v12 = vadd.f32 %v3851_v61, %v3847_v59 }
 0x159   : > { %3996 = vst [vmem:[#allocation17_spill] sm:$0xff] %v3897_v38  ;;  %v3899_v39 = vpop.f32.mrf.mxu1  ;;  %v2331_v38 = vadd.f32 %v3372_v34, %v2266_v6  ;;  %v3452_v6 = vadd.f32 %v3451_v16, %v3450_v14 }
 0x15a   : > { %3997 = vst [vmem:[#allocation18_spill] sm:$0xff] %v3899_v39  ;;  %v3901_v9 = vpop.f32.mrf.mxu0  ;;  %v2342_v57 = vadd.f32 %v3381_v50, %v2277_v53  ;;  %v2347_v26 = vadd.f32 %v3384_v12, %v2282_v52  ;;  %v4002_v53 = vld [vmem:[#allocation12_spill] sm:$0xff] }
 0x15b   : > { %v3903_v40 = vpop.f32.mrf.mxu1  ;;  %v2396_v45 = vadd.f32 %v3412_v8, %v2331_v38  ;;  %v3455_v38 = vadd.f32 %v3454_v20, %v3453_v18  ;;  %v3347_v18 = vadd.f32 %v3857_v1, %v3853_v63  ;;  %v3350_v1 = vadd.f32 %v3865_v5, %v3861_v3 }
 0x15c   : > { %3998 = vst [vmem:[#allocation19_spill] sm:$0xff] %v3903_v40  ;;  %v3906_v32 = vpop.f32.mrf.mxu0  ;;  %v2407_v29 = vadd.f32 %v3421_v58, %v2342_v57  ;;  %v4005_v58 = vld [vmem:[#allocation8_spill] sm:$0xff] }
 0x15d   : > { %v3908_v10 = vpop.f32.mrf.mxu1  ;;  %v2461_v34 = vadd.f32 %v3452_v6, %v2396_v45  ;;  %v2464_v41 = vadd.f32 %v3455_v38, %v2399_v46  ;;  %v2285_v63 = vadd.f32 %v3347_v18, %v3825_v27  ;;  %v4003_v38 = vld [vmem:[#allocation14_spill] sm:$0xff] }
 0x15e   : > { %v3910_v35 = vpop.f32.mrf.mxu0  ;;  %v2472_v49 = vadd.f32 %v3461_v23, %v2407_v29 }
 0x15f   : > { %v3912_v37 = vpop.f32.mrf.mxu1  ;;  %v2350_v48 = vadd.f32 %v3387_v62, %v2285_v63 }
 0x160   : > { %v3915_v39 = vpop.f32.mrf.mxu0  ;;  %v3999_v27 = vld [vmem:[#allocation17_spill] sm:$0xff] }
 0x161   : > { %v3917_v40 = vpop.f32.mrf.mxu1 }
 0x162   : > { %v3490_v44 = vpop.f32.mrf.mxu0 }
 0x163   : > { %v3530_v11 = vpop.f32.mrf.mxu1 }
 0x164   : > { %v3491_v51 = vpop.f32.mrf.mxu0 }
 0x165   : > { %v3531_v4 = vpop.f32.mrf.mxu1  ;;  %v3492_v8 = vadd.f32 %v3491_v51, %v3490_v44  ;;  %v2412_v51 = vadd.f32 %v3424_v47, %v2347_v26  ;;  %v4009_v26 = vld [vmem:[#allocation18_spill] sm:$0xff] }
 0x166   : > { %v3493_v55 = vpop.f32.mrf.mxu0  ;;  %v3532_v14 = vadd.f32 %v3531_v4, %v3530_v11  ;;  %v2469_v11 = vadd.f32 %v3458_v54, %v2404_v43  ;;  %v3427_v4 = vadd.f32 %v3999_v27, %v3893_v36  ;;  %v3430_v43 = vadd.f32 %v3906_v32, %v3901_v9  ;;  %v4007_v54 = vld [vmem:[#allocation7_spill] sm:$0xff] }
 0x167   : > { %v3533_v17 = vpop.f32.mrf.mxu1  ;;  %v2526_v7 = vadd.f32 %v3492_v8, %v2461_v34  ;;  %v4000_v8 = vld [vmem:[#allocation6_spill] sm:$0xff]  ;;  %v4010_v32 = vld [vmem:[#allocation11_spill] sm:$0xff] }
 0x168   : > { %v3494_v60 = vpop.f32.mrf.mxu0  ;;  %v2290_v0 = vadd.f32 %v3350_v1, %v4000_v8  ;;  %v3433_v1 = vadd.f32 %v3915_v39, %v3910_v35 }
 0x169   : > { %v3534_v16 = vpop.f32.mrf.mxu1  ;;  %v2591_v22 = vadd.f32 %v3532_v14, %v2526_v7  ;;  %v3495_v24 = vadd.f32 %v3494_v60, %v3493_v55  ;;  %v3353_v55 = vadd.f32 %v4002_v53, %v4001_v2  ;;  %v4004_v7 = vld [vmem:[#allocation15_spill] sm:$0xff]  ;;  %v4006_v60 = vld [vmem:[#allocation9_spill] sm:$0xff] }
 0x16a   : > { %v3496_v20 = vpop.f32.mrf.mxu0  ;;  %v3535_v56 = vadd.f32 %v3534_v16, %v3533_v17  ;;  %v3464_v14 = vadd.f32 %v4004_v7, %v4003_v38  ;;  %v3390_v16 = vadd.f32 %v4006_v60, %v4005_v58 }
 0x16b   : > { %v3536_v45 = vpop.f32.mrf.mxu1  ;;  %v2529_v21 = vadd.f32 %v3495_v24, %v2464_v41  ;;  %v2629_v59 = vmul.f32 0.2, %v2591_v22  ;;  %vm2621_vm0 = vcmp.ge.f32.partialorder %v2591_v22, 0.0  ;;  %v2415_v41 = vadd.f32 %v3427_v4, %v2350_v48  ;;  %v4012_v4 = vld [vmem:[#allocation19_spill] sm:$0xff] }
 0x16c   : > { %v3497_v42 = vpop.f32.mrf.mxu0  ;;  %v2477_v57 = vadd.f32 %v3464_v14, %v2412_v51 }
 0x16d   : > { %v3537_v44 = vpop.f32.mrf.mxu1  ;;  %v2594_v61 = vadd.f32 %v3535_v56, %v2529_v21  ;;  %v3498_v13 = vadd.f32 %v3497_v42, %v3496_v20  ;;  %v2637_v34 = vsel %vm2621_vm0, %v2591_v22, %v2629_v59  ;;  %v2293_v21 = vadd.f32 %v3353_v55, %v4007_v54  ;;  %v4008_v56 = vld [vmem:[#allocation16_spill] sm:$0xff]  ;;  %v4011_v59 = vld [vmem:[#allocation13_spill] sm:$0xff] }
 0x16e   : > { %v3499_v25 = vpop.f32.mrf.mxu0  ;;  %v3538_v6 = vadd.f32 %v3537_v44, %v3536_v45  ;;  %v2355_v45 = vadd.f32 %v3390_v16, %v2290_v0  ;;  %v3467_v29 = vadd.f32 %v4009_v26, %v4008_v56  ;;  %v3473_v0 = vadd.f32 %v3917_v40, %v3912_v37 }
 0x16f   : > { %v3539_v15 = vpop.f32.mrf.mxu1  ;;  %vm2622_vm1 = vcmp.ge.f32.partialorder %v2594_v61, 0.0  ;;  %v2630_v31 = vmul.f32 0.2, %v2594_v61  ;;  %v2534_v33 = vadd.f32 %v3498_v13, %v2469_v11 }
 0x170   : > { %v3500_v3 = vpop.f32.mrf.mxu0  ;;  %v2480_v13 = vadd.f32 %v3467_v29, %v2415_v41  ;;  %v2420_v63 = vadd.f32 %v3430_v43, %v2355_v45 }
 0x171   : > { %v3540_v5 = vpop.f32.mrf.mxu1  ;;  %v2638_v28 = vsel %vm2622_vm1, %v2594_v61, %v2630_v31  ;;  %v2599_v30 = vadd.f32 %v3538_v6, %v2534_v33  ;;  %v3501_v46 = vadd.f32 %v3500_v3, %v3499_v25  ;;  %v3393_v61 = vadd.f32 %v4011_v59, %v4010_v32 }
 0x172   : > { %v3199_v17 = vpack.c.bf16 %v2638_v28, %v2637_v34  ;;  %v3502_v36 = vpop.f32.mrf.mxu0  ;;  %v3541_v52 = vadd.f32 %v3540_v5, %v3539_v15  ;;  %v3470_v3 = vadd.f32 %v3908_v10, %v4012_v4 }
 0x173   : > { %v3542_v19 = vpop.f32.mrf.mxu1  ;;  %v2537_v50 = vadd.f32 %v3501_v46, %v2472_v49  ;;  %v2631_v12 = vmul.f32 0.2, %v2599_v30  ;;  %vm2623_vm2 = vcmp.ge.f32.partialorder %v2599_v30, 0.0  ;;  %v2358_v62 = vadd.f32 %v3393_v61, %v2293_v21 }
 0x174   : > { %3200 = vst [vmem:[%s3952_s26] sm:$0xff] %v3199_v17   ;;  %v3503_v22 = vpop.f32.mrf.mxu0  ;;  %v2485_v35 = vadd.f32 %v3470_v3, %v2420_v63 }
 0x175   : > { %v3543_v24 = vpop.f32.mrf.mxu1  ;;  %v2602_v18 = vadd.f32 %v3541_v52, %v2537_v50  ;;  %v3504_v20 = vadd.f32 %v3503_v22, %v3502_v36  ;;  %v2639_v15 = vsel %vm2623_vm2, %v2599_v30, %v2631_v12  ;;  %v2423_v28 = vadd.f32 %v3433_v1, %v2358_v62 }
 0x176   : > { %v3505_v47 = vpop.f32.mrf.mxu0  ;;  %v3544_v9 = vadd.f32 %v3543_v24, %v3542_v19 }
 0x177   : > { %v3545_v42 = vpop.f32.mrf.mxu1  ;;  %vm2624_vm3 = vcmp.ge.f32.partialorder %v2602_v18, 0.0  ;;  %v2632_v44 = vmul.f32 0.2, %v2602_v18  ;;  %v2542_v11 = vadd.f32 %v3504_v20, %v2477_v57  ;;  %v2488_v36 = vadd.f32 %v3473_v0, %v2423_v28 }
 0x178   : > { %v3506_v23 = vpop.f32.mrf.mxu0 }
 0x179   : > { %v3546_v25 = vpop.f32.mrf.mxu1  ;;  %v2640_v31 = vsel %vm2624_vm3, %v2602_v18, %v2632_v44  ;;  %v2607_v33 = vadd.f32 %v3544_v9, %v2542_v11  ;;  %v3507_v6 = vadd.f32 %v3506_v23, %v3505_v47 }
 0x17a   : > { %v3204_v49 = vpack.c.bf16 %v2640_v31, %v2639_v15  ;;  %v3508_v51 = vpop.f32.mrf.mxu0  ;;  %v3547_v34 = vadd.f32 %v3546_v25, %v3545_v42 }
 0x17b   : > { %v3548_v27 = vpop.f32.mrf.mxu1  ;;  %v2545_v5 = vadd.f32 %v3507_v6, %v2480_v13  ;;  %v2633_v39 = vmul.f32 0.2, %v2607_v33  ;;  %vm2625_vm4 = vcmp.ge.f32.partialorder %v2607_v33, 0.0 }
 0x17c   : > { %3231 = vst [vmem:[%s3952_s26 + $0x8] sm:$0xff] %v3204_v49   ;;  %v3509_v46 = vpop.f32.mrf.mxu0 }
 0x17d   : > { %v3549_v48 = vpop.f32.mrf.mxu1  ;;  %v2610_v8 = vadd.f32 %v3547_v34, %v2545_v5  ;;  %v3510_v30 = vadd.f32 %v3509_v46, %v3508_v51  ;;  %v2641_v7 = vsel %vm2625_vm4, %v2607_v33, %v2633_v39 }
 0x17e   : > { %v3511_v2 = vpop.f32.mrf.mxu0  ;;  %v3550_v17 = vadd.f32 %v3549_v48, %v3548_v27 }
 0x17f   : > { %v3551_v53 = vpop.f32.mrf.mxu1  ;;  %vm2626_vm5 = vcmp.ge.f32.partialorder %v2610_v8, 0.0  ;;  %v2634_v55 = vmul.f32 0.2, %v2610_v8  ;;  %v2550_v10 = vadd.f32 %v3510_v30, %v2485_v35 }
 0x180   : > { %v3512_v19 = vpop.f32.mrf.mxu0 }
 0x181   : > { %v3552_v38 = vpop.f32.mrf.mxu1  ;;  %v2642_v14 = vsel %vm2626_vm5, %v2610_v8, %v2634_v55  ;;  %v2615_v50 = vadd.f32 %v3550_v17, %v2550_v10  ;;  %v3513_v52 = vadd.f32 %v3512_v19, %v3511_v2 }
 0x182   : > { %v3209_v58 = vpack.c.bf16 %v2642_v14, %v2641_v7  ;;  %v3553_v16 = vadd.f32 %v3552_v38, %v3551_v53 }
 0x183   : > { %v2553_v60 = vadd.f32 %v3513_v52, %v2488_v36  ;;  %v2635_v40 = vmul.f32 0.2, %v2615_v50  ;;  %vm2627_vm6 = vcmp.ge.f32.partialorder %v2615_v50, 0.0 }
 0x184   : > { %3232 = vst [vmem:[%s3952_s26 + $0x10] sm:$0xff] %v3209_v58  }
 0x185   : > { %v2618_v37 = vadd.f32 %v3553_v16, %v2553_v60  ;;  %v2643_v43 = vsel %vm2627_vm6, %v2615_v50, %v2635_v40 }
 0x187   : > { %vm2628_vm7 = vcmp.ge.f32.partialorder %v2618_v37, 0.0  ;;  %v2636_v41 = vmul.f32 0.2, %v2618_v37 }
 0x189   : > { %v2644_v22 = vsel %vm2628_vm7, %v2618_v37, %v2636_v41 }
 0x18a   : > { %v3214_v24 = vpack.c.bf16 %v2644_v22, %v2643_v43 }
 0x18c   : > { %3233 = vst [vmem:[%s3952_s26 + $0x18] sm:$0xff] %v3214_v24  }
 0x18d PF: > { %s13_s9 = sadd.s32 1, %s3740_s9  }
 0x18e   : > { %p10_p1 = scmp.ge.s32.totalorder %s13_s9, 4  }
 0x190   :  { %12 = sbr.rel (!%p10_p1) target bundleno = 1 (0x1), region = 190 }
 0x195   :  { %2706 = vsyncpa [#allocation4], 1 }
 0x196   :  { %2708 = vsyncpa [#allocation4 + $0x1], 1 }

// kernel: _lambda_.12
= control target key start
LH: loop header
LB: loop body
LE: loop exit
PB: predicated region body
PF: predicated region fallthrough
CT: control target
= control target key end

     0   :  { %s2873_s15 = smov 0   ;;  %s3340_s0 = inlined_call_operand.vmem [shape: bf16[2,1,1,128], index: 0, kind: input, shape index: {}]   ;;  %s3341_s1 = inlined_call_operand.vmem [shape: bf16[2048,128], index: 1, kind: input, shape index: {}]   ;;  %s3342_s2 = inlined_call_operand.vmem [shape: bf16[2,16,128], index: 2, kind: output, shape index: {0}]   ;;  %s3343_s3 = inlined_call_operand.vmem [shape: f32[2,1,128], index: 3, kind: output, shape index: {1}]   ;;  %s3344_s4 = inlined_call_operand.vmem [shape: f32[2,1,128], index: 4, kind: output, shape index: {2}]  }
   0x1 LB: > { %s2329_s16 = sadd.s32 4294967295, %s2844_s15   ;;  %p2333_p0 = scmp.ge.s32.totalorder %s2844_s15, 1  ;;  %s2844_s15 = sphi %s2873_s15, %s15_s15  }
   0x2   : > { %p165_p1 = scmp.lt.s32.totalorder %s2844_s15, 3 }
   0x4   : > { %p166_p2 = pnand %p2333_p0, %p165_p1 }
   0x5   : > { %p195_p3 = scmp.lt.s32.totalorder (!%p166_p2), %s2329_s16, 1 }
   0x6   : > { %169 = sbr.rel (%p166_p2) target bundleno = 364 (0x16c), region = 28 }
   0xb   : > { %v2710_v0 = vld [vmem:[%s3341_s1 + $0x78] sm:$0xff]   ;;  %v2846_v3 = vmov 0.0   ;;  %v2714_v5 = vld [vmem:[%s3341_s1 + $0x70] sm:$0xff]   ;;  %v2718_v9 = vld [vmem:[%s3341_s1 + $0x68] sm:$0xff]   ;;  %s3346_s16 = smov (!%p195_p3, %s2329_s16), 1  ;;  %v420_v30 = vlaneseq }
   0xc   : > { %v2711_v1 = vld [vmem:[%s3341_s1 + $0xf8] sm:$0xff]   ;;  %2524 = vmatprep.subr.bf16.mxu0 %v2710_v0  ;;  %210 = vst [vmem:[#allocation2] sm:$0x7f] %v2846_v3  ;;  %211 = vst [vmem:[#allocation2 + $0x8] sm:$0x7f] %v2846_v3  ;;  %v2715_v6 = vld [vmem:[%s3341_s1 + $0xf0] sm:$0xff]   ;;  %s197_s5 = scalar_lea.vmem %s3340_s0, %s3346_s16  ;;  %s205_s18 = scalar_lea.vmem %s3343_s3, %s3346_s16 }
   0xd   : > { %v2712_v2 = vld [vmem:[%s3341_s1 + $0x38] sm:$0xff]   ;;  %212 = vst [vmem:[#allocation2 + $0x10] sm:$0x7f] %v2846_v3  ;;  %213 = vst [vmem:[#allocation2 + $0x18] sm:$0x7f] %v2846_v3  ;;  %2546 = vmatprep.subr.bf16.mxu1 %v2711_v1  ;;  %v2716_v7 = vld [vmem:[%s3341_s1 + $0x30] sm:$0xff]   ;;  %s208_s21 = scalar_lea.vmem %s3344_s4, %s3346_s16 }
   0xe   : > { %214 = vst [vmem:[#allocation2 + $0x20] sm:$0x7f] %v2846_v3  ;;  %215 = vst [vmem:[#allocation2 + $0x28] sm:$0x7f] %v2846_v3  ;;  %v2713_v4 = vld [vmem:[%s3341_s1 + $0xb8] sm:$0xff]   ;;  %2525 = vmatpush3.bf16.msra.mxu0 %v2712_v2  ;;  %v2717_v8 = vld [vmem:[%s3341_s1 + $0xb0] sm:$0xff]  }
   0xf   : > { %216 = vst [vmem:[#allocation2 + $0x30] sm:$0x7f] %v2846_v3  ;;  %2547 = vmatpush3.bf16.msra.mxu1 %v2713_v4  ;;  %2526 = vmatprep.subr.bf16.mxu0 %v2714_v5  ;;  %v2719_v10 = vld [vmem:[%s3341_s1 + $0xe8] sm:$0xff]   ;;  %v2722_v13 = vld [vmem:[%s3341_s1 + $0x60] sm:$0xff]   ;;  %v2726_v17 = vld [vmem:[%s3341_s1 + $0x58] sm:$0xff]   ;;  %v421_v36 = vshrl.u32 %v420_v30, 7 }
  0x10   : > { %2548 = vmatprep.subr.bf16.mxu1 %v2715_v6  ;;  %v2720_v11 = vld [vmem:[%s3341_s1 + $0x28] sm:$0xff]   ;;  %v2723_v14 = vld [vmem:[%s3341_s1 + $0xe0] sm:$0xff]   ;;  %v2727_v18 = vld [vmem:[%s3341_s1 + $0xd8] sm:$0xff]   ;;  %v2847_v44 = vmov 1983009808   ;;  %s2516_s10 = sshll.u32 %s3346_s16, 3 }
  0x11   : > { %v2721_v12 = vld [vmem:[%s3341_s1 + $0xa8] sm:$0xff]   ;;  %v2724_v15 = vld [vmem:[%s3341_s1 + $0x20] sm:$0xff]   ;;  %v2728_v19 = vld [vmem:[%s3341_s1 + $0x18] sm:$0xff]   ;;  %v418_v45 = vunpack.c.l.s4 %v2847_v44  ;;  %s202_s13 = scalar_lea.vmem %s3342_s2, %s2516_s10 }
  0x12   : > { %2527 = vmatpush3.bf16.msra.mxu0 %v2716_v7  ;;  %v2725_v16 = vld [vmem:[%s3341_s1 + $0xa0] sm:$0xff]   ;;  %v2729_v20 = vld [vmem:[%s3341_s1 + $0x98] sm:$0xff]   ;;  %v2730_v21 = vld [vmem:[%s3341_s1 + $0x50] sm:$0xff]  }
  0x13   : > { %2549 = vmatpush3.bf16.msra.mxu1 %v2717_v8  ;;  %2528 = vmatprep.subr.bf16.mxu0 %v2718_v9  ;;  %v2731_v22 = vld [vmem:[%s3341_s1 + $0xd0] sm:$0xff]   ;;  %v2734_v25 = vld [vmem:[%s3341_s1 + $0x48] sm:$0xff]   ;;  %v2738_v29 = vld [vmem:[%s3341_s1 + $0x40] sm:$0xff]   ;;  %v419_v52 = vunpack.c.0.s8 %v418_v45 }
  0x14   : > { %2550 = vmatprep.subr.bf16.mxu1 %v2719_v10  ;;  %v2732_v23 = vld [vmem:[%s3341_s1 + $0x10] sm:$0xff]   ;;  %v2735_v26 = vld [vmem:[%s3341_s1 + $0xc8] sm:$0xff]   ;;  %v2739_v31 = vld [vmem:[%s3341_s1 + $0xc0] sm:$0xff]  }
  0x15   : > { %v2733_v24 = vld [vmem:[%s3341_s1 + $0x90] sm:$0xff]   ;;  %v2736_v27 = vld [vmem:[%s3341_s1 + $0x8] sm:$0xff]   ;;  %v2740_v32 = vld [vmem:[%s3341_s1] sm:$0xff]   ;;  %v2993_v58 = vsub.s32 %v419_v52, %v421_v36 }
  0x16   : > { %2529 = vmatpush3.bf16.msra.mxu0 %v2720_v11  ;;  %v2737_v28 = vld [vmem:[%s3341_s1 + $0x88] sm:$0xff]   ;;  %v2741_v33 = vld [vmem:[%s3341_s1 + $0x80] sm:$0xff]   ;;  %v223_v41 = vld [vmem:[#allocation2 + $0x10] sm:$0xf] }
  0x17   : > { %2551 = vmatpush3.bf16.msra.mxu1 %v2721_v12  ;;  %2530 = vmatprep.subr.bf16.mxu0 %v2722_v13  ;;  %v217_v34 = vld [vmem:[%s197_s5] sm:$0x1]  ;;  %v222_v38 = vld [vmem:[#allocation2 + $0x8] sm:$0xf]  ;;  %v229_v39 = vld [vmem:[#allocation2 + $0x1] sm:$0xf] }
  0x18   : > { %2552 = vmatprep.subr.bf16.mxu1 %v2723_v14  ;;  %v221_v35 = vld [vmem:[#allocation2] sm:$0xf]  ;;  %v218_v37 = vunpack.c.l.bf16 %v217_v34  ;;  %v230_v40 = vld [vmem:[#allocation2 + $0x9] sm:$0xf]  ;;  %v231_v42 = vld [vmem:[#allocation2 + $0x11] sm:$0xf] }
  0x19   : > { %v237_v43 = vld [vmem:[#allocation2 + $0x2] sm:$0xf]  ;;  %v238_v46 = vld [vmem:[#allocation2 + $0xa] sm:$0xf]  ;;  %v239_v47 = vld [vmem:[#allocation2 + $0x12] sm:$0xf]  ;;  %v2336_v51 = vpack.c.bf16 %v229_v39, %v221_v35  ;;  %v2344_v53 = vpack.c.bf16 %v230_v40, %v222_v38  ;;  %v2352_v59 = vpack.c.bf16 %v231_v42, %v223_v41 }
  0x1a   : > { %2531 = vmatpush3.bf16.msra.mxu0 %v2724_v15  ;;  %220 = vst [vmem:[#allocation2 + $0x1b] sm:$0x1] %v218_v37  ;;  %v245_v48 = vld [vmem:[#allocation2 + $0x3] sm:$0xf]  ;;  %v246_v49 = vld [vmem:[#allocation2 + $0xb] sm:$0xf] }
  0x1b   : > { %2553 = vmatpush3.bf16.msra.mxu1 %v2725_v16  ;;  %2532 = vmatprep.subr.bf16.mxu0 %v2726_v17  ;;  %v247_v50 = vld [vmem:[#allocation2 + $0x13] sm:$0xf]  ;;  %v2337_v54 = vpack.c.bf16 %v245_v48, %v237_v43  ;;  %v2742_v55 = vld [vmem:[%s3341_s1 + $0x178] sm:$0xff]   ;;  %v2345_v56 = vpack.c.bf16 %v246_v49, %v238_v46  ;;  %v423_v61 = vrot.slane %v2336_v51, %v2993_v58  ;;  %v2751_v30 = vld [vmem:[%s3341_s1 + $0x1e8] sm:$0xff]  }
  0x1c   : > { %2554 = vmatprep.subr.bf16.mxu1 %v2727_v18  ;;  %v2743_v57 = vld [vmem:[%s3341_s1 + $0x1f8] sm:$0xff]   ;;  %v2353_v60 = vpack.c.bf16 %v247_v50, %v239_v47  ;;  %v491_v62 = vrot.slane %v2344_v53, %v2993_v58  ;;  %v559_v4 = vrot.slane %v2352_v59, %v2993_v58  ;;  %v2755_v34 = vld [vmem:[%s3341_s1 + $0x1e0] sm:$0xff]   ;;  %v2762_v41 = vld [vmem:[%s3341_s1 + $0x150] sm:$0xff]  }
  0x1d   : > { %v430_v63 = vrot.slane %v2337_v54, %v2993_v58  ;;  %v498_v3 = vrot.slane %v2345_v56, %v2993_v58  ;;  %v2744_v18 = vld [vmem:[%s3341_s1 + $0x138] sm:$0xff]   ;;  %v2756_v35 = vld [vmem:[%s3341_s1 + $0x120] sm:$0xff]   ;;  %v2763_v42 = vld [vmem:[%s3341_s1 + $0x1d0] sm:$0xff]  }
  0x1e   : > { %2533 = vmatpush3.bf16.msra.mxu0 %v2728_v19  ;;  %v2368_v6 = vcombine.low %v423_v61, %v491_v62  ;;  %v566_v8 = vrot.slane %v2353_v60, %v2993_v58  ;;  %v2757_v36 = vld [vmem:[%s3341_s1 + $0x1a0] sm:$0xff]   ;;  %v2758_v37 = vld [vmem:[%s3341_s1 + $0x158] sm:$0xff]   ;;  %v2764_v43 = vld [vmem:[%s3341_s1 + $0x110] sm:$0xff]  }
  0x1f   : > { %2555 = vmatpush3.bf16.msra.mxu1 %v2729_v20  ;;  %2534 = vmatprep.subr.bf16.mxu0 %v2730_v21  ;;  %v2369_v10 = vcombine.low %v430_v63, %v498_v3  ;;  %v2745_v20 = vld [vmem:[%s3341_s1 + $0x1b8] sm:$0xff]   ;;  %v2765_v44 = vld [vmem:[%s3341_s1 + $0x190] sm:$0xff]   ;;  %v2766_v45 = vld [vmem:[%s3341_s1 + $0x148] sm:$0xff]  }
  0x20   : > { %2556 = vmatprep.subr.bf16.mxu1 %v2731_v22  ;;  %v953_v14 = vrot.slane %v2368_v6, %v2993_v58  ;;  %v2759_v38 = vld [vmem:[%s3341_s1 + $0x1d8] sm:$0xff]   ;;  %v254_v46 = vld [vmem:[#allocation2 + $0x8] sm:$0xf]  ;;  %v255_v47 = vld [vmem:[#allocation2 + $0x10] sm:$0xf] }
  0x21   : > { %v224_v0 = vld [vmem:[#allocation2 + $0x18] sm:$0xf]  ;;  %v960_v16 = vrot.slane %v2369_v10, %v2993_v58  ;;  %v2767_v49 = vld [vmem:[%s3341_s1 + $0x1c8] sm:$0xff]   ;;  %v257_v50 = vld [vmem:[#allocation2 + $0x20] sm:$0xf] }
  0x22   : > { %2535 = vmatpush3.bf16.msra.mxu0 %v2732_v23  ;;  %v232_v1 = vld [vmem:[#allocation2 + $0x19] sm:$0xf]  ;;  %v2746_v23 = vld [vmem:[%s3341_s1 + $0x170] sm:$0xff]   ;;  %v262_v51 = vld [vmem:[#allocation2 + $0x9] sm:$0xf] }
  0x23   : > { %2557 = vmatpush3.bf16.msra.mxu1 %v2733_v24  ;;  %2536 = vmatprep.subr.bf16.mxu0 %v2734_v25  ;;  %v240_v2 = vld [vmem:[#allocation2 + $0x1a] sm:$0xf]  ;;  %v2360_v5 = vpack.c.bf16 %v232_v1, %v224_v0  ;;  %v263_v52 = vld [vmem:[#allocation2 + $0x11] sm:$0xf]  ;;  %v265_v54 = vld [vmem:[#allocation2 + $0x21] sm:$0xf] }
  0x24   : > { %2558 = vmatprep.subr.bf16.mxu1 %v2735_v26  ;;  %v248_v7 = vld [vmem:[#allocation2 + $0x1b] sm:$0xf]  ;;  %v2747_v26 = vld [vmem:[%s3341_s1 + $0x1f0] sm:$0xff]   ;;  %v2346_v56 = vpack.c.bf16 %v263_v52, %v255_v47  ;;  %v2768_v59 = vld [vmem:[%s3341_s1 + $0x108] sm:$0xff]   ;;  %v2362_v61 = vpack.c.bf16 %v265_v54, %v257_v50 }
  0x25   : > { %v2361_v9 = vpack.c.bf16 %v248_v7, %v240_v2  ;;  %v627_v11 = vrot.slane %v2360_v5, %v2993_v58  ;;  %v2760_v39 = vld [vmem:[%s3341_s1 + $0x118] sm:$0xff]   ;;  %v271_v62 = vld [vmem:[#allocation2 + $0x12] sm:$0xf]  ;;  %v273_v0 = vld [vmem:[#allocation2 + $0x22] sm:$0xf] }
  0x26   : > { %2537 = vmatpush3.bf16.msra.mxu0 %v2736_v27  ;;  %v2748_v27 = vld [vmem:[%s3341_s1 + $0x130] sm:$0xff]   ;;  %v2761_v40 = vld [vmem:[%s3341_s1 + $0x198] sm:$0xff]   ;;  %v2769_v1 = vld [vmem:[%s3341_s1 + $0x188] sm:$0xff]  }
  0x27   : > { %2559 = vmatpush3.bf16.msra.mxu1 %v2737_v28  ;;  %2538 = vmatprep.subr.bf16.mxu0 %v2738_v29  ;;  %v634_v12 = vrot.slane %v2361_v9, %v2993_v58  ;;  %v2370_v13 = vcombine.low %v559_v4, %v627_v11  ;;  %v2749_v28 = vld [vmem:[%s3341_s1 + $0x1b0] sm:$0xff]   ;;  %v2750_v29 = vld [vmem:[%s3341_s1 + $0x168] sm:$0xff]   ;;  %v256_v48 = vld [vmem:[#allocation2 + $0x18] sm:$0xf]  ;;  %v508_v4 = vrot.slane %v2346_v56, %v2993_v58 }
  0x28   : > { %2560 = vmatprep.subr.bf16.mxu1 %v2739_v31  ;;  %v2752_v31 = vld [vmem:[%s3341_s1 + $0x128] sm:$0xff]   ;;  %v264_v53 = vld [vmem:[#allocation2 + $0x19] sm:$0xf]  ;;  %v2770_v2 = vld [vmem:[%s3341_s1 + $0x140] sm:$0xff]   ;;  %v644_v9 = vrot.slane %v2362_v61, %v2993_v58 }
  0x29   : > { %v2371_v15 = vcombine.low %v566_v8, %v634_v12  ;;  %v967_v17 = vrot.slane %v2370_v13, %v2993_v58  ;;  %v2354_v60 = vpack.c.bf16 %v264_v53, %v256_v48  ;;  %v272_v63 = vld [vmem:[#allocation2 + $0x1a] sm:$0xf]  ;;  %v278_v5 = vld [vmem:[#allocation2 + $0xb] sm:$0xf]  ;;  %v279_v6 = vld [vmem:[#allocation2 + $0x13] sm:$0xf] }
  0x2a   : > { %2539 = vmatpush3.bf16.msra.mxu0 %v2740_v32  ;;  %v2753_v32 = vld [vmem:[%s3341_s1 + $0x1a8] sm:$0xff]   ;;  %v280_v7 = vld [vmem:[#allocation2 + $0x1b] sm:$0xf]  ;;  %v281_v10 = vld [vmem:[#allocation2 + $0x23] sm:$0xf]  ;;  %v2347_v12 = vpack.c.bf16 %v279_v6, %v271_v62 }
  0x2b   : > { %2561 = vmatpush3.bf16.msra.mxu1 %v2741_v33  ;;  %2568 = vmatprep.subr.bf16.mxu0 %v2742_v55  ;;  %v974_v19 = vrot.slane %v2371_v15, %v2993_v58  ;;  %v976_v21 = vcombine.high %v953_v14, %v967_v17  ;;  %v975_v22 = vcombine.low %v953_v14, %v967_v17  ;;  %v2754_v33 = vld [vmem:[%s3341_s1 + $0x160] sm:$0xff]   ;;  %v2790_v50 = vld [vmem:[%s3341_s1 + $0x258] sm:$0xff]   ;;  %v2794_v54 = vld [vmem:[%s3341_s1 + $0x250] sm:$0xff]  }
  0x2c   : > { %2590 = vmatprep.subr.bf16.mxu1 %v2743_v57  ;;  %v2338_v55 = vpack.c.bf16 %v262_v51, %v254_v46  ;;  %v270_v57 = vld [vmem:[#allocation2 + $0xa] sm:$0xf]  ;;  %v576_v8 = vrot.slane %v2354_v60, %v2993_v58  ;;  %v2771_v13 = vld [vmem:[%s3341_s1 + $0x1c0] sm:$0xff]   ;;  %v2355_v15 = vpack.c.bf16 %v280_v7, %v272_v63  ;;  %v2791_v51 = vld [vmem:[%s3341_s1 + $0x2d8] sm:$0xff]  }
  0x2d   : > { %v978_v24 = vcombine.high %v960_v16, %v974_v19  ;;  %v977_v25 = vcombine.low %v960_v16, %v974_v19  ;;  %1903 = vmatprep.mubr.bf16.mxu0 %v976_v21  ;;  %v2339_v11 = vpack.c.bf16 %v278_v5, %v270_v57  ;;  %v2363_v16 = vpack.c.bf16 %v281_v10, %v273_v0  ;;  %v2772_v17 = vld [vmem:[%s3341_s1 + $0x100] sm:$0xff]   ;;  %v2792_v52 = vld [vmem:[%s3341_s1 + $0x218] sm:$0xff]   ;;  %v2796_v56 = vld [vmem:[%s3341_s1 + $0x210] sm:$0xff]  }
  0x2e   : > { %1904 = vmatmul.mubr.bf16.vlgmr.msra.gmra.mxu0 %v975_v22  ;;  %v440_v3 = vrot.slane %v2338_v55, %v2993_v58  ;;  %v2773_v21 = vld [vmem:[%s3341_s1 + $0x180] sm:$0xff]   ;;  %v2793_v53 = vld [vmem:[%s3341_s1 + $0x298] sm:$0xff]   ;;  %v2795_v55 = vld [vmem:[%s3341_s1 + $0x2d0] sm:$0xff]  }
  0x2f   : > { %1944 = vmatprep.mubr.bf16.mxu1 %v978_v24  ;;  %2569 = vmatpush3.bf16.msra.mxu0 %v2744_v18  ;;  %v2374_v18 = vcombine.low %v576_v8, %v644_v9  ;;  %v447_v19 = vrot.slane %v2339_v11, %v2993_v58  ;;  %v651_v24 = vrot.slane %v2363_v16, %v2993_v58  ;;  %v2786_v46 = vld [vmem:[%s3341_s1 + $0x260] sm:$0xff]   ;;  %v2797_v57 = vld [vmem:[%s3341_s1 + $0x290] sm:$0xff]   ;;  %v2799_v60 = vld [vmem:[%s3341_s1 + $0x2c8] sm:$0xff]  }
  0x30   : > { %1945 = vmatmul.mubr.bf16.vlgmr.msra.gmra.mxu1 %v977_v25  ;;  %2570 = vmatprep.subr.bf16.mxu0 %v2746_v23  ;;  %v2372_v14 = vcombine.low %v440_v3, %v508_v4  ;;  %v583_v23 = vrot.slane %v2355_v15, %v2993_v58  ;;  %v2787_v47 = vld [vmem:[%s3341_s1 + $0x2e0] sm:$0xff]   ;;  %v2800_v61 = vld [vmem:[%s3341_s1 + $0x208] sm:$0xff]   ;;  %v295_v5 = vld [vmem:[#allocation2 + $0x11] sm:$0xf] }
  0x31   : > { %2591 = vmatpush3.bf16.msra.mxu1 %v2745_v20  ;;  %v515_v20 = vrot.slane %v2347_v12, %v2993_v58  ;;  %v1003_v25 = vrot.slane %v2374_v18, %v2993_v58  ;;  %v2788_v48 = vld [vmem:[%s3341_s1 + $0x220] sm:$0xff]   ;;  %v2801_v62 = vld [vmem:[%s3341_s1 + $0x288] sm:$0xff]   ;;  %v296_v7 = vld [vmem:[#allocation2 + $0x19] sm:$0xf] }
  0x32   : > { %2592 = vmatprep.subr.bf16.mxu1 %v2747_v26  ;;  %v989_v22 = vrot.slane %v2372_v14, %v2993_v58  ;;  %v2802_v63 = vld [vmem:[%s3341_s1 + $0x240] sm:$0xff]   ;;  %v290_v4 = vld [vmem:[#allocation2 + $0x28] sm:$0xf]  ;;  %v303_v15 = vld [vmem:[#allocation2 + $0x12] sm:$0xf] }
  0x33   : > { %2571 = vmatpush3.bf16.msra.mxu0 %v2748_v27  ;;  %v2373_v26 = vcombine.low %v447_v19, %v515_v20  ;;  %v2774_v27 = vld [vmem:[%s3341_s1 + $0x278] sm:$0xff]   ;;  %v2803_v0 = vld [vmem:[%s3341_s1 + $0x2c0] sm:$0xff]   ;;  %v298_v9 = vld [vmem:[#allocation2 + $0x29] sm:$0xf] }
  0x34   : > { %2572 = vmatprep.subr.bf16.mxu0 %v2750_v29  ;;  %v2775_v29 = vld [vmem:[%s3341_s1 + $0x2f8] sm:$0xff]   ;;  %v289_v3 = vld [vmem:[#allocation2 + $0x20] sm:$0xf]  ;;  %v2364_v14 = vpack.c.bf16 %v298_v9, %v290_v4  ;;  %v306_v19 = vld [vmem:[#allocation2 + $0x2a] sm:$0xf] }
  0x35   : > { %2593 = vmatpush3.bf16.msra.mxu1 %v2749_v28  ;;  %v2375_v28 = vcombine.low %v583_v23, %v651_v24  ;;  %v2804_v6 = vld [vmem:[%s3341_s1 + $0x200] sm:$0xff]   ;;  %v304_v16 = vld [vmem:[#allocation2 + $0x1a] sm:$0xf]  ;;  %v311_v20 = vld [vmem:[#allocation2 + $0x13] sm:$0xf] }
  0x36   : > { %2594 = vmatprep.subr.bf16.mxu1 %v2751_v30  ;;  %v1012_v30 = vcombine.high %v989_v22, %v1003_v25  ;;  %v297_v8 = vld [vmem:[#allocation2 + $0x21] sm:$0xf]  ;;  %v661_v24 = vrot.slane %v2364_v14, %v2993_v58  ;;  %v2825_v4 = vld [vmem:[%s3341_s1 + $0x398] sm:$0xff]   ;;  %v2831_v9 = vld [vmem:[%s3341_s1 + $0x3c8] sm:$0xff]  }
  0x37   : > { %2573 = vmatpush3.bf16.msra.mxu0 %v2752_v31  ;;  %v996_v31 = vrot.slane %v2373_v26, %v2993_v58  ;;  %v2805_v11 = vld [vmem:[%s3341_s1 + $0x280] sm:$0xff]   ;;  %v314_v26 = vld [vmem:[#allocation2 + $0x2b] sm:$0xf] }
  0x38   : > { %2574 = vmatprep.subr.bf16.mxu0 %v2754_v33  ;;  %v1010_v33 = vrot.slane %v2375_v28, %v2993_v58  ;;  %1985 = vmatprep.mubr.bf16.mxu0 %v1012_v30  ;;  %v2365_v30 = vpack.c.bf16 %v314_v26, %v306_v19  ;;  %v2836_v14 = vld [vmem:[%s3341_s1 + $0x300] sm:$0xff]   ;;  %v327_v19 = vld [vmem:[#allocation2 + $0x19] sm:$0xf] }
  0x39   : > { %2595 = vmatpush3.bf16.msra.mxu1 %v2753_v32  ;;  %v2776_v32 = vld [vmem:[%s3341_s1 + $0x238] sm:$0xff]  }
  0x3a   : > { %2596 = vmatprep.subr.bf16.mxu1 %v2755_v34  ;;  %v1011_v34 = vcombine.low %v989_v22, %v1003_v25  ;;  %v313_v25 = vld [vmem:[#allocation2 + $0x23] sm:$0xf] }
  0x3b   : > { %2575 = vmatpush3.bf16.msra.mxu0 %v2756_v35  ;;  %v2777_v35 = vld [vmem:[%s3341_s1 + $0x2b8] sm:$0xff]  }
  0x3c   : > { %2576 = vmatprep.subr.bf16.mxu0 %v2758_v37  ;;  %v1014_v37 = vcombine.high %v996_v31, %v1010_v33 }
  0x3d   : > { %2597 = vmatpush3.bf16.msra.mxu1 %v2757_v36  ;;  %v2778_v36 = vld [vmem:[%s3341_s1 + $0x270] sm:$0xff]  }
  0x3e   : > { %2598 = vmatprep.subr.bf16.mxu1 %v2759_v38  ;;  %v1013_v38 = vcombine.low %v996_v31, %v1010_v33  ;;  %2026 = vmatprep.mubr.bf16.mxu1 %v1014_v37  ;;  %v2806_v31 = vld [vmem:[%s3341_s1 + $0x378] sm:$0xff]  }
  0x3f   : > { %2577 = vmatpush3.bf16.msra.mxu0 %v2760_v39  ;;  %v2779_v39 = vld [vmem:[%s3341_s1 + $0x2f0] sm:$0xff]  }
  0x40   : > { %2578 = vmatprep.subr.bf16.mxu0 %v2762_v41  ;;  %v2781_v41 = vld [vmem:[%s3341_s1 + $0x2b0] sm:$0xff]  }
  0x41   : > { %2599 = vmatpush3.bf16.msra.mxu1 %v2761_v40  ;;  %v2780_v40 = vld [vmem:[%s3341_s1 + $0x230] sm:$0xff]  }
  0x42   : > { %2600 = vmatprep.subr.bf16.mxu1 %v2763_v42  ;;  %v2782_v42 = vld [vmem:[%s3341_s1 + $0x268] sm:$0xff]  }
  0x43   : > { %2579 = vmatpush3.bf16.msra.mxu0 %v2764_v43  ;;  %v2783_v43 = vld [vmem:[%s3341_s1 + $0x2e8] sm:$0xff]  }
  0x44   : > { %2580 = vmatprep.subr.bf16.mxu0 %v2766_v45  ;;  %v2785_v45 = vld [vmem:[%s3341_s1 + $0x2a8] sm:$0xff]  }
  0x45   : > { %2601 = vmatpush3.bf16.msra.mxu1 %v2765_v44  ;;  %v2784_v44 = vld [vmem:[%s3341_s1 + $0x228] sm:$0xff]  }
  0x46   : > { %2602 = vmatprep.subr.bf16.mxu1 %v2767_v49  ;;  %v2789_v49 = vld [vmem:[%s3341_s1 + $0x2a0] sm:$0xff]  }
  0x47   : > { %2581 = vmatpush3.bf16.msra.mxu0 %v2768_v59  ;;  %v2798_v59 = vld [vmem:[%s3341_s1 + $0x248] sm:$0xff]  }
  0x48   : > { %2582 = vmatprep.subr.bf16.mxu0 %v2770_v2  ;;  %v288_v2 = vld [vmem:[#allocation2 + $0x18] sm:$0xf] }
  0x49   : > { %2603 = vmatpush3.bf16.msra.mxu1 %v2769_v1  ;;  %v287_v1 = vld [vmem:[#allocation2 + $0x10] sm:$0xf]  ;;  %v2348_v12 = vpack.c.bf16 %v296_v7, %v288_v2  ;;  %v2824_v2 = vld [vmem:[%s3341_s1 + $0x318] sm:$0xff]   ;;  %v2830_v7 = vld [vmem:[%s3341_s1 + $0x348] sm:$0xff]  }
  0x4a   : > { %2604 = vmatprep.subr.bf16.mxu1 %v2771_v13  ;;  %v2340_v10 = vpack.c.bf16 %v295_v5, %v287_v1  ;;  %v2356_v13 = vpack.c.bf16 %v297_v8, %v289_v3  ;;  %v2823_v1 = vld [vmem:[%s3341_s1 + $0x3d8] sm:$0xff]   ;;  %v2826_v3 = vld [vmem:[%s3341_s1 + $0x350] sm:$0xff]  }
  0x4b   : > { %2583 = vmatpush3.bf16.msra.mxu0 %v2772_v17  ;;  %v305_v17 = vld [vmem:[#allocation2 + $0x22] sm:$0xf]  ;;  %v525_v22 = vrot.slane %v2348_v12, %v2993_v58  ;;  %v2827_v5 = vld [vmem:[%s3341_s1 + $0x3d0] sm:$0xff]  }
  0x4c   : > { %2612 = vmatprep.subr.bf16.mxu0 %v2774_v27  ;;  %v457_v18 = vrot.slane %v2340_v10, %v2993_v58  ;;  %v593_v23 = vrot.slane %v2356_v13, %v2993_v58  ;;  %v2341_v27 = vpack.c.bf16 %v311_v20, %v303_v15  ;;  %v2829_v8 = vld [vmem:[%s3341_s1 + $0x390] sm:$0xff]   ;;  %v2832_v10 = vld [vmem:[%s3341_s1 + $0x308] sm:$0xff]   ;;  %v2834_v12 = vld [vmem:[%s3341_s1 + $0x340] sm:$0xff]  }
  0x4d   : > { %2605 = vmatpush3.bf16.msra.mxu1 %v2773_v21  ;;  %v312_v21 = vld [vmem:[#allocation2 + $0x1b] sm:$0xf]  ;;  %v2835_v13 = vld [vmem:[%s3341_s1 + $0x3c0] sm:$0xff]  }
  0x4e   : > { %2634 = vmatprep.subr.bf16.mxu1 %v2775_v29  ;;  %1986 = vmatmul.mubr.bf16.vlgmr.msra.gmra.mxu0 %v1011_v34  ;;  %v2349_v28 = vpack.c.bf16 %v312_v21, %v304_v16  ;;  %v2357_v29 = vpack.c.bf16 %v313_v25, %v305_v17  ;;  %v2378_v33 = vcombine.low %v593_v23, %v661_v24  ;;  %v2807_v34 = vld [vmem:[%s3341_s1 + $0x3f8] sm:$0xff]   ;;  %v320_v16 = vld [vmem:[#allocation2 + $0x20] sm:$0xf]  ;;  %v321_v17 = vld [vmem:[#allocation2 + $0x28] sm:$0xf] }
  0x4f   : > { %2613 = vmatpush3.bf16.msra.mxu0 %v2776_v32  ;;  %v2376_v32 = vcombine.low %v457_v18, %v525_v22  ;;  %v319_v15 = vld [vmem:[#allocation2 + $0x18] sm:$0xf]  ;;  %v322_v18 = vld [vmem:[#allocation2 + $0x30] sm:$0xf]  ;;  %v328_v20 = vld [vmem:[#allocation2 + $0x21] sm:$0xf] }
  0x50   : > { %2027 = vmatmul.mubr.bf16.vlgmr.msra.gmra.mxu1 %v1013_v38  ;;  %2614 = vmatprep.subr.bf16.mxu0 %v2778_v36  ;;  %v532_v36 = vrot.slane %v2349_v28, %v2993_v58  ;;  %v600_v37 = vrot.slane %v2357_v29, %v2993_v58  ;;  %v668_v38 = vrot.slane %v2365_v30, %v2993_v58  ;;  %v329_v21 = vld [vmem:[#allocation2 + $0x29] sm:$0xf]  ;;  %v2837_v22 = vld [vmem:[%s3341_s1 + $0x380] sm:$0xff]   ;;  %v330_v23 = vld [vmem:[#allocation2 + $0x31] sm:$0xf] }
  0x51   : > { %2635 = vmatpush3.bf16.msra.mxu1 %v2777_v35  ;;  %v464_v35 = vrot.slane %v2341_v27, %v2993_v58  ;;  %v2342_v24 = vpack.c.bf16 %v327_v19, %v319_v15  ;;  %v2350_v25 = vpack.c.bf16 %v328_v20, %v320_v16  ;;  %v2358_v26 = vpack.c.bf16 %v329_v21, %v321_v17  ;;  %v335_v27 = vld [vmem:[#allocation2 + $0x1a] sm:$0xf]  ;;  %v336_v28 = vld [vmem:[#allocation2 + $0x22] sm:$0xf]  ;;  %v337_v30 = vld [vmem:[#allocation2 + $0x2a] sm:$0xf] }
  0x52   : > { %2636 = vmatprep.subr.bf16.mxu1 %v2779_v39  ;;  %v1025_v39 = vrot.slane %v2376_v32, %v2993_v58  ;;  %v2366_v29 = vpack.c.bf16 %v330_v23, %v322_v18  ;;  %v343_v32 = vld [vmem:[#allocation2 + $0x1b] sm:$0xf] }
  0x53   : > { %2615 = vmatpush3.bf16.msra.mxu0 %v2780_v40  ;;  %v1039_v40 = vrot.slane %v2378_v33, %v2993_v58  ;;  %v474_v33 = vrot.slane %v2342_v24, %v2993_v58 }
  0x54   : > { %2616 = vmatprep.subr.bf16.mxu0 %v2782_v42  ;;  %v2379_v42 = vcombine.low %v600_v37, %v668_v38  ;;  %v345_v37 = vld [vmem:[#allocation2 + $0x2b] sm:$0xf]  ;;  %v346_v38 = vld [vmem:[#allocation2 + $0x33] sm:$0xf] }
  0x55   : > { %2637 = vmatpush3.bf16.msra.mxu1 %v2781_v41  ;;  %v2377_v41 = vcombine.low %v464_v35, %v532_v36  ;;  %v610_v35 = vrot.slane %v2358_v26, %v2993_v58  ;;  %v344_v36 = vld [vmem:[#allocation2 + $0x23] sm:$0xf] }
  0x56   : > { %2638 = vmatprep.subr.bf16.mxu1 %v2783_v43  ;;  %v1048_v43 = vcombine.high %v1025_v39, %v1039_v40 }
  0x57   : > { %2617 = vmatpush3.bf16.msra.mxu0 %v2784_v44  ;;  %v1047_v44 = vcombine.low %v1025_v39, %v1039_v40  ;;  %v2343_v39 = vpack.c.bf16 %v343_v32, %v335_v27  ;;  %v678_v40 = vrot.slane %v2366_v29, %v2993_v58 }
  0x58   : > { %2618 = vmatprep.subr.bf16.mxu0 %v2786_v46  ;;  %v1032_v46 = vrot.slane %v2377_v41, %v2993_v58  ;;  %2067 = vmatprep.mubr.bf16.mxu0 %v1048_v43  ;;  %v2351_v41 = vpack.c.bf16 %v344_v36, %v336_v28 }
  0x59   : > { %2639 = vmatpush3.bf16.msra.mxu1 %v2785_v45  ;;  %v2808_v45 = vld [vmem:[%s3341_s1 + $0x338] sm:$0xff]  }
  0x5a   : > { %2640 = vmatprep.subr.bf16.mxu1 %v2787_v47  ;;  %v1046_v47 = vrot.slane %v2379_v42, %v2993_v58  ;;  %v2359_v42 = vpack.c.bf16 %v345_v37, %v337_v30 }
  0x5b   : > { %2619 = vmatpush3.bf16.msra.mxu0 %v2788_v48  ;;  %v2810_v48 = vld [vmem:[%s3341_s1 + $0x370] sm:$0xff]  }
  0x5c   : > { %2620 = vmatprep.subr.bf16.mxu0 %v2790_v50  ;;  %v1050_v50 = vcombine.high %v1032_v46, %v1046_v47 }
  0x5d   : > { %2641 = vmatpush3.bf16.msra.mxu1 %v2789_v49  ;;  %v2809_v49 = vld [vmem:[%s3341_s1 + $0x3b8] sm:$0xff]  }
  0x5e   : > { %2642 = vmatprep.subr.bf16.mxu1 %v2791_v51  ;;  %v1049_v51 = vcombine.low %v1032_v46, %v1046_v47  ;;  %2108 = vmatprep.mubr.bf16.mxu1 %v1050_v50  ;;  %v2382_v46 = vcombine.low %v610_v35, %v678_v40  ;;  %v549_v47 = vrot.slane %v2351_v41, %v2993_v58 }
  0x5f   : > { %2621 = vmatpush3.bf16.msra.mxu0 %v2792_v52  ;;  %v2811_v52 = vld [vmem:[%s3341_s1 + $0x3f0] sm:$0xff]  }
  0x60   : > { %2622 = vmatprep.subr.bf16.mxu0 %v2794_v54  ;;  %v2814_v54 = vld [vmem:[%s3341_s1 + $0x368] sm:$0xff]  }
  0x61   : > { %2643 = vmatpush3.bf16.msra.mxu1 %v2793_v53  ;;  %v2812_v53 = vld [vmem:[%s3341_s1 + $0x330] sm:$0xff]  }
  0x62   : > { %2644 = vmatprep.subr.bf16.mxu1 %v2795_v55  ;;  %v2813_v55 = vld [vmem:[%s3341_s1 + $0x3b0] sm:$0xff]  }
  0x63   : > { %2623 = vmatpush3.bf16.msra.mxu0 %v2796_v56  ;;  %v2815_v56 = vld [vmem:[%s3341_s1 + $0x3e8] sm:$0xff]  }
  0x64   : > { %2624 = vmatprep.subr.bf16.mxu0 %v2798_v59  ;;  %v2818_v59 = vld [vmem:[%s3341_s1 + $0x360] sm:$0xff]  }
  0x65   : > { %2645 = vmatpush3.bf16.msra.mxu1 %v2797_v57  ;;  %v2816_v57 = vld [vmem:[%s3341_s1 + $0x328] sm:$0xff]  }
  0x66   : > { %2646 = vmatprep.subr.bf16.mxu1 %v2799_v60  ;;  %v2817_v60 = vld [vmem:[%s3341_s1 + $0x3a8] sm:$0xff]  }
  0x67   : > { %2625 = vmatpush3.bf16.msra.mxu0 %v2800_v61  ;;  %v2819_v61 = vld [vmem:[%s3341_s1 + $0x3e0] sm:$0xff]  }
  0x68   : > { %2626 = vmatprep.subr.bf16.mxu0 %v2802_v63  ;;  %v2822_v63 = vld [vmem:[%s3341_s1 + $0x358] sm:$0xff]  }
  0x69   : > { %2647 = vmatpush3.bf16.msra.mxu1 %v2801_v62  ;;  %v2820_v62 = vld [vmem:[%s3341_s1 + $0x320] sm:$0xff]  }
  0x6a   : > { %2648 = vmatprep.subr.bf16.mxu1 %v2803_v0  ;;  %v2821_v0 = vld [vmem:[%s3341_s1 + $0x3a0] sm:$0xff]  }
  0x6b   : > { %2627 = vmatpush3.bf16.msra.mxu0 %v2804_v6  ;;  %v2828_v6 = vld [vmem:[%s3341_s1 + $0x310] sm:$0xff]  }
  0x6c   : > { %2656 = vmatprep.subr.bf16.mxu0 %v2806_v31  ;;  %v338_v31 = vld [vmem:[#allocation2 + $0x32] sm:$0xf] }
  0x6d   : > { %2649 = vmatpush3.bf16.msra.mxu1 %v2805_v11  ;;  %v2833_v11 = vld [vmem:[%s3341_s1 + $0x388] sm:$0xff]  }
  0x6e   : > { %2678 = vmatprep.subr.bf16.mxu1 %v2807_v34  ;;  %2068 = vmatmul.mubr.bf16.vlgmr.msra.gmra.mxu0 %v1047_v44  ;;  %v542_v34 = vrot.slane %v2350_v25, %v2993_v58  ;;  %v481_v44 = vrot.slane %v2343_v39, %v2993_v58 }
  0x6f   : > { %2657 = vmatpush3.bf16.msra.mxu0 %v2808_v45  ;;  %v2367_v45 = vpack.c.bf16 %v346_v38, %v338_v31 }
  0x70   : > { %2658 = vmatprep.subr.bf16.mxu0 %v2810_v48  ;;  %2109 = vmatmul.mubr.bf16.vlgmr.msra.gmra.mxu1 %v1049_v51  ;;  %v2380_v43 = vcombine.low %v474_v33, %v542_v34  ;;  %v617_v48 = vrot.slane %v2359_v42, %v2993_v58  ;;  %v1075_v51 = vrot.slane %v2382_v46, %v2993_v58 }
  0x71   : > { %2679 = vmatpush3.bf16.msra.mxu1 %v2809_v49  ;;  %v685_v50 = vrot.slane %v2367_v45, %v2993_v58 }
  0x72   : > { %2680 = vmatprep.subr.bf16.mxu1 %v2811_v52  ;;  %v1061_v49 = vrot.slane %v2380_v43, %v2993_v58  ;;  %v2381_v52 = vcombine.low %v481_v44, %v549_v47 }
  0x73   : > { %2659 = vmatpush3.bf16.msra.mxu0 %v2812_v53  ;;  %v2383_v53 = vcombine.low %v617_v48, %v685_v50 }
  0x74   : > { %2660 = vmatprep.subr.bf16.mxu0 %v2814_v54  ;;  %v1084_v54 = vcombine.high %v1061_v49, %v1075_v51 }
  0x75   : > { %2681 = vmatpush3.bf16.msra.mxu1 %v2813_v55  ;;  %v1068_v55 = vrot.slane %v2381_v52, %v2993_v58 }
  0x76   : > { %2682 = vmatprep.subr.bf16.mxu1 %v2815_v56  ;;  %v1083_v56 = vcombine.low %v1061_v49, %v1075_v51  ;;  %2149 = vmatprep.mubr.bf16.mxu0 %v1084_v54 }
  0x77   : > { %2661 = vmatpush3.bf16.msra.mxu0 %v2816_v57  ;;  %v1082_v57 = vrot.slane %v2383_v53, %v2993_v58 }
  0x78   : > { %2662 = vmatprep.subr.bf16.mxu0 %v2818_v59 }
  0x79   : > { %2683 = vmatpush3.bf16.msra.mxu1 %v2817_v60  ;;  %v1086_v59 = vcombine.high %v1068_v55, %v1082_v57  ;;  %v1085_v60 = vcombine.low %v1068_v55, %v1082_v57 }
  0x7a   : > { %2684 = vmatprep.subr.bf16.mxu1 %v2819_v61 }
  0x7b   : > { %2663 = vmatpush3.bf16.msra.mxu0 %v2820_v62  ;;  %2190 = vmatprep.mubr.bf16.mxu1 %v1086_v59 }
  0x7c   : > { %2664 = vmatprep.subr.bf16.mxu0 %v2822_v63 }
  0x7d   : > { %2685 = vmatpush3.bf16.msra.mxu1 %v2821_v0 }
  0x7e   : > { %2686 = vmatprep.subr.bf16.mxu1 %v2823_v1 }
  0x7f   : > { %2665 = vmatpush3.bf16.msra.mxu0 %v2824_v2 }
  0x80   : > { %2666 = vmatprep.subr.bf16.mxu0 %v2826_v3 }
  0x81   : > { %2687 = vmatpush3.bf16.msra.mxu1 %v2825_v4 }
  0x82   : > { %2688 = vmatprep.subr.bf16.mxu1 %v2827_v5 }
  0x83   : > { %2667 = vmatpush3.bf16.msra.mxu0 %v2828_v6 }
  0x84   : > { %2668 = vmatprep.subr.bf16.mxu0 %v2830_v7 }
  0x85   : > { %2689 = vmatpush3.bf16.msra.mxu1 %v2829_v8 }
  0x86   : > { %2690 = vmatprep.subr.bf16.mxu1 %v2831_v9 }
  0x87   : > { %2669 = vmatpush3.bf16.msra.mxu0 %v2832_v10 }
  0x88   : > { %2670 = vmatprep.subr.bf16.mxu0 %v2834_v12 }
  0x89   : > { %2691 = vmatpush3.bf16.msra.mxu1 %v2833_v11 }
  0x8a   : > { %2692 = vmatprep.subr.bf16.mxu1 %v2835_v13 }
  0x8b   : > { %2671 = vmatpush3.bf16.msra.mxu0 %v2836_v14 }
  0x8d   : > { %2693 = vmatpush3.bf16.msra.mxu1 %v2837_v22 }
  0x8e   : > { %2150 = vmatmul.mubr.bf16.vlgmr.msra.gmra.mxu0 %v1083_v56 }
  0x90   : > { %2191 = vmatmul.mubr.bf16.vlgmr.msra.gmra.mxu1 %v1085_v60 }
  0xee   : > { %v2540_v61 = vpop.f32.mrf.mxu0 }
  0xf0   : > { %v2541_v62 = vpop.f32.mrf.mxu0  ;;  %v2562_v63 = vpop.f32.mrf.mxu1 }
  0xf1   : > { %v2542_v13 = vadd.f32 %v2541_v62, %v2540_v61 }
  0xf2   : > { %v2543_v0 = vpop.f32.mrf.mxu0  ;;  %v2563_v1 = vpop.f32.mrf.mxu1 }
  0xf3   : > { %v2564_v14 = vadd.f32 %v2563_v1, %v2562_v63 }
  0xf4   : > { %v2544_v2 = vpop.f32.mrf.mxu0  ;;  %v2565_v3 = vpop.f32.mrf.mxu1 }
  0xf5   : > { %v2545_v18 = vadd.f32 %v2544_v2, %v2543_v0  ;;  %v1947_v20 = vadd.f32 %v2564_v14, %v2542_v13 }
  0xf6   : > { %v2566_v5 = vpop.f32.mrf.mxu1 }
  0xf7   : > { %v2567_v19 = vadd.f32 %v2566_v5, %v2565_v3 }
  0xf9   : > { %v1950_v26 = vadd.f32 %v2567_v19, %v2545_v18 }
 0x10e   : > { %v2584_v4 = vpop.f32.mrf.mxu0 }
 0x110   : > { %v2585_v6 = vpop.f32.mrf.mxu0  ;;  %v2606_v7 = vpop.f32.mrf.mxu1 }
 0x111   : > { %v2586_v17 = vadd.f32 %v2585_v6, %v2584_v4 }
 0x112   : > { %v2587_v8 = vpop.f32.mrf.mxu0  ;;  %v2607_v9 = vpop.f32.mrf.mxu1 }
 0x113   : > { %v1988_v24 = vadd.f32 %v2586_v17, %v1947_v20  ;;  %v2608_v25 = vadd.f32 %v2607_v9, %v2606_v7 }
 0x114   : > { %v2588_v58 = vpop.f32.mrf.mxu0  ;;  %v2609_v10 = vpop.f32.mrf.mxu1 }
 0x115   : > { %v2589_v22 = vadd.f32 %v2588_v58, %v2587_v8  ;;  %v2029_v31 = vadd.f32 %v2608_v25, %v1988_v24 }
 0x116   : > { %v2610_v12 = vpop.f32.mrf.mxu1 }
 0x117   : > { %v1991_v29 = vadd.f32 %v2589_v22, %v1950_v26  ;;  %v2611_v32 = vadd.f32 %v2610_v12, %v2609_v10 }
 0x119   : > { %v2032_v37 = vadd.f32 %v2611_v32, %v1991_v29 }
 0x12e   : > { %v2628_v11 = vpop.f32.mrf.mxu0 }
 0x130   : > { %v2629_v15 = vpop.f32.mrf.mxu0  ;;  %v2650_v16 = vpop.f32.mrf.mxu1 }
 0x131   : > { %v2630_v27 = vadd.f32 %v2629_v15, %v2628_v11 }
 0x132   : > { %v2631_v21 = vpop.f32.mrf.mxu0  ;;  %v2651_v23 = vpop.f32.mrf.mxu1 }
 0x133   : > { %v2070_v34 = vadd.f32 %v2630_v27, %v2029_v31  ;;  %v2652_v35 = vadd.f32 %v2651_v23, %v2650_v16 }
 0x134   : > { %v2632_v28 = vpop.f32.mrf.mxu0  ;;  %v2653_v30 = vpop.f32.mrf.mxu1 }
 0x135   : > { %v2633_v33 = vadd.f32 %v2632_v28, %v2631_v21  ;;  %v2111_v43 = vadd.f32 %v2652_v35, %v2070_v34 }
 0x136   : > { %v2654_v38 = vpop.f32.mrf.mxu1 }
 0x137   : > { %v2073_v40 = vadd.f32 %v2633_v33, %v2032_v37  ;;  %v2655_v45 = vadd.f32 %v2654_v38, %v2653_v30 }
 0x139   : > { %v2114_v49 = vadd.f32 %v2655_v45, %v2073_v40 }
 0x14e   : > { %v2672_v36 = vpop.f32.mrf.mxu0 }
 0x150   : > { %v2673_v39 = vpop.f32.mrf.mxu0  ;;  %v2694_v41 = vpop.f32.mrf.mxu1 }
 0x151   : > { %v2674_v42 = vadd.f32 %v2673_v39, %v2672_v36 }
 0x152   : > { %v2675_v44 = vpop.f32.mrf.mxu0  ;;  %v2695_v46 = vpop.f32.mrf.mxu1 }
 0x153   : > { %v2152_v47 = vadd.f32 %v2674_v42, %v2111_v43  ;;  %v2696_v52 = vadd.f32 %v2695_v46, %v2694_v41 }
 0x154   : > { %v2676_v48 = vpop.f32.mrf.mxu0  ;;  %v2697_v50 = vpop.f32.mrf.mxu1 }
 0x155   : > { %v2677_v51 = vadd.f32 %v2676_v48, %v2675_v44  ;;  %v2193_v55 = vadd.f32 %v2696_v52, %v2152_v47 }
 0x156   : > { %v2698_v54 = vpop.f32.mrf.mxu1 }
 0x157   : > { %v2155_v53 = vadd.f32 %v2677_v51, %v2114_v49  ;;  %v2699_v56 = vadd.f32 %v2698_v54, %v2697_v50  ;;  %v2217_v59 = vmul.f32 %v2193_v55, %v2193_v55 }
 0x159   : > { %v2196_v57 = vadd.f32 %v2699_v56, %v2155_v53 }
 0x15b   : > { %v2522_v60 = vpack.c.bf16 %v2196_v57, %v2193_v55  ;;  %v2209_v61 = vadd.f32 %v2196_v57, %v2193_v55  ;;  %v2218_v62 = vmul.f32 %v2196_v57, %v2196_v57 }
 0x15d   : > { %2523 = vst [vmem:[%s202_s13] sm:$0xff] %v2522_v60   ;;  %v2210_v63 = vrot.slane %v2209_v61, 4  ;;  %v2219_v0 = vadd.f32 %v2218_v62, %v2217_v59 }
 0x15f   : > { %v2211_v1 = vadd.f32 %v2210_v63, %v2209_v61  ;;  %v2220_v2 = vrot.slane %v2219_v0, 4 }
 0x161   : > { %v2212_v3 = vrot.slane %v2211_v1, 2  ;;  %v2221_v4 = vadd.f32 %v2220_v2, %v2219_v0 }
 0x163   : > { %v2213_v5 = vadd.f32 %v2212_v3, %v2211_v1  ;;  %v2222_v6 = vrot.slane %v2221_v4, 2 }
 0x165   : > { %v2214_v7 = vrot.slane %v2213_v5, 1  ;;  %v2223_v8 = vadd.f32 %v2222_v6, %v2221_v4 }
 0x167   : > { %v2215_v9 = vadd.f32 %v2214_v7, %v2213_v5  ;;  %v2224_v58 = vrot.slane %v2223_v8, 1 }
 0x169   : > { %2216 = vst [vmem:[%s205_s18] sm:$0x1] %v2215_v9  ;;  %v2225_v10 = vadd.f32 %v2224_v58, %v2223_v8 }
 0x16b   : > { %2226 = vst [vmem:[%s208_s21] sm:$0x1] %v2225_v10 }
 0x16c PF: > { %s15_s15 = sadd.s32 1, %s2844_s15  }
 0x16d   : > { %p12_p4 = scmp.ge.s32.totalorder %s15_s15, 4  }
 0x16f   :  { %14 = sbr.rel (!%p12_p4) target bundleno = 1 (0x1), region = 85 }

// kernel: _lambda_.13
= control target key start
LH: loop header
LB: loop body
LE: loop exit
PB: predicated region body
PF: predicated region fallthrough
CT: control target
= control target key end

     0   :  { %s3949_s21 = smov 0   ;;  %s4967_s0 = inlined_call_operand.vmem [shape: bf16[2,4,4,128], index: 0, kind: input, shape index: {}]   ;;  %s4968_s1 = inlined_call_operand.vmem [shape: bf16[1152,512], index: 1, kind: input, shape index: {}]   ;;  %s4969_s2 = inlined_call_operand.vmem [shape: f32[1,1,128], index: 2, kind: input, shape index: {}]   ;;  %s4970_s3 = inlined_call_operand.vmem [shape: f32[1,1,128], index: 3, kind: input, shape index: {}]   ;;  %s4971_s4 = inlined_call_operand.vmem [shape: bf16[2,16,512], index: 4, kind: output, shape index: {0}]   ;;  %s4972_s5 = inlined_call_operand.vmem [shape: f32[2,1,512], index: 5, kind: output, shape index: {1}]   ;;  %s4973_s6 = inlined_call_operand.vmem [shape: f32[2,1,512], index: 6, kind: output, shape index: {2}]  }
   0x1 LB: > { %s3121_s22 = sadd.s32 4294967295, %s3908_s21   ;;  %p3125_p0 = scmp.ge.s32.totalorder %s3908_s21, 1  ;;  %s3908_s21 = sphi %s3949_s21, %s17_s21  }
   0x2   : > { %p217_p1 = scmp.lt.s32.totalorder %s3908_s21, 3 }
   0x4   : > { %p218_p2 = pnand %p3125_p0, %p217_p1 }
   0x5   : > { %p255_p3 = scmp.lt.s32.totalorder (!%p218_p2), %s3121_s22, 1 }
   0x6   : > { %221 = sbr.rel (%p218_p2) target bundleno = 529 (0x211), region = 36 }
   0xb   : > { %v3470_v0 = vld [vmem:[%s4968_s1 + $0xe4] ss:$16 sps:$4 sm:$0xff]   ;;  %v3910_v2 = vmov 0.0   ;;  %v3474_v3 = vld [vmem:[%s4968_s1 + $0xe0] ss:$16 sps:$4 sm:$0xff]   ;;  %s4975_s22 = smov (!%p255_p3, %s3121_s22), 1 }
   0xc   : > { %v3472_v1 = vld [vmem:[%s4968_s1 + $0x2e4] ss:$16 sps:$4 sm:$0xff]   ;;  %274 = vst [vmem:[#allocation2] sm:$0x3f] %v3910_v2  ;;  %275 = vst [vmem:[#allocation2 + $0x8] sm:$0x3f] %v3910_v2  ;;  %2418 = vmatprep.subr.bf16.mxu0 %v3470_v0 }
   0xd   : > { %276 = vst [vmem:[#allocation2 + $0x10] sm:$0x3f] %v3910_v2  ;;  %277 = vst [vmem:[#allocation2 + $0x18] sm:$0x3f] %v3910_v2  ;;  %v3475_v4 = vld [vmem:[%s4968_s1 + $0x2e0] ss:$16 sps:$4 sm:$0xff]   ;;  %2461 = vmatprep.subr.bf16.mxu1 %v3472_v1  ;;  %2419 = vmatpush1.bf16.msra.mxu0 %v3474_v3 }
   0xe   : > { %278 = vst [vmem:[#allocation2 + $0x20] sm:$0x3f] %v3910_v2  ;;  %279 = vst [vmem:[#allocation2 + $0x28] sm:$0x3f] %v3910_v2  ;;  %v3476_v5 = vld [vmem:[%s4968_s1 + $0xc4] ss:$16 sps:$4 sm:$0xff]   ;;  %2462 = vmatpush1.bf16.msra.mxu1 %v3475_v4  ;;  %v433_v4 = vlaneseq }
   0xf   : > { %v3478_v6 = vld [vmem:[%s4968_s1 + $0x2c4] ss:$16 sps:$4 sm:$0xff]   ;;  %v3480_v7 = vld [vmem:[%s4968_s1 + $0xc0] ss:$16 sps:$4 sm:$0xff]   ;;  %2420 = vmatprep.subr.bf16.mxu0 %v3476_v5  ;;  %s3452_s15 = sshll.u32 %s4975_s22, 3  ;;  %s3453_s11 = sshll.u32 %s4975_s22, 5 }
  0x10   : > { %v3481_v8 = vld [vmem:[%s4968_s1 + $0x2c0] ss:$16 sps:$4 sm:$0xff]   ;;  %2463 = vmatprep.subr.bf16.mxu1 %v3478_v6  ;;  %v3482_v9 = vld [vmem:[%s4968_s1 + $0xa4] ss:$16 sps:$4 sm:$0xff]   ;;  %s259_s26 = scalar_lea.vmem %s4967_s0, %s3452_s15  ;;  %v3911_v2 = vmov 1983009808   ;;  %s4931_s14 = scalar_lea.vmem %s4971_s4, %s3453_s11 }
  0x11   : > { %v3484_v10 = vld [vmem:[%s4968_s1 + $0x2a4] ss:$16 sps:$4 sm:$0xff]   ;;  %v3486_v11 = vld [vmem:[%s4968_s1 + $0xa0] ss:$16 sps:$4 sm:$0xff]   ;;  %2421 = vmatpush1.bf16.msra.mxu0 %v3480_v7  ;;  %v431_v3 = vunpack.c.l.s4 %v3911_v2  ;;  %s3130_s15 = sshll.u32 %s4975_s22, 2  ;;  %vm2935_vm0 = vcmp.lt.s32.totalorder %v433_v4, 512 }
  0x12   : > { %v3487_v12 = vld [vmem:[%s4968_s1 + $0x2a0] ss:$16 sps:$4 sm:$0xff]   ;;  %2464 = vmatpush1.bf16.msra.mxu1 %v3481_v8  ;;  %v3488_v13 = vld [vmem:[%s4968_s1 + $0x84] ss:$16 sps:$4 sm:$0xff]   ;;  %2422 = vmatprep.subr.bf16.mxu0 %v3482_v9  ;;  %s268_s18 = scalar_lea.vmem %s4972_s5, %s3130_s15  ;;  %s272_s22 = scalar_lea.vmem %s4973_s6, %s3130_s15 }
  0x13   : > { %2465 = vmatprep.subr.bf16.mxu1 %v3484_v10  ;;  %v3490_v14 = vld [vmem:[%s4968_s1 + $0x284] ss:$16 sps:$4 sm:$0xff]   ;;  %v3492_v15 = vld [vmem:[%s4968_s1 + $0x80] ss:$16 sps:$4 sm:$0xff]  }
  0x14   : > { %v3493_v16 = vld [vmem:[%s4968_s1 + $0x280] ss:$16 sps:$4 sm:$0xff]   ;;  %v3494_v17 = vld [vmem:[%s4968_s1 + $0x64] ss:$16 sps:$4 sm:$0xff]  }
  0x15   : > { %2423 = vmatpush1.bf16.msra.mxu0 %v3486_v11  ;;  %v3496_v18 = vld [vmem:[%s4968_s1 + $0x264] ss:$16 sps:$4 sm:$0xff]   ;;  %v3498_v19 = vld [vmem:[%s4968_s1 + $0x60] ss:$16 sps:$4 sm:$0xff]  }
  0x16   : > { %2466 = vmatpush1.bf16.msra.mxu1 %v3487_v12  ;;  %2424 = vmatprep.subr.bf16.mxu0 %v3488_v13  ;;  %v3499_v20 = vld [vmem:[%s4968_s1 + $0x260] ss:$16 sps:$4 sm:$0xff]   ;;  %v3500_v21 = vld [vmem:[%s4968_s1 + $0x44] ss:$16 sps:$4 sm:$0xff]  }
  0x17   : > { %2467 = vmatprep.subr.bf16.mxu1 %v3490_v14  ;;  %v3502_v22 = vld [vmem:[%s4968_s1 + $0x244] ss:$16 sps:$4 sm:$0xff]   ;;  %v3504_v23 = vld [vmem:[%s4968_s1 + $0x40] ss:$16 sps:$4 sm:$0xff]  }
  0x18   : > { %v3505_v24 = vld [vmem:[%s4968_s1 + $0x240] ss:$16 sps:$4 sm:$0xff]   ;;  %v3506_v25 = vld [vmem:[%s4968_s1 + $0x24] ss:$16 sps:$4 sm:$0xff]  }
  0x19   : > { %2425 = vmatpush1.bf16.msra.mxu0 %v3492_v15  ;;  %v3508_v26 = vld [vmem:[%s4968_s1 + $0x224] ss:$16 sps:$4 sm:$0xff]   ;;  %v3510_v27 = vld [vmem:[%s4968_s1 + $0x20] ss:$16 sps:$4 sm:$0xff]  }
  0x1a   : > { %2468 = vmatpush1.bf16.msra.mxu1 %v3493_v16  ;;  %2426 = vmatprep.subr.bf16.mxu0 %v3494_v17  ;;  %v3511_v28 = vld [vmem:[%s4968_s1 + $0x220] ss:$16 sps:$4 sm:$0xff]   ;;  %v3512_v29 = vld [vmem:[%s4968_s1 + $0x4] ss:$16 sps:$4 sm:$0xff]  }
  0x1b   : > { %2469 = vmatprep.subr.bf16.mxu1 %v3496_v18  ;;  %v3514_v30 = vld [vmem:[%s4968_s1 + $0x204] ss:$16 sps:$4 sm:$0xff]   ;;  %v3516_v31 = vld [vmem:[%s4968_s1] ss:$16 sps:$4 sm:$0xff]   ;;  %v432_v18 = vunpack.c.0.s8 %v431_v3 }
  0x1c   : > { %v3517_v32 = vld [vmem:[%s4968_s1 + $0x200] ss:$16 sps:$4 sm:$0xff]   ;;  %v3518_v33 = vld [vmem:[%s4968_s1 + $0x1e4] ss:$16 sps:$4 sm:$0xff]  }
  0x1d   : > { %2427 = vmatpush1.bf16.msra.mxu0 %v3498_v19  ;;  %v3520_v34 = vld [vmem:[%s4968_s1 + $0x3e4] ss:$16 sps:$4 sm:$0xff]   ;;  %v3522_v35 = vld [vmem:[%s4968_s1 + $0x1e0] ss:$16 sps:$4 sm:$0xff]   ;;  %v4142_v19 = vshrl.u32 %v433_v4, 7 }
  0x1e   : > { %2470 = vmatpush1.bf16.msra.mxu1 %v3499_v20  ;;  %2428 = vmatprep.subr.bf16.mxu0 %v3500_v21  ;;  %v3523_v36 = vld [vmem:[%s4968_s1 + $0x3e0] ss:$16 sps:$4 sm:$0xff]   ;;  %v3524_v37 = vld [vmem:[%s4968_s1 + $0x1c4] ss:$16 sps:$4 sm:$0xff]  }
  0x1f   : > { %2471 = vmatprep.subr.bf16.mxu1 %v3502_v22  ;;  %v3526_v38 = vld [vmem:[%s4968_s1 + $0x3c4] ss:$16 sps:$4 sm:$0xff]   ;;  %v3528_v39 = vld [vmem:[%s4968_s1 + $0x1c0] ss:$16 sps:$4 sm:$0xff]  }
  0x20   : > { %v3529_v40 = vld [vmem:[%s4968_s1 + $0x3c0] ss:$16 sps:$4 sm:$0xff]   ;;  %v3530_v41 = vld [vmem:[%s4968_s1 + $0x1a4] ss:$16 sps:$4 sm:$0xff]  }
  0x21   : > { %2429 = vmatpush1.bf16.msra.mxu0 %v3504_v23  ;;  %v3532_v42 = vld [vmem:[%s4968_s1 + $0x3a4] ss:$16 sps:$4 sm:$0xff]   ;;  %v3534_v43 = vld [vmem:[%s4968_s1 + $0x1a0] ss:$16 sps:$4 sm:$0xff]  }
  0x22   : > { %2472 = vmatpush1.bf16.msra.mxu1 %v3505_v24  ;;  %2430 = vmatprep.subr.bf16.mxu0 %v3506_v25  ;;  %v3535_v44 = vld [vmem:[%s4968_s1 + $0x3a0] ss:$16 sps:$4 sm:$0xff]   ;;  %v3536_v45 = vld [vmem:[%s4968_s1 + $0x184] ss:$16 sps:$4 sm:$0xff]  }
  0x23   : > { %2473 = vmatprep.subr.bf16.mxu1 %v3508_v26  ;;  %v3538_v46 = vld [vmem:[%s4968_s1 + $0x384] ss:$16 sps:$4 sm:$0xff]   ;;  %v3540_v47 = vld [vmem:[%s4968_s1 + $0x180] ss:$16 sps:$4 sm:$0xff]  }
  0x24   : > { %v280_v48 = vld [vmem:[%s259_s26] sm:$0x3]  ;;  %v281_v49 = vld [vmem:[%s259_s26 + $0x2] sm:$0x3]  ;;  %v282_v50 = vld [vmem:[%s259_s26 + $0x4] sm:$0x3] }
  0x25   : > { %2431 = vmatpush1.bf16.msra.mxu0 %v3510_v27  ;;  %v284_v51 = vunpack.c.l.bf16 %v280_v48  ;;  %v3132_v52 = vld [vmem:[%s4969_s2] ss:$0 sm:$0xff]  ;;  %v3542_v54 = vld [vmem:[%s4968_s1 + $0x164] ss:$16 sps:$4 sm:$0xff]   ;;  %v285_v55 = vunpack.c.l.bf16 %v281_v49  ;;  %v286_v56 = vunpack.c.l.bf16 %v282_v50  ;;  %v4157_v27 = vsub.s32 %v432_v18, %v4142_v19 }
  0x26   : > { %2474 = vmatpush1.bf16.msra.mxu1 %v3511_v28  ;;  %2432 = vmatprep.subr.bf16.mxu0 %v3512_v29  ;;  %v3541_v53 = vld [vmem:[%s4968_s1 + $0x380] ss:$16 sps:$4 sm:$0xff]   ;;  %v3544_v58 = vld [vmem:[%s4968_s1 + $0x364] ss:$16 sps:$4 sm:$0xff]  }
  0x27   : > { %2475 = vmatprep.subr.bf16.mxu1 %v3514_v30  ;;  %v3133_v57 = vld [vmem:[%s4970_s3] ss:$0 sm:$0xff]  ;;  %v295_v59 = vmul.f32 %v3132_v52, %v284_v51  ;;  %v283_v60 = vld [vmem:[%s259_s26 + $0x6] sm:$0x3]  ;;  %v296_v61 = vmul.f32 %v3132_v52, %v285_v55  ;;  %v297_v62 = vmul.f32 %v3132_v52, %v286_v56  ;;  %v327_v20 = vld [vmem:[#allocation2 + $0x1] sm:$0xf] }
  0x28   : > { %v287_v63 = vunpack.c.l.bf16 %v283_v60  ;;  %v3546_v0 = vld [vmem:[%s4968_s1 + $0x160] ss:$16 sps:$4 sm:$0xff]   ;;  %v3548_v9 = vld [vmem:[%s4968_s1 + $0x144] ss:$16 sps:$4 sm:$0xff]  }
  0x29   : > { %2433 = vmatpush1.bf16.msra.mxu0 %v3516_v31  ;;  %v306_v1 = vadd.f32 %v3133_v57, %v295_v59  ;;  %v3547_v5 = vld [vmem:[%s4968_s1 + $0x360] ss:$16 sps:$4 sm:$0xff]   ;;  %v307_v6 = vadd.f32 %v3133_v57, %v296_v61  ;;  %v308_v7 = vadd.f32 %v3133_v57, %v297_v62  ;;  %v3550_v10 = vld [vmem:[%s4968_s1 + $0x344] ss:$16 sps:$4 sm:$0xff]  }
  0x2a   : > { %2476 = vmatpush1.bf16.msra.mxu1 %v3517_v32  ;;  %2434 = vmatprep.subr.bf16.mxu0 %v3518_v33  ;;  %v298_v8 = vmul.f32 %v3132_v52, %v287_v63  ;;  %v3552_v12 = vld [vmem:[%s4968_s1 + $0x140] ss:$16 sps:$4 sm:$0xff]   ;;  %v3554_v22 = vld [vmem:[%s4968_s1 + $0x124] ss:$16 sps:$4 sm:$0xff]  }
  0x2b   : > { %2477 = vmatprep.subr.bf16.mxu1 %v3520_v34  ;;  %v310_v11 = vmax.f32 %v306_v1, 0.0  ;;  %v311_v13 = vmax.f32 %v307_v6, 0.0  ;;  %v312_v14 = vmax.f32 %v308_v7, 0.0  ;;  %v3553_v16 = vld [vmem:[%s4968_s1 + $0x340] ss:$16 sps:$4 sm:$0xff]  }
  0x2c   : > { %v309_v15 = vadd.f32 %v3133_v57, %v298_v8  ;;  %v319_v17 = vld [vmem:[#allocation2] sm:$0xf]  ;;  %v3556_v23 = vld [vmem:[%s4968_s1 + $0x324] ss:$16 sps:$4 sm:$0xff]  }
  0x2d   : > { %2435 = vmatpush2.bf16.msra.mxu0 %v3522_v35  ;;  %315 = vst [vmem:[#allocation2 + $0x9] sm:$0xf] %v310_v11  ;;  %316 = vst [vmem:[#allocation2 + $0x11] sm:$0xf] %v311_v13  ;;  %v3558_v24 = vld [vmem:[%s4968_s1 + $0x120] ss:$16 sps:$4 sm:$0xff]   ;;  %v3134_v26 = vpack.c.bf16 %v327_v20, %v319_v17 }
  0x2e   : > { %2478 = vmatpush2.bf16.msra.mxu1 %v3523_v36  ;;  %2436 = vmatprep.subr.bf16.mxu0 %v3524_v37  ;;  %317 = vst [vmem:[#allocation2 + $0x19] sm:$0xf] %v312_v14  ;;  %v313_v21 = vmax.f32 %v309_v15, 0.0  ;;  %v3559_v25 = vld [vmem:[%s4968_s1 + $0x320] ss:$16 sps:$4 sm:$0xff]  }
  0x2f   : > { %2479 = vmatprep.subr.bf16.mxu1 %v3526_v38  ;;  %v3560_v28 = vld [vmem:[%s4968_s1 + $0x104] ss:$16 sps:$4 sm:$0xff]   ;;  %v3564_v31 = vld [vmem:[%s4968_s1 + $0x100] ss:$16 sps:$4 sm:$0xff]  }
  0x30   : > { %318 = vst [vmem:[#allocation2 + $0x21] sm:$0xf] %v313_v21  ;;  %v3562_v29 = vld [vmem:[%s4968_s1 + $0x304] ss:$16 sps:$4 sm:$0xff]   ;;  %v3565_v32 = vld [vmem:[%s4968_s1 + $0x300] ss:$16 sps:$4 sm:$0xff]  }
  0x31   : > { %2437 = vmatpush2.bf16.msra.mxu0 %v3528_v39  ;;  %v335_v30 = vld [vmem:[#allocation2 + $0x2] sm:$0xf]  ;;  %v436_v39 = vrot.slane %v3134_v26, %v4157_v27 }
  0x32   : > { %2480 = vmatpush2.bf16.msra.mxu1 %v3529_v40  ;;  %2438 = vmatprep.subr.bf16.mxu0 %v3530_v41  ;;  %v3568_v41 = vld [vmem:[%s4968_s1 + $0x4e4] ss:$16 sps:$4 sm:$0xff]   ;;  %v3569_v14 = vld [vmem:[%s4968_s1 + $0x6e0] ss:$16 sps:$4 sm:$0xff]  }
  0x33   : > { %2481 = vmatprep.subr.bf16.mxu1 %v3532_v42  ;;  %v3571_v42 = vld [vmem:[%s4968_s1 + $0x6e4] ss:$16 sps:$4 sm:$0xff]   ;;  %v3575_v18 = vld [vmem:[%s4968_s1 + $0x6c0] ss:$16 sps:$4 sm:$0xff]  }
  0x34   : > { %v320_v33 = vld [vmem:[#allocation2 + $0x8] sm:$0xf]  ;;  %v321_v36 = vld [vmem:[#allocation2 + $0x10] sm:$0xf]  ;;  %v3574_v11 = vld [vmem:[%s4968_s1 + $0x4c4] ss:$16 sps:$4 sm:$0xff]  }
  0x35   : > { %2439 = vmatpush2.bf16.msra.mxu0 %v3534_v43  ;;  %v328_v34 = vld [vmem:[#allocation2 + $0x9] sm:$0xf]  ;;  %v322_v37 = vld [vmem:[#allocation2 + $0x18] sm:$0xf]  ;;  %v329_v38 = vld [vmem:[#allocation2 + $0x11] sm:$0xf] }
  0x36   : > { %2482 = vmatpush2.bf16.msra.mxu1 %v3535_v44  ;;  %2440 = vmatprep.subr.bf16.mxu0 %v3536_v45  ;;  %v336_v35 = vld [vmem:[#allocation2 + $0xa] sm:$0xf]  ;;  %v3138_v40 = vpack.c.bf16 %v328_v34, %v320_v33  ;;  %v330_v43 = vld [vmem:[#allocation2 + $0x19] sm:$0xf]  ;;  %v3142_v44 = vpack.c.bf16 %v329_v38, %v321_v36  ;;  %v337_v45 = vld [vmem:[#allocation2 + $0x12] sm:$0xf] }
  0x37   : > { %2483 = vmatprep.subr.bf16.mxu1 %v3538_v46  ;;  %v338_v46 = vld [vmem:[#allocation2 + $0x1a] sm:$0xf]  ;;  %v3146_v48 = vpack.c.bf16 %v330_v43, %v322_v37  ;;  %v343_v49 = vld [vmem:[#allocation2 + $0x8] sm:$0xf]  ;;  %v344_v50 = vld [vmem:[#allocation2 + $0x10] sm:$0xf] }
  0x38   : > { %v345_v51 = vld [vmem:[#allocation2 + $0x18] sm:$0xf]  ;;  %v518_v52 = vrot.slane %v3142_v44, %v4157_v27  ;;  %v3139_v55 = vpack.c.bf16 %v344_v50, %v336_v35  ;;  %v3577_v15 = vld [vmem:[%s4968_s1 + $0x6c4] ss:$16 sps:$4 sm:$0xff]   ;;  %v3578_v21 = vld [vmem:[%s4968_s1 + $0x4a0] ss:$16 sps:$4 sm:$0xff]  }
  0x39   : > { %2441 = vmatpush2.bf16.msra.mxu0 %v3540_v47  ;;  %v477_v47 = vrot.slane %v3138_v40, %v4157_v27  ;;  %v3143_v56 = vpack.c.bf16 %v345_v51, %v337_v45  ;;  %v559_v57 = vrot.slane %v3146_v48, %v4157_v27  ;;  %v3580_v17 = vld [vmem:[%s4968_s1 + $0x4a4] ss:$16 sps:$4 sm:$0xff]   ;;  %v3596_v34 = vld [vmem:[%s4968_s1 + $0x440] ss:$16 sps:$4 sm:$0xff]   ;;  %v351_v40 = vld [vmem:[#allocation2 + $0x9] sm:$0xf] }
  0x3a   : > { %2484 = vmatpush2.bf16.msra.mxu1 %v3541_v53  ;;  %2442 = vmatprep.subr.bf16.mxu0 %v3542_v54  ;;  %v346_v53 = vld [vmem:[#allocation2 + $0x20] sm:$0xf]  ;;  %v3135_v54 = vpack.c.bf16 %v343_v49, %v335_v30  ;;  %v484_v61 = vrot.slane %v3139_v55, %v4157_v27  ;;  %v3583_v20 = vld [vmem:[%s4968_s1 + $0x6a4] ss:$16 sps:$4 sm:$0xff]   ;;  %v353_v43 = vld [vmem:[#allocation2 + $0x19] sm:$0xf] }
  0x3b   : > { %2485 = vmatprep.subr.bf16.mxu1 %v3544_v58  ;;  %v3150_v58 = vcombine.low %v436_v39, %v477_v47  ;;  %v3147_v59 = vpack.c.bf16 %v346_v53, %v338_v46  ;;  %v525_v62 = vrot.slane %v3143_v56, %v4157_v27  ;;  %v3152_v63 = vcombine.low %v518_v52, %v559_v57  ;;  %v3592_v26 = vld [vmem:[%s4968_s1 + $0x464] ss:$16 sps:$4 sm:$0xff]   ;;  %v3590_v30 = vld [vmem:[%s4968_s1 + $0x460] ss:$16 sps:$4 sm:$0xff]   ;;  %v359_v46 = vld [vmem:[#allocation2 + $0xa] sm:$0xf] }
  0x3c   : > { %v443_v60 = vrot.slane %v3135_v54, %v4157_v27  ;;  %v3601_v33 = vld [vmem:[%s4968_s1 + $0x644] ss:$16 sps:$4 sm:$0xff]   ;;  %v3599_v35 = vld [vmem:[%s4968_s1 + $0x640] ss:$16 sps:$4 sm:$0xff]   ;;  %v361_v48 = vld [vmem:[#allocation2 + $0x1a] sm:$0xf]  ;;  %v3136_v51 = vpack.c.bf16 %v359_v46, %v351_v40 }
  0x3d   : > { %2443 = vmatpush2.bf16.msra.mxu0 %v3546_v0  ;;  %v890_v0 = vrot.slane %v3150_v58, %v4157_v27  ;;  %v566_v1 = vrot.slane %v3147_v59, %v4157_v27  ;;  %v904_v3 = vrot.slane %v3152_v63, %v4157_v27  ;;  %v3604_v36 = vld [vmem:[%s4968_s1 + $0x424] ss:$16 sps:$4 sm:$0xff]   ;;  %v3602_v37 = vld [vmem:[%s4968_s1 + $0x420] ss:$16 sps:$4 sm:$0xff]   ;;  %v3144_v53 = vpack.c.bf16 %v361_v48, %v353_v43  ;;  %v369_v55 = vld [vmem:[#allocation2 + $0x18] sm:$0xf] }
  0x3e   : > { %2486 = vmatpush2.bf16.msra.mxu1 %v3547_v5  ;;  %2444 = vmatprep.subr.bf16.mxu0 %v3548_v9  ;;  %v3151_v2 = vcombine.low %v443_v60, %v484_v61  ;;  %v3607_v38 = vld [vmem:[%s4968_s1 + $0x624] ss:$16 sps:$4 sm:$0xff]   ;;  %v3608_v49 = vld [vmem:[%s4968_s1 + $0x400] ss:$16 sps:$4 sm:$0xff]   ;;  %v371_v58 = vld [vmem:[#allocation2 + $0x28] sm:$0xf]  ;;  %v453_v60 = vrot.slane %v3136_v51, %v4157_v27 }
  0x3f   : > { %2487 = vmatprep.subr.bf16.mxu1 %v3550_v10  ;;  %v3153_v5 = vcombine.low %v525_v62, %v566_v1  ;;  %v4188_v7 = vcombine.high %v890_v0, %v904_v3  ;;  %v4191_v9 = vcombine.low %v890_v0, %v904_v3  ;;  %v3566_v10 = vld [vmem:[%s4968_s1 + $0x4e0] ss:$16 sps:$4 sm:$0xff]   ;;  %v3610_v39 = vld [vmem:[%s4968_s1 + $0x404] ss:$16 sps:$4 sm:$0xff]   ;;  %v535_v62 = vrot.slane %v3144_v53, %v4157_v27  ;;  %v377_v63 = vld [vmem:[#allocation2 + $0x19] sm:$0xf] }
  0x40   : > { %v897_v6 = vrot.slane %v3151_v2, %v4157_v27  ;;  %v354_v44 = vld [vmem:[#allocation2 + $0x21] sm:$0xf]  ;;  %v360_v47 = vld [vmem:[#allocation2 + $0x12] sm:$0xf]  ;;  %v379_v1 = vld [vmem:[#allocation2 + $0x29] sm:$0xf] }
  0x41   : > { %2445 = vmatpush2.bf16.msra.mxu0 %v3552_v12  ;;  %v911_v8 = vrot.slane %v3153_v5, %v4157_v27  ;;  %2450 = vmatprep.mubr.bf16.mxu0 %v4188_v7  ;;  %v3613_v45 = vld [vmem:[%s4968_s1 + $0x604] ss:$16 sps:$4 sm:$0xff]   ;;  %v368_v54 = vld [vmem:[#allocation2 + $0x10] sm:$0xf]  ;;  %v370_v57 = vld [vmem:[#allocation2 + $0x20] sm:$0xf] }
  0x42   : > { %2488 = vmatpush2.bf16.msra.mxu1 %v3553_v16  ;;  %2446 = vmatprep.subr.bf16.mxu0 %v3554_v22  ;;  %v3572_v16 = vld [vmem:[%s4968_s1 + $0x4c0] ss:$16 sps:$4 sm:$0xff]   ;;  %v3586_v22 = vld [vmem:[%s4968_s1 + $0x484] ss:$16 sps:$4 sm:$0xff]  }
  0x43   : > { %2489 = vmatprep.subr.bf16.mxu1 %v3556_v23  ;;  %v4200_v12 = vcombine.high %v897_v6, %v911_v8  ;;  %v4202_v13 = vcombine.low %v897_v6, %v911_v8  ;;  %v3581_v23 = vld [vmem:[%s4968_s1 + $0x6a0] ss:$16 sps:$4 sm:$0xff]   ;;  %v3616_v3 = vld [vmem:[%s4968_s1 + $0x5e4] ss:$16 sps:$4 sm:$0xff]   ;;  %v3141_v6 = vpack.c.bf16 %v377_v63, %v369_v55  ;;  %v3667_v63 = vld [vmem:[%s4968_s1 + $0xec] ss:$16 sps:$4 sm:$0xff]  }
  0x44   : > { %v362_v50 = vld [vmem:[#allocation2 + $0x22] sm:$0xf]  ;;  %v376_v59 = vld [vmem:[#allocation2 + $0x11] sm:$0xf] }
  0x45   : > { %2447 = vmatpush2.bf16.msra.mxu0 %v3558_v24  ;;  %2493 = vmatprep.mubr.bf16.mxu1 %v4200_v12  ;;  %v3589_v24 = vld [vmem:[%s4968_s1 + $0x684] ss:$16 sps:$4 sm:$0xff]   ;;  %v3148_v56 = vpack.c.bf16 %v362_v50, %v354_v44  ;;  %v3137_v2 = vpack.c.bf16 %v376_v59, %v368_v54  ;;  %v3632_v43 = vld [vmem:[%s4968_s1 + $0x580] ss:$16 sps:$4 sm:$0xff]  }
  0x46   : > { %2490 = vmatpush2.bf16.msra.mxu1 %v3559_v25  ;;  %2448 = vmatprep.subr.bf16.mxu0 %v3560_v28  ;;  %v3584_v25 = vld [vmem:[%s4968_s1 + $0x480] ss:$16 sps:$4 sm:$0xff]   ;;  %v3634_v40 = vld [vmem:[%s4968_s1 + $0x584] ss:$16 sps:$4 sm:$0xff]  }
  0x47   : > { %2491 = vmatprep.subr.bf16.mxu1 %v3562_v29  ;;  %v3587_v28 = vld [vmem:[%s4968_s1 + $0x680] ss:$16 sps:$4 sm:$0xff]   ;;  %v3595_v29 = vld [vmem:[%s4968_s1 + $0x664] ss:$16 sps:$4 sm:$0xff]   ;;  %v576_v5 = vrot.slane %v3148_v56, %v4157_v27 }
  0x48   : > { %v378_v0 = vld [vmem:[#allocation2 + $0x21] sm:$0xf] }
  0x49   : > { %2449 = vmatpush2.bf16.msra.mxu0 %v3564_v31  ;;  %v3598_v31 = vld [vmem:[%s4968_s1 + $0x444] ss:$16 sps:$4 sm:$0xff]   ;;  %v3145_v8 = vpack.c.bf16 %v378_v0, %v370_v57  ;;  %v3644_v51 = vld [vmem:[%s4968_s1 + $0x540] ss:$16 sps:$4 sm:$0xff]  }
  0x4a   : > { %2492 = vmatpush2.bf16.msra.mxu1 %v3565_v32  ;;  %2504 = vmatprep.subr.bf16.mxu0 %v3568_v41  ;;  %v3593_v32 = vld [vmem:[%s4968_s1 + $0x660] ss:$16 sps:$4 sm:$0xff]   ;;  %v3640_v44 = vld [vmem:[%s4968_s1 + $0x564] ss:$16 sps:$4 sm:$0xff]  }
  0x4b   : > { %2547 = vmatprep.subr.bf16.mxu1 %v3571_v42  ;;  %v3605_v41 = vld [vmem:[%s4968_s1 + $0x620] ss:$16 sps:$4 sm:$0xff]   ;;  %v3643_v46 = vld [vmem:[%s4968_s1 + $0x764] ss:$16 sps:$4 sm:$0xff]  }
  0x4c   : > { %2451 = vmatmul.mubr.bf16.vlgmr.msra.gmra.mxu0 %v4191_v9  ;;  %v352_v42 = vld [vmem:[#allocation2 + $0x11] sm:$0xf] }
  0x4d   : > { %2505 = vmatpush1.bf16.msra.mxu0 %v3566_v10  ;;  %2494 = vmatmul.mubr.bf16.vlgmr.msra.gmra.mxu1 %v4202_v13  ;;  %v3140_v52 = vpack.c.bf16 %v360_v47, %v352_v42  ;;  %v3149_v10 = vpack.c.bf16 %v379_v1, %v371_v58  ;;  %v3637_v42 = vld [vmem:[%s4968_s1 + $0x784] ss:$16 sps:$4 sm:$0xff]   ;;  %v3638_v47 = vld [vmem:[%s4968_s1 + $0x560] ss:$16 sps:$4 sm:$0xff]  }
  0x4e   : > { %2506 = vmatprep.subr.bf16.mxu0 %v3574_v11  ;;  %2548 = vmatpush1.bf16.msra.mxu1 %v3569_v14  ;;  %v3611_v11 = vld [vmem:[%s4968_s1 + $0x600] ss:$16 sps:$4 sm:$0xff]   ;;  %v3646_v48 = vld [vmem:[%s4968_s1 + $0x544] ss:$16 sps:$4 sm:$0xff]  }
  0x4f   : > { %2549 = vmatprep.subr.bf16.mxu1 %v3577_v15  ;;  %v494_v61 = vrot.slane %v3140_v52, %v4157_v27  ;;  %v460_v15 = vrot.slane %v3137_v2, %v4157_v27  ;;  %v3649_v50 = vld [vmem:[%s4968_s1 + $0x744] ss:$16 sps:$4 sm:$0xff]   ;;  %v3647_v53 = vld [vmem:[%s4968_s1 + $0x740] ss:$16 sps:$4 sm:$0xff]  }
  0x50   : > { %v3652_v52 = vld [vmem:[%s4968_s1 + $0x524] ss:$16 sps:$4 sm:$0xff]   ;;  %v3650_v55 = vld [vmem:[%s4968_s1 + $0x520] ss:$16 sps:$4 sm:$0xff]  }
  0x51   : > { %2507 = vmatpush1.bf16.msra.mxu0 %v3572_v16  ;;  %v3154_v14 = vcombine.low %v453_v60, %v494_v61  ;;  %v3619_v16 = vld [vmem:[%s4968_s1 + $0x7e4] ss:$16 sps:$4 sm:$0xff]   ;;  %v3653_v57 = vld [vmem:[%s4968_s1 + $0x720] ss:$16 sps:$4 sm:$0xff]  }
  0x52   : > { %2508 = vmatprep.subr.bf16.mxu0 %v3580_v17  ;;  %2550 = vmatpush1.bf16.msra.mxu1 %v3575_v18  ;;  %v3156_v17 = vcombine.low %v535_v62, %v576_v5  ;;  %v501_v18 = vrot.slane %v3141_v6, %v4157_v27  ;;  %v3655_v54 = vld [vmem:[%s4968_s1 + $0x724] ss:$16 sps:$4 sm:$0xff]   ;;  %v3656_v59 = vld [vmem:[%s4968_s1 + $0x500] ss:$16 sps:$4 sm:$0xff]   ;;  %v3673_v5 = vld [vmem:[%s4968_s1 + $0xcc] ss:$16 sps:$4 sm:$0xff]  }
  0x53   : > { %2551 = vmatprep.subr.bf16.mxu1 %v3583_v20  ;;  %v542_v20 = vrot.slane %v3145_v8, %v4157_v27  ;;  %v3658_v56 = vld [vmem:[%s4968_s1 + $0x504] ss:$16 sps:$4 sm:$0xff]   ;;  %v3659_v61 = vld [vmem:[%s4968_s1 + $0x700] ss:$16 sps:$4 sm:$0xff]   ;;  %v3912_v8 = vmov 0  }
  0x54   : > { %v3661_v58 = vld [vmem:[%s4968_s1 + $0x704] ss:$16 sps:$4 sm:$0xff]   ;;  %v3662_v0 = vld [vmem:[%s4968_s1 + $0x8e0] ss:$16 sps:$4 sm:$0xff]  }
  0x55   : > { %2509 = vmatpush1.bf16.msra.mxu0 %v3578_v21  ;;  %v583_v21 = vrot.slane %v3149_v10, %v4157_v27  ;;  %v3664_v60 = vld [vmem:[%s4968_s1 + $0x8e4] ss:$16 sps:$4 sm:$0xff]   ;;  %v3668_v6 = vld [vmem:[%s4968_s1 + $0x8c0] ss:$16 sps:$4 sm:$0xff]  }
  0x56   : > { %2510 = vmatprep.subr.bf16.mxu0 %v3586_v22  ;;  %2552 = vmatpush1.bf16.msra.mxu1 %v3581_v23  ;;  %v3614_v22 = vld [vmem:[%s4968_s1 + $0x5e0] ss:$16 sps:$4 sm:$0xff]   ;;  %v4309_v23 = vrot.slane %v3154_v14, %v4157_v27  ;;  %v3670_v2 = vld [vmem:[%s4968_s1 + $0x8c4] ss:$16 sps:$4 sm:$0xff]   ;;  %v3679_v14 = vld [vmem:[%s4968_s1 + $0xac] ss:$16 sps:$4 sm:$0xff]  }
  0x57   : > { %2553 = vmatprep.subr.bf16.mxu1 %v3589_v24  ;;  %v3622_v24 = vld [vmem:[%s4968_s1 + $0x5c4] ss:$16 sps:$4 sm:$0xff]  }
  0x58   : > { %v3676_v10 = vld [vmem:[%s4968_s1 + $0x8a4] ss:$16 sps:$4 sm:$0xff]  }
  0x59   : > { %2511 = vmatpush1.bf16.msra.mxu0 %v3584_v25  ;;  %v4315_v25 = vrot.slane %v3156_v17, %v4157_v27  ;;  %v3682_v17 = vld [vmem:[%s4968_s1 + $0x884] ss:$16 sps:$4 sm:$0xff]  }
  0x5a   : > { %2512 = vmatprep.subr.bf16.mxu0 %v3592_v26  ;;  %2554 = vmatpush1.bf16.msra.mxu1 %v3587_v28  ;;  %v3155_v26 = vcombine.low %v460_v15, %v501_v18  ;;  %v3157_v28 = vcombine.low %v542_v20, %v583_v21  ;;  %v3674_v15 = vld [vmem:[%s4968_s1 + $0x8a0] ss:$16 sps:$4 sm:$0xff]   ;;  %v3685_v18 = vld [vmem:[%s4968_s1 + $0x8c] ss:$16 sps:$4 sm:$0xff]  }
  0x5b   : > { %2555 = vmatprep.subr.bf16.mxu1 %v3595_v29  ;;  %v3617_v29 = vld [vmem:[%s4968_s1 + $0x7e0] ss:$16 sps:$4 sm:$0xff]   ;;  %v4422_v62 = vcombine.low %v4309_v23, %v4315_v25  ;;  %v385_v21 = vld [vmem:[#allocation2 + $0x1a] sm:$0xf] }
  0x5c   : > { %v384_v20 = vld [vmem:[#allocation2 + $0x12] sm:$0xf] }
  0x5d   : > { %2513 = vmatpush1.bf16.msra.mxu0 %v3590_v30  ;;  %v3625_v30 = vld [vmem:[%s4968_s1 + $0x7c4] ss:$16 sps:$4 sm:$0xff]  }
  0x5e   : > { %2514 = vmatprep.subr.bf16.mxu0 %v3598_v31  ;;  %2556 = vmatpush1.bf16.msra.mxu1 %v3593_v32  ;;  %v4325_v31 = vcombine.high %v4309_v23, %v4315_v25  ;;  %v4328_v32 = vrot.slane %v3155_v26, %v4157_v27  ;;  %v387_v23 = vld [vmem:[#allocation2 + $0x2a] sm:$0xf] }
  0x5f   : > { %2557 = vmatprep.subr.bf16.mxu1 %v3601_v33  ;;  %v4331_v33 = vrot.slane %v3157_v28, %v4157_v27  ;;  %v3683_v25 = vld [vmem:[%s4968_s1 + $0x88] ss:$16 sps:$4 sm:$0xff]   ;;  %v3691_v26 = vld [vmem:[%s4968_s1 + $0x6c] ss:$16 sps:$4 sm:$0xff]   ;;  %v388_v28 = vpack.c.bf16 %v384_v20, %v384_v20 }
  0x60   : > { %2536 = vmatprep.mubr.bf16.mxu0 %v4325_v31  ;;  %v3742_v20 = vld [vmem:[%s4968_s1 + $0x14c] ss:$16 sps:$4 sm:$0xff]  }
  0x61   : > { %2515 = vmatpush1.bf16.msra.mxu0 %v3596_v34  ;;  %v3620_v34 = vld [vmem:[%s4968_s1 + $0x5c0] ss:$16 sps:$4 sm:$0xff]   ;;  %v4432_v1 = vcombine.low %v4328_v32, %v4331_v33 }
  0x62   : > { %2516 = vmatprep.subr.bf16.mxu0 %v3604_v36  ;;  %2558 = vmatpush1.bf16.msra.mxu1 %v3599_v35  ;;  %v3628_v35 = vld [vmem:[%s4968_s1 + $0x5a4] ss:$16 sps:$4 sm:$0xff]   ;;  %v4342_v36 = vcombine.high %v4328_v32, %v4331_v33  ;;  %v391_v32 = vpack.c.bf16 %v387_v23, %v387_v23  ;;  %v3686_v33 = vld [vmem:[%s4968_s1 + $0x860] ss:$16 sps:$4 sm:$0xff]   ;;  %v3740_v23 = vld [vmem:[%s4968_s1 + $0x148] ss:$16 sps:$4 sm:$0xff]  }
  0x63   : > { %2559 = vmatprep.subr.bf16.mxu1 %v3607_v38  ;;  %v3631_v38 = vld [vmem:[%s4968_s1 + $0x7a4] ss:$16 sps:$4 sm:$0xff]  }
  0x64   : > { %2579 = vmatprep.mubr.bf16.mxu1 %v4342_v36 }
  0x65   : > { %2517 = vmatpush1.bf16.msra.mxu0 %v3602_v37  ;;  %v3623_v37 = vld [vmem:[%s4968_s1 + $0x7c0] ss:$16 sps:$4 sm:$0xff]  }
  0x66   : > { %2518 = vmatprep.subr.bf16.mxu0 %v3610_v39  ;;  %2560 = vmatpush1.bf16.msra.mxu1 %v3605_v41  ;;  %v3626_v39 = vld [vmem:[%s4968_s1 + $0x5a0] ss:$16 sps:$4 sm:$0xff]  }
  0x67   : > { %2561 = vmatprep.subr.bf16.mxu1 %v3613_v45  ;;  %v3629_v41 = vld [vmem:[%s4968_s1 + $0x7a0] ss:$16 sps:$4 sm:$0xff]  }
  0x68   : > { %v3635_v45 = vld [vmem:[%s4968_s1 + $0x780] ss:$16 sps:$4 sm:$0xff]  }
  0x69   : > { %2519 = vmatpush1.bf16.msra.mxu0 %v3608_v49  ;;  %v3641_v49 = vld [vmem:[%s4968_s1 + $0x760] ss:$16 sps:$4 sm:$0xff]  }
  0x6a   : > { %2520 = vmatprep.subr.bf16.mxu0 %v3616_v3  ;;  %2562 = vmatpush1.bf16.msra.mxu1 %v3611_v11  ;;  %v3665_v3 = vld [vmem:[%s4968_s1 + $0xe8] ss:$16 sps:$4 sm:$0xff]  }
  0x6b   : > { %2563 = vmatprep.subr.bf16.mxu1 %v3619_v16  ;;  %v3671_v11 = vld [vmem:[%s4968_s1 + $0xc8] ss:$16 sps:$4 sm:$0xff]  }
  0x6c   : > { %v3677_v16 = vld [vmem:[%s4968_s1 + $0xa8] ss:$16 sps:$4 sm:$0xff]  }
  0x6d   : > { %2521 = vmatpush2.bf16.msra.mxu0 %v3614_v22  ;;  %v386_v22 = vld [vmem:[#allocation2 + $0x22] sm:$0xf] }
  0x6e   : > { %2522 = vmatprep.subr.bf16.mxu0 %v3622_v24  ;;  %2564 = vmatpush2.bf16.msra.mxu1 %v3617_v29  ;;  %v3688_v24 = vld [vmem:[%s4968_s1 + $0x864] ss:$16 sps:$4 sm:$0xff]   ;;  %v389_v29 = vpack.c.bf16 %v385_v21, %v385_v21  ;;  %v3743_v21 = vld [vmem:[%s4968_s1 + $0x248] ss:$16 sps:$4 sm:$0xff]  }
  0x6f   : > { %2565 = vmatprep.subr.bf16.mxu1 %v3625_v30  ;;  %v390_v30 = vpack.c.bf16 %v386_v22, %v386_v22  ;;  %v3751_v22 = vld [vmem:[%s4968_s1 + $0x22c] ss:$16 sps:$4 sm:$0xff]  }
  0x71   : > { %2523 = vmatpush2.bf16.msra.mxu0 %v3620_v34  ;;  %v3694_v34 = vld [vmem:[%s4968_s1 + $0x844] ss:$16 sps:$4 sm:$0xff]  }
  0x72   : > { %2524 = vmatprep.subr.bf16.mxu0 %v3628_v35  ;;  %2566 = vmatpush2.bf16.msra.mxu1 %v3623_v37  ;;  %v3689_v35 = vld [vmem:[%s4968_s1 + $0x68] ss:$16 sps:$4 sm:$0xff]   ;;  %v3697_v37 = vld [vmem:[%s4968_s1 + $0x4c] ss:$16 sps:$4 sm:$0xff]  }
  0x73   : > { %2567 = vmatprep.subr.bf16.mxu1 %v3631_v38  ;;  %v468_v38 = vrot.slane %v388_v28, %v4157_v27  ;;  %v3746_v28 = vld [vmem:[%s4968_s1 + $0x128] ss:$16 sps:$4 sm:$0xff]  }
  0x75   : > { %2525 = vmatpush2.bf16.msra.mxu0 %v3626_v39  ;;  %v509_v39 = vrot.slane %v389_v29, %v4157_v27  ;;  %v3754_v29 = vld [vmem:[%s4968_s1 + $0x10c] ss:$16 sps:$4 sm:$0xff]  }
  0x76   : > { %2526 = vmatprep.subr.bf16.mxu0 %v3634_v40  ;;  %2568 = vmatpush2.bf16.msra.mxu1 %v3629_v41  ;;  %v550_v40 = vrot.slane %v390_v30, %v4157_v27  ;;  %v591_v41 = vrot.slane %v391_v32, %v4157_v27  ;;  %v3755_v30 = vld [vmem:[%s4968_s1 + $0x208] ss:$16 sps:$4 sm:$0xff]   ;;  %v3760_v32 = vld [vmem:[%s4968_s1 + $0x3ec] ss:$16 sps:$4 sm:$0xff]  }
  0x77   : > { %2569 = vmatprep.subr.bf16.mxu1 %v3637_v42  ;;  %v3692_v42 = vld [vmem:[%s4968_s1 + $0x840] ss:$16 sps:$4 sm:$0xff]  }
  0x79   : > { %2527 = vmatpush2.bf16.msra.mxu0 %v3632_v43  ;;  %v3700_v43 = vld [vmem:[%s4968_s1 + $0x824] ss:$16 sps:$4 sm:$0xff]  }
  0x7a   : > { %2528 = vmatprep.subr.bf16.mxu0 %v3640_v44  ;;  %2570 = vmatpush2.bf16.msra.mxu1 %v3635_v45  ;;  %v3695_v44 = vld [vmem:[%s4968_s1 + $0x48] ss:$16 sps:$4 sm:$0xff]   ;;  %v3703_v45 = vld [vmem:[%s4968_s1 + $0x2c] ss:$16 sps:$4 sm:$0xff]  }
  0x7b   : > { %2571 = vmatprep.subr.bf16.mxu1 %v3643_v46  ;;  %v952_v46 = vcombine.low %v468_v38, %v509_v39  ;;  %v3761_v38 = vld [vmem:[%s4968_s1 + $0x4e8] ss:$16 sps:$4 sm:$0xff]   ;;  %v3769_v39 = vld [vmem:[%s4968_s1 + $0x4cc] ss:$16 sps:$4 sm:$0xff]  }
  0x7d   : > { %2529 = vmatpush2.bf16.msra.mxu0 %v3638_v47  ;;  %v953_v47 = vcombine.low %v550_v40, %v591_v41  ;;  %v3764_v40 = vld [vmem:[%s4968_s1 + $0x3c8] ss:$16 sps:$4 sm:$0xff]   ;;  %v3772_v41 = vld [vmem:[%s4968_s1 + $0x3ac] ss:$16 sps:$4 sm:$0xff]  }
  0x7e   : > { %2530 = vmatprep.subr.bf16.mxu0 %v3646_v48  ;;  %2572 = vmatpush2.bf16.msra.mxu1 %v3641_v49  ;;  %v3698_v48 = vld [vmem:[%s4968_s1 + $0x820] ss:$16 sps:$4 sm:$0xff]   ;;  %v3706_v49 = vld [vmem:[%s4968_s1 + $0x804] ss:$16 sps:$4 sm:$0xff]  }
  0x7f   : > { %2573 = vmatprep.subr.bf16.mxu1 %v3649_v50  ;;  %v3701_v50 = vld [vmem:[%s4968_s1 + $0x28] ss:$16 sps:$4 sm:$0xff]  }
  0x81   : > { %2531 = vmatpush2.bf16.msra.mxu0 %v3644_v51  ;;  %v3709_v51 = vld [vmem:[%s4968_s1 + $0xc] ss:$16 sps:$4 sm:$0xff]  }
  0x82   : > { %2532 = vmatprep.subr.bf16.mxu0 %v3652_v52  ;;  %2574 = vmatpush2.bf16.msra.mxu1 %v3647_v53  ;;  %v960_v52 = vrot.slane %v952_v46, %v4157_v27  ;;  %v967_v53 = vrot.slane %v953_v47, %v4157_v27  ;;  %v3712_v27 = vld [vmem:[%s4968_s1 + $0x1ec] ss:$16 sps:$4 sm:$0xff]   ;;  %v3776_v46 = vld [vmem:[%s4968_s1 + $0x388] ss:$16 sps:$4 sm:$0xff]  }
  0x83   : > { %2575 = vmatprep.subr.bf16.mxu1 %v3655_v54  ;;  %v3704_v54 = vld [vmem:[%s4968_s1 + $0x800] ss:$16 sps:$4 sm:$0xff]   ;;  %v3784_v47 = vld [vmem:[%s4968_s1 + $0x36c] ss:$16 sps:$4 sm:$0xff]  }
  0x85   : > { %2533 = vmatpush2.bf16.msra.mxu0 %v3650_v55  ;;  %v3715_v55 = vld [vmem:[%s4968_s1 + $0x2ec] ss:$16 sps:$4 sm:$0xff]  }
  0x86   : > { %2534 = vmatprep.subr.bf16.mxu0 %v3658_v56  ;;  %2576 = vmatpush2.bf16.msra.mxu1 %v3653_v57  ;;  %v3707_v56 = vld [vmem:[%s4968_s1 + $0x8] ss:$16 sps:$4 sm:$0xff]   ;;  %v4534_v57 = vcombine.low %v960_v52, %v967_v53  ;;  %v3793_v53 = vld [vmem:[%s4968_s1 + $0x44c] ss:$16 sps:$4 sm:$0xff]  }
  0x87   : > { %2577 = vmatprep.subr.bf16.mxu1 %v3661_v58  ;;  %v3713_v58 = vld [vmem:[%s4968_s1 + $0x2e8] ss:$16 sps:$4 sm:$0xff]  }
  0x88   : > { %v3785_v52 = vld [vmem:[%s4968_s1 + $0x468] ss:$16 sps:$4 sm:$0xff]  }
  0x89   : > { %2535 = vmatpush2.bf16.msra.mxu0 %v3656_v59  ;;  %v3721_v59 = vld [vmem:[%s4968_s1 + $0x2cc] ss:$16 sps:$4 sm:$0xff]  }
  0x8a   : > { %2590 = vmatprep.subr.bf16.mxu0 %v3664_v60  ;;  %2578 = vmatpush2.bf16.msra.mxu1 %v3659_v61  ;;  %v3710_v60 = vld [vmem:[%s4968_s1 + $0x1e8] ss:$16 sps:$4 sm:$0xff]   ;;  %v3718_v61 = vld [vmem:[%s4968_s1 + $0x1cc] ss:$16 sps:$4 sm:$0xff]  }
  0x8b   : > { %2633 = vmatprep.subr.bf16.mxu1 %v3667_v63  ;;  %v3719_v63 = vld [vmem:[%s4968_s1 + $0x2c8] ss:$16 sps:$4 sm:$0xff]  }
  0x8c   : > { %2537 = vmatmul.mubr.bf16.vlgmr.msra.gmra.mxu0 %v4422_v62 }
  0x8d   : > { %2591 = vmatpush1.bf16.msra.mxu0 %v3662_v0  ;;  %2622 = vmatprep.mubr.bf16.mxu0 %v3912_v8  ;;  %v3727_v0 = vld [vmem:[%s4968_s1 + $0x2ac] ss:$16 sps:$4 sm:$0xff]  }
  0x8e   : > { %2580 = vmatmul.mubr.bf16.vlgmr.msra.gmra.mxu1 %v4432_v1  ;;  %2592 = vmatprep.subr.bf16.mxu0 %v3670_v2  ;;  %v3716_v2 = vld [vmem:[%s4968_s1 + $0x1c8] ss:$16 sps:$4 sm:$0xff]  }
  0x8f   : > { %2634 = vmatpush1.bf16.msra.mxu1 %v3665_v3  ;;  %2665 = vmatprep.mubr.bf16.mxu1 %v4188_v7  ;;  %v3680_v7 = vld [vmem:[%s4968_s1 + $0x880] ss:$16 sps:$4 sm:$0xff]   ;;  %v3724_v3 = vld [vmem:[%s4968_s1 + $0x1ac] ss:$16 sps:$4 sm:$0xff]  }
  0x90   : > { %2635 = vmatprep.subr.bf16.mxu1 %v3673_v5  ;;  %v3733_v5 = vld [vmem:[%s4968_s1 + $0x28c] ss:$16 sps:$4 sm:$0xff]  }
  0x91   : > { %2593 = vmatpush1.bf16.msra.mxu0 %v3668_v6  ;;  %v3722_v6 = vld [vmem:[%s4968_s1 + $0x1a8] ss:$16 sps:$4 sm:$0xff]  }
  0x92   : > { %2594 = vmatprep.subr.bf16.mxu0 %v3676_v10  ;;  %v3730_v10 = vld [vmem:[%s4968_s1 + $0x18c] ss:$16 sps:$4 sm:$0xff]  }
  0x93   : > { %2636 = vmatpush1.bf16.msra.mxu1 %v3671_v11  ;;  %v3731_v11 = vld [vmem:[%s4968_s1 + $0x288] ss:$16 sps:$4 sm:$0xff]  }
  0x94   : > { %2637 = vmatprep.subr.bf16.mxu1 %v3679_v14  ;;  %v3739_v14 = vld [vmem:[%s4968_s1 + $0x26c] ss:$16 sps:$4 sm:$0xff]  }
  0x95   : > { %2595 = vmatpush1.bf16.msra.mxu0 %v3674_v15  ;;  %v3728_v15 = vld [vmem:[%s4968_s1 + $0x188] ss:$16 sps:$4 sm:$0xff]  }
  0x96   : > { %2596 = vmatprep.subr.bf16.mxu0 %v3682_v17  ;;  %v3737_v17 = vld [vmem:[%s4968_s1 + $0x268] ss:$16 sps:$4 sm:$0xff]  }
  0x97   : > { %2638 = vmatpush1.bf16.msra.mxu1 %v3677_v16  ;;  %v3736_v16 = vld [vmem:[%s4968_s1 + $0x16c] ss:$16 sps:$4 sm:$0xff]  }
  0x98   : > { %2639 = vmatprep.subr.bf16.mxu1 %v3685_v18  ;;  %v3734_v18 = vld [vmem:[%s4968_s1 + $0x168] ss:$16 sps:$4 sm:$0xff]  }
  0x99   : > { %2597 = vmatpush1.bf16.msra.mxu0 %v3680_v7  ;;  %v3745_v7 = vld [vmem:[%s4968_s1 + $0x24c] ss:$16 sps:$4 sm:$0xff]  }
  0x9a   : > { %2598 = vmatprep.subr.bf16.mxu0 %v3688_v24  ;;  %v3748_v24 = vld [vmem:[%s4968_s1 + $0x12c] ss:$16 sps:$4 sm:$0xff]  }
  0x9b   : > { %2640 = vmatpush1.bf16.msra.mxu1 %v3683_v25  ;;  %v3749_v25 = vld [vmem:[%s4968_s1 + $0x228] ss:$16 sps:$4 sm:$0xff]  }
  0x9c   : > { %2641 = vmatprep.subr.bf16.mxu1 %v3691_v26  ;;  %v3757_v26 = vld [vmem:[%s4968_s1 + $0x20c] ss:$16 sps:$4 sm:$0xff]  }
  0x9d   : > { %2599 = vmatpush1.bf16.msra.mxu0 %v3686_v33  ;;  %v3752_v33 = vld [vmem:[%s4968_s1 + $0x108] ss:$16 sps:$4 sm:$0xff]  }
  0x9e   : > { %2600 = vmatprep.subr.bf16.mxu0 %v3694_v34  ;;  %v3763_v34 = vld [vmem:[%s4968_s1 + $0x4ec] ss:$16 sps:$4 sm:$0xff]  }
  0x9f   : > { %2642 = vmatpush1.bf16.msra.mxu1 %v3689_v35  ;;  %v3758_v35 = vld [vmem:[%s4968_s1 + $0x3e8] ss:$16 sps:$4 sm:$0xff]  }
  0xa0   : > { %2643 = vmatprep.subr.bf16.mxu1 %v3697_v37  ;;  %v3766_v37 = vld [vmem:[%s4968_s1 + $0x3cc] ss:$16 sps:$4 sm:$0xff]  }
  0xa1   : > { %2601 = vmatpush1.bf16.msra.mxu0 %v3692_v42  ;;  %v3767_v42 = vld [vmem:[%s4968_s1 + $0x4c8] ss:$16 sps:$4 sm:$0xff]  }
  0xa2   : > { %2602 = vmatprep.subr.bf16.mxu0 %v3700_v43  ;;  %v3775_v43 = vld [vmem:[%s4968_s1 + $0x4ac] ss:$16 sps:$4 sm:$0xff]  }
  0xa3   : > { %2644 = vmatpush1.bf16.msra.mxu1 %v3695_v44  ;;  %v3778_v44 = vld [vmem:[%s4968_s1 + $0x38c] ss:$16 sps:$4 sm:$0xff]  }
  0xa4   : > { %2645 = vmatprep.subr.bf16.mxu1 %v3703_v45  ;;  %v3781_v45 = vld [vmem:[%s4968_s1 + $0x48c] ss:$16 sps:$4 sm:$0xff]  }
  0xa5   : > { %2603 = vmatpush1.bf16.msra.mxu0 %v3698_v48  ;;  %v3779_v48 = vld [vmem:[%s4968_s1 + $0x488] ss:$16 sps:$4 sm:$0xff]  }
  0xa6   : > { %2604 = vmatprep.subr.bf16.mxu0 %v3706_v49  ;;  %v3787_v49 = vld [vmem:[%s4968_s1 + $0x46c] ss:$16 sps:$4 sm:$0xff]  }
  0xa7   : > { %2646 = vmatpush1.bf16.msra.mxu1 %v3701_v50  ;;  %v3782_v50 = vld [vmem:[%s4968_s1 + $0x368] ss:$16 sps:$4 sm:$0xff]  }
  0xa8   : > { %2647 = vmatprep.subr.bf16.mxu1 %v3709_v51  ;;  %v3790_v51 = vld [vmem:[%s4968_s1 + $0x34c] ss:$16 sps:$4 sm:$0xff]  }
  0xa9   : > { %2605 = vmatpush1.bf16.msra.mxu0 %v3704_v54  ;;  %v3788_v54 = vld [vmem:[%s4968_s1 + $0x348] ss:$16 sps:$4 sm:$0xff]  }
  0xaa   : > { %2676 = vmatprep.subr.bf16.mxu0 %v3715_v55  ;;  %v3796_v55 = vld [vmem:[%s4968_s1 + $0x32c] ss:$16 sps:$4 sm:$0xff]  }
  0xab   : > { %2648 = vmatpush1.bf16.msra.mxu1 %v3707_v56  ;;  %v3791_v56 = vld [vmem:[%s4968_s1 + $0x448] ss:$16 sps:$4 sm:$0xff]  }
  0xac   : > { %2623 = vmatmul.mubr.bf16.vlgmr.msra.gmra.mxu0 %v4534_v57  ;;  %2649 = vmatprep.subr.bf16.mxu1 %v3712_v27  ;;  %v3799_v27 = vld [vmem:[%s4968_s1 + $0x42c] ss:$16 sps:$4 sm:$0xff]  }
  0xad   : > { %2677 = vmatpush1.bf16.msra.mxu0 %v3713_v58  ;;  %2708 = vmatprep.mubr.bf16.mxu0 %v4200_v12  ;;  %v3725_v12 = vld [vmem:[%s4968_s1 + $0x2a8] ss:$16 sps:$4 sm:$0xff]  }
  0xae   : > { %2678 = vmatprep.subr.bf16.mxu0 %v3721_v59  ;;  %v3794_v58 = vld [vmem:[%s4968_s1 + $0x328] ss:$16 sps:$4 sm:$0xff]   ;;  %v3802_v59 = vld [vmem:[%s4968_s1 + $0x30c] ss:$16 sps:$4 sm:$0xff]  }
  0xaf   : > { %2650 = vmatpush2.bf16.msra.mxu1 %v3710_v60  ;;  %v3797_v60 = vld [vmem:[%s4968_s1 + $0x428] ss:$16 sps:$4 sm:$0xff]  }
  0xb0   : > { %2651 = vmatprep.subr.bf16.mxu1 %v3718_v61  ;;  %v3805_v61 = vld [vmem:[%s4968_s1 + $0x40c] ss:$16 sps:$4 sm:$0xff]  }
  0xb1   : > { %2679 = vmatpush1.bf16.msra.mxu0 %v3719_v63  ;;  %v3800_v63 = vld [vmem:[%s4968_s1 + $0x308] ss:$16 sps:$4 sm:$0xff]  }
  0xb2   : > { %2680 = vmatprep.subr.bf16.mxu0 %v3727_v0  ;;  %v3811_v0 = vld [vmem:[%s4968_s1 + $0x6ec] ss:$16 sps:$4 sm:$0xff]  }
  0xb3   : > { %2652 = vmatpush2.bf16.msra.mxu1 %v3716_v2  ;;  %v3803_v2 = vld [vmem:[%s4968_s1 + $0x408] ss:$16 sps:$4 sm:$0xff]  }
  0xb4   : > { %2653 = vmatprep.subr.bf16.mxu1 %v3724_v3  ;;  %v3808_v3 = vld [vmem:[%s4968_s1 + $0x5ec] ss:$16 sps:$4 sm:$0xff]  }
  0xb5   : > { %2681 = vmatpush1.bf16.msra.mxu0 %v3725_v12  ;;  %v3809_v12 = vld [vmem:[%s4968_s1 + $0x6e8] ss:$16 sps:$4 sm:$0xff]  }
  0xb6   : > { %2682 = vmatprep.subr.bf16.mxu0 %v3733_v5  ;;  %v3817_v5 = vld [vmem:[%s4968_s1 + $0x6cc] ss:$16 sps:$4 sm:$0xff]  }
  0xb7   : > { %2654 = vmatpush2.bf16.msra.mxu1 %v3722_v6  ;;  %v3806_v6 = vld [vmem:[%s4968_s1 + $0x5e8] ss:$16 sps:$4 sm:$0xff]  }
  0xb8   : > { %2655 = vmatprep.subr.bf16.mxu1 %v3730_v10  ;;  %v3814_v10 = vld [vmem:[%s4968_s1 + $0x5cc] ss:$16 sps:$4 sm:$0xff]  }
  0xb9   : > { %2683 = vmatpush1.bf16.msra.mxu0 %v3731_v11  ;;  %v3815_v11 = vld [vmem:[%s4968_s1 + $0x6c8] ss:$16 sps:$4 sm:$0xff]  }
  0xba   : > { %2684 = vmatprep.subr.bf16.mxu0 %v3739_v14  ;;  %v3823_v14 = vld [vmem:[%s4968_s1 + $0x6ac] ss:$16 sps:$4 sm:$0xff]  }
  0xbb   : > { %2656 = vmatpush2.bf16.msra.mxu1 %v3728_v15  ;;  %v3820_v15 = vld [vmem:[%s4968_s1 + $0x5ac] ss:$16 sps:$4 sm:$0xff]  }
  0xbc   : > { %2657 = vmatprep.subr.bf16.mxu1 %v3736_v16  ;;  %v3829_v16 = vld [vmem:[%s4968_s1 + $0x68c] ss:$16 sps:$4 sm:$0xff]  }
  0xbd   : > { %2685 = vmatpush1.bf16.msra.mxu0 %v3737_v17  ;;  %v3818_v17 = vld [vmem:[%s4968_s1 + $0x5a8] ss:$16 sps:$4 sm:$0xff]  }
  0xbe   : > { %2686 = vmatprep.subr.bf16.mxu0 %v3745_v7  ;;  %v3826_v7 = vld [vmem:[%s4968_s1 + $0x58c] ss:$16 sps:$4 sm:$0xff]  }
  0xbf   : > { %2658 = vmatpush2.bf16.msra.mxu1 %v3734_v18  ;;  %v3827_v18 = vld [vmem:[%s4968_s1 + $0x688] ss:$16 sps:$4 sm:$0xff]  }
  0xc0   : > { %2659 = vmatprep.subr.bf16.mxu1 %v3742_v20  ;;  %v3835_v20 = vld [vmem:[%s4968_s1 + $0x66c] ss:$16 sps:$4 sm:$0xff]  }
  0xc1   : > { %2687 = vmatpush1.bf16.msra.mxu0 %v3743_v21  ;;  %v3824_v21 = vld [vmem:[%s4968_s1 + $0x588] ss:$16 sps:$4 sm:$0xff]  }
  0xc2   : > { %2688 = vmatprep.subr.bf16.mxu0 %v3751_v22  ;;  %v3832_v22 = vld [vmem:[%s4968_s1 + $0x56c] ss:$16 sps:$4 sm:$0xff]  }
  0xc3   : > { %2660 = vmatpush2.bf16.msra.mxu1 %v3740_v23  ;;  %v3833_v23 = vld [vmem:[%s4968_s1 + $0x668] ss:$16 sps:$4 sm:$0xff]  }
  0xc4   : > { %2661 = vmatprep.subr.bf16.mxu1 %v3748_v24  ;;  %v3841_v24 = vld [vmem:[%s4968_s1 + $0x64c] ss:$16 sps:$4 sm:$0xff]  }
  0xc5   : > { %2689 = vmatpush1.bf16.msra.mxu0 %v3749_v25  ;;  %v3830_v25 = vld [vmem:[%s4968_s1 + $0x568] ss:$16 sps:$4 sm:$0xff]  }
  0xc6   : > { %2690 = vmatprep.subr.bf16.mxu0 %v3757_v26  ;;  %v3838_v26 = vld [vmem:[%s4968_s1 + $0x54c] ss:$16 sps:$4 sm:$0xff]  }
  0xc7   : > { %2662 = vmatpush2.bf16.msra.mxu1 %v3746_v28  ;;  %v3839_v28 = vld [vmem:[%s4968_s1 + $0x648] ss:$16 sps:$4 sm:$0xff]  }
  0xc8   : > { %2663 = vmatprep.subr.bf16.mxu1 %v3754_v29  ;;  %v3847_v29 = vld [vmem:[%s4968_s1 + $0x62c] ss:$16 sps:$4 sm:$0xff]  }
  0xc9   : > { %2691 = vmatpush1.bf16.msra.mxu0 %v3755_v30  ;;  %v3836_v30 = vld [vmem:[%s4968_s1 + $0x548] ss:$16 sps:$4 sm:$0xff]  }
  0xca   : > { %2692 = vmatprep.subr.bf16.mxu0 %v3760_v32  ;;  %v3844_v32 = vld [vmem:[%s4968_s1 + $0x52c] ss:$16 sps:$4 sm:$0xff]  }
  0xcb   : > { %2664 = vmatpush2.bf16.msra.mxu1 %v3752_v33  ;;  %v3845_v33 = vld [vmem:[%s4968_s1 + $0x628] ss:$16 sps:$4 sm:$0xff]  }
  0xcc   : > { %2719 = vmatprep.subr.bf16.mxu1 %v3763_v34  ;;  %v3853_v34 = vld [vmem:[%s4968_s1 + $0x60c] ss:$16 sps:$4 sm:$0xff]  }
  0xcd   : > { %2693 = vmatpush2.bf16.msra.mxu0 %v3758_v35  ;;  %v3842_v35 = vld [vmem:[%s4968_s1 + $0x528] ss:$16 sps:$4 sm:$0xff]  }
  0xce   : > { %2666 = vmatmul.mubr.bf16.vlgmr.msra.gmra.mxu1 %v4191_v9  ;;  %2694 = vmatprep.subr.bf16.mxu0 %v3766_v37  ;;  %v3770_v9 = vld [vmem:[%s4968_s1 + $0x3a8] ss:$16 sps:$4 sm:$0xff]   ;;  %v3850_v37 = vld [vmem:[%s4968_s1 + $0x50c] ss:$16 sps:$4 sm:$0xff]  }
  0xcf   : > { %2720 = vmatpush1.bf16.msra.mxu1 %v3761_v38  ;;  %2751 = vmatprep.mubr.bf16.mxu1 %v4325_v31  ;;  %v3773_v31 = vld [vmem:[%s4968_s1 + $0x4a8] ss:$16 sps:$4 sm:$0xff]  }
  0xd0   : > { %2721 = vmatprep.subr.bf16.mxu1 %v3769_v39  ;;  %v3851_v38 = vld [vmem:[%s4968_s1 + $0x608] ss:$16 sps:$4 sm:$0xff]   ;;  %v3856_v39 = vld [vmem:[%s4968_s1 + $0x7ec] ss:$16 sps:$4 sm:$0xff]  }
  0xd1   : > { %2695 = vmatpush2.bf16.msra.mxu0 %v3764_v40  ;;  %v3848_v40 = vld [vmem:[%s4968_s1 + $0x508] ss:$16 sps:$4 sm:$0xff]  }
  0xd2   : > { %2696 = vmatprep.subr.bf16.mxu0 %v3772_v41  ;;  %v3859_v41 = vld [vmem:[%s4968_s1 + $0x8ec] ss:$16 sps:$4 sm:$0xff]  }
  0xd3   : > { %2722 = vmatpush1.bf16.msra.mxu1 %v3767_v42  ;;  %v3854_v42 = vld [vmem:[%s4968_s1 + $0x7e8] ss:$16 sps:$4 sm:$0xff]  }
  0xd4   : > { %2723 = vmatprep.subr.bf16.mxu1 %v3775_v43  ;;  %v3862_v43 = vld [vmem:[%s4968_s1 + $0x7cc] ss:$16 sps:$4 sm:$0xff]  }
  0xd5   : > { %2697 = vmatpush2.bf16.msra.mxu0 %v3770_v9  ;;  %v3857_v9 = vld [vmem:[%s4968_s1 + $0x8e8] ss:$16 sps:$4 sm:$0xff]  }
  0xd6   : > { %2698 = vmatprep.subr.bf16.mxu0 %v3778_v44  ;;  %v3865_v44 = vld [vmem:[%s4968_s1 + $0x8cc] ss:$16 sps:$4 sm:$0xff]  }
  0xd7   : > { %2724 = vmatpush1.bf16.msra.mxu1 %v3773_v31  ;;  %v3860_v31 = vld [vmem:[%s4968_s1 + $0x7c8] ss:$16 sps:$4 sm:$0xff]  }
  0xd8   : > { %2725 = vmatprep.subr.bf16.mxu1 %v3781_v45  ;;  %v3868_v45 = vld [vmem:[%s4968_s1 + $0x7ac] ss:$16 sps:$4 sm:$0xff]  }
  0xd9   : > { %2699 = vmatpush2.bf16.msra.mxu0 %v3776_v46  ;;  %v3863_v46 = vld [vmem:[%s4968_s1 + $0x8c8] ss:$16 sps:$4 sm:$0xff]  }
  0xda   : > { %2700 = vmatprep.subr.bf16.mxu0 %v3784_v47  ;;  %v3871_v47 = vld [vmem:[%s4968_s1 + $0x8ac] ss:$16 sps:$4 sm:$0xff]  }
  0xdb   : > { %2726 = vmatpush1.bf16.msra.mxu1 %v3779_v48  ;;  %v3874_v48 = vld [vmem:[%s4968_s1 + $0x78c] ss:$16 sps:$4 sm:$0xff]  }
  0xdc   : > { %2727 = vmatprep.subr.bf16.mxu1 %v3787_v49  ;;  %v3877_v49 = vld [vmem:[%s4968_s1 + $0x88c] ss:$16 sps:$4 sm:$0xff]  }
  0xdd   : > { %2701 = vmatpush2.bf16.msra.mxu0 %v3782_v50  ;;  %v3872_v50 = vld [vmem:[%s4968_s1 + $0x788] ss:$16 sps:$4 sm:$0xff]  }
  0xde   : > { %2702 = vmatprep.subr.bf16.mxu0 %v3790_v51  ;;  %v3880_v51 = vld [vmem:[%s4968_s1 + $0x76c] ss:$16 sps:$4 sm:$0xff]  }
  0xdf   : > { %2728 = vmatpush1.bf16.msra.mxu1 %v3785_v52  ;;  %v3875_v52 = vld [vmem:[%s4968_s1 + $0x888] ss:$16 sps:$4 sm:$0xff]  }
  0xe0   : > { %2729 = vmatprep.subr.bf16.mxu1 %v3793_v53  ;;  %v3883_v53 = vld [vmem:[%s4968_s1 + $0x86c] ss:$16 sps:$4 sm:$0xff]  }
  0xe1   : > { %2703 = vmatpush2.bf16.msra.mxu0 %v3788_v54  ;;  %v3878_v54 = vld [vmem:[%s4968_s1 + $0x768] ss:$16 sps:$4 sm:$0xff]  }
  0xe2   : > { %2704 = vmatprep.subr.bf16.mxu0 %v3796_v55  ;;  %v3886_v55 = vld [vmem:[%s4968_s1 + $0x74c] ss:$16 sps:$4 sm:$0xff]  }
  0xe3   : > { %2730 = vmatpush1.bf16.msra.mxu1 %v3791_v56  ;;  %v3881_v56 = vld [vmem:[%s4968_s1 + $0x868] ss:$16 sps:$4 sm:$0xff]  }
  0xe4   : > { %2731 = vmatprep.subr.bf16.mxu1 %v3799_v27  ;;  %v3889_v27 = vld [vmem:[%s4968_s1 + $0x84c] ss:$16 sps:$4 sm:$0xff]  }
  0xe5   : > { %2705 = vmatpush2.bf16.msra.mxu0 %v3794_v58  ;;  %v3884_v58 = vld [vmem:[%s4968_s1 + $0x748] ss:$16 sps:$4 sm:$0xff]  }
  0xe6   : > { %2706 = vmatprep.subr.bf16.mxu0 %v3802_v59  ;;  %v3892_v59 = vld [vmem:[%s4968_s1 + $0x72c] ss:$16 sps:$4 sm:$0xff]  }
  0xe7   : > { %2732 = vmatpush1.bf16.msra.mxu1 %v3797_v60  ;;  %v3887_v60 = vld [vmem:[%s4968_s1 + $0x848] ss:$16 sps:$4 sm:$0xff]  }
  0xe8   : > { %2733 = vmatprep.subr.bf16.mxu1 %v3805_v61  ;;  %v3895_v61 = vld [vmem:[%s4968_s1 + $0x82c] ss:$16 sps:$4 sm:$0xff]  }
  0xe9   : > { %2707 = vmatpush2.bf16.msra.mxu0 %v3800_v63  ;;  %v3890_v63 = vld [vmem:[%s4968_s1 + $0x728] ss:$16 sps:$4 sm:$0xff]  }
  0xea   : > { %2762 = vmatprep.subr.bf16.mxu0 %v3811_v0  ;;  %v3898_v0 = vld [vmem:[%s4968_s1 + $0x70c] ss:$16 sps:$4 sm:$0xff]  }
  0xeb   : > { %2734 = vmatpush1.bf16.msra.mxu1 %v3803_v2  ;;  %v3893_v2 = vld [vmem:[%s4968_s1 + $0x828] ss:$16 sps:$4 sm:$0xff]  }
  0xec   : > { %2709 = vmatmul.mubr.bf16.vlgmr.msra.gmra.mxu0 %v4202_v13  ;;  %2735 = vmatprep.subr.bf16.mxu1 %v3808_v3  ;;  %v3812_v13 = vld [vmem:[%s4968_s1 + $0x5c8] ss:$16 sps:$4 sm:$0xff]   ;;  %v3901_v3 = vld [vmem:[%s4968_s1 + $0x80c] ss:$16 sps:$4 sm:$0xff]  }
  0xed   : > { %2763 = vmatpush1.bf16.msra.mxu0 %v3809_v12  ;;  %2794 = vmatprep.mubr.bf16.mxu0 %v4342_v36  ;;  %v3821_v36 = vld [vmem:[%s4968_s1 + $0x6a8] ss:$16 sps:$4 sm:$0xff]  }
  0xee   : > { %2764 = vmatprep.subr.bf16.mxu0 %v3817_v5  ;;  %v3896_v12 = vld [vmem:[%s4968_s1 + $0x708] ss:$16 sps:$4 sm:$0xff]  }
  0xef   : > { %2736 = vmatpush2.bf16.msra.mxu1 %v3806_v6  ;;  %v3899_v5 = vld [vmem:[%s4968_s1 + $0x808] ss:$16 sps:$4 sm:$0xff]  }
  0xf0   : > { %2737 = vmatprep.subr.bf16.mxu1 %v3814_v10 }
  0xf1   : > { %2765 = vmatpush1.bf16.msra.mxu0 %v3815_v11 }
  0xf2   : > { %2766 = vmatprep.subr.bf16.mxu0 %v3823_v14 }
  0xf3   : > { %2738 = vmatpush2.bf16.msra.mxu1 %v3812_v13 }
  0xf4   : > { %2739 = vmatprep.subr.bf16.mxu1 %v3820_v15 }
  0xf5   : > { %2767 = vmatpush1.bf16.msra.mxu0 %v3821_v36 }
  0xf6   : > { %2768 = vmatprep.subr.bf16.mxu0 %v3829_v16 }
  0xf7   : > { %2740 = vmatpush2.bf16.msra.mxu1 %v3818_v17 }
  0xf8   : > { %2741 = vmatprep.subr.bf16.mxu1 %v3826_v7 }
  0xf9   : > { %2769 = vmatpush1.bf16.msra.mxu0 %v3827_v18 }
  0xfa   : > { %2770 = vmatprep.subr.bf16.mxu0 %v3835_v20 }
  0xfb   : > { %2742 = vmatpush2.bf16.msra.mxu1 %v3824_v21 }
  0xfc   : > { %2743 = vmatprep.subr.bf16.mxu1 %v3832_v22 }
  0xfd   : > { %2771 = vmatpush1.bf16.msra.mxu0 %v3833_v23 }
  0xfe   : > { %2772 = vmatprep.subr.bf16.mxu0 %v3841_v24 }
  0xff   : > { %2744 = vmatpush2.bf16.msra.mxu1 %v3830_v25 }
 0x100   : > { %2745 = vmatprep.subr.bf16.mxu1 %v3838_v26 }
 0x101   : > { %2773 = vmatpush1.bf16.msra.mxu0 %v3839_v28 }
 0x102   : > { %2774 = vmatprep.subr.bf16.mxu0 %v3847_v29 }
 0x103   : > { %2746 = vmatpush2.bf16.msra.mxu1 %v3836_v30 }
 0x104   : > { %2747 = vmatprep.subr.bf16.mxu1 %v3844_v32 }
 0x105   : > { %2775 = vmatpush1.bf16.msra.mxu0 %v3845_v33 }
 0x106   : > { %2776 = vmatprep.subr.bf16.mxu0 %v3853_v34 }
 0x107   : > { %2748 = vmatpush2.bf16.msra.mxu1 %v3842_v35 }
 0x108   : > { %2749 = vmatprep.subr.bf16.mxu1 %v3850_v37 }
 0x109   : > { %2777 = vmatpush1.bf16.msra.mxu0 %v3851_v38 }
 0x10a   : > { %2778 = vmatprep.subr.bf16.mxu0 %v3856_v39 }
 0x10b   : > { %2750 = vmatpush2.bf16.msra.mxu1 %v3848_v40 }
 0x10c   : > { %2805 = vmatprep.subr.bf16.mxu1 %v3859_v41  ;;  %v2452_v6 = vpop.f32.mrf.mxu0 }
 0x10d   : > { %2779 = vmatpush2.bf16.msra.mxu0 %v3854_v42  ;;  %v2495_v11 = vpop.f32.mrf.mxu1 }
 0x10e   : > { %2752 = vmatmul.mubr.bf16.vlgmr.msra.gmra.mxu1 %v4422_v62  ;;  %2780 = vmatprep.subr.bf16.mxu0 %v3862_v43  ;;  %v3866_v62 = vld [vmem:[%s4968_s1 + $0x7a8] ss:$16 sps:$4 sm:$0xff]   ;;  %v2454_v10 = vpop.f32.mrf.mxu0  ;;  %v2496_v21 = vadd.f32 %v2495_v11, %v2452_v6 }
 0x10f   : > { %2806 = vmatpush1.bf16.msra.mxu1 %v3857_v9  ;;  %2837 = vmatprep.mubr.bf16.mxu1 %v3912_v8  ;;  %v3869_v8 = vld [vmem:[%s4968_s1 + $0x8a8] ss:$16 sps:$4 sm:$0xff]   ;;  %v2497_v13 = vpop.f32.mrf.mxu1 }
 0x110   : > { %2807 = vmatprep.subr.bf16.mxu1 %v3865_v44  ;;  %v2456_v14 = vpop.f32.mrf.mxu0  ;;  %v2498_v22 = vadd.f32 %v2497_v13, %v2454_v10 }
 0x111   : > { %2781 = vmatpush2.bf16.msra.mxu0 %v3860_v31  ;;  %v2499_v36 = vpop.f32.mrf.mxu1 }
 0x112   : > { %2782 = vmatprep.subr.bf16.mxu0 %v3868_v45  ;;  %v2458_v15 = vpop.f32.mrf.mxu0  ;;  %v2500_v24 = vadd.f32 %v2499_v36, %v2456_v14 }
 0x113   : > { %2808 = vmatpush1.bf16.msra.mxu1 %v3863_v46  ;;  %v2501_v17 = vpop.f32.mrf.mxu1 }
 0x114   : > { %2809 = vmatprep.subr.bf16.mxu1 %v3871_v47  ;;  %v2502_v26 = vadd.f32 %v2501_v17, %v2458_v15 }
 0x115   : > { %2783 = vmatpush2.bf16.msra.mxu0 %v3866_v62 }
 0x116   : > { %2784 = vmatprep.subr.bf16.mxu0 %v3874_v48 }
 0x117   : > { %2810 = vmatpush1.bf16.msra.mxu1 %v3869_v8 }
 0x118   : > { %2811 = vmatprep.subr.bf16.mxu1 %v3877_v49 }
 0x119   : > { %2785 = vmatpush2.bf16.msra.mxu0 %v3872_v50 }
 0x11a   : > { %2786 = vmatprep.subr.bf16.mxu0 %v3880_v51 }
 0x11b   : > { %2812 = vmatpush1.bf16.msra.mxu1 %v3875_v52 }
 0x11c   : > { %2813 = vmatprep.subr.bf16.mxu1 %v3883_v53 }
 0x11d   : > { %2787 = vmatpush2.bf16.msra.mxu0 %v3878_v54 }
 0x11e   : > { %2788 = vmatprep.subr.bf16.mxu0 %v3886_v55 }
 0x11f   : > { %2814 = vmatpush1.bf16.msra.mxu1 %v3881_v56 }
 0x120   : > { %2815 = vmatprep.subr.bf16.mxu1 %v3889_v27 }
 0x121   : > { %2789 = vmatpush2.bf16.msra.mxu0 %v3884_v58 }
 0x122   : > { %2790 = vmatprep.subr.bf16.mxu0 %v3892_v59 }
 0x123   : > { %2816 = vmatpush1.bf16.msra.mxu1 %v3887_v60 }
 0x124   : > { %2817 = vmatprep.subr.bf16.mxu1 %v3895_v61 }
 0x125   : > { %2791 = vmatpush2.bf16.msra.mxu0 %v3890_v63 }
 0x126   : > { %2792 = vmatprep.subr.bf16.mxu0 %v3898_v0 }
 0x127   : > { %2818 = vmatpush1.bf16.msra.mxu1 %v3893_v2 }
 0x128   : > { %2819 = vmatprep.subr.bf16.mxu1 %v3901_v3 }
 0x129   : > { %2793 = vmatpush2.bf16.msra.mxu0 %v3896_v12 }
 0x12b   : > { %2820 = vmatpush1.bf16.msra.mxu1 %v3899_v5 }
 0x12c   : > { %2795 = vmatmul.mubr.bf16.vlgmr.msra.gmra.mxu0 %v4432_v1 }
 0x12e   : > { %2838 = vmatmul.mubr.bf16.vlgmr.msra.gmra.mxu1 %v4534_v57 }
 0x14c   : > { %v2538_v16 = vpop.f32.mrf.mxu0 }
 0x14d   : > { %v2539_v1 = vadd.f32 %v2538_v16, %v2496_v21 }
 0x14e   : > { %v2540_v7 = vpop.f32.mrf.mxu0  ;;  %v2581_v18 = vpop.f32.mrf.mxu1 }
 0x14f   : > { %v2541_v25 = vadd.f32 %v2540_v7, %v2498_v22  ;;  %v2582_v32 = vadd.f32 %v2581_v18, %v2539_v1 }
 0x150   : > { %v2542_v20 = vpop.f32.mrf.mxu0  ;;  %v2583_v23 = vpop.f32.mrf.mxu1 }
 0x151   : > { %v2543_v28 = vadd.f32 %v2542_v20, %v2500_v24  ;;  %v2584_v33 = vadd.f32 %v2583_v23, %v2541_v25 }
 0x152   : > { %v2544_v57 = vpop.f32.mrf.mxu0  ;;  %v2585_v29 = vpop.f32.mrf.mxu1 }
 0x153   : > { %v2545_v34 = vadd.f32 %v2544_v57, %v2502_v26  ;;  %v2586_v37 = vadd.f32 %v2585_v29, %v2543_v28 }
 0x154   : > { %v2587_v40 = vpop.f32.mrf.mxu1 }
 0x155   : > { %v2588_v42 = vadd.f32 %v2587_v40, %v2545_v34 }
 0x16c   : > { %v2624_v30 = vpop.f32.mrf.mxu0 }
 0x16d   : > { %v2625_v38 = vadd.f32 %v2624_v30, %v2582_v32 }
 0x16e   : > { %v2626_v35 = vpop.f32.mrf.mxu0 }
 0x16f   : > { %v2627_v39 = vadd.f32 %v2626_v35, %v2584_v33  ;;  %v2938_v31 = vmul.f32 %v2625_v38, %v2625_v38 }
 0x170   : > { %v2628_v41 = vpop.f32.mrf.mxu0 }
 0x171   : > { %v3454_v43 = vpack.c.bf16 %v2627_v39, %v2625_v38  ;;  %v2629_v9 = vadd.f32 %v2628_v41, %v2586_v37  ;;  %v2939_v50 = vmul.f32 %v2627_v39, %v2627_v39 }
 0x172   : > { %v2630_v44 = vpop.f32.mrf.mxu0 }
 0x173   : > { %2872 = vst [vmem:[%s4931_s14] sm:$0xff] %v3454_v43  ;;  %v2876_v45 = vadd.f32 %v2629_v9, %v2625_v38  ;;  %v2942_v46 = vmul.f32 %v2629_v9, %v2629_v9  ;;  %v2631_v47 = vadd.f32 %v2630_v44, %v2588_v42 }
 0x175   : > { %v2877_v62 = vrot.slane %v2876_v45, 4  ;;  %v2946_v48 = vadd.f32 %v2942_v46, %v2938_v31  ;;  %v3456_v8 = vpack.c.bf16 %v2631_v47, %v2629_v9  ;;  %v2883_v49 = vadd.f32 %v2631_v47, %v2627_v39 }
 0x176   : > { %v2943_v51 = vmul.f32 %v2631_v47, %v2631_v47 }
 0x177   : > { %v2878_v52 = vadd.f32 %v2877_v62, %v2876_v45  ;;  %v2947_v53 = vrot.slane %v2946_v48, 4  ;;  %2874 = vst [vmem:[%s4931_s14 + $0x10] sm:$0xff] %v3456_v8  ;;  %v2884_v54 = vrot.slane %v2883_v49, 4 }
 0x178   : > { %v2953_v55 = vadd.f32 %v2943_v51, %v2939_v50 }
 0x179   : > { %v2879_v56 = vrot.slane %v2878_v52, 2  ;;  %v2948_v27 = vadd.f32 %v2947_v53, %v2946_v48  ;;  %v2885_v58 = vadd.f32 %v2884_v54, %v2883_v49 }
 0x17a   : > { %v2954_v59 = vrot.slane %v2953_v55, 4 }
 0x17b   : > { %v2880_v60 = vadd.f32 %v2879_v56, %v2878_v52  ;;  %v2949_v61 = vrot.slane %v2948_v27, 2  ;;  %v2886_v63 = vrot.slane %v2885_v58, 2 }
 0x17c   : > { %v2955_v0 = vadd.f32 %v2954_v59, %v2953_v55 }
 0x17d   : > { %v2881_v2 = vrot.slane %v2880_v60, 1  ;;  %v2950_v3 = vadd.f32 %v2949_v61, %v2948_v27  ;;  %v2887_v12 = vadd.f32 %v2886_v63, %v2885_v58 }
 0x17e   : > { %v2956_v5 = vrot.slane %v2955_v0, 2 }
 0x17f   : > { %v2888_v6 = vrot.slane %v2887_v12, 1  ;;  %v2951_v10 = vrot.slane %v2950_v3, 1  ;;  %v4935_v14 = vadd.f32 %v2881_v2, %v2880_v60 }
 0x180   : > { %v2957_v11 = vadd.f32 %v2956_v5, %v2955_v0 }
 0x181   : > { %v4937_v13 = vadd.f32 %v2888_v6, %v2887_v12  ;;  %v4941_v16 = vadd.f32 %v2951_v10, %v2950_v3  ;;  %v3913_v12 = vmov 1966171168  }
 0x182   : > { %v2958_v15 = vrot.slane %v2957_v11, 1  ;;  %v2911_v5 = vunpack.c.l.s4 %v3913_v12 }
 0x183   : > { %v2908_v36 = vcombine.low %v4935_v14, %v4937_v13 }
 0x184   : > { %v4943_v17 = vadd.f32 %v2958_v15, %v2957_v11 }
 0x186   : > { %v2978_v7 = vcombine.low %v4941_v16, %v4943_v17 }
 0x18e   : > { %v2667_v18 = vpop.f32.mrf.mxu1 }
 0x190   : > { %v2669_v20 = vpop.f32.mrf.mxu1 }
 0x192   : > { %v2671_v21 = vpop.f32.mrf.mxu1 }
 0x194   : > { %v2673_v22 = vpop.f32.mrf.mxu1 }
 0x1ac   : > { %v2710_v23 = vpop.f32.mrf.mxu0 }
 0x1ad   : > { %v2711_v28 = vadd.f32 %v2710_v23, %v2667_v18  ;;  %v2912_v23 = vunpack.c.0.s8 %v2911_v5 }
 0x1ae   : > { %v2712_v1 = vpop.f32.mrf.mxu0 }
 0x1af   : > { %v2713_v30 = vadd.f32 %v2712_v1, %v2669_v20 }
 0x1b0   : > { %v2714_v57 = vpop.f32.mrf.mxu0 }
 0x1b1   : > { %v2715_v35 = vadd.f32 %v2714_v57, %v2671_v21 }
 0x1b2   : > { %v2716_v29 = vpop.f32.mrf.mxu0 }
 0x1b3   : > { %v2717_v41 = vadd.f32 %v2716_v29, %v2673_v22 }
 0x1ce   : > { %v2753_v24 = vpop.f32.mrf.mxu1 }
 0x1cf   : > { %v2754_v32 = vadd.f32 %v2753_v24, %v2711_v28 }
 0x1d0   : > { %v2755_v25 = vpop.f32.mrf.mxu1 }
 0x1d1   : > { %v2756_v37 = vadd.f32 %v2755_v25, %v2713_v30  ;;  %v2915_v30 = vsub.s32 %v2912_v23, %v4142_v19 }
 0x1d2   : > { %v2757_v26 = vpop.f32.mrf.mxu1 }
 0x1d3   : > { %v2758_v42 = vadd.f32 %v2757_v26, %v2715_v35 }
 0x1d4   : > { %v2759_v33 = vpop.f32.mrf.mxu1 }
 0x1d5   : > { %v2760_v31 = vadd.f32 %v2759_v33, %v2717_v41 }
 0x1ec   : > { %v2796_v34 = vpop.f32.mrf.mxu0 }
 0x1ed   : > { %v2797_v38 = vadd.f32 %v2796_v34, %v2754_v32 }
 0x1ee   : > { %v2839_v39 = vpop.f32.mrf.mxu1  ;;  %v2798_v40 = vpop.f32.mrf.mxu0 }
 0x1ef   : > { %v2799_v43 = vadd.f32 %v2798_v40, %v2756_v37  ;;  %v2840_v45 = vadd.f32 %v2839_v39, %v2797_v38  ;;  %v2916_v39 = vrot.slane %v2908_v36, %v2915_v30 }
 0x1f0   : > { %v2841_v9 = vpop.f32.mrf.mxu1  ;;  %v2800_v44 = vpop.f32.mrf.mxu0 }
 0x1f1   : > { %v2842_v46 = vadd.f32 %v2841_v9, %v2799_v43  ;;  %v2801_v47 = vadd.f32 %v2800_v44, %v2758_v42  ;;  %v2940_v52 = vmul.f32 %v2840_v45, %v2840_v45  ;;  %v2986_v43 = vrot.slane %v2978_v7, %v2915_v30 }
 0x1f2   : > { %v2843_v62 = vpop.f32.mrf.mxu1  ;;  %v2802_v48 = vpop.f32.mrf.mxu0 }
 0x1f3   : > { %v3455_v8 = vpack.c.bf16 %v2842_v46, %v2840_v45  ;;  %v2844_v49 = vadd.f32 %v2843_v62, %v2801_v47  ;;  %v2803_v50 = vadd.f32 %v2802_v48, %v2760_v31  ;;  %v2941_v60 = vmul.f32 %v2842_v46, %v2842_v46 }
 0x1f4   : > { %v2845_v51 = vpop.f32.mrf.mxu1 }
 0x1f5   : > { %2873 = vst [vmem:[%s4931_s14 + $0x8] sm:$0xff] %v3455_v8  ;;  %v2890_v53 = vadd.f32 %v2844_v49, %v2840_v45  ;;  %v2944_v54 = vmul.f32 %v2844_v49, %v2844_v49  ;;  %v2846_v55 = vadd.f32 %v2845_v51, %v2803_v50 }
 0x1f7   : > { %v2891_v56 = vrot.slane %v2890_v53, 4  ;;  %v2960_v27 = vadd.f32 %v2944_v54, %v2940_v52  ;;  %v3457_v58 = vpack.c.bf16 %v2846_v55, %v2844_v49  ;;  %v2897_v59 = vadd.f32 %v2846_v55, %v2842_v46 }
 0x1f8   : > { %v2945_v61 = vmul.f32 %v2846_v55, %v2846_v55 }
 0x1f9   : > { %v2892_v63 = vadd.f32 %v2891_v56, %v2890_v53  ;;  %v2961_v0 = vrot.slane %v2960_v27, 4  ;;  %2875 = vst [vmem:[%s4931_s14 + $0x18] sm:$0xff] %v3457_v58  ;;  %v2898_v2 = vrot.slane %v2897_v59, 4 }
 0x1fa   : > { %v2967_v3 = vadd.f32 %v2945_v61, %v2941_v60 }
 0x1fb   : > { %v2893_v6 = vrot.slane %v2892_v63, 2  ;;  %v2962_v10 = vadd.f32 %v2961_v0, %v2960_v27  ;;  %v2899_v11 = vadd.f32 %v2898_v2, %v2897_v59 }
 0x1fc   : > { %v2968_v15 = vrot.slane %v2967_v3, 4 }
 0x1fd   : > { %v2894_v18 = vadd.f32 %v2893_v6, %v2892_v63  ;;  %v2963_v20 = vrot.slane %v2962_v10, 2  ;;  %v2900_v21 = vrot.slane %v2899_v11, 2 }
 0x1fe   : > { %v2969_v22 = vadd.f32 %v2968_v15, %v2967_v3 }
 0x1ff   : > { %v2895_v24 = vrot.slane %v2894_v18, 1  ;;  %v2964_v1 = vadd.f32 %v2963_v20, %v2962_v10  ;;  %v2901_v25 = vadd.f32 %v2900_v21, %v2899_v11 }
 0x200   : > { %v2970_v57 = vrot.slane %v2969_v22, 2 }
 0x201   : > { %v2902_v26 = vrot.slane %v2901_v25, 1  ;;  %v2965_v28 = vrot.slane %v2964_v1, 1  ;;  %v2896_v32 = vadd.f32 %v2895_v24, %v2894_v18 }
 0x202   : > { %v2971_v29 = vadd.f32 %v2970_v57, %v2969_v22 }
 0x203   : > { %v2903_v33 = vadd.f32 %v2902_v26, %v2901_v25  ;;  %v2966_v37 = vadd.f32 %v2965_v28, %v2964_v1 }
 0x204   : > { %v2972_v34 = vrot.slane %v2971_v29, 1 }
 0x205   : > { %v2909_v35 = vcombine.low %v2896_v32, %v2903_v33 }
 0x206   : > { %v2973_v38 = vadd.f32 %v2972_v34, %v2971_v29 }
 0x207   : > { %v2923_v40 = vrot.slane %v2909_v35, %v2915_v30 }
 0x208   : > { %v2979_v41 = vcombine.low %v2966_v37, %v2973_v38 }
 0x209   : > { %v2924_v42 = vcombine.low %v2916_v39, %v2923_v40 }
 0x20a   : > { %v2993_v19 = vrot.slane %v2979_v41, %v2915_v30 }
 0x20b   : > { %v2931_v9 = vrot.slane %v2924_v42, %v2915_v30 }
 0x20c   : > { %v2994_v44 = vcombine.low %v2986_v43, %v2993_v19 }
 0x20d   : > { %2937 = vst.msk [vmem:[%s268_s18] sm:$0xf] %vm2935_vm0, %v2931_v9 }
 0x20e   : > { %v3001_v14 = vrot.slane %v2994_v44, %v2915_v30 }
 0x210   : > { %3003 = vst.msk [vmem:[%s272_s22] sm:$0xf] %vm2935_vm0, %v3001_v14 }
 0x211 PF: > { %s17_s21 = sadd.s32 1, %s3908_s21  }
 0x212   : > { %p14_p4 = scmp.ge.s32.totalorder %s17_s21, 4  }
 0x214   :  { %16 = sbr.rel (!%p14_p4) target bundleno = 1 (0x1), region = 92 }

// kernel: _lambda_.15
= control target key start
LH: loop header
LB: loop body
LE: loop exit
PB: predicated region body
PF: predicated region fallthrough
CT: control target
= control target key end

     0   :  { %s3686_s9 = smov 0   ;;  %s4272_s0 = inlined_call_operand.vmem [shape: bf16[2,16,16,128], index: 0, kind: input, shape index: {}]   ;;  %s4273_s1 = inlined_call_operand.vmem [shape: bf16[2048,128], index: 1, kind: input, shape index: {}]   ;;  %s4274_s2 = inlined_call_operand.vmem [shape: bf16[2,64,128], index: 2, kind: output, shape index: {}]  }
   0x1 LB: > { %s2818_s10 = sadd.s32 4294967295, %s3668_s9   ;;  %p2822_p0 = scmp.ge.s32.totalorder %s3668_s9, 1  ;;  %s3668_s9 = sphi %s3686_s9, %s12_s9  }
   0x2   : > { %p112_p1 = scmp.lt.s32.totalorder %s3668_s9, 3 }
   0x4   : > { %p113_p2 = pnand %p2822_p0, %p112_p1 }
   0x6   : > { %116 = sbr.rel (%p113_p2) target bundleno = 381 (0x17d), region = 28 }
   0xb   : > { %v3534_v0 = vld [vmem:[%s4273_s1 + $0x78] sm:$0xff]   ;;  %v3670_v3 = vmov 0.0   ;;  %v3538_v5 = vld [vmem:[%s4273_s1 + $0x70] sm:$0xff]   ;;  %v3542_v9 = vld [vmem:[%s4273_s1 + $0x68] sm:$0xff]   ;;  %p134_p3 = scmp.lt.s32.totalorder %s2818_s10, 1 }
   0xc   : > { %v3535_v1 = vld [vmem:[%s4273_s1 + $0xf8] sm:$0xff]   ;;  %3205 = vmatprep.subr.bf16.mxu0 %v3534_v0  ;;  %145 = vst [vmem:[#allocation2] sm:$0xff] %v3670_v3  ;;  %146 = vst [vmem:[#allocation2 + $0x8] sm:$0xff] %v3670_v3  ;;  %v3539_v6 = vld [vmem:[%s4273_s1 + $0xf0] sm:$0xff]  }
   0xd   : > { %v3536_v2 = vld [vmem:[%s4273_s1 + $0x38] sm:$0xff]   ;;  %151 = vst [vmem:[#allocation2 + $0x30] sm:$0xff] %v3670_v3  ;;  %152 = vst [vmem:[#allocation2 + $0x38] sm:$0xff] %v3670_v3  ;;  %3245 = vmatprep.subr.bf16.mxu1 %v3535_v1  ;;  %v3540_v7 = vld [vmem:[%s4273_s1 + $0x30] sm:$0xff]   ;;  %s4304_s10 = smov (!%p134_p3, %s2818_s10), 1 }
   0xe   : > { %153 = vst [vmem:[#allocation2 + $0x40] sm:$0x3] %v3670_v3  ;;  %147 = vst [vmem:[#allocation2 + $0x10] sm:$0x3] %v3670_v3  ;;  %v3537_v4 = vld [vmem:[%s4273_s1 + $0xb8] sm:$0xff]   ;;  %3206 = vmatpush3.bf16.msra.mxu0 %v3536_v2  ;;  %v3541_v8 = vld [vmem:[%s4273_s1 + $0xb0] sm:$0xff]  }
   0xf   : > { %148 = vst [vmem:[#allocation2 + $0x18] sm:$0xff] %v3670_v3  ;;  %149 = vst [vmem:[#allocation2 + $0x20] sm:$0xff] %v3670_v3  ;;  %3246 = vmatpush3.bf16.msra.mxu1 %v3537_v4  ;;  %3207 = vmatprep.subr.bf16.mxu0 %v3538_v5  ;;  %v3543_v10 = vld [vmem:[%s4273_s1 + $0xe8] sm:$0xff]   ;;  %v3546_v13 = vld [vmem:[%s4273_s1 + $0x60] sm:$0xff]   ;;  %s3029_s13 = sshll.u32 %s4304_s10, 7  ;;  %s3030_s17 = sshll.u32 %s4304_s10, 5 }
  0x10   : > { %150 = vst [vmem:[#allocation2 + $0x28] sm:$0x3] %v3670_v3  ;;  %154 = vst [vmem:[#allocation2 + $0x48] sm:$0xff] %v3670_v3  ;;  %3247 = vmatprep.subr.bf16.mxu1 %v3539_v6  ;;  %v3544_v11 = vld [vmem:[%s4273_s1 + $0x28] sm:$0xff]   ;;  %v3547_v14 = vld [vmem:[%s4273_s1 + $0xe0] sm:$0xff]   ;;  %s3794_s22 = scalar_lea.vmem %s4272_s0, %s3029_s13  ;;  %s4243_s10 = scalar_lea.vmem %s4274_s2, %s3030_s17 }
  0x11   : > { %155 = vst [vmem:[#allocation2 + $0x50] sm:$0xff] %v3670_v3  ;;  %156 = vst [vmem:[#allocation2 + $0x58] sm:$0x3] %v3670_v3  ;;  %v3545_v12 = vld [vmem:[%s4273_s1 + $0xa8] sm:$0xff]   ;;  %v3548_v15 = vld [vmem:[%s4273_s1 + $0x20] sm:$0xff]  }
  0x12   : > { %157 = vst [vmem:[#allocation2 + $0x60] sm:$0xff] %v3670_v3  ;;  %158 = vst [vmem:[#allocation2 + $0x68] sm:$0xff] %v3670_v3  ;;  %3208 = vmatpush3.bf16.msra.mxu0 %v3540_v7  ;;  %v3549_v16 = vld [vmem:[%s4273_s1 + $0xa0] sm:$0xff]   ;;  %v3550_v17 = vld [vmem:[%s4273_s1 + $0x58] sm:$0xff]  }
  0x13   : > { %159 = vst [vmem:[#allocation2 + $0x70] sm:$0x3] %v3670_v3  ;;  %160 = vst [vmem:[#allocation2 + $0x78] sm:$0xff] %v3670_v3  ;;  %3248 = vmatpush3.bf16.msra.mxu1 %v3541_v8  ;;  %3209 = vmatprep.subr.bf16.mxu0 %v3542_v9  ;;  %v3551_v18 = vld [vmem:[%s4273_s1 + $0xd8] sm:$0xff]   ;;  %v3554_v21 = vld [vmem:[%s4273_s1 + $0x50] sm:$0xff]  }
  0x14   : > { %161 = vst [vmem:[#allocation2 + $0x80] sm:$0xff] %v3670_v3  ;;  %162 = vst [vmem:[#allocation2 + $0x88] sm:$0x3] %v3670_v3  ;;  %3249 = vmatprep.subr.bf16.mxu1 %v3543_v10  ;;  %v3552_v19 = vld [vmem:[%s4273_s1 + $0x18] sm:$0xff]   ;;  %v3555_v22 = vld [vmem:[%s4273_s1 + $0xd0] sm:$0xff]  }
  0x15   : > { %163 = vst [vmem:[#allocation2 + $0x90] sm:$0xff] %v3670_v3  ;;  %164 = vst [vmem:[#allocation2 + $0x98] sm:$0xff] %v3670_v3  ;;  %v3553_v20 = vld [vmem:[%s4273_s1 + $0x98] sm:$0xff]   ;;  %v3556_v23 = vld [vmem:[%s4273_s1 + $0x10] sm:$0xff]  }
  0x16   : > { %165 = vst [vmem:[#allocation2 + $0xa0] sm:$0x3] %v3670_v3  ;;  %166 = vst [vmem:[#allocation2 + $0xa8] sm:$0xff] %v3670_v3  ;;  %3210 = vmatpush3.bf16.msra.mxu0 %v3544_v11  ;;  %v3557_v24 = vld [vmem:[%s4273_s1 + $0x90] sm:$0xff]   ;;  %v3558_v25 = vld [vmem:[%s4273_s1 + $0x48] sm:$0xff]  }
  0x17   : > { %167 = vst [vmem:[#allocation2 + $0xb0] sm:$0xff] %v3670_v3  ;;  %168 = vst [vmem:[#allocation2 + $0xb8] sm:$0x3] %v3670_v3  ;;  %3250 = vmatpush3.bf16.msra.mxu1 %v3545_v12  ;;  %3211 = vmatprep.subr.bf16.mxu0 %v3546_v13  ;;  %v3559_v26 = vld [vmem:[%s4273_s1 + $0xc8] sm:$0xff]   ;;  %v3562_v29 = vld [vmem:[%s4273_s1 + $0x40] sm:$0xff]  }
  0x18   : > { %169 = vst [vmem:[#allocation2 + $0xc0] sm:$0xff] %v3670_v3  ;;  %170 = vst [vmem:[#allocation2 + $0xc8] sm:$0xff] %v3670_v3  ;;  %3251 = vmatprep.subr.bf16.mxu1 %v3547_v14  ;;  %v3560_v27 = vld [vmem:[%s4273_s1 + $0x8] sm:$0xff]   ;;  %v3563_v30 = vld [vmem:[%s4273_s1 + $0xc0] sm:$0xff]  }
  0x19   : > { %171 = vst [vmem:[#allocation2 + $0xd0] sm:$0x3] %v3670_v3  ;;  %172 = vst [vmem:[#allocation2 + $0xd8] sm:$0xff] %v3670_v3  ;;  %v3561_v28 = vld [vmem:[%s4273_s1 + $0x88] sm:$0xff]   ;;  %v3564_v31 = vld [vmem:[%s4273_s1] sm:$0xff]  }
  0x1a   : > { %173 = vst [vmem:[#allocation2 + $0xe0] sm:$0xff] %v3670_v3  ;;  %174 = vst [vmem:[#allocation2 + $0xe8] sm:$0x3] %v3670_v3  ;;  %3212 = vmatpush3.bf16.msra.mxu0 %v3548_v15  ;;  %v3565_v32 = vld [vmem:[%s4273_s1 + $0x80] sm:$0xff]   ;;  %v3187_v33 = vld [vmem:[%s3794_s22 + $0x8] sm:$0xff]  }
  0x1b   : > { %175 = vst [vmem:[#allocation2 + $0xf0] sm:$0xff] %v3670_v3  ;;  %176 = vst [vmem:[#allocation2 + $0xf8] sm:$0xff] %v3670_v3  ;;  %3252 = vmatpush3.bf16.msra.mxu1 %v3549_v16  ;;  %3213 = vmatprep.subr.bf16.mxu0 %v3550_v17  ;;  %v3109_v34 = vunpack.c.l.bf16 %v3187_v33  ;;  %v3110_v35 = vunpack.c.h.bf16 %v3187_v33  ;;  %v3566_v36 = vld [vmem:[%s4273_s1 + $0x178] sm:$0xff]   ;;  %v320_v38 = vld [vmem:[#allocation2 + $0x1] ss:$2 sm:$0xff] }
  0x1c   : > { %177 = vst [vmem:[#allocation2 + $0x100] sm:$0x3] %v3670_v3  ;;  %178 = vst [vmem:[#allocation2 + $0x108] sm:$0xff] %v3670_v3  ;;  %3253 = vmatprep.subr.bf16.mxu1 %v3551_v18  ;;  %v3567_v37 = vld [vmem:[%s4273_s1 + $0x1f8] sm:$0xff]   ;;  %v368_v39 = vld [vmem:[#allocation2 + $0x3] ss:$2 sm:$0xff] }
  0x1d   : > { %179 = vst [vmem:[#allocation2 + $0x110] sm:$0xff] %v3670_v3  ;;  %180 = vst [vmem:[#allocation2 + $0x118] sm:$0x3] %v3670_v3  ;;  %v296_v40 = vld [vmem:[#allocation2] ss:$2 sm:$0xff]  ;;  %v3568_v42 = vld [vmem:[%s4273_s1 + $0x138] sm:$0xff]  }
  0x1e   : > { %181 = vst [vmem:[#allocation2 + $0x120] sm:$0xff] %v3670_v3  ;;  %182 = vst [vmem:[#allocation2 + $0x128] sm:$0xff] %v3670_v3  ;;  %3214 = vmatpush3.bf16.msra.mxu0 %v3552_v19  ;;  %v344_v41 = vld [vmem:[#allocation2 + $0x2] ss:$2 sm:$0xff]  ;;  %v3569_v43 = vld [vmem:[%s4273_s1 + $0x1b8] sm:$0xff]  }
  0x1f   : > { %183 = vst [vmem:[#allocation2 + $0x130] sm:$0x3] %v3670_v3  ;;  %184 = vst [vmem:[#allocation2 + $0x138] sm:$0xff] %v3670_v3  ;;  %3254 = vmatpush3.bf16.msra.mxu1 %v3553_v20  ;;  %3215 = vmatprep.subr.bf16.mxu0 %v3554_v21  ;;  %v3189_v44 = vld [vmem:[%s3794_s22 + $0x18] sm:$0xff]   ;;  %v3570_v48 = vld [vmem:[%s4273_s1 + $0x170] sm:$0xff]  }
  0x20   : > { %185 = vst [vmem:[#allocation2 + $0x140] sm:$0xff] %v3670_v3  ;;  %186 = vst [vmem:[#allocation2 + $0x148] sm:$0x3] %v3670_v3  ;;  %3255 = vmatprep.subr.bf16.mxu1 %v3555_v22  ;;  %v3117_v49 = vunpack.c.l.bf16 %v3189_v44  ;;  %v3118_v50 = vunpack.c.h.bf16 %v3189_v44  ;;  %v3191_v55 = vld [vmem:[%s3794_s22 + $0x28] sm:$0xff]   ;;  %v3571_v57 = vld [vmem:[%s4273_s1 + $0x1f0] sm:$0xff]  }
  0x21   : > { %187 = vst [vmem:[#allocation2 + $0x150] sm:$0xff] %v3670_v3  ;;  %188 = vst [vmem:[#allocation2 + $0x158] sm:$0xff] %v3670_v3  ;;  %v3125_v58 = vunpack.c.l.bf16 %v3191_v55  ;;  %v3126_v59 = vunpack.c.h.bf16 %v3191_v55  ;;  %v3572_v60 = vld [vmem:[%s4273_s1 + $0x130] sm:$0xff]   ;;  %v3574_v62 = vld [vmem:[%s4273_s1 + $0x168] sm:$0xff]  }
  0x22   : > { %189 = vst [vmem:[#allocation2 + $0x160] sm:$0x3] %v3670_v3  ;;  %190 = vst [vmem:[#allocation2 + $0x168] sm:$0xff] %v3670_v3  ;;  %3216 = vmatpush3.bf16.msra.mxu0 %v3556_v23  ;;  %v3573_v61 = vld [vmem:[%s4273_s1 + $0x1b0] sm:$0xff]   ;;  %v3575_v63 = vld [vmem:[%s4273_s1 + $0x1e8] sm:$0xff]  }
  0x23   : > { %191 = vst [vmem:[#allocation2 + $0x170] sm:$0xff] %v3670_v3  ;;  %192 = vst [vmem:[#allocation2 + $0x178] sm:$0x3] %v3670_v3  ;;  %3256 = vmatpush3.bf16.msra.mxu1 %v3557_v24  ;;  %3217 = vmatprep.subr.bf16.mxu0 %v3558_v25  ;;  %v3576_v0 = vld [vmem:[%s4273_s1 + $0x128] sm:$0xff]   ;;  %v3578_v6 = vld [vmem:[%s4273_s1 + $0x160] sm:$0xff]  }
  0x24   : > { %193 = vst [vmem:[#allocation2 + $0x180] sm:$0xff] %v3670_v3  ;;  %194 = vst [vmem:[#allocation2 + $0x188] sm:$0xff] %v3670_v3  ;;  %3257 = vmatprep.subr.bf16.mxu1 %v3559_v26  ;;  %v3577_v1 = vld [vmem:[%s4273_s1 + $0x1a8] sm:$0xff]   ;;  %v3579_v7 = vld [vmem:[%s4273_s1 + $0x1e0] sm:$0xff]  }
  0x25   : > { %195 = vst [vmem:[#allocation2 + $0x190] sm:$0x3] %v3670_v3  ;;  %196 = vst [vmem:[#allocation2 + $0x198] sm:$0xff] %v3670_v3  ;;  %v3580_v11 = vld [vmem:[%s4273_s1 + $0x120] sm:$0xff]   ;;  %v3193_v17 = vld [vmem:[%s3794_s22 + $0x38] sm:$0xff]  }
  0x26   : > { %197 = vst [vmem:[#allocation2 + $0x1a0] sm:$0xff] %v3670_v3  ;;  %198 = vst [vmem:[#allocation2 + $0x1a8] sm:$0x3] %v3670_v3  ;;  %3218 = vmatpush3.bf16.msra.mxu0 %v3560_v27  ;;  %v3581_v12 = vld [vmem:[%s4273_s1 + $0x1a0] sm:$0xff]   ;;  %v3195_v18 = vld [vmem:[%s3794_s22 + $0x48] sm:$0xff]   ;;  %v3133_v20 = vunpack.c.l.bf16 %v3193_v17  ;;  %v3134_v21 = vunpack.c.h.bf16 %v3193_v17 }
  0x27   : > { %3258 = vmatpush3.bf16.msra.mxu1 %v3561_v28  ;;  %3219 = vmatprep.subr.bf16.mxu0 %v3562_v29  ;;  %266 = vst [vmem:[#allocation2 + $0x31] sm:$0xff] %v3109_v34  ;;  %267 = vst [vmem:[#allocation2 + $0x39] sm:$0xff] %v3110_v35  ;;  %v3141_v22 = vunpack.c.l.bf16 %v3195_v18  ;;  %v3582_v23 = vld [vmem:[%s4273_s1 + $0x158] sm:$0xff]   ;;  %v3142_v24 = vunpack.c.h.bf16 %v3195_v18  ;;  %v3586_v28 = vld [vmem:[%s4273_s1 + $0x150] sm:$0xff]  }
  0x28   : > { %3259 = vmatprep.subr.bf16.mxu1 %v3563_v30  ;;  %270 = vst [vmem:[#allocation2 + $0x61] sm:$0xff] %v3117_v49  ;;  %271 = vst [vmem:[#allocation2 + $0x69] sm:$0xff] %v3118_v50  ;;  %v3583_v25 = vld [vmem:[%s4273_s1 + $0x1d8] sm:$0xff]   ;;  %v3587_v29 = vld [vmem:[%s4273_s1 + $0x1d0] sm:$0xff]  }
  0x29   : > { %274 = vst [vmem:[#allocation2 + $0x91] sm:$0xff] %v3125_v58  ;;  %275 = vst [vmem:[#allocation2 + $0x99] sm:$0xff] %v3126_v59  ;;  %v3584_v26 = vld [vmem:[%s4273_s1 + $0x118] sm:$0xff]   ;;  %v3588_v30 = vld [vmem:[%s4273_s1 + $0x110] sm:$0xff]  }
  0x2a   : > { %3220 = vmatpush3.bf16.msra.mxu0 %v3564_v31  ;;  %278 = vst [vmem:[#allocation2 + $0xc1] sm:$0xff] %v3133_v20  ;;  %279 = vst [vmem:[#allocation2 + $0xc9] sm:$0xff] %v3134_v21  ;;  %v3585_v27 = vld [vmem:[%s4273_s1 + $0x198] sm:$0xff]   ;;  %v3589_v31 = vld [vmem:[%s4273_s1 + $0x190] sm:$0xff]  }
  0x2b   : > { %3260 = vmatpush3.bf16.msra.mxu1 %v3565_v32  ;;  %3285 = vmatprep.subr.bf16.mxu0 %v3566_v36  ;;  %282 = vst [vmem:[#allocation2 + $0xf1] sm:$0xff] %v3141_v22  ;;  %283 = vst [vmem:[#allocation2 + $0xf9] sm:$0xff] %v3142_v24  ;;  %v3197_v32 = vld [vmem:[%s3794_s22 + $0x58] sm:$0xff]   ;;  %v3199_v33 = vld [vmem:[%s3794_s22 + $0x68] sm:$0xff]  }
  0x2c   : > { %3325 = vmatprep.subr.bf16.mxu1 %v3567_v37  ;;  %v3149_v37 = vunpack.c.l.bf16 %v3197_v32  ;;  %v3590_v50 = vld [vmem:[%s4273_s1 + $0x148] sm:$0xff]   ;;  %v3595_v55 = vld [vmem:[%s4273_s1 + $0x1c0] sm:$0xff]   ;;  %v3192_v18 = vld [vmem:[%s3794_s22 + $0x30] sm:$0xff]  }
  0x2d   : > { %v3601_v22 = vld [vmem:[%s4273_s1 + $0x2b8] sm:$0xff]   ;;  %v3130_v24 = vunpack.c.h.bf16 %v3192_v18 }
  0x2e   : > { %v322_v45 = vld [vmem:[#allocation2 + $0x31] ss:$2 sm:$0xff]  ;;  %v298_v47 = vld [vmem:[#allocation2 + $0x30] ss:$2 sm:$0xff]  ;;  %286 = vst [vmem:[#allocation2 + $0x121] sm:$0xff] %v3149_v37 }
  0x2f   : > { %v370_v46 = vld [vmem:[#allocation2 + $0x33] ss:$2 sm:$0xff]  ;;  %v3032_v51 = vpack.c.bf16 %v322_v45, %v320_v38  ;;  %v3031_v53 = vpack.c.bf16 %v298_v47, %v296_v40  ;;  %v346_v54 = vld [vmem:[#allocation2 + $0x32] ss:$2 sm:$0xff]  ;;  %v372_v3 = vld [vmem:[#allocation2 + $0x63] ss:$2 sm:$0xff]  ;;  %v3150_v38 = vunpack.c.h.bf16 %v3197_v32  ;;  %v3158_v40 = vunpack.c.h.bf16 %v3199_v33 }
  0x30   : > { %v3034_v52 = vpack.c.bf16 %v370_v46, %v368_v39  ;;  %v3033_v56 = vpack.c.bf16 %v346_v54, %v344_v41  ;;  %v324_v2 = vld [vmem:[#allocation2 + $0x61] ss:$2 sm:$0xff]  ;;  %v300_v4 = vld [vmem:[#allocation2 + $0x60] ss:$2 sm:$0xff]  ;;  %v326_v8 = vld [vmem:[#allocation2 + $0x91] ss:$2 sm:$0xff]  ;;  %v3157_v39 = vunpack.c.l.bf16 %v3199_v33 }
  0x31   : > { %2118 = vmatprep.mubr.bf16.mxu0 %v3032_v51  ;;  %v348_v5 = vld [vmem:[#allocation2 + $0x62] ss:$2 sm:$0xff]  ;;  %v374_v9 = vld [vmem:[#allocation2 + $0x93] ss:$2 sm:$0xff]  ;;  %v3048_v13 = vpack.c.bf16 %v326_v8, %v324_v2  ;;  %v350_v16 = vld [vmem:[#allocation2 + $0x92] ss:$2 sm:$0xff] }
  0x32   : > { %2183 = vmatprep.mubr.bf16.mxu1 %v3034_v52  ;;  %2119 = vmatmul.mubr.bf16.vlgmr.msra.gmra.mxu0 %v3031_v53  ;;  %v302_v10 = vld [vmem:[#allocation2 + $0x90] ss:$2 sm:$0xff]  ;;  %v3050_v14 = vpack.c.bf16 %v374_v9, %v372_v3  ;;  %v3049_v19 = vpack.c.bf16 %v350_v16, %v348_v5  ;;  %v328_v34 = vld [vmem:[#allocation2 + $0xc1] ss:$2 sm:$0xff]  ;;  %v304_v36 = vld [vmem:[#allocation2 + $0xc0] ss:$2 sm:$0xff] }
  0x33   : > { %2184 = vmatmul.mubr.bf16.vlgmr.msra.gmra.mxu1 %v3033_v56  ;;  %3286 = vmatpush3.bf16.msra.mxu0 %v3568_v42  ;;  %v3047_v15 = vpack.c.bf16 %v302_v10, %v300_v4  ;;  %v376_v35 = vld [vmem:[#allocation2 + $0xc3] ss:$2 sm:$0xff]  ;;  %v378_v42 = vld [vmem:[#allocation2 + $0xf3] ss:$2 sm:$0xff]  ;;  %v352_v47 = vld [vmem:[#allocation2 + $0xc2] ss:$2 sm:$0xff] }
  0x34   : > { %3326 = vmatpush3.bf16.msra.mxu1 %v3569_v43  ;;  %3287 = vmatprep.subr.bf16.mxu0 %v3570_v48  ;;  %v330_v41 = vld [vmem:[#allocation2 + $0xf1] ss:$2 sm:$0xff]  ;;  %v306_v43 = vld [vmem:[#allocation2 + $0xf0] ss:$2 sm:$0xff]  ;;  %v3066_v45 = vpack.c.bf16 %v378_v42, %v376_v35  ;;  %287 = vst [vmem:[#allocation2 + $0x129] sm:$0xff] %v3150_v38  ;;  %290 = vst [vmem:[#allocation2 + $0x151] sm:$0xff] %v3157_v39 }
  0x35   : > { %3327 = vmatprep.subr.bf16.mxu1 %v3571_v57  ;;  %2126 = vmatprep.mubr.bf16.mxu0 %v3048_v13  ;;  %v3064_v44 = vpack.c.bf16 %v330_v41, %v328_v34  ;;  %v3063_v46 = vpack.c.bf16 %v306_v43, %v304_v36  ;;  %v354_v48 = vld [vmem:[#allocation2 + $0xf2] ss:$2 sm:$0xff]  ;;  %291 = vst [vmem:[#allocation2 + $0x159] sm:$0xff] %v3158_v40  ;;  %v3591_v51 = vld [vmem:[%s4273_s1 + $0x1c8] sm:$0xff]   ;;  %277 = vst [vmem:[#allocation2 + $0xb1] sm:$0xff] %v3130_v24 }
  0x36   : > { %2191 = vmatprep.mubr.bf16.mxu1 %v3050_v14  ;;  %v3065_v49 = vpack.c.bf16 %v354_v48, %v352_v47  ;;  %v3592_v52 = vld [vmem:[%s4273_s1 + $0x108] sm:$0xff]   ;;  %v3594_v54 = vld [vmem:[%s4273_s1 + $0x140] sm:$0xff]   ;;  %v3599_v13 = vld [vmem:[%s4273_s1 + $0x2f8] sm:$0xff]  }
  0x37   : > { %3288 = vmatpush3.bf16.msra.mxu0 %v3572_v60  ;;  %v3593_v53 = vld [vmem:[%s4273_s1 + $0x188] sm:$0xff]   ;;  %v3596_v3 = vld [vmem:[%s4273_s1 + $0x100] sm:$0xff]   ;;  %v3602_v33 = vld [vmem:[%s4273_s1 + $0x270] sm:$0xff]  }
  0x38   : > { %3328 = vmatpush3.bf16.msra.mxu1 %v3573_v61  ;;  %3289 = vmatprep.subr.bf16.mxu0 %v3574_v62  ;;  %v3597_v5 = vld [vmem:[%s4273_s1 + $0x180] sm:$0xff]   ;;  %v3603_v35 = vld [vmem:[%s4273_s1 + $0x2f0] sm:$0xff]   ;;  %v3606_v38 = vld [vmem:[%s4273_s1 + $0x268] sm:$0xff]  }
  0x39   : > { %3329 = vmatprep.subr.bf16.mxu1 %v3575_v63  ;;  %v3190_v14 = vld [vmem:[%s3794_s22 + $0x20] sm:$0xff]   ;;  %v3604_v36 = vld [vmem:[%s4273_s1 + $0x230] sm:$0xff]   ;;  %v3607_v39 = vld [vmem:[%s4273_s1 + $0x2e8] sm:$0xff]  }
  0x3a   : > { %2127 = vmatmul.mubr.bf16.gmra.mxu0 %v3047_v15  ;;  %v3600_v15 = vld [vmem:[%s4273_s1 + $0x238] sm:$0xff]   ;;  %v3121_v16 = vunpack.c.l.bf16 %v3190_v14  ;;  %v3122_v17 = vunpack.c.h.bf16 %v3190_v14  ;;  %v3605_v37 = vld [vmem:[%s4273_s1 + $0x2b0] sm:$0xff]   ;;  %v3608_v43 = vld [vmem:[%s4273_s1 + $0x228] sm:$0xff]  }
  0x3b   : > { %3290 = vmatpush3.bf16.msra.mxu0 %v3576_v0  ;;  %2192 = vmatmul.mubr.bf16.gmra.mxu1 %v3049_v19  ;;  %v332_v56 = vld [vmem:[#allocation2 + $0x121] ss:$2 sm:$0xff]  ;;  %v308_v61 = vld [vmem:[#allocation2 + $0x120] ss:$2 sm:$0xff] }
  0x3c   : > { %3330 = vmatpush3.bf16.msra.mxu1 %v3577_v1  ;;  %3291 = vmatprep.subr.bf16.mxu0 %v3578_v6  ;;  %v334_v57 = vld [vmem:[#allocation2 + $0x151] ss:$2 sm:$0xff]  ;;  %v310_v62 = vld [vmem:[#allocation2 + $0x150] ss:$2 sm:$0xff]  ;;  %v3104_v6 = vld [vmem:[%s3794_s22] sm:$0xff]   ;;  %272 = vst [vmem:[#allocation2 + $0x79] sm:$0xff] %v3121_v16 }
  0x3d   : > { %3331 = vmatprep.subr.bf16.mxu1 %v3579_v7  ;;  %2134 = vmatprep.mubr.bf16.mxu0 %v3064_v44  ;;  %v380_v58 = vld [vmem:[#allocation2 + $0x123] ss:$2 sm:$0xff]  ;;  %v3080_v59 = vpack.c.bf16 %v334_v57, %v332_v56  ;;  %v382_v60 = vld [vmem:[#allocation2 + $0x153] ss:$2 sm:$0xff]  ;;  %v3079_v0 = vpack.c.bf16 %v310_v62, %v308_v61  ;;  %v356_v1 = vld [vmem:[#allocation2 + $0x122] ss:$2 sm:$0xff]  ;;  %v3105_v8 = vunpack.c.l.bf16 %v3104_v6  ;;  %v3106_v9 = vunpack.c.h.bf16 %v3104_v6 }
  0x3e   : > { %2199 = vmatprep.mubr.bf16.mxu1 %v3066_v45  ;;  %v3082_v63 = vpack.c.bf16 %v382_v60, %v380_v58  ;;  %v358_v2 = vld [vmem:[#allocation2 + $0x152] ss:$2 sm:$0xff]  ;;  %273 = vst [vmem:[#allocation2 + $0x81] sm:$0xff] %v3122_v17  ;;  %v3609_v44 = vld [vmem:[%s4273_s1 + $0x2a8] sm:$0xff]  }
  0x3f   : > { %3292 = vmatpush3.bf16.msra.mxu0 %v3580_v11  ;;  %v3081_v4 = vpack.c.bf16 %v358_v2, %v356_v1  ;;  %v3188_v7 = vld [vmem:[%s3794_s22 + $0x10] sm:$0xff]   ;;  %264 = vst [vmem:[#allocation2 + $0x19] sm:$0xff] %v3105_v8  ;;  %265 = vst [vmem:[#allocation2 + $0x21] sm:$0xff] %v3106_v9  ;;  %v3610_v48 = vld [vmem:[%s4273_s1 + $0x260] sm:$0xff]  }
  0x40   : > { %3332 = vmatpush3.bf16.msra.mxu1 %v3581_v12  ;;  %3293 = vmatprep.subr.bf16.mxu0 %v3582_v23  ;;  %v3113_v10 = vunpack.c.l.bf16 %v3188_v7  ;;  %v3114_v11 = vunpack.c.h.bf16 %v3188_v7  ;;  %v3598_v12 = vld [vmem:[%s4273_s1 + $0x278] sm:$0xff]   ;;  %v3129_v23 = vunpack.c.l.bf16 %v3192_v18  ;;  %v3612_v56 = vld [vmem:[%s4273_s1 + $0x220] sm:$0xff]   ;;  %v3196_v61 = vld [vmem:[%s3794_s22 + $0x50] sm:$0xff]  }
  0x41   : > { %3333 = vmatprep.subr.bf16.mxu1 %v3583_v25  ;;  %v3613_v57 = vld [vmem:[%s4273_s1 + $0x2a0] sm:$0xff]   ;;  %v3145_v62 = vunpack.c.l.bf16 %v3196_v61  ;;  %v3615_v1 = vld [vmem:[%s4273_s1 + $0x2d8] sm:$0xff]   ;;  %v3200_v7 = vld [vmem:[%s3794_s22 + $0x70] sm:$0xff]  }
  0x42   : > { %2135 = vmatmul.mubr.bf16.gmra.mxu0 %v3063_v46  ;;  %268 = vst [vmem:[#allocation2 + $0x49] sm:$0xff] %v3113_v10  ;;  %269 = vst [vmem:[#allocation2 + $0x51] sm:$0xff] %v3114_v11  ;;  %v3194_v58 = vld [vmem:[%s3794_s22 + $0x40] sm:$0xff]   ;;  %v3616_v2 = vld [vmem:[%s4273_s1 + $0x218] sm:$0xff]   ;;  %v3162_v16 = vunpack.c.h.bf16 %v3200_v7 }
  0x43   : > { %3294 = vmatpush3.bf16.msra.mxu0 %v3584_v26  ;;  %2200 = vmatmul.mubr.bf16.gmra.mxu1 %v3065_v49  ;;  %276 = vst [vmem:[#allocation2 + $0xa9] sm:$0xff] %v3129_v23  ;;  %v3138_v60 = vunpack.c.h.bf16 %v3194_v58  ;;  %284 = vst [vmem:[#allocation2 + $0x109] sm:$0xff] %v3145_v62  ;;  %v3198_v6 = vld [vmem:[%s3794_s22 + $0x60] sm:$0xff]   ;;  %v3620_v11 = vld [vmem:[%s4273_s1 + $0x210] sm:$0xff]  }
  0x44   : > { %3334 = vmatpush3.bf16.msra.mxu1 %v3585_v27  ;;  %3295 = vmatprep.subr.bf16.mxu0 %v3586_v28  ;;  %v3154_v14 = vunpack.c.h.bf16 %v3198_v6  ;;  %293 = vst [vmem:[#allocation2 + $0x171] sm:$0xff] %v3162_v16  ;;  %v3634_v62 = vld [vmem:[%s4273_s1 + $0x370] sm:$0xff]   ;;  %v3640_v16 = vld [vmem:[%s4273_s1 + $0x328] sm:$0xff]  }
  0x45   : > { %3335 = vmatprep.subr.bf16.mxu1 %v3587_v29  ;;  %2142 = vmatprep.mubr.bf16.mxu0 %v3080_v59  ;;  %v419_v40 = vld [vmem:[#allocation2 + $0x79] ss:$2 sm:$0xff]  ;;  %v395_v42 = vld [vmem:[#allocation2 + $0x78] ss:$2 sm:$0xff]  ;;  %v3137_v59 = vunpack.c.l.bf16 %v3194_v58  ;;  %281 = vst [vmem:[#allocation2 + $0xe1] sm:$0xff] %v3138_v60 }
  0x46   : > { %2207 = vmatprep.mubr.bf16.mxu1 %v3082_v63  ;;  %v415_v19 = vld [vmem:[#allocation2 + $0x19] ss:$2 sm:$0xff]  ;;  %v391_v27 = vld [vmem:[#allocation2 + $0x18] ss:$2 sm:$0xff]  ;;  %v3146_v63 = vunpack.c.h.bf16 %v3196_v61  ;;  %289 = vst [vmem:[#allocation2 + $0x141] sm:$0xff] %v3154_v14  ;;  %v3638_v14 = vld [vmem:[%s4273_s1 + $0x368] sm:$0xff]  }
  0x47   : > { %3296 = vmatpush3.bf16.msra.mxu0 %v3588_v30  ;;  %v463_v21 = vld [vmem:[#allocation2 + $0x1b] ss:$2 sm:$0xff]  ;;  %280 = vst [vmem:[#allocation2 + $0xd9] sm:$0xff] %v3137_v59 }
  0x48   : > { %3336 = vmatpush3.bf16.msra.mxu1 %v3589_v31  ;;  %3297 = vmatprep.subr.bf16.mxu0 %v3590_v50  ;;  %v439_v31 = vld [vmem:[#allocation2 + $0x1a] ss:$2 sm:$0xff]  ;;  %v467_v41 = vld [vmem:[#allocation2 + $0x7b] ss:$2 sm:$0xff]  ;;  %285 = vst [vmem:[#allocation2 + $0x111] sm:$0xff] %v3146_v63  ;;  %v3635_v63 = vld [vmem:[%s4273_s1 + $0x3f0] sm:$0xff]  }
  0x49   : > { %3337 = vmatprep.subr.bf16.mxu1 %v3591_v51  ;;  %v417_v20 = vld [vmem:[#allocation2 + $0x49] ss:$2 sm:$0xff]  ;;  %v393_v28 = vld [vmem:[#allocation2 + $0x48] ss:$2 sm:$0xff]  ;;  %v3631_v58 = vld [vmem:[%s4273_s1 + $0x3f8] sm:$0xff]  }
  0x4a   : > { %2143 = vmatmul.mubr.bf16.gmra.mxu0 %v3079_v0  ;;  %v3036_v25 = vpack.c.bf16 %v417_v20, %v415_v19  ;;  %v465_v26 = vld [vmem:[#allocation2 + $0x4b] ss:$2 sm:$0xff]  ;;  %v3035_v30 = vpack.c.bf16 %v393_v28, %v391_v27  ;;  %v441_v32 = vld [vmem:[#allocation2 + $0x4a] ss:$2 sm:$0xff] }
  0x4b   : > { %3298 = vmatpush3.bf16.msra.mxu0 %v3592_v52  ;;  %2208 = vmatmul.mubr.bf16.gmra.mxu1 %v3081_v4  ;;  %v3038_v29 = vpack.c.bf16 %v465_v26, %v463_v21  ;;  %v3037_v34 = vpack.c.bf16 %v441_v32, %v439_v31  ;;  %v421_v45 = vld [vmem:[#allocation2 + $0xa9] ss:$2 sm:$0xff]  ;;  %v397_v47 = vld [vmem:[#allocation2 + $0xa8] ss:$2 sm:$0xff]  ;;  %v3614_v0 = vld [vmem:[%s4273_s1 + $0x258] sm:$0xff]  }
  0x4c   : > { %3338 = vmatpush3.bf16.msra.mxu1 %v3593_v53  ;;  %3299 = vmatprep.subr.bf16.mxu0 %v3594_v54  ;;  %v469_v46 = vld [vmem:[#allocation2 + $0xab] ss:$2 sm:$0xff]  ;;  %v3052_v49 = vpack.c.bf16 %v421_v45, %v419_v40  ;;  %v3051_v51 = vpack.c.bf16 %v397_v47, %v395_v42  ;;  %v443_v52 = vld [vmem:[#allocation2 + $0x7a] ss:$2 sm:$0xff]  ;;  %v445_v53 = vld [vmem:[#allocation2 + $0xaa] ss:$2 sm:$0xff] }
  0x4d   : > { %3339 = vmatprep.subr.bf16.mxu1 %v3595_v55  ;;  %2248 = vmatprep.mubr.bf16.mxu0 %v3036_v25  ;;  %v3054_v50 = vpack.c.bf16 %v469_v46, %v467_v41  ;;  %v3053_v54 = vpack.c.bf16 %v445_v53, %v443_v52  ;;  %v3611_v55 = vld [vmem:[%s4273_s1 + $0x2e0] sm:$0xff]   ;;  %v3618_v4 = vld [vmem:[%s4273_s1 + $0x250] sm:$0xff]   ;;  %v3622_v26 = vld [vmem:[%s4273_s1 + $0x248] sm:$0xff]  }
  0x4e   : > { %2313 = vmatprep.mubr.bf16.mxu1 %v3038_v29  ;;  %v423_v8 = vld [vmem:[#allocation2 + $0xd9] ss:$2 sm:$0xff]  ;;  %v399_v10 = vld [vmem:[#allocation2 + $0xd8] ss:$2 sm:$0xff]  ;;  %v3623_v27 = vld [vmem:[%s4273_s1 + $0x2c8] sm:$0xff]  }
  0x4f   : > { %3300 = vmatpush3.bf16.msra.mxu0 %v3596_v3  ;;  %v3617_v3 = vld [vmem:[%s4273_s1 + $0x298] sm:$0xff]   ;;  %v425_v17 = vld [vmem:[#allocation2 + $0x109] ss:$2 sm:$0xff]  ;;  %v401_v19 = vld [vmem:[#allocation2 + $0x108] ss:$2 sm:$0xff] }
  0x50   : > { %3340 = vmatpush3.bf16.msra.mxu1 %v3597_v5  ;;  %3365 = vmatprep.subr.bf16.mxu0 %v3598_v12  ;;  %v3619_v5 = vld [vmem:[%s4273_s1 + $0x2d0] sm:$0xff]   ;;  %v471_v9 = vld [vmem:[#allocation2 + $0xdb] ss:$2 sm:$0xff]  ;;  %v3068_v20 = vpack.c.bf16 %v425_v17, %v423_v8  ;;  %v447_v23 = vld [vmem:[#allocation2 + $0xda] ss:$2 sm:$0xff] }
  0x51   : > { %3405 = vmatprep.subr.bf16.mxu1 %v3599_v13  ;;  %v3621_v12 = vld [vmem:[%s4273_s1 + $0x290] sm:$0xff]   ;;  %v3153_v13 = vunpack.c.l.bf16 %v3198_v6  ;;  %v3624_v28 = vld [vmem:[%s4273_s1 + $0x208] sm:$0xff]   ;;  %v3627_v31 = vld [vmem:[%s4273_s1 + $0x2c0] sm:$0xff]  }
  0x52   : > { %2249 = vmatmul.mubr.bf16.vlgmr.msra.gmra.mxu0 %v3035_v30  ;;  %v473_v18 = vld [vmem:[#allocation2 + $0x10b] ss:$2 sm:$0xff]  ;;  %v449_v24 = vld [vmem:[#allocation2 + $0x10a] ss:$2 sm:$0xff]  ;;  %v3626_v30 = vld [vmem:[%s4273_s1 + $0x240] sm:$0xff]  }
  0x53   : > { %2314 = vmatmul.mubr.bf16.vlgmr.msra.gmra.mxu1 %v3037_v34  ;;  %3366 = vmatpush3.bf16.msra.mxu0 %v3600_v15  ;;  %v3161_v15 = vunpack.c.l.bf16 %v3200_v7  ;;  %v3070_v21 = vpack.c.bf16 %v473_v18, %v471_v9  ;;  %288 = vst [vmem:[#allocation2 + $0x139] sm:$0xff] %v3153_v13  ;;  %v3069_v25 = vpack.c.bf16 %v449_v24, %v447_v23  ;;  %v3625_v29 = vld [vmem:[%s4273_s1 + $0x288] sm:$0xff]   ;;  %v3629_v45 = vld [vmem:[%s4273_s1 + $0x280] sm:$0xff]   ;;  %v511_v46 = vld [vmem:[#allocation2 + $0x31] ss:$2 sm:$0xff] }
  0x54   : > { %3406 = vmatpush3.bf16.msra.mxu1 %v3601_v22  ;;  %3367 = vmatprep.subr.bf16.mxu0 %v3602_v33  ;;  %v3067_v22 = vpack.c.bf16 %v401_v19, %v399_v10  ;;  %v513_v47 = vld [vmem:[#allocation2 + $0x61] ss:$2 sm:$0xff]  ;;  %v489_v53 = vld [vmem:[#allocation2 + $0x60] ss:$2 sm:$0xff]  ;;  %v3632_v60 = vld [vmem:[%s4273_s1 + $0x338] sm:$0xff]  }
  0x55   : > { %3407 = vmatprep.subr.bf16.mxu1 %v3603_v35  ;;  %2256 = vmatprep.mubr.bf16.mxu0 %v3052_v49  ;;  %292 = vst [vmem:[#allocation2 + $0x169] sm:$0xff] %v3161_v15  ;;  %v559_v49 = vld [vmem:[#allocation2 + $0x33] ss:$2 sm:$0xff]  ;;  %v565_v6 = vld [vmem:[#allocation2 + $0xc3] ss:$2 sm:$0xff] }
  0x56   : > { %2321 = vmatprep.mubr.bf16.mxu1 %v3054_v50  ;;  %v561_v50 = vld [vmem:[#allocation2 + $0x63] ss:$2 sm:$0xff]  ;;  %v3633_v61 = vld [vmem:[%s4273_s1 + $0x3b8] sm:$0xff]   ;;  %v493_v8 = vld [vmem:[#allocation2 + $0xc0] ss:$2 sm:$0xff] }
  0x57   : > { %3368 = vmatpush3.bf16.msra.mxu0 %v3604_v36  ;;  %v3042_v52 = vpack.c.bf16 %v561_v50, %v559_v49  ;;  %v491_v7 = vld [vmem:[#allocation2 + $0x90] ss:$2 sm:$0xff]  ;;  %v3639_v15 = vld [vmem:[%s4273_s1 + $0x3e8] sm:$0xff]   ;;  %v3642_v18 = vld [vmem:[%s4273_s1 + $0x360] sm:$0xff]  }
  0x58   : > { %3408 = vmatpush3.bf16.msra.mxu1 %v3605_v37  ;;  %3369 = vmatprep.subr.bf16.mxu0 %v3606_v38  ;;  %v3055_v10 = vpack.c.bf16 %v493_v8, %v491_v7  ;;  %v3641_v17 = vld [vmem:[%s4273_s1 + $0x3a8] sm:$0xff]   ;;  %v3643_v19 = vld [vmem:[%s4273_s1 + $0x3e0] sm:$0xff]   ;;  %v523_v49 = vld [vmem:[#allocation2 + $0x151] ss:$2 sm:$0xff] }
  0x59   : > { %3409 = vmatprep.subr.bf16.mxu1 %v3607_v39  ;;  %v521_v23 = vld [vmem:[#allocation2 + $0x121] ss:$2 sm:$0xff]  ;;  %v583_v7 = vld [vmem:[#allocation2 + $0x48] ss:$2 sm:$0xff]  ;;  %v585_v8 = vld [vmem:[#allocation2 + $0x78] ss:$2 sm:$0xff] }
  0x5a   : > { %2257 = vmatmul.mubr.bf16.gmra.mxu0 %v3051_v51  ;;  %v427_v32 = vld [vmem:[#allocation2 + $0x139] ss:$2 sm:$0xff]  ;;  %v403_v37 = vld [vmem:[#allocation2 + $0x138] ss:$2 sm:$0xff] }
  0x5b   : > { %2322 = vmatmul.mubr.bf16.gmra.mxu1 %v3053_v54  ;;  %3370 = vmatpush3.bf16.msra.mxu0 %v3608_v43  ;;  %v475_v34 = vld [vmem:[#allocation2 + $0x13b] ss:$2 sm:$0xff]  ;;  %v451_v41 = vld [vmem:[#allocation2 + $0x13a] ss:$2 sm:$0xff] }
  0x5c   : > { %3410 = vmatpush3.bf16.msra.mxu1 %v3609_v44  ;;  %3371 = vmatprep.subr.bf16.mxu0 %v3610_v48  ;;  %v429_v33 = vld [vmem:[#allocation2 + $0x169] ss:$2 sm:$0xff]  ;;  %v405_v38 = vld [vmem:[#allocation2 + $0x168] ss:$2 sm:$0xff]  ;;  %v3628_v44 = vld [vmem:[%s4273_s1 + $0x200] sm:$0xff]   ;;  %v3040_v48 = vpack.c.bf16 %v513_v47, %v511_v46 }
  0x5d   : > { %3411 = vmatprep.subr.bf16.mxu1 %v3611_v55  ;;  %2264 = vmatprep.mubr.bf16.mxu0 %v3068_v20  ;;  %v3084_v35 = vpack.c.bf16 %v429_v33, %v427_v32  ;;  %v477_v36 = vld [vmem:[#allocation2 + $0x16b] ss:$2 sm:$0xff]  ;;  %v3083_v40 = vpack.c.bf16 %v405_v38, %v403_v37  ;;  %v453_v42 = vld [vmem:[#allocation2 + $0x16a] ss:$2 sm:$0xff]  ;;  %v3644_v20 = vld [vmem:[%s4273_s1 + $0x320] sm:$0xff]  }
  0x5e   : > { %2329 = vmatprep.mubr.bf16.mxu1 %v3070_v21  ;;  %v3086_v39 = vpack.c.bf16 %v477_v36, %v475_v34  ;;  %v3085_v43 = vpack.c.bf16 %v453_v42, %v451_v41  ;;  %v487_v51 = vld [vmem:[#allocation2 + $0x30] ss:$2 sm:$0xff]  ;;  %v3645_v21 = vld [vmem:[%s4273_s1 + $0x3a0] sm:$0xff]   ;;  %v3655_v46 = vld [vmem:[%s4273_s1 + $0x3c8] sm:$0xff]  }
  0x5f   : > { %3372 = vmatpush3.bf16.msra.mxu0 %v3612_v56  ;;  %v535_v54 = vld [vmem:[#allocation2 + $0x32] ss:$2 sm:$0xff]  ;;  %v537_v55 = vld [vmem:[#allocation2 + $0x62] ss:$2 sm:$0xff]  ;;  %v567_v24 = vld [vmem:[#allocation2 + $0xf3] ss:$2 sm:$0xff] }
  0x60   : > { %3412 = vmatpush3.bf16.msra.mxu1 %v3613_v57  ;;  %3373 = vmatprep.subr.bf16.mxu0 %v3614_v0  ;;  %v3630_v56 = vld [vmem:[%s4273_s1 + $0x378] sm:$0xff]   ;;  %v3039_v57 = vpack.c.bf16 %v489_v53, %v487_v51  ;;  %v3041_v59 = vpack.c.bf16 %v537_v55, %v535_v54  ;;  %v3636_v0 = vld [vmem:[%s4273_s1 + $0x330] sm:$0xff]   ;;  %v3656_v47 = vld [vmem:[%s4273_s1 + $0x308] sm:$0xff]  }
  0x61   : > { %3413 = vmatprep.subr.bf16.mxu1 %v3615_v1  ;;  %v3637_v1 = vld [vmem:[%s4273_s1 + $0x3b0] sm:$0xff]   ;;  %v3646_v34 = vld [vmem:[%s4273_s1 + $0x358] sm:$0xff]   ;;  %v3659_v54 = vld [vmem:[%s4273_s1 + $0x3c0] sm:$0xff]  }
  0x62   : > { %2265 = vmatmul.mubr.bf16.gmra.mxu0 %v3067_v22  ;;  %v519_v22 = vld [vmem:[#allocation2 + $0xf1] ss:$2 sm:$0xff]  ;;  %v545_v32 = vld [vmem:[#allocation2 + $0x122] ss:$2 sm:$0xff]  ;;  %v547_v53 = vld [vmem:[#allocation2 + $0x152] ss:$2 sm:$0xff] }
  0x63   : > { %3374 = vmatpush3.bf16.msra.mxu0 %v3616_v2  ;;  %2330 = vmatmul.mubr.bf16.gmra.mxu1 %v3069_v25  ;;  %v515_v2 = vld [vmem:[#allocation2 + $0x91] ss:$2 sm:$0xff]  ;;  %v499_v51 = vld [vmem:[#allocation2 + $0x150] ss:$2 sm:$0xff]  ;;  %v3660_v55 = vld [vmem:[%s4273_s1 + $0x300] sm:$0xff]  }
  0x64   : > { %3414 = vmatpush3.bf16.msra.mxu1 %v3617_v3  ;;  %3375 = vmatprep.subr.bf16.mxu0 %v3618_v4  ;;  %v517_v3 = vld [vmem:[#allocation2 + $0xc1] ss:$2 sm:$0xff]  ;;  %v3648_v36 = vld [vmem:[%s4273_s1 + $0x318] sm:$0xff]   ;;  %v3650_v38 = vld [vmem:[%s4273_s1 + $0x350] sm:$0xff]  }
  0x65   : > { %3415 = vmatprep.subr.bf16.mxu1 %v3619_v5  ;;  %2272 = vmatprep.mubr.bf16.mxu0 %v3084_v35  ;;  %v563_v4 = vld [vmem:[#allocation2 + $0x93] ss:$2 sm:$0xff]  ;;  %v3056_v5 = vpack.c.bf16 %v517_v3, %v515_v2  ;;  %v569_v25 = vld [vmem:[#allocation2 + $0x123] ss:$2 sm:$0xff] }
  0x66   : > { %2337 = vmatprep.mubr.bf16.mxu1 %v3086_v39  ;;  %v3058_v9 = vpack.c.bf16 %v565_v6, %v563_v4  ;;  %v3647_v35 = vld [vmem:[%s4273_s1 + $0x3d8] sm:$0xff]   ;;  %v3651_v39 = vld [vmem:[%s4273_s1 + $0x3d0] sm:$0xff]  }
  0x67   : > { %3376 = vmatpush3.bf16.msra.mxu0 %v3620_v11  ;;  %v539_v11 = vld [vmem:[#allocation2 + $0x92] ss:$2 sm:$0xff]  ;;  %v571_v50 = vld [vmem:[#allocation2 + $0x153] ss:$2 sm:$0xff] }
  0x68   : > { %3416 = vmatpush3.bf16.msra.mxu1 %v3621_v12  ;;  %3377 = vmatprep.subr.bf16.mxu0 %v3622_v26  ;;  %v541_v12 = vld [vmem:[#allocation2 + $0xc2] ss:$2 sm:$0xff]  ;;  %v3072_v26 = vpack.c.bf16 %v521_v23, %v519_v22  ;;  %v3649_v37 = vld [vmem:[%s4273_s1 + $0x398] sm:$0xff]   ;;  %v615_v23 = vld [vmem:[#allocation2 + $0x109] ss:$2 sm:$0xff] }
  0x69   : > { %3417 = vmatprep.subr.bf16.mxu1 %v3623_v27  ;;  %v3057_v13 = vpack.c.bf16 %v541_v12, %v539_v11  ;;  %v3074_v27 = vpack.c.bf16 %v569_v25, %v567_v24  ;;  %v3653_v41 = vld [vmem:[%s4273_s1 + $0x390] sm:$0xff]   ;;  %v3201_v42 = vld [vmem:[%s3794_s22 + $0x78] sm:$0xff]  }
  0x6a   : > { %2273 = vmatmul.mubr.bf16.gmra.mxu0 %v3083_v40  ;;  %v3652_v40 = vld [vmem:[%s4273_s1 + $0x310] sm:$0xff]   ;;  %v613_v12 = vld [vmem:[#allocation2 + $0xd9] ss:$2 sm:$0xff]  ;;  %v637_v22 = vld [vmem:[#allocation2 + $0xda] ss:$2 sm:$0xff] }
  0x6b   : > { %3378 = vmatpush3.bf16.msra.mxu0 %v3624_v28  ;;  %2338 = vmatmul.mubr.bf16.gmra.mxu1 %v3085_v43  ;;  %v495_v28 = vld [vmem:[#allocation2 + $0xf0] ss:$2 sm:$0xff]  ;;  %v3165_v43 = vunpack.c.l.bf16 %v3201_v42  ;;  %v655_v4 = vld [vmem:[#allocation2 + $0x4b] ss:$2 sm:$0xff] }
  0x6c   : > { %3418 = vmatpush3.bf16.msra.mxu1 %v3625_v29  ;;  %3379 = vmatprep.subr.bf16.mxu0 %v3626_v30  ;;  %v497_v29 = vld [vmem:[#allocation2 + $0x120] ss:$2 sm:$0xff]  ;;  %v611_v11 = vld [vmem:[#allocation2 + $0xa9] ss:$2 sm:$0xff]  ;;  %v617_v24 = vld [vmem:[#allocation2 + $0x139] ss:$2 sm:$0xff] }
  0x6d   : > { %3419 = vmatprep.subr.bf16.mxu1 %v3627_v31  ;;  %2378 = vmatprep.mubr.bf16.mxu0 %v3040_v48  ;;  %v543_v30 = vld [vmem:[#allocation2 + $0xf2] ss:$2 sm:$0xff]  ;;  %v3071_v31 = vpack.c.bf16 %v497_v29, %v495_v28  ;;  %294 = vst [vmem:[#allocation2 + $0x181] sm:$0xff] %v3165_v43  ;;  %v3657_v48 = vld [vmem:[%s4273_s1 + $0x388] sm:$0xff]   ;;  %v3076_v29 = vpack.c.bf16 %v617_v24, %v615_v23 }
  0x6e   : > { %2443 = vmatprep.mubr.bf16.mxu1 %v3042_v52  ;;  %v3073_v33 = vpack.c.bf16 %v545_v32, %v543_v30  ;;  %v3658_v52 = vld [vmem:[%s4273_s1 + $0x340] sm:$0xff]   ;;  %v663_v25 = vld [vmem:[#allocation2 + $0x10b] ss:$2 sm:$0xff]  ;;  %v595_v43 = vld [vmem:[#allocation2 + $0x168] ss:$2 sm:$0xff] }
  0x6f   : > { %3380 = vmatpush3.bf16.msra.mxu0 %v3628_v44  ;;  %v3166_v44 = vunpack.c.h.bf16 %v3201_v42  ;;  %v593_v32 = vld [vmem:[#allocation2 + $0x138] ss:$2 sm:$0xff] }
  0x70   : > { %3420 = vmatpush3.bf16.msra.mxu1 %v3629_v45  ;;  %3445 = vmatprep.subr.bf16.mxu0 %v3630_v56  ;;  %v3654_v45 = vld [vmem:[%s4273_s1 + $0x348] sm:$0xff]   ;;  %v3661_v56 = vld [vmem:[%s4273_s1 + $0x380] sm:$0xff]  }
  0x71   : > { %3485 = vmatprep.subr.bf16.mxu1 %v3631_v58  ;;  %295 = vst [vmem:[#allocation2 + $0x189] sm:$0xff] %v3166_v44  ;;  %v597_v44 = vld [vmem:[#allocation2 + $0x198] ss:$2 sm:$0xff] }
  0x72   : > { %2379 = vmatmul.mubr.bf16.vlgmr.msra.gmra.mxu0 %v3039_v57 }
  0x73   : > { %2444 = vmatmul.mubr.bf16.vlgmr.msra.gmra.mxu1 %v3041_v59  ;;  %3446 = vmatpush3.bf16.msra.mxu0 %v3632_v60 }
  0x74   : > { %3486 = vmatpush3.bf16.msra.mxu1 %v3633_v61  ;;  %3447 = vmatprep.subr.bf16.mxu0 %v3634_v62 }
  0x75   : > { %3487 = vmatprep.subr.bf16.mxu1 %v3635_v63  ;;  %2386 = vmatprep.mubr.bf16.mxu0 %v3056_v5  ;;  %v657_v5 = vld [vmem:[#allocation2 + $0x7b] ss:$2 sm:$0xff] }
  0x76   : > { %2451 = vmatprep.mubr.bf16.mxu1 %v3058_v9  ;;  %v3046_v6 = vpack.c.bf16 %v657_v5, %v655_v4  ;;  %v631_v9 = vld [vmem:[#allocation2 + $0x4a] ss:$2 sm:$0xff] }
  0x77   : > { %3448 = vmatpush3.bf16.msra.mxu0 %v3636_v0  ;;  %v607_v0 = vld [vmem:[#allocation2 + $0x49] ss:$2 sm:$0xff] }
  0x78   : > { %3488 = vmatpush3.bf16.msra.mxu1 %v3637_v1  ;;  %3449 = vmatprep.subr.bf16.mxu0 %v3638_v14  ;;  %v525_v57 = vld [vmem:[#allocation2 + $0x181] ss:$2 sm:$0xff]  ;;  %v501_v59 = vld [vmem:[#allocation2 + $0x180] ss:$2 sm:$0xff] }
  0x79   : > { %3489 = vmatprep.subr.bf16.mxu1 %v3639_v15  ;;  %v573_v58 = vld [vmem:[#allocation2 + $0x183] ss:$2 sm:$0xff]  ;;  %v3088_v60 = vpack.c.bf16 %v525_v57, %v523_v49  ;;  %v3087_v62 = vpack.c.bf16 %v501_v59, %v499_v51  ;;  %v549_v63 = vld [vmem:[#allocation2 + $0x182] ss:$2 sm:$0xff]  ;;  %v3043_v15 = vpack.c.bf16 %v585_v8, %v583_v7 }
  0x7a   : > { %2387 = vmatmul.mubr.bf16.gmra.mxu0 %v3055_v10  ;;  %v3090_v61 = vpack.c.bf16 %v573_v58, %v571_v50  ;;  %v609_v1 = vld [vmem:[#allocation2 + $0x79] ss:$2 sm:$0xff]  ;;  %v3089_v2 = vpack.c.bf16 %v549_v63, %v547_v53  ;;  %v633_v10 = vld [vmem:[#allocation2 + $0x7a] ss:$2 sm:$0xff] }
  0x7b   : > { %2452 = vmatmul.mubr.bf16.gmra.mxu1 %v3057_v13  ;;  %3450 = vmatpush3.bf16.msra.mxu0 %v3640_v16  ;;  %v3044_v3 = vpack.c.bf16 %v609_v1, %v607_v0  ;;  %v659_v13 = vld [vmem:[#allocation2 + $0xab] ss:$2 sm:$0xff]  ;;  %v661_v14 = vld [vmem:[#allocation2 + $0xdb] ss:$2 sm:$0xff]  ;;  %v3045_v16 = vpack.c.bf16 %v633_v10, %v631_v9 }
  0x7c   : > { %3490 = vmatpush3.bf16.msra.mxu1 %v3641_v17  ;;  %3451 = vmatprep.subr.bf16.mxu0 %v3642_v18  ;;  %v3060_v17 = vpack.c.bf16 %v613_v12, %v611_v11  ;;  %v3062_v18 = vpack.c.bf16 %v661_v14, %v659_v13 }
  0x7d   : > { %3491 = vmatprep.subr.bf16.mxu1 %v3643_v19  ;;  %2394 = vmatprep.mubr.bf16.mxu0 %v3072_v26  ;;  %v587_v19 = vld [vmem:[#allocation2 + $0xa8] ss:$2 sm:$0xff]  ;;  %v665_v26 = vld [vmem:[#allocation2 + $0x13b] ss:$2 sm:$0xff] }
  0x7e   : > { %2459 = vmatprep.mubr.bf16.mxu1 %v3074_v27  ;;  %v3078_v30 = vpack.c.bf16 %v665_v26, %v663_v25 }
  0x7f   : > { %3452 = vmatpush3.bf16.msra.mxu0 %v3644_v20  ;;  %v589_v20 = vld [vmem:[#allocation2 + $0xd8] ss:$2 sm:$0xff] }
  0x80   : > { %3492 = vmatpush3.bf16.msra.mxu1 %v3645_v21  ;;  %3453 = vmatprep.subr.bf16.mxu0 %v3646_v34  ;;  %v635_v21 = vld [vmem:[#allocation2 + $0xaa] ss:$2 sm:$0xff]  ;;  %v3059_v27 = vpack.c.bf16 %v589_v20, %v587_v19  ;;  %v641_v34 = vld [vmem:[#allocation2 + $0x13a] ss:$2 sm:$0xff] }
  0x81   : > { %3493 = vmatprep.subr.bf16.mxu1 %v3647_v35  ;;  %v3061_v28 = vpack.c.bf16 %v637_v22, %v635_v21  ;;  %v619_v35 = vld [vmem:[#allocation2 + $0x169] ss:$2 sm:$0xff] }
  0x82   : > { %2395 = vmatmul.mubr.bf16.gmra.mxu0 %v3071_v31  ;;  %v591_v31 = vld [vmem:[#allocation2 + $0x108] ss:$2 sm:$0xff] }
  0x83   : > { %2460 = vmatmul.mubr.bf16.gmra.mxu1 %v3073_v33  ;;  %3454 = vmatpush3.bf16.msra.mxu0 %v3648_v36  ;;  %v639_v33 = vld [vmem:[#allocation2 + $0x10a] ss:$2 sm:$0xff]  ;;  %v621_v36 = vld [vmem:[#allocation2 + $0x199] ss:$2 sm:$0xff] }
  0x84   : > { %3494 = vmatpush3.bf16.msra.mxu1 %v3649_v37  ;;  %3455 = vmatprep.subr.bf16.mxu0 %v3650_v38  ;;  %v667_v37 = vld [vmem:[#allocation2 + $0x16b] ss:$2 sm:$0xff]  ;;  %v669_v38 = vld [vmem:[#allocation2 + $0x19b] ss:$2 sm:$0xff] }
  0x85   : > { %3495 = vmatprep.subr.bf16.mxu1 %v3651_v39  ;;  %2402 = vmatprep.mubr.bf16.mxu0 %v3088_v60  ;;  %v3075_v39 = vpack.c.bf16 %v593_v32, %v591_v31  ;;  %v3094_v42 = vpack.c.bf16 %v669_v38, %v667_v37 }
  0x86   : > { %2467 = vmatprep.mubr.bf16.mxu1 %v3090_v61 }
  0x87   : > { %3456 = vmatpush3.bf16.msra.mxu0 %v3652_v40  ;;  %v3077_v40 = vpack.c.bf16 %v641_v34, %v639_v33 }
  0x88   : > { %3496 = vmatpush3.bf16.msra.mxu1 %v3653_v41  ;;  %3457 = vmatprep.subr.bf16.mxu0 %v3654_v45  ;;  %v3092_v41 = vpack.c.bf16 %v621_v36, %v619_v35  ;;  %v643_v45 = vld [vmem:[#allocation2 + $0x16a] ss:$2 sm:$0xff] }
  0x89   : > { %3497 = vmatprep.subr.bf16.mxu1 %v3655_v46  ;;  %v645_v46 = vld [vmem:[#allocation2 + $0x19a] ss:$2 sm:$0xff] }
  0x8a   : > { %2403 = vmatmul.mubr.bf16.gmra.mxu0 %v3087_v62 }
  0x8b   : > { %3458 = vmatpush3.bf16.msra.mxu0 %v3656_v47  ;;  %2468 = vmatmul.mubr.bf16.gmra.mxu1 %v3089_v2  ;;  %v3091_v47 = vpack.c.bf16 %v597_v44, %v595_v43 }
  0x8c   : > { %3498 = vmatpush3.bf16.msra.mxu1 %v3657_v48  ;;  %3459 = vmatprep.subr.bf16.mxu0 %v3658_v52  ;;  %v3093_v48 = vpack.c.bf16 %v645_v46, %v643_v45 }
  0x8d   : > { %3499 = vmatprep.subr.bf16.mxu1 %v3659_v54  ;;  %2508 = vmatprep.mubr.bf16.mxu0 %v3044_v3 }
  0x8e   : > { %2573 = vmatprep.mubr.bf16.mxu1 %v3046_v6 }
  0x8f   : > { %3460 = vmatpush3.bf16.msra.mxu0 %v3660_v55 }
  0x90   : > { %3500 = vmatpush3.bf16.msra.mxu1 %v3661_v56 }
  0x92   : > { %2509 = vmatmul.mubr.bf16.vlgmr.msra.gmra.mxu0 %v3043_v15 }
  0x93   : > { %2574 = vmatmul.mubr.bf16.vlgmr.msra.gmra.mxu1 %v3045_v16  ;;  %2516 = vmatprep.mubr.bf16.mxu0 %v3060_v17 }
  0x94   : > { %2581 = vmatprep.mubr.bf16.mxu1 %v3062_v18 }
  0x9a   : > { %2517 = vmatmul.mubr.bf16.gmra.mxu0 %v3059_v27 }
  0x9b   : > { %2582 = vmatmul.mubr.bf16.gmra.mxu1 %v3061_v28  ;;  %2524 = vmatprep.mubr.bf16.mxu0 %v3076_v29 }
  0x9c   : > { %2589 = vmatprep.mubr.bf16.mxu1 %v3078_v30 }
  0xa2   : > { %2525 = vmatmul.mubr.bf16.gmra.mxu0 %v3075_v39 }
  0xa3   : > { %2590 = vmatmul.mubr.bf16.gmra.mxu1 %v3077_v40  ;;  %2532 = vmatprep.mubr.bf16.mxu0 %v3092_v41 }
  0xa4   : > { %2597 = vmatprep.mubr.bf16.mxu1 %v3094_v42 }
  0xaa   : > { %2533 = vmatmul.mubr.bf16.gmra.mxu0 %v3091_v47 }
  0xab   : > { %2598 = vmatmul.mubr.bf16.gmra.mxu1 %v3093_v48 }
  0xf2   : > { %v3221_v49 = vpop.f32.mrf.mxu0 }
  0xf3   : > { %v3261_v50 = vpop.f32.mrf.mxu1 }
  0xf4   : > { %v3222_v51 = vpop.f32.mrf.mxu0 }
  0xf5   : > { %v3262_v52 = vpop.f32.mrf.mxu1  ;;  %v3223_v53 = vadd.f32 %v3222_v51, %v3221_v49 }
  0xf6   : > { %v3263_v54 = vadd.f32 %v3262_v52, %v3261_v50  ;;  %v3224_v55 = vpop.f32.mrf.mxu0 }
  0xf7   : > { %v3264_v56 = vpop.f32.mrf.mxu1 }
  0xf8   : > { %v4106_v57 = vadd.f32 %v3263_v54, %v3223_v53  ;;  %v3225_v58 = vpop.f32.mrf.mxu0 }
  0xf9   : > { %v3265_v59 = vpop.f32.mrf.mxu1  ;;  %v3226_v60 = vadd.f32 %v3225_v58, %v3224_v55 }
  0xfa   : > { %v3266_v61 = vadd.f32 %v3265_v59, %v3264_v56  ;;  %v3227_v63 = vpop.f32.mrf.mxu0 }
  0xfb   : > { %v3267_v0 = vpop.f32.mrf.mxu1 }
  0xfc   : > { %v4108_v62 = vadd.f32 %v3266_v61, %v3226_v60  ;;  %v3228_v1 = vpop.f32.mrf.mxu0 }
  0xfd   : > { %v3268_v2 = vpop.f32.mrf.mxu1  ;;  %v3229_v3 = vadd.f32 %v3228_v1, %v3227_v63 }
  0xfe   : > { %v3269_v4 = vadd.f32 %v3268_v2, %v3267_v0  ;;  %v3230_v5 = vpop.f32.mrf.mxu0 }
  0xff   : > { %v3270_v6 = vpop.f32.mrf.mxu1 }
 0x100   : > { %v4110_v7 = vadd.f32 %v3269_v4, %v3229_v3  ;;  %v3231_v8 = vpop.f32.mrf.mxu0 }
 0x101   : > { %v3271_v9 = vpop.f32.mrf.mxu1  ;;  %v3232_v10 = vadd.f32 %v3231_v8, %v3230_v5 }
 0x102   : > { %v3272_v11 = vadd.f32 %v3271_v9, %v3270_v6  ;;  %v3233_v13 = vpop.f32.mrf.mxu0 }
 0x103   : > { %v3273_v14 = vpop.f32.mrf.mxu1 }
 0x104   : > { %v4112_v12 = vadd.f32 %v3272_v11, %v3232_v10  ;;  %v3234_v15 = vpop.f32.mrf.mxu0 }
 0x105   : > { %v3274_v16 = vpop.f32.mrf.mxu1  ;;  %v3235_v17 = vadd.f32 %v3234_v15, %v3233_v13 }
 0x106   : > { %v3275_v18 = vadd.f32 %v3274_v16, %v3273_v14  ;;  %v3236_v19 = vpop.f32.mrf.mxu0 }
 0x107   : > { %v3276_v20 = vpop.f32.mrf.mxu1 }
 0x108   : > { %v4114_v21 = vadd.f32 %v3275_v18, %v3235_v17  ;;  %v3237_v22 = vpop.f32.mrf.mxu0 }
 0x109   : > { %v3277_v23 = vpop.f32.mrf.mxu1  ;;  %v3238_v24 = vadd.f32 %v3237_v22, %v3236_v19 }
 0x10a   : > { %v3278_v25 = vadd.f32 %v3277_v23, %v3276_v20  ;;  %v3239_v26 = vpop.f32.mrf.mxu0 }
 0x10b   : > { %v3279_v28 = vpop.f32.mrf.mxu1 }
 0x10c   : > { %v4116_v27 = vadd.f32 %v3278_v25, %v3238_v24  ;;  %v3240_v29 = vpop.f32.mrf.mxu0 }
 0x10d   : > { %v3241_v30 = vadd.f32 %v3240_v29, %v3239_v26  ;;  %v3280_v31 = vpop.f32.mrf.mxu1 }
 0x10e   : > { %v3281_v32 = vadd.f32 %v3280_v31, %v3279_v28  ;;  %v3242_v33 = vpop.f32.mrf.mxu0 }
 0x10f   : > { %v3282_v34 = vpop.f32.mrf.mxu1 }
 0x110   : > { %v4118_v35 = vadd.f32 %v3281_v32, %v3241_v30  ;;  %v3243_v36 = vpop.f32.mrf.mxu0 }
 0x111   : > { %v3244_v37 = vadd.f32 %v3243_v36, %v3242_v33  ;;  %v3283_v38 = vpop.f32.mrf.mxu1 }
 0x112   : > { %4275 = vst [vmem:[#allocation3_spill] sm:$0xff] %v4118_v35  ;;  %v3284_v39 = vadd.f32 %v3283_v38, %v3282_v34  ;;  %v3301_v41 = vpop.f32.mrf.mxu0 }
 0x113   : > { %v3341_v42 = vpop.f32.mrf.mxu1 }
 0x114   : > { %v4120_v40 = vadd.f32 %v3284_v39, %v3244_v37  ;;  %v3302_v43 = vpop.f32.mrf.mxu0 }
 0x115   : > { %v3342_v44 = vpop.f32.mrf.mxu1 }
 0x116   : > { %4276 = vst [vmem:[#allocation4_spill] sm:$0xff] %v4120_v40  ;;  %v3304_v45 = vpop.f32.mrf.mxu0 }
 0x117   : > { %v4122_v46 = vpop.f32.mrf.mxu1 }
 0x118   : > { %v3305_v47 = vpop.f32.mrf.mxu0 }
 0x119   : > { %v4124_v48 = vpop.f32.mrf.mxu1 }
 0x11a   : > { %v3307_v49 = vpop.f32.mrf.mxu0 }
 0x11b   : > { %v4126_v50 = vpop.f32.mrf.mxu1 }
 0x11c   : > { %v3308_v51 = vpop.f32.mrf.mxu0 }
 0x11d   : > { %v4128_v52 = vpop.f32.mrf.mxu1 }
 0x11e   : > { %v4130_v53 = vpop.f32.mrf.mxu0 }
 0x11f   : > { %v4132_v54 = vpop.f32.mrf.mxu1 }
 0x120   : > { %v3311_v55 = vpop.f32.mrf.mxu0 }
 0x121   : > { %v4134_v56 = vpop.f32.mrf.mxu1 }
 0x122   : > { %v4136_v58 = vpop.f32.mrf.mxu0 }
 0x123   : > { %v4138_v59 = vpop.f32.mrf.mxu1 }
 0x124   : > { %v4140_v60 = vpop.f32.mrf.mxu0 }
 0x125   : > { %v4142_v61 = vpop.f32.mrf.mxu1 }
 0x126   : > { %v4144_v63 = vpop.f32.mrf.mxu0 }
 0x127   : > { %v4146_v0 = vpop.f32.mrf.mxu1 }
 0x128   : > { %v4148_v1 = vpop.f32.mrf.mxu0 }
 0x129   : > { %v4150_v2 = vpop.f32.mrf.mxu1 }
 0x12a   : > { %v4152_v3 = vpop.f32.mrf.mxu0 }
 0x12b   : > { %v4154_v4 = vpop.f32.mrf.mxu1 }
 0x12c   : > { %4277 = vst [vmem:[#allocation5_spill] sm:$0xff] %v4154_v4  ;;  %v4156_v5 = vpop.f32.mrf.mxu0  ;;  %v3306_v4 = vadd.f32 %v3305_v47, %v3304_v45 }
 0x12d   : > { %v4158_v6 = vpop.f32.mrf.mxu1 }
 0x12e   : > { %4278 = vst [vmem:[#allocation6_spill] sm:$0xff] %v4158_v6  ;;  %v4160_v8 = vpop.f32.mrf.mxu0 }
 0x12f   : > { %4279 = vst [vmem:[#allocation7_spill] sm:$0xff] %v4160_v8  ;;  %v4162_v9 = vpop.f32.mrf.mxu1 }
 0x130   : > { %4280 = vst [vmem:[#allocation8_spill] sm:$0xff] %v4162_v9  ;;  %v4164_v10 = vpop.f32.mrf.mxu0 }
 0x131   : > { %4281 = vst [vmem:[#allocation9_spill] sm:$0xff] %v4164_v10  ;;  %v4166_v11 = vpop.f32.mrf.mxu1 }
 0x132   : > { %4282 = vst [vmem:[#allocation10_spill] sm:$0xff] %v4166_v11  ;;  %v3381_v13 = vpop.f32.mrf.mxu0  ;;  %v3303_v11 = vadd.f32 %v3302_v43, %v3301_v41  ;;  %v2254_v41 = vadd.f32 %v3306_v4, %v4108_v62  ;;  %v3309_v43 = vadd.f32 %v3308_v51, %v3307_v49  ;;  %v3349_v62 = vadd.f32 %v4128_v52, %v4126_v50 }
 0x133   : > { %v3421_v14 = vpop.f32.mrf.mxu1  ;;  %v3315_v49 = vadd.f32 %v4140_v60, %v4136_v58  ;;  %v3352_v50 = vadd.f32 %v4134_v56, %v4132_v54 }
 0x134   : > { %v3382_v15 = vpop.f32.mrf.mxu0  ;;  %v2251_v6 = vadd.f32 %v3303_v11, %v4106_v57  ;;  %v3346_v57 = vadd.f32 %v4124_v48, %v4122_v46 }
 0x135   : > { %v3422_v16 = vpop.f32.mrf.mxu1  ;;  %v3383_v8 = vadd.f32 %v3382_v15, %v3381_v13  ;;  %v2259_v15 = vadd.f32 %v3309_v43, %v4110_v7  ;;  %v2267_v52 = vadd.f32 %v3315_v49, %v4114_v21 }
 0x136   : > { %v3384_v17 = vpop.f32.mrf.mxu0  ;;  %v2319_v13 = vadd.f32 %v3346_v57, %v2254_v41 }
 0x137   : > { %v3424_v18 = vpop.f32.mrf.mxu1 }
 0x138   : > { %v3385_v19 = vpop.f32.mrf.mxu0 }
 0x139   : > { %v3425_v20 = vpop.f32.mrf.mxu1  ;;  %v3386_v47 = vadd.f32 %v3385_v19, %v3384_v17  ;;  %v2324_v19 = vadd.f32 %v3349_v62, %v2259_v15  ;;  %v3358_v62 = vadd.f32 %v4150_v2, %v4146_v0  ;;  %v4291_v2 = vld [vmem:[#allocation7_spill] sm:$0xff] }
 0x13a   : > { %v3387_v22 = vpop.f32.mrf.mxu0 }
 0x13b   : > { %v4168_v23 = vpop.f32.mrf.mxu1  ;;  %v2384_v46 = vadd.f32 %v3386_v47, %v2319_v13 }
 0x13c   : > { %v3388_v24 = vpop.f32.mrf.mxu0 }
 0x13d   : > { %v4170_v25 = vpop.f32.mrf.mxu1  ;;  %v3389_v48 = vadd.f32 %v3388_v24, %v3387_v22 }
 0x13e   : > { %v3390_v26 = vpop.f32.mrf.mxu0  ;;  %v3429_v54 = vadd.f32 %v4170_v25, %v4168_v23 }
 0x13f   : > { %v4172_v28 = vpop.f32.mrf.mxu1  ;;  %v2389_v43 = vadd.f32 %v3389_v48, %v2324_v19 }
 0x140   : > { %v3391_v29 = vpop.f32.mrf.mxu0 }
 0x141   : > { %v4174_v30 = vpop.f32.mrf.mxu1  ;;  %v3392_v58 = vadd.f32 %v3391_v29, %v3390_v26 }
 0x142   : > { %v4176_v31 = vpop.f32.mrf.mxu0  ;;  %v3432_v23 = vadd.f32 %v4174_v30, %v4172_v28 }
 0x143   : > { %v4178_v32 = vpop.f32.mrf.mxu1 }
 0x144   : > { %4283 = vst [vmem:[#allocation11_spill] sm:$0xff] %v4178_v32  ;;  %v4180_v33 = vpop.f32.mrf.mxu0 }
 0x145   : > { %v4182_v34 = vpop.f32.mrf.mxu1  ;;  %v3395_v47 = vadd.f32 %v4180_v33, %v4176_v31 }
 0x146   : > { %4284 = vst [vmem:[#allocation12_spill] sm:$0xff] %v4182_v34  ;;  %v4184_v36 = vpop.f32.mrf.mxu0  ;;  %v3343_v34 = vadd.f32 %v3342_v44, %v3341_v42  ;;  %v3312_v42 = vadd.f32 %v3311_v55, %v4130_v53 }
 0x147   : > { %v4186_v37 = vpop.f32.mrf.mxu1 }
 0x148   : > { %4285 = vst [vmem:[#allocation13_spill] sm:$0xff] %v4186_v37  ;;  %v4188_v38 = vpop.f32.mrf.mxu0  ;;  %v2262_v53 = vadd.f32 %v3312_v42, %v4112_v12  ;;  %v3355_v12 = vadd.f32 %v4142_v61, %v4138_v59 }
 0x149   : > { %4286 = vst [vmem:[#allocation14_spill] sm:$0xff] %v4188_v38  ;;  %v4190_v39 = vpop.f32.mrf.mxu1  ;;  %v2316_v38 = vadd.f32 %v3343_v34, %v2251_v6  ;;  %v3423_v6 = vadd.f32 %v3422_v16, %v3421_v14 }
 0x14a   : > { %4287 = vst [vmem:[#allocation15_spill] sm:$0xff] %v4190_v39  ;;  %v4192_v9 = vpop.f32.mrf.mxu0  ;;  %v2327_v57 = vadd.f32 %v3352_v50, %v2262_v53  ;;  %v2332_v26 = vadd.f32 %v3355_v12, %v2267_v52  ;;  %v4292_v53 = vld [vmem:[#allocation9_spill] sm:$0xff] }
 0x14b   : > { %v4194_v40 = vpop.f32.mrf.mxu1  ;;  %v2381_v45 = vadd.f32 %v3383_v8, %v2316_v38  ;;  %v3426_v38 = vadd.f32 %v3425_v20, %v3424_v18  ;;  %v3318_v18 = vadd.f32 %v4148_v1, %v4144_v63  ;;  %v3321_v1 = vadd.f32 %v4156_v5, %v4152_v3 }
 0x14c   : > { %4288 = vst [vmem:[#allocation16_spill] sm:$0xff] %v4194_v40  ;;  %v4197_v32 = vpop.f32.mrf.mxu0  ;;  %v2392_v29 = vadd.f32 %v3392_v58, %v2327_v57  ;;  %v4295_v58 = vld [vmem:[#allocation5_spill] sm:$0xff] }
 0x14d   : > { %v4199_v10 = vpop.f32.mrf.mxu1  ;;  %v2446_v34 = vadd.f32 %v3423_v6, %v2381_v45  ;;  %v2449_v41 = vadd.f32 %v3426_v38, %v2384_v46  ;;  %v2270_v63 = vadd.f32 %v3318_v18, %v4116_v27  ;;  %v4293_v38 = vld [vmem:[#allocation11_spill] sm:$0xff] }
 0x14e   : > { %v4201_v35 = vpop.f32.mrf.mxu0  ;;  %v2457_v49 = vadd.f32 %v3432_v23, %v2392_v29 }
 0x14f   : > { %v4203_v37 = vpop.f32.mrf.mxu1  ;;  %v2335_v48 = vadd.f32 %v3358_v62, %v2270_v63 }
 0x150   : > { %v4206_v39 = vpop.f32.mrf.mxu0  ;;  %v4289_v27 = vld [vmem:[#allocation14_spill] sm:$0xff] }
 0x151   : > { %v4208_v40 = vpop.f32.mrf.mxu1 }
 0x152   : > { %v3461_v44 = vpop.f32.mrf.mxu0 }
 0x153   : > { %v3501_v11 = vpop.f32.mrf.mxu1 }
 0x154   : > { %v3462_v51 = vpop.f32.mrf.mxu0 }
 0x155   : > { %v3502_v4 = vpop.f32.mrf.mxu1  ;;  %v3463_v8 = vadd.f32 %v3462_v51, %v3461_v44  ;;  %v2397_v51 = vadd.f32 %v3395_v47, %v2332_v26  ;;  %v4299_v26 = vld [vmem:[#allocation15_spill] sm:$0xff] }
 0x156   : > { %v3464_v55 = vpop.f32.mrf.mxu0  ;;  %v3503_v14 = vadd.f32 %v3502_v4, %v3501_v11  ;;  %v2454_v11 = vadd.f32 %v3429_v54, %v2389_v43  ;;  %v3398_v4 = vadd.f32 %v4289_v27, %v4184_v36  ;;  %v3401_v43 = vadd.f32 %v4197_v32, %v4192_v9  ;;  %v4297_v54 = vld [vmem:[#allocation4_spill] sm:$0xff] }
 0x157   : > { %v3504_v17 = vpop.f32.mrf.mxu1  ;;  %v2511_v7 = vadd.f32 %v3463_v8, %v2446_v34  ;;  %v4290_v8 = vld [vmem:[#allocation3_spill] sm:$0xff]  ;;  %v4300_v32 = vld [vmem:[#allocation8_spill] sm:$0xff] }
 0x158   : > { %v3465_v60 = vpop.f32.mrf.mxu0  ;;  %v2275_v0 = vadd.f32 %v3321_v1, %v4290_v8  ;;  %v3404_v1 = vadd.f32 %v4206_v39, %v4201_v35 }
 0x159   : > { %v3505_v16 = vpop.f32.mrf.mxu1  ;;  %v2576_v22 = vadd.f32 %v3503_v14, %v2511_v7  ;;  %v3466_v24 = vadd.f32 %v3465_v60, %v3464_v55  ;;  %v3324_v55 = vadd.f32 %v4292_v53, %v4291_v2  ;;  %v4294_v7 = vld [vmem:[#allocation12_spill] sm:$0xff]  ;;  %v4296_v60 = vld [vmem:[#allocation6_spill] sm:$0xff] }
 0x15a   : > { %v3467_v20 = vpop.f32.mrf.mxu0  ;;  %v3506_v56 = vadd.f32 %v3505_v16, %v3504_v17  ;;  %v3435_v14 = vadd.f32 %v4294_v7, %v4293_v38  ;;  %v3361_v16 = vadd.f32 %v4296_v60, %v4295_v58 }
 0x15b   : > { %v3507_v45 = vpop.f32.mrf.mxu1  ;;  %v2514_v21 = vadd.f32 %v3466_v24, %v2449_v41  ;;  %v2614_v59 = vmul.f32 0.2, %v2576_v22  ;;  %vm2606_vm0 = vcmp.ge.f32.partialorder %v2576_v22, 0.0  ;;  %v2400_v41 = vadd.f32 %v3398_v4, %v2335_v48  ;;  %v4302_v4 = vld [vmem:[#allocation16_spill] sm:$0xff] }
 0x15c   : > { %v3468_v42 = vpop.f32.mrf.mxu0  ;;  %v2462_v57 = vadd.f32 %v3435_v14, %v2397_v51 }
 0x15d   : > { %v3508_v44 = vpop.f32.mrf.mxu1  ;;  %v2579_v61 = vadd.f32 %v3506_v56, %v2514_v21  ;;  %v3469_v13 = vadd.f32 %v3468_v42, %v3467_v20  ;;  %v2622_v34 = vsel %vm2606_vm0, %v2576_v22, %v2614_v59  ;;  %v2278_v21 = vadd.f32 %v3324_v55, %v4297_v54  ;;  %v4298_v56 = vld [vmem:[#allocation13_spill] sm:$0xff]  ;;  %v4301_v59 = vld [vmem:[#allocation10_spill] sm:$0xff] }
 0x15e   : > { %v3470_v25 = vpop.f32.mrf.mxu0  ;;  %v3509_v6 = vadd.f32 %v3508_v44, %v3507_v45  ;;  %v2340_v45 = vadd.f32 %v3361_v16, %v2275_v0  ;;  %v3438_v29 = vadd.f32 %v4299_v26, %v4298_v56  ;;  %v3444_v0 = vadd.f32 %v4208_v40, %v4203_v37 }
 0x15f   : > { %v3510_v15 = vpop.f32.mrf.mxu1  ;;  %vm2607_vm1 = vcmp.ge.f32.partialorder %v2579_v61, 0.0  ;;  %v2615_v31 = vmul.f32 0.2, %v2579_v61  ;;  %v2519_v33 = vadd.f32 %v3469_v13, %v2454_v11 }
 0x160   : > { %v3471_v3 = vpop.f32.mrf.mxu0  ;;  %v2465_v13 = vadd.f32 %v3438_v29, %v2400_v41  ;;  %v2405_v63 = vadd.f32 %v3401_v43, %v2340_v45 }
 0x161   : > { %v3511_v5 = vpop.f32.mrf.mxu1  ;;  %v2623_v28 = vsel %vm2607_vm1, %v2579_v61, %v2615_v31  ;;  %v2584_v30 = vadd.f32 %v3509_v6, %v2519_v33  ;;  %v3472_v46 = vadd.f32 %v3471_v3, %v3470_v25  ;;  %v3364_v61 = vadd.f32 %v4301_v59, %v4300_v32 }
 0x162   : > { %v3170_v17 = vpack.c.bf16 %v2623_v28, %v2622_v34  ;;  %v3473_v36 = vpop.f32.mrf.mxu0  ;;  %v3512_v52 = vadd.f32 %v3511_v5, %v3510_v15  ;;  %v3441_v3 = vadd.f32 %v4199_v10, %v4302_v4 }
 0x163   : > { %v3513_v19 = vpop.f32.mrf.mxu1  ;;  %v2522_v50 = vadd.f32 %v3472_v46, %v2457_v49  ;;  %v2616_v12 = vmul.f32 0.2, %v2584_v30  ;;  %vm2608_vm2 = vcmp.ge.f32.partialorder %v2584_v30, 0.0  ;;  %v2343_v62 = vadd.f32 %v3364_v61, %v2278_v21 }
 0x164   : > { %3171 = vst [vmem:[%s4243_s10] sm:$0xff] %v3170_v17   ;;  %v3474_v22 = vpop.f32.mrf.mxu0  ;;  %v2470_v35 = vadd.f32 %v3441_v3, %v2405_v63 }
 0x165   : > { %v3514_v24 = vpop.f32.mrf.mxu1  ;;  %v2587_v18 = vadd.f32 %v3512_v52, %v2522_v50  ;;  %v3475_v20 = vadd.f32 %v3474_v22, %v3473_v36  ;;  %v2624_v15 = vsel %vm2608_vm2, %v2584_v30, %v2616_v12  ;;  %v2408_v28 = vadd.f32 %v3404_v1, %v2343_v62 }
 0x166   : > { %v3476_v47 = vpop.f32.mrf.mxu0  ;;  %v3515_v9 = vadd.f32 %v3514_v24, %v3513_v19 }
 0x167   : > { %v3516_v42 = vpop.f32.mrf.mxu1  ;;  %vm2609_vm3 = vcmp.ge.f32.partialorder %v2587_v18, 0.0  ;;  %v2617_v44 = vmul.f32 0.2, %v2587_v18  ;;  %v2527_v11 = vadd.f32 %v3475_v20, %v2462_v57  ;;  %v2473_v36 = vadd.f32 %v3444_v0, %v2408_v28 }
 0x168   : > { %v3477_v23 = vpop.f32.mrf.mxu0 }
 0x169   : > { %v3517_v25 = vpop.f32.mrf.mxu1  ;;  %v2625_v31 = vsel %vm2609_vm3, %v2587_v18, %v2617_v44  ;;  %v2592_v33 = vadd.f32 %v3515_v9, %v2527_v11  ;;  %v3478_v6 = vadd.f32 %v3477_v23, %v3476_v47 }
 0x16a   : > { %v3175_v49 = vpack.c.bf16 %v2625_v31, %v2624_v15  ;;  %v3479_v51 = vpop.f32.mrf.mxu0  ;;  %v3518_v34 = vadd.f32 %v3517_v25, %v3516_v42 }
 0x16b   : > { %v3519_v27 = vpop.f32.mrf.mxu1  ;;  %v2530_v5 = vadd.f32 %v3478_v6, %v2465_v13  ;;  %v2618_v39 = vmul.f32 0.2, %v2592_v33  ;;  %vm2610_vm4 = vcmp.ge.f32.partialorder %v2592_v33, 0.0 }
 0x16c   : > { %3202 = vst [vmem:[%s4243_s10 + $0x8] sm:$0xff] %v3175_v49   ;;  %v3480_v46 = vpop.f32.mrf.mxu0 }
 0x16d   : > { %v3520_v48 = vpop.f32.mrf.mxu1  ;;  %v2595_v8 = vadd.f32 %v3518_v34, %v2530_v5  ;;  %v3481_v30 = vadd.f32 %v3480_v46, %v3479_v51  ;;  %v2626_v7 = vsel %vm2610_vm4, %v2592_v33, %v2618_v39 }
 0x16e   : > { %v3482_v2 = vpop.f32.mrf.mxu0  ;;  %v3521_v17 = vadd.f32 %v3520_v48, %v3519_v27 }
 0x16f   : > { %v3522_v53 = vpop.f32.mrf.mxu1  ;;  %vm2611_vm5 = vcmp.ge.f32.partialorder %v2595_v8, 0.0  ;;  %v2619_v55 = vmul.f32 0.2, %v2595_v8  ;;  %v2535_v10 = vadd.f32 %v3481_v30, %v2470_v35 }
 0x170   : > { %v3483_v19 = vpop.f32.mrf.mxu0 }
 0x171   : > { %v3523_v38 = vpop.f32.mrf.mxu1  ;;  %v2627_v14 = vsel %vm2611_vm5, %v2595_v8, %v2619_v55  ;;  %v2600_v50 = vadd.f32 %v3521_v17, %v2535_v10  ;;  %v3484_v52 = vadd.f32 %v3483_v19, %v3482_v2 }
 0x172   : > { %v3180_v58 = vpack.c.bf16 %v2627_v14, %v2626_v7  ;;  %v3524_v16 = vadd.f32 %v3523_v38, %v3522_v53 }
 0x173   : > { %v2538_v60 = vadd.f32 %v3484_v52, %v2473_v36  ;;  %v2620_v40 = vmul.f32 0.2, %v2600_v50  ;;  %vm2612_vm6 = vcmp.ge.f32.partialorder %v2600_v50, 0.0 }
 0x174   : > { %3203 = vst [vmem:[%s4243_s10 + $0x10] sm:$0xff] %v3180_v58  }
 0x175   : > { %v2603_v37 = vadd.f32 %v3524_v16, %v2538_v60  ;;  %v2628_v43 = vsel %vm2612_vm6, %v2600_v50, %v2620_v40 }
 0x177   : > { %vm2613_vm7 = vcmp.ge.f32.partialorder %v2603_v37, 0.0  ;;  %v2621_v41 = vmul.f32 0.2, %v2603_v37 }
 0x179   : > { %v2629_v22 = vsel %vm2613_vm7, %v2603_v37, %v2621_v41 }
 0x17a   : > { %v3185_v24 = vpack.c.bf16 %v2629_v22, %v2628_v43 }
 0x17c   : > { %3204 = vst [vmem:[%s4243_s10 + $0x18] sm:$0xff] %v3185_v24  }
 0x17d PF: > { %s12_s9 = sadd.s32 1, %s3668_s9  }
 0x17e   : > { %p9_p4 = scmp.ge.s32.totalorder %s12_s9, 4  }
 0x180   :  { %11 = sbr.rel (!%p9_p4) target bundleno = 1 (0x1), region = 185 }

// kernel: _lambda_.14
= control target key start
LH: loop header
LB: loop body
LE: loop exit
PB: predicated region body
PF: predicated region fallthrough
CT: control target
= control target key end

     0   :  { %s4268_s15 = smov 0   ;;  %s5632_s0 = inlined_call_operand.vmem [shape: bf16[2,8,8,128], index: 0, kind: input, shape index: {}]   ;;  %s5633_s1 = inlined_call_operand.vmem [shape: bf16[1152,512], index: 1, kind: input, shape index: {}]   ;;  %s5634_s2 = inlined_call_operand.vmem [shape: f32[1,1,128], index: 2, kind: input, shape index: {}]   ;;  %s5635_s3 = inlined_call_operand.vmem [shape: f32[1,1,128], index: 3, kind: input, shape index: {}]   ;;  %s5636_s4 = inlined_call_operand.vmem [shape: bf16[2,64,512], index: 4, kind: output, shape index: {}]  }
   0x1 LB: > { %s3300_s16 = sadd.s32 4294967295, %s4239_s15   ;;  %p3304_p0 = scmp.ge.s32.totalorder %s4239_s15, 1  ;;  %s4239_s15 = sphi %s4268_s15, %s14_s15  }
   0x2   : > { %p162_p1 = scmp.lt.s32.totalorder %s4239_s15, 3 }
   0x4   : > { %p163_p2 = pnand %p3304_p0, %p162_p1 }
   0x6   : > { %166 = sbr.rel (%p163_p2) target bundleno = 544 (0x220), region = 36 }
   0xb   : > { %v3736_v0 = vld [vmem:[%s5633_s1 + $0xe4] ss:$16 sps:$4 sm:$0xff]   ;;  %v4241_v2 = vmov 0.0   ;;  %v3740_v3 = vld [vmem:[%s5633_s1 + $0xe0] ss:$16 sps:$4 sm:$0xff]   ;;  %p188_p3 = scmp.lt.s32.totalorder %s3300_s16, 1 }
   0xc   : > { %v3738_v1 = vld [vmem:[%s5633_s1 + $0x2e4] ss:$16 sps:$4 sm:$0xff]   ;;  %199 = vst [vmem:[#allocation2] sm:$0xff] %v4241_v2  ;;  %200 = vst [vmem:[#allocation2 + $0x8] sm:$0x3] %v4241_v2  ;;  %2371 = vmatprep.subr.bf16.mxu0 %v3736_v0 }
   0xd   : > { %201 = vst [vmem:[#allocation2 + $0x10] sm:$0xff] %v4241_v2  ;;  %202 = vst [vmem:[#allocation2 + $0x18] sm:$0x3] %v4241_v2  ;;  %v3741_v4 = vld [vmem:[%s5633_s1 + $0x2e0] ss:$16 sps:$4 sm:$0xff]   ;;  %2444 = vmatprep.subr.bf16.mxu1 %v3738_v1  ;;  %2372 = vmatpush1.bf16.msra.mxu0 %v3740_v3  ;;  %s5646_s16 = smov (!%p188_p3, %s3300_s16), 1 }
   0xe   : > { %203 = vst [vmem:[#allocation2 + $0x20] sm:$0xff] %v4241_v2  ;;  %204 = vst [vmem:[#allocation2 + $0x28] sm:$0x3] %v4241_v2  ;;  %v3742_v5 = vld [vmem:[%s5633_s1 + $0xc4] ss:$16 sps:$4 sm:$0xff]   ;;  %2445 = vmatpush1.bf16.msra.mxu1 %v3741_v4  ;;  %s3653_s27 = sshll.u32 %s5646_s16, 5 }
   0xf   : > { %205 = vst [vmem:[#allocation2 + $0x30] sm:$0xff] %v4241_v2  ;;  %206 = vst [vmem:[#allocation2 + $0x38] sm:$0x3] %v4241_v2  ;;  %v3744_v6 = vld [vmem:[%s5633_s1 + $0x2c4] ss:$16 sps:$4 sm:$0xff]   ;;  %2373 = vmatprep.subr.bf16.mxu0 %v3742_v5  ;;  %s4438_s10 = scalar_lea.vmem %s5632_s0, %s3653_s27  ;;  %s3654_s28 = sshll.u32 %s5646_s16, 7 }
  0x10   : > { %207 = vst [vmem:[#allocation2 + $0x40] sm:$0xff] %v4241_v2  ;;  %208 = vst [vmem:[#allocation2 + $0x48] sm:$0x3] %v4241_v2  ;;  %v3746_v7 = vld [vmem:[%s5633_s1 + $0xc0] ss:$16 sps:$4 sm:$0xff]   ;;  %2446 = vmatprep.subr.bf16.mxu1 %v3744_v6  ;;  %s5520_s30 = scalar_lea.vmem %s5636_s4, %s3654_s28 }
  0x11   : > { %209 = vst [vmem:[#allocation2 + $0x50] sm:$0xff] %v4241_v2  ;;  %210 = vst [vmem:[#allocation2 + $0x58] sm:$0x3] %v4241_v2  ;;  %v3747_v8 = vld [vmem:[%s5633_s1 + $0x2c0] ss:$16 sps:$4 sm:$0xff]   ;;  %2374 = vmatpush1.bf16.msra.mxu0 %v3746_v7 }
  0x12   : > { %211 = vst [vmem:[#allocation2 + $0x60] sm:$0xff] %v4241_v2  ;;  %212 = vst [vmem:[#allocation2 + $0x68] sm:$0x3] %v4241_v2  ;;  %v3748_v9 = vld [vmem:[%s5633_s1 + $0xa4] ss:$16 sps:$4 sm:$0xff]   ;;  %2447 = vmatpush1.bf16.msra.mxu1 %v3747_v8 }
  0x13   : > { %213 = vst [vmem:[#allocation2 + $0x70] sm:$0xff] %v4241_v2  ;;  %214 = vst [vmem:[#allocation2 + $0x78] sm:$0x3] %v4241_v2  ;;  %v3750_v10 = vld [vmem:[%s5633_s1 + $0x2a4] ss:$16 sps:$4 sm:$0xff]   ;;  %2375 = vmatprep.subr.bf16.mxu0 %v3748_v9 }
  0x14   : > { %215 = vst [vmem:[#allocation2 + $0x80] sm:$0xff] %v4241_v2  ;;  %216 = vst [vmem:[#allocation2 + $0x88] sm:$0x3] %v4241_v2  ;;  %v3752_v11 = vld [vmem:[%s5633_s1 + $0xa0] ss:$16 sps:$4 sm:$0xff]   ;;  %2448 = vmatprep.subr.bf16.mxu1 %v3750_v10 }
  0x15   : > { %217 = vst [vmem:[#allocation2 + $0x90] sm:$0xff] %v4241_v2  ;;  %218 = vst [vmem:[#allocation2 + $0x98] sm:$0x3] %v4241_v2  ;;  %v3753_v12 = vld [vmem:[%s5633_s1 + $0x2a0] ss:$16 sps:$4 sm:$0xff]   ;;  %2376 = vmatpush1.bf16.msra.mxu0 %v3752_v11 }
  0x16   : > { %v3754_v13 = vld [vmem:[%s5633_s1 + $0x84] ss:$16 sps:$4 sm:$0xff]   ;;  %v3758_v15 = vld [vmem:[%s5633_s1 + $0x80] ss:$16 sps:$4 sm:$0xff]   ;;  %2449 = vmatpush1.bf16.msra.mxu1 %v3753_v12 }
  0x17   : > { %v3756_v14 = vld [vmem:[%s5633_s1 + $0x284] ss:$16 sps:$4 sm:$0xff]   ;;  %v3759_v16 = vld [vmem:[%s5633_s1 + $0x280] ss:$16 sps:$4 sm:$0xff]   ;;  %2377 = vmatprep.subr.bf16.mxu0 %v3754_v13 }
  0x18   : > { %v3760_v17 = vld [vmem:[%s5633_s1 + $0x64] ss:$16 sps:$4 sm:$0xff]   ;;  %2450 = vmatprep.subr.bf16.mxu1 %v3756_v14  ;;  %v3764_v19 = vld [vmem:[%s5633_s1 + $0x60] ss:$16 sps:$4 sm:$0xff]  }
  0x19   : > { %v3762_v18 = vld [vmem:[%s5633_s1 + $0x264] ss:$16 sps:$4 sm:$0xff]   ;;  %v3765_v20 = vld [vmem:[%s5633_s1 + $0x260] ss:$16 sps:$4 sm:$0xff]   ;;  %2378 = vmatpush1.bf16.msra.mxu0 %v3758_v15 }
  0x1a   : > { %2451 = vmatpush1.bf16.msra.mxu1 %v3759_v16  ;;  %v3766_v21 = vld [vmem:[%s5633_s1 + $0x44] ss:$16 sps:$4 sm:$0xff]   ;;  %2379 = vmatprep.subr.bf16.mxu0 %v3760_v17  ;;  %v3770_v23 = vld [vmem:[%s5633_s1 + $0x40] ss:$16 sps:$4 sm:$0xff]  }
  0x1b   : > { %2452 = vmatprep.subr.bf16.mxu1 %v3762_v18  ;;  %v3768_v22 = vld [vmem:[%s5633_s1 + $0x244] ss:$16 sps:$4 sm:$0xff]   ;;  %v3771_v24 = vld [vmem:[%s5633_s1 + $0x240] ss:$16 sps:$4 sm:$0xff]  }
  0x1c   : > { %v3772_v25 = vld [vmem:[%s5633_s1 + $0x24] ss:$16 sps:$4 sm:$0xff]   ;;  %v3776_v27 = vld [vmem:[%s5633_s1 + $0x20] ss:$16 sps:$4 sm:$0xff]  }
  0x1d   : > { %2380 = vmatpush1.bf16.msra.mxu0 %v3764_v19  ;;  %v3774_v26 = vld [vmem:[%s5633_s1 + $0x224] ss:$16 sps:$4 sm:$0xff]   ;;  %v3777_v28 = vld [vmem:[%s5633_s1 + $0x220] ss:$16 sps:$4 sm:$0xff]  }
  0x1e   : > { %2453 = vmatpush1.bf16.msra.mxu1 %v3765_v20  ;;  %2381 = vmatprep.subr.bf16.mxu0 %v3766_v21  ;;  %v3778_v29 = vld [vmem:[%s5633_s1 + $0x4] ss:$16 sps:$4 sm:$0xff]   ;;  %v3782_v31 = vld [vmem:[%s5633_s1] ss:$16 sps:$4 sm:$0xff]  }
  0x1f   : > { %2454 = vmatprep.subr.bf16.mxu1 %v3768_v22  ;;  %v3780_v30 = vld [vmem:[%s5633_s1 + $0x204] ss:$16 sps:$4 sm:$0xff]   ;;  %v3783_v32 = vld [vmem:[%s5633_s1 + $0x200] ss:$16 sps:$4 sm:$0xff]  }
  0x20   : > { %v3784_v33 = vld [vmem:[%s5633_s1 + $0x1e4] ss:$16 sps:$4 sm:$0xff]   ;;  %v3788_v35 = vld [vmem:[%s5633_s1 + $0x1e0] ss:$16 sps:$4 sm:$0xff]  }
  0x21   : > { %2382 = vmatpush1.bf16.msra.mxu0 %v3770_v23  ;;  %v3786_v34 = vld [vmem:[%s5633_s1 + $0x3e4] ss:$16 sps:$4 sm:$0xff]   ;;  %v3789_v36 = vld [vmem:[%s5633_s1 + $0x3e0] ss:$16 sps:$4 sm:$0xff]  }
  0x22   : > { %2455 = vmatpush1.bf16.msra.mxu1 %v3771_v24  ;;  %2383 = vmatprep.subr.bf16.mxu0 %v3772_v25  ;;  %v3790_v37 = vld [vmem:[%s5633_s1 + $0x1c4] ss:$16 sps:$4 sm:$0xff]   ;;  %v3794_v39 = vld [vmem:[%s5633_s1 + $0x1c0] ss:$16 sps:$4 sm:$0xff]  }
  0x23   : > { %2456 = vmatprep.subr.bf16.mxu1 %v3774_v26  ;;  %v3792_v38 = vld [vmem:[%s5633_s1 + $0x3c4] ss:$16 sps:$4 sm:$0xff]   ;;  %v3795_v40 = vld [vmem:[%s5633_s1 + $0x3c0] ss:$16 sps:$4 sm:$0xff]  }
  0x24   : > { %v3796_v41 = vld [vmem:[%s5633_s1 + $0x1a4] ss:$16 sps:$4 sm:$0xff]   ;;  %v3800_v43 = vld [vmem:[%s5633_s1 + $0x1a0] ss:$16 sps:$4 sm:$0xff]  }
  0x25   : > { %2384 = vmatpush1.bf16.msra.mxu0 %v3776_v27  ;;  %v3798_v42 = vld [vmem:[%s5633_s1 + $0x3a4] ss:$16 sps:$4 sm:$0xff]   ;;  %v3801_v44 = vld [vmem:[%s5633_s1 + $0x3a0] ss:$16 sps:$4 sm:$0xff]  }
  0x26   : > { %2457 = vmatpush1.bf16.msra.mxu1 %v3777_v28  ;;  %2385 = vmatprep.subr.bf16.mxu0 %v3778_v29  ;;  %v3802_v45 = vld [vmem:[%s5633_s1 + $0x184] ss:$16 sps:$4 sm:$0xff]   ;;  %v3806_v48 = vld [vmem:[%s5633_s1 + $0x180] ss:$16 sps:$4 sm:$0xff]  }
  0x27   : > { %2458 = vmatprep.subr.bf16.mxu1 %v3780_v30  ;;  %v3804_v46 = vld [vmem:[%s5633_s1 + $0x384] ss:$16 sps:$4 sm:$0xff]   ;;  %v3807_v49 = vld [vmem:[%s5633_s1 + $0x380] ss:$16 sps:$4 sm:$0xff]  }
  0x28   : > { %v3708_v47 = vld [vmem:[%s4438_s10] sm:$0xff]  }
  0x29   : > { %2386 = vmatpush1.bf16.msra.mxu0 %v3782_v31  ;;  %v3709_v50 = vunpack.c.l.bf16 %v3708_v47  ;;  %v4456_v51 = vld [vmem:[%s5634_s2] ss:$0 sm:$0xff]  ;;  %v3710_v52 = vunpack.c.h.bf16 %v3708_v47  ;;  %v3808_v54 = vld [vmem:[%s5633_s1 + $0x164] ss:$16 sps:$4 sm:$0xff]  }
  0x2a   : > { %2459 = vmatpush1.bf16.msra.mxu1 %v3783_v32  ;;  %2387 = vmatprep.subr.bf16.mxu0 %v3784_v33  ;;  %v4461_v53 = vld [vmem:[%s5635_s3] ss:$0 sm:$0xff]  ;;  %v3810_v55 = vld [vmem:[%s5633_s1 + $0x364] ss:$16 sps:$4 sm:$0xff]   ;;  %v3723_v32 = vld [vmem:[%s4438_s10 + $0x8] sm:$0xff]  }
  0x2b   : > { %2460 = vmatprep.subr.bf16.mxu1 %v3786_v34  ;;  %v242_v56 = vmul.f32 %v3709_v50, %v4456_v51  ;;  %v243_v57 = vmul.f32 %v3710_v52, %v4456_v51  ;;  %v3812_v58 = vld [vmem:[%s5633_s1 + $0x160] ss:$16 sps:$4 sm:$0xff]   ;;  %v3814_v63 = vld [vmem:[%s5633_s1 + $0x144] ss:$16 sps:$4 sm:$0xff]   ;;  %v3713_v33 = vunpack.c.l.bf16 %v3723_v32  ;;  %v3714_v34 = vunpack.c.h.bf16 %v3723_v32 }
  0x2c   : > { %v3813_v59 = vld [vmem:[%s5633_s1 + $0x360] ss:$16 sps:$4 sm:$0xff]   ;;  %v3816_v0 = vld [vmem:[%s5633_s1 + $0x344] ss:$16 sps:$4 sm:$0xff]  }
  0x2d   : > { %2388 = vmatpush2.bf16.msra.mxu0 %v3788_v35  ;;  %v257_v60 = vadd.f32 %v4461_v53, %v242_v56  ;;  %v258_v61 = vadd.f32 %v4461_v53, %v243_v57  ;;  %v298_v62 = vld [vmem:[#allocation2 + $0x1] sm:$0xff] }
  0x2e   : > { %2461 = vmatpush2.bf16.msra.mxu1 %v3789_v36  ;;  %2389 = vmatprep.subr.bf16.mxu0 %v3790_v37  ;;  %v3818_v6 = vld [vmem:[%s5633_s1 + $0x140] ss:$16 sps:$4 sm:$0xff]   ;;  %v3820_v8 = vld [vmem:[%s5633_s1 + $0x124] ss:$16 sps:$4 sm:$0xff]  }
  0x2f   : > { %2462 = vmatprep.subr.bf16.mxu1 %v3792_v38  ;;  %v265_v1 = vmax.f32 %v257_v60, 0.0  ;;  %v4485_v3 = vmax.f32 %v258_v61, 0.0  ;;  %v3819_v7 = vld [vmem:[%s5633_s1 + $0x340] ss:$16 sps:$4 sm:$0xff]   ;;  %v3822_v9 = vld [vmem:[%s5633_s1 + $0x324] ss:$16 sps:$4 sm:$0xff]   ;;  %v244_v38 = vmul.f32 %v3713_v33, %v4456_v51 }
  0x30   : > { %v3824_v10 = vld [vmem:[%s5633_s1 + $0x120] ss:$16 sps:$4 sm:$0xff]   ;;  %v3826_v12 = vld [vmem:[%s5633_s1 + $0x104] ss:$16 sps:$4 sm:$0xff]  }
  0x31   : > { %2390 = vmatpush2.bf16.msra.mxu0 %v3794_v39  ;;  %274 = vst [vmem:[#allocation2 + $0x11] sm:$0xff] %v265_v1  ;;  %v4487_v4 = vpack.c.bf16 %v265_v1, %v298_v62  ;;  %275 = vst [vmem:[#allocation2 + $0x21] sm:$0xff] %v4485_v3  ;;  %v4491_v5 = vpack.c.bf16 %v4485_v3, %v265_v1  ;;  %v3825_v11 = vld [vmem:[%s5633_s1 + $0x320] ss:$16 sps:$4 sm:$0xff]   ;;  %v3828_v13 = vld [vmem:[%s5633_s1 + $0x304] ss:$16 sps:$4 sm:$0xff]   ;;  %v245_v39 = vmul.f32 %v3714_v34, %v4456_v51 }
  0x32   : > { %2463 = vmatpush2.bf16.msra.mxu1 %v3795_v40  ;;  %2391 = vmatprep.subr.bf16.mxu0 %v3796_v41  ;;  %v3830_v14 = vld [vmem:[%s5633_s1 + $0x100] ss:$16 sps:$4 sm:$0xff]   ;;  %v3834_v21 = vld [vmem:[%s5633_s1 + $0x4e4] ss:$16 sps:$4 sm:$0xff]   ;;  %v259_v41 = vadd.f32 %v4461_v53, %v244_v38 }
  0x33   : > { %2464 = vmatprep.subr.bf16.mxu1 %v3798_v42  ;;  %2403 = vmatprep.mubr.bf16.mxu0 %v4487_v4  ;;  %v3831_v15 = vld [vmem:[%s5633_s1 + $0x300] ss:$16 sps:$4 sm:$0xff]   ;;  %v3837_v22 = vld [vmem:[%s5633_s1 + $0x6e4] ss:$16 sps:$4 sm:$0xff]   ;;  %v260_v42 = vadd.f32 %v4461_v53, %v245_v39 }
  0x34   : > { %v314_v19 = vld [vmem:[#allocation2 + $0x2] sm:$0xff]  ;;  %v4597_v47 = vmax.f32 %v259_v41, 0.0 }
  0x35   : > { %2392 = vmatpush2.bf16.msra.mxu0 %v3800_v43  ;;  %v3832_v25 = vld [vmem:[%s5633_s1 + $0x4e0] ss:$16 sps:$4 sm:$0xff]   ;;  %v3843_v27 = vld [vmem:[%s5633_s1 + $0x6c4] ss:$16 sps:$4 sm:$0xff]  }
  0x36   : > { %2465 = vmatpush2.bf16.msra.mxu1 %v3801_v44  ;;  %2393 = vmatprep.subr.bf16.mxu0 %v3802_v45  ;;  %v3835_v26 = vld [vmem:[%s5633_s1 + $0x6e0] ss:$16 sps:$4 sm:$0xff]   ;;  %v3846_v30 = vld [vmem:[%s5633_s1 + $0x4a4] ss:$16 sps:$4 sm:$0xff]   ;;  %276 = vst [vmem:[#allocation2 + $0x31] sm:$0xff] %v4597_v47 }
  0x37   : > { %2466 = vmatprep.subr.bf16.mxu1 %v3804_v46  ;;  %v3838_v28 = vld [vmem:[%s5633_s1 + $0x4c0] ss:$16 sps:$4 sm:$0xff]   ;;  %v3849_v31 = vld [vmem:[%s5633_s1 + $0x6a4] ss:$16 sps:$4 sm:$0xff]  }
  0x38   : > { %v330_v16 = vld [vmem:[#allocation2 + $0x10] sm:$0xff]  ;;  %v4524_v17 = vld [vmem:[#allocation2 + $0x20] sm:$0xff] }
  0x39   : > { %2394 = vmatpush2.bf16.msra.mxu0 %v3806_v48  ;;  %v4527_v18 = vpack.c.bf16 %v4524_v17, %v330_v16  ;;  %v4529_v20 = vld [vmem:[#allocation2 + $0x12] sm:$0xff]  ;;  %v4539_v23 = vpack.c.bf16 %v330_v16, %v4241_v2  ;;  %v4599_v48 = vmax.f32 %v260_v42, 0.0 }
  0x3a   : > { %2467 = vmatpush2.bf16.msra.mxu1 %v3807_v49  ;;  %2395 = vmatprep.subr.bf16.mxu0 %v3808_v54  ;;  %v4542_v24 = vpack.c.bf16 %v4529_v20, %v314_v19  ;;  %v3840_v2 = vld [vmem:[%s5633_s1 + $0x4c4] ss:$16 sps:$4 sm:$0xff]   ;;  %v3841_v29 = vld [vmem:[%s5633_s1 + $0x6c0] ss:$16 sps:$4 sm:$0xff]   ;;  %v4607_v54 = vpack.c.bf16 %v4597_v47, %v4485_v3 }
  0x3b   : > { %2468 = vmatprep.subr.bf16.mxu1 %v3810_v55  ;;  %2476 = vmatprep.mubr.bf16.mxu1 %v4527_v18  ;;  %v3844_v35 = vld [vmem:[%s5633_s1 + $0x4a0] ss:$16 sps:$4 sm:$0xff]   ;;  %v3852_v37 = vld [vmem:[%s5633_s1 + $0x484] ss:$16 sps:$4 sm:$0xff]   ;;  %277 = vst [vmem:[#allocation2 + $0x41] sm:$0xff] %v4599_v48 }
  0x3c   : > { %v3847_v36 = vld [vmem:[%s5633_s1 + $0x6a0] ss:$16 sps:$4 sm:$0xff]   ;;  %v3855_v40 = vld [vmem:[%s5633_s1 + $0x684] ss:$16 sps:$4 sm:$0xff]  }
  0x3d   : > { %2396 = vmatpush2.bf16.msra.mxu0 %v3812_v58  ;;  %v3850_v43 = vld [vmem:[%s5633_s1 + $0x480] ss:$16 sps:$4 sm:$0xff]   ;;  %v3858_v46 = vld [vmem:[%s5633_s1 + $0x464] ss:$16 sps:$4 sm:$0xff]  }
  0x3e   : > { %2469 = vmatpush2.bf16.msra.mxu1 %v3813_v59  ;;  %2397 = vmatprep.subr.bf16.mxu0 %v3814_v63  ;;  %v3853_v44 = vld [vmem:[%s5633_s1 + $0x680] ss:$16 sps:$4 sm:$0xff]   ;;  %v3861_v52 = vld [vmem:[%s5633_s1 + $0x664] ss:$16 sps:$4 sm:$0xff]   ;;  %v3725_v63 = vld [vmem:[%s4438_s10 + $0x18] sm:$0xff]  }
  0x3f   : > { %2470 = vmatprep.subr.bf16.mxu1 %v3816_v0  ;;  %v3724_v45 = vld [vmem:[%s4438_s10 + $0x10] sm:$0xff]  }
  0x40   : > { %v3717_v49 = vunpack.c.l.bf16 %v3724_v45  ;;  %v3718_v50 = vunpack.c.h.bf16 %v3724_v45  ;;  %v3856_v57 = vld [vmem:[%s5633_s1 + $0x460] ss:$16 sps:$4 sm:$0xff]   ;;  %v3864_v59 = vld [vmem:[%s5633_s1 + $0x444] ss:$16 sps:$4 sm:$0xff]  }
  0x41   : > { %2398 = vmatpush2.bf16.msra.mxu0 %v3818_v6  ;;  %v3859_v58 = vld [vmem:[%s5633_s1 + $0x660] ss:$16 sps:$4 sm:$0xff]   ;;  %v3867_v62 = vld [vmem:[%s5633_s1 + $0x644] ss:$16 sps:$4 sm:$0xff]  }
  0x42   : > { %2471 = vmatpush2.bf16.msra.mxu1 %v3819_v7  ;;  %2399 = vmatprep.subr.bf16.mxu0 %v3820_v8  ;;  %v246_v55 = vmul.f32 %v3717_v49, %v4456_v51  ;;  %v247_v56 = vmul.f32 %v3718_v50, %v4456_v51  ;;  %v3862_v0 = vld [vmem:[%s5633_s1 + $0x440] ss:$16 sps:$4 sm:$0xff]   ;;  %v3721_v7 = vunpack.c.l.bf16 %v3725_v63  ;;  %v3722_v8 = vunpack.c.h.bf16 %v3725_v63  ;;  %v3885_v38 = vld [vmem:[%s5633_s1 + $0x7e4] ss:$16 sps:$4 sm:$0xff]  }
  0x43   : > { %2472 = vmatprep.subr.bf16.mxu1 %v3822_v9  ;;  %v3865_v1 = vld [vmem:[%s5633_s1 + $0x640] ss:$16 sps:$4 sm:$0xff]   ;;  %v3870_v9 = vld [vmem:[%s5633_s1 + $0x424] ss:$16 sps:$4 sm:$0xff]  }
  0x44   : > { %v261_v60 = vadd.f32 %v4461_v53, %v246_v55  ;;  %v262_v61 = vadd.f32 %v4461_v53, %v247_v56  ;;  %v4650_v16 = vld [vmem:[#allocation2 + $0x32] sm:$0xff]  ;;  %v4694_v34 = vld [vmem:[#allocation2 + $0x42] sm:$0xff] }
  0x45   : > { %2400 = vmatpush2.bf16.msra.mxu0 %v3824_v10  ;;  %v3873_v10 = vld [vmem:[%s5633_s1 + $0x624] ss:$16 sps:$4 sm:$0xff]   ;;  %v3886_v49 = vld [vmem:[%s5633_s1 + $0x5c0] ss:$16 sps:$4 sm:$0xff]  }
  0x46   : > { %2473 = vmatpush2.bf16.msra.mxu1 %v3825_v11  ;;  %2401 = vmatprep.subr.bf16.mxu0 %v3826_v12  ;;  %v4634_v3 = vmax.f32 %v261_v60, 0.0  ;;  %v4636_v6 = vmax.f32 %v262_v61, 0.0  ;;  %v4644_v11 = vld [vmem:[#allocation2 + $0x22] sm:$0xff]  ;;  %v248_v12 = vmul.f32 %v3721_v7, %v4456_v51 }
  0x47   : > { %2474 = vmatprep.subr.bf16.mxu1 %v3828_v13  ;;  %v249_v13 = vmul.f32 %v3722_v8, %v4456_v51  ;;  %v4663_v51 = vpack.c.bf16 %v4650_v16, %v4644_v11  ;;  %v3891_v45 = vld [vmem:[%s5633_s1 + $0x7c4] ss:$16 sps:$4 sm:$0xff]   ;;  %v3889_v50 = vld [vmem:[%s5633_s1 + $0x7c0] ss:$16 sps:$4 sm:$0xff]  }
  0x48   : > { %278 = vst [vmem:[#allocation2 + $0x51] sm:$0xff] %v4634_v3  ;;  %279 = vst [vmem:[#allocation2 + $0x61] sm:$0xff] %v4636_v6  ;;  %v3894_v55 = vld [vmem:[%s5633_s1 + $0x5a4] ss:$16 sps:$4 sm:$0xff]   ;;  %v3892_v61 = vld [vmem:[%s5633_s1 + $0x5a0] ss:$16 sps:$4 sm:$0xff]  }
  0x49   : > { %2402 = vmatpush2.bf16.msra.mxu0 %v3830_v14  ;;  %v332_v14 = vld [vmem:[#allocation2 + $0x30] sm:$0xff] }
  0x4a   : > { %2475 = vmatpush2.bf16.msra.mxu1 %v3831_v15  ;;  %2517 = vmatprep.subr.bf16.mxu0 %v3834_v21  ;;  %v333_v15 = vld [vmem:[#allocation2 + $0x40] sm:$0xff]  ;;  %v4655_v21 = vpack.c.bf16 %v332_v14, %v4524_v17 }
  0x4b   : > { %2590 = vmatprep.subr.bf16.mxu1 %v3837_v22  ;;  %v4652_v19 = vpack.c.bf16 %v333_v15, %v332_v14  ;;  %v263_v22 = vadd.f32 %v4461_v53, %v248_v12  ;;  %v3871_v17 = vld [vmem:[%s5633_s1 + $0x620] ss:$16 sps:$4 sm:$0xff]   ;;  %v3903_v7 = vld [vmem:[%s5633_s1 + $0x784] ss:$16 sps:$4 sm:$0xff]  }
  0x4c   : > { %2404 = vmatmul.mubr.bf16.vlgmr.msra.gmra.mxu0 %v4539_v23  ;;  %v3898_v8 = vld [vmem:[%s5633_s1 + $0x580] ss:$16 sps:$4 sm:$0xff]   ;;  %v3915_v14 = vld [vmem:[%s5633_s1 + $0x744] ss:$16 sps:$4 sm:$0xff]  }
  0x4d   : > { %2477 = vmatmul.mubr.bf16.vlgmr.msra.gmra.mxu1 %v4542_v24  ;;  %2518 = vmatpush1.bf16.msra.mxu0 %v3832_v25  ;;  %v3868_v25 = vld [vmem:[%s5633_s1 + $0x420] ss:$16 sps:$4 sm:$0xff]  }
  0x4e   : > { %2591 = vmatpush1.bf16.msra.mxu1 %v3835_v26  ;;  %2519 = vmatprep.subr.bf16.mxu0 %v3840_v2  ;;  %v4667_v26 = vpack.c.bf16 %v4634_v3, %v4599_v48  ;;  %v264_v2 = vadd.f32 %v4461_v53, %v249_v13  ;;  %v3874_v53 = vld [vmem:[%s5633_s1 + $0x400] ss:$16 sps:$4 sm:$0xff]   ;;  %v3912_v13 = vld [vmem:[%s5633_s1 + $0x544] ss:$16 sps:$4 sm:$0xff]  }
  0x4f   : > { %2592 = vmatprep.subr.bf16.mxu1 %v3843_v27  ;;  %2413 = vmatprep.mubr.bf16.mxu0 %v4607_v54  ;;  %v4673_v27 = vmax.f32 %v263_v22, 0.0  ;;  %v334_v32 = vld [vmem:[#allocation2 + $0x50] sm:$0xff]  ;;  %v335_v33 = vld [vmem:[#allocation2 + $0x60] sm:$0xff] }
  0x50   : > { %2486 = vmatprep.mubr.bf16.mxu1 %v4652_v19  ;;  %v4708_v39 = vpack.c.bf16 %v334_v32, %v333_v15  ;;  %v3907_v12 = vld [vmem:[%s5633_s1 + $0x760] ss:$16 sps:$4 sm:$0xff]  }
  0x51   : > { %2520 = vmatpush1.bf16.msra.mxu0 %v3838_v28  ;;  %v3876_v28 = vld [vmem:[%s5633_s1 + $0x404] ss:$16 sps:$4 sm:$0xff]   ;;  %280 = vst [vmem:[#allocation2 + $0x71] sm:$0xff] %v4673_v27  ;;  %v4719_v42 = vpack.c.bf16 %v4673_v27, %v4636_v6  ;;  %v3910_v15 = vld [vmem:[%s5633_s1 + $0x540] ss:$16 sps:$4 sm:$0xff]  }
  0x52   : > { %2593 = vmatpush1.bf16.msra.mxu1 %v3841_v29  ;;  %2521 = vmatprep.subr.bf16.mxu0 %v3846_v30  ;;  %v3879_v29 = vld [vmem:[%s5633_s1 + $0x604] ss:$16 sps:$4 sm:$0xff]   ;;  %v4681_v30 = vmax.f32 %v264_v2, 0.0  ;;  %v3913_v22 = vld [vmem:[%s5633_s1 + $0x740] ss:$16 sps:$4 sm:$0xff]  }
  0x53   : > { %2594 = vmatprep.subr.bf16.mxu1 %v3849_v31  ;;  %v3877_v31 = vld [vmem:[%s5633_s1 + $0x600] ss:$16 sps:$4 sm:$0xff]   ;;  %v3921_v2 = vld [vmem:[%s5633_s1 + $0x724] ss:$16 sps:$4 sm:$0xff]  }
  0x54   : > { %2414 = vmatmul.mubr.bf16.gmra.mxu0 %v4655_v21  ;;  %281 = vst [vmem:[#allocation2 + $0x81] sm:$0xff] %v4681_v30 }
  0x55   : > { %2522 = vmatpush1.bf16.msra.mxu0 %v3844_v35  ;;  %2487 = vmatmul.mubr.bf16.gmra.mxu1 %v4663_v51  ;;  %v4697_v35 = vpack.c.bf16 %v335_v33, %v334_v32  ;;  %v3925_v32 = vld [vmem:[%s5633_s1 + $0x700] ss:$16 sps:$4 sm:$0xff]  }
  0x56   : > { %2595 = vmatpush1.bf16.msra.mxu1 %v3847_v36  ;;  %2523 = vmatprep.subr.bf16.mxu0 %v3852_v37  ;;  %v4699_v36 = vld [vmem:[#allocation2 + $0x52] sm:$0xff] }
  0x57   : > { %2596 = vmatprep.subr.bf16.mxu1 %v3855_v40  ;;  %2423 = vmatprep.mubr.bf16.mxu0 %v4667_v26  ;;  %v3882_v37 = vld [vmem:[%s5633_s1 + $0x5e4] ss:$16 sps:$4 sm:$0xff]   ;;  %v3880_v40 = vld [vmem:[%s5633_s1 + $0x5e0] ss:$16 sps:$4 sm:$0xff]   ;;  %v4715_v41 = vpack.c.bf16 %v4699_v36, %v4694_v34 }
  0x58   : > { %2496 = vmatprep.mubr.bf16.mxu1 %v4697_v35 }
  0x59   : > { %2524 = vmatpush1.bf16.msra.mxu0 %v3850_v43  ;;  %v3883_v43 = vld [vmem:[%s5633_s1 + $0x7e0] ss:$16 sps:$4 sm:$0xff]  }
  0x5a   : > { %2597 = vmatpush1.bf16.msra.mxu1 %v3853_v44  ;;  %2525 = vmatprep.subr.bf16.mxu0 %v3858_v46  ;;  %v3888_v44 = vld [vmem:[%s5633_s1 + $0x5c4] ss:$16 sps:$4 sm:$0xff]  }
  0x5b   : > { %2598 = vmatprep.subr.bf16.mxu1 %v3861_v52  ;;  %v336_v46 = vld [vmem:[#allocation2 + $0x70] sm:$0xff]  ;;  %v4737_v52 = vld [vmem:[#allocation2 + $0x80] sm:$0xff] }
  0x5c   : > { %2424 = vmatmul.mubr.bf16.gmra.mxu0 %v4708_v39  ;;  %v4745_v56 = vpack.c.bf16 %v4737_v52, %v336_v46  ;;  %v4755_v60 = vpack.c.bf16 %v336_v46, %v335_v33  ;;  %v3930_v33 = vld [vmem:[%s5633_s1 + $0x8e4] ss:$16 sps:$4 sm:$0xff]   ;;  %v3934_v46 = vld [vmem:[%s5633_s1 + $0x8c0] ss:$16 sps:$4 sm:$0xff]  }
  0x5d   : > { %2526 = vmatpush1.bf16.msra.mxu0 %v3856_v57  ;;  %2497 = vmatmul.mubr.bf16.gmra.mxu1 %v4715_v41  ;;  %v4747_v57 = vld [vmem:[#allocation2 + $0x62] sm:$0xff] }
  0x5e   : > { %2599 = vmatpush1.bf16.msra.mxu1 %v3859_v58  ;;  %2527 = vmatprep.subr.bf16.mxu0 %v3864_v59  ;;  %v4749_v58 = vld [vmem:[#allocation2 + $0x72] sm:$0xff] }
  0x5f   : > { %2600 = vmatprep.subr.bf16.mxu1 %v3867_v62  ;;  %2433 = vmatprep.mubr.bf16.mxu0 %v4719_v42  ;;  %v3897_v59 = vld [vmem:[%s5633_s1 + $0x7a4] ss:$16 sps:$4 sm:$0xff]   ;;  %v3895_v62 = vld [vmem:[%s5633_s1 + $0x7a0] ss:$16 sps:$4 sm:$0xff]   ;;  %v4765_v63 = vpack.c.bf16 %v4749_v58, %v4747_v57 }
  0x60   : > { %2506 = vmatprep.mubr.bf16.mxu1 %v4745_v56 }
  0x61   : > { %2528 = vmatpush1.bf16.msra.mxu0 %v3862_v0  ;;  %v4769_v0 = vpack.c.bf16 %v4644_v11, %v4529_v20  ;;  %v3901_v20 = vld [vmem:[%s5633_s1 + $0x780] ss:$16 sps:$4 sm:$0xff]  }
  0x62   : > { %2601 = vmatpush1.bf16.msra.mxu1 %v3865_v1  ;;  %2529 = vmatprep.subr.bf16.mxu0 %v3870_v9  ;;  %v3900_v1 = vld [vmem:[%s5633_s1 + $0x584] ss:$16 sps:$4 sm:$0xff]   ;;  %v3904_v11 = vld [vmem:[%s5633_s1 + $0x560] ss:$16 sps:$4 sm:$0xff]  }
  0x63   : > { %2602 = vmatprep.subr.bf16.mxu1 %v3873_v10  ;;  %v3906_v9 = vld [vmem:[%s5633_s1 + $0x564] ss:$16 sps:$4 sm:$0xff]  }
  0x64   : > { %2434 = vmatmul.mubr.bf16.gmra.mxu0 %v4755_v60  ;;  %v3909_v10 = vld [vmem:[%s5633_s1 + $0x764] ss:$16 sps:$4 sm:$0xff]  }
  0x65   : > { %2530 = vmatpush1.bf16.msra.mxu0 %v3868_v25  ;;  %2507 = vmatmul.mubr.bf16.gmra.mxu1 %v4765_v63  ;;  %v3918_v25 = vld [vmem:[%s5633_s1 + $0x524] ss:$16 sps:$4 sm:$0xff]  }
  0x66   : > { %2603 = vmatpush1.bf16.msra.mxu1 %v3871_v17  ;;  %2531 = vmatprep.subr.bf16.mxu0 %v3876_v28  ;;  %v3916_v17 = vld [vmem:[%s5633_s1 + $0x520] ss:$16 sps:$4 sm:$0xff]  }
  0x67   : > { %2604 = vmatprep.subr.bf16.mxu1 %v3879_v29  ;;  %2549 = vmatprep.mubr.bf16.mxu0 %v4769_v0  ;;  %v3919_v28 = vld [vmem:[%s5633_s1 + $0x720] ss:$16 sps:$4 sm:$0xff]   ;;  %v3924_v29 = vld [vmem:[%s5633_s1 + $0x504] ss:$16 sps:$4 sm:$0xff]  }
  0x68   : > { %2622 = vmatprep.mubr.bf16.mxu1 %v4607_v54 }
  0x69   : > { %2532 = vmatpush1.bf16.msra.mxu0 %v3874_v53  ;;  %v3927_v53 = vld [vmem:[%s5633_s1 + $0x704] ss:$16 sps:$4 sm:$0xff]  }
  0x6a   : > { %2605 = vmatpush1.bf16.msra.mxu1 %v3877_v31  ;;  %2533 = vmatprep.subr.bf16.mxu0 %v3882_v37  ;;  %v3922_v31 = vld [vmem:[%s5633_s1 + $0x500] ss:$16 sps:$4 sm:$0xff]   ;;  %v3933_v37 = vld [vmem:[%s5633_s1 + $0xec] ss:$16 sps:$4 sm:$0xff]  }
  0x6b   : > { %2606 = vmatprep.subr.bf16.mxu1 %v3885_v38  ;;  %v3928_v38 = vld [vmem:[%s5633_s1 + $0x8e0] ss:$16 sps:$4 sm:$0xff]  }
  0x6d   : > { %2534 = vmatpush2.bf16.msra.mxu0 %v3880_v40  ;;  %v3931_v40 = vld [vmem:[%s5633_s1 + $0xe8] ss:$16 sps:$4 sm:$0xff]  }
  0x6e   : > { %2607 = vmatpush2.bf16.msra.mxu1 %v3883_v43  ;;  %2535 = vmatprep.subr.bf16.mxu0 %v3888_v44  ;;  %v3936_v43 = vld [vmem:[%s5633_s1 + $0x8c4] ss:$16 sps:$4 sm:$0xff]   ;;  %v3939_v44 = vld [vmem:[%s5633_s1 + $0xcc] ss:$16 sps:$4 sm:$0xff]  }
  0x6f   : > { %2608 = vmatprep.subr.bf16.mxu1 %v3891_v45  ;;  %v4855_v45 = vpack.c.bf16 %v4694_v34, %v4650_v16  ;;  %v3945_v16 = vld [vmem:[%s5633_s1 + $0xac] ss:$16 sps:$4 sm:$0xff]   ;;  %v4875_v34 = vpack.c.bf16 %v4599_v48, %v4597_v47  ;;  %v4891_v48 = vpack.c.bf16 %v4747_v57, %v4699_v36  ;;  %v3952_v57 = vld [vmem:[%s5633_s1 + $0x860] ss:$16 sps:$4 sm:$0xff]  }
  0x70   : > { %v3951_v47 = vld [vmem:[%s5633_s1 + $0x8c] ss:$16 sps:$4 sm:$0xff]  }
  0x71   : > { %2536 = vmatpush2.bf16.msra.mxu0 %v3886_v49  ;;  %v3937_v49 = vld [vmem:[%s5633_s1 + $0xc8] ss:$16 sps:$4 sm:$0xff]   ;;  %v3957_v36 = vld [vmem:[%s5633_s1 + $0x6c] ss:$16 sps:$4 sm:$0xff]  }
  0x72   : > { %2609 = vmatpush2.bf16.msra.mxu1 %v3889_v50  ;;  %2537 = vmatprep.subr.bf16.mxu0 %v3894_v55  ;;  %v3942_v50 = vld [vmem:[%s5633_s1 + $0x8a4] ss:$16 sps:$4 sm:$0xff]   ;;  %v3940_v55 = vld [vmem:[%s5633_s1 + $0x8a0] ss:$16 sps:$4 sm:$0xff]  }
  0x73   : > { %2610 = vmatprep.subr.bf16.mxu1 %v3897_v59  ;;  %v3943_v59 = vld [vmem:[%s5633_s1 + $0xa8] ss:$16 sps:$4 sm:$0xff]  }
  0x75   : > { %2538 = vmatpush2.bf16.msra.mxu0 %v3892_v61  ;;  %v3948_v61 = vld [vmem:[%s5633_s1 + $0x884] ss:$16 sps:$4 sm:$0xff]  }
  0x76   : > { %2611 = vmatpush2.bf16.msra.mxu1 %v3895_v62  ;;  %2539 = vmatprep.subr.bf16.mxu0 %v3900_v1  ;;  %v3946_v62 = vld [vmem:[%s5633_s1 + $0x880] ss:$16 sps:$4 sm:$0xff]   ;;  %v3949_v1 = vld [vmem:[%s5633_s1 + $0x88] ss:$16 sps:$4 sm:$0xff]  }
  0x77   : > { %2612 = vmatprep.subr.bf16.mxu1 %v3903_v7  ;;  %v3954_v7 = vld [vmem:[%s5633_s1 + $0x864] ss:$16 sps:$4 sm:$0xff]  }
  0x79   : > { %2540 = vmatpush2.bf16.msra.mxu0 %v3898_v8  ;;  %v4914_v8 = vpack.c.bf16 %v4636_v6, %v4634_v3  ;;  %v3963_v3 = vld [vmem:[%s5633_s1 + $0x4c] ss:$16 sps:$4 sm:$0xff]  }
  0x7a   : > { %2613 = vmatpush2.bf16.msra.mxu1 %v3901_v20  ;;  %2541 = vmatprep.subr.bf16.mxu0 %v3906_v9  ;;  %v4916_v20 = vld [vmem:[#allocation2 + $0x82] sm:$0xff]  ;;  %v402_v9 = vld [vmem:[#allocation2 + $0x91] sm:$0xff] }
  0x7b   : > { %2614 = vmatprep.subr.bf16.mxu1 %v3909_v10  ;;  %v3955_v10 = vld [vmem:[%s5633_s1 + $0x68] ss:$16 sps:$4 sm:$0xff]   ;;  %v4929_v6 = vpack.c.bf16 %v4916_v20, %v4749_v58  ;;  %v3966_v58 = vld [vmem:[%s5633_s1 + $0x824] ss:$16 sps:$4 sm:$0xff]  }
  0x7d   : > { %2542 = vmatpush2.bf16.msra.mxu0 %v3904_v11  ;;  %v3960_v11 = vld [vmem:[%s5633_s1 + $0x844] ss:$16 sps:$4 sm:$0xff]  }
  0x7e   : > { %2615 = vmatpush2.bf16.msra.mxu1 %v3907_v12  ;;  %2543 = vmatprep.subr.bf16.mxu0 %v3912_v13  ;;  %v4932_v12 = vpack.c.bf16 %v402_v9, %v4681_v30  ;;  %v3958_v13 = vld [vmem:[%s5633_s1 + $0x840] ss:$16 sps:$4 sm:$0xff]   ;;  %v4006_v9 = vld [vmem:[%s5633_s1 + $0x148] ss:$16 sps:$4 sm:$0xff]  }
  0x7f   : > { %2616 = vmatprep.subr.bf16.mxu1 %v3915_v14  ;;  %v3961_v14 = vld [vmem:[%s5633_s1 + $0x48] ss:$16 sps:$4 sm:$0xff]  }
  0x81   : > { %2544 = vmatpush2.bf16.msra.mxu0 %v3910_v15  ;;  %v3969_v15 = vld [vmem:[%s5633_s1 + $0x2c] ss:$16 sps:$4 sm:$0xff]  }
  0x82   : > { %2617 = vmatpush2.bf16.msra.mxu1 %v3913_v22  ;;  %2545 = vmatprep.subr.bf16.mxu0 %v3918_v25  ;;  %v4952_v22 = vpack.c.bf16 %v4681_v30, %v4673_v27  ;;  %v3964_v25 = vld [vmem:[%s5633_s1 + $0x820] ss:$16 sps:$4 sm:$0xff]   ;;  %v3975_v27 = vld [vmem:[%s5633_s1 + $0xc] ss:$16 sps:$4 sm:$0xff]  }
  0x83   : > { %2618 = vmatprep.subr.bf16.mxu1 %v3921_v2  ;;  %v4232_v2 = vld [vmem:[#allocation2] sm:$0xff] }
  0x84   : > { %v3970_v30 = vld [vmem:[%s5633_s1 + $0x800] ss:$16 sps:$4 sm:$0xff]  }
  0x85   : > { %2546 = vmatpush2.bf16.msra.mxu0 %v3916_v17  ;;  %v4958_v17 = vpack.c.bf16 %v4232_v2, %v4737_v52  ;;  %v3973_v52 = vld [vmem:[%s5633_s1 + $0x8] ss:$16 sps:$4 sm:$0xff]  }
  0x86   : > { %2619 = vmatpush2.bf16.msra.mxu1 %v3919_v28  ;;  %2547 = vmatprep.subr.bf16.mxu0 %v3924_v29  ;;  %v3967_v28 = vld [vmem:[%s5633_s1 + $0x28] ss:$16 sps:$4 sm:$0xff]   ;;  %v3972_v29 = vld [vmem:[%s5633_s1 + $0x804] ss:$16 sps:$4 sm:$0xff]  }
  0x87   : > { %2620 = vmatprep.subr.bf16.mxu1 %v3927_v53  ;;  %v3978_v53 = vld [vmem:[%s5633_s1 + $0x1ec] ss:$16 sps:$4 sm:$0xff]   ;;  %v4018_v2 = vld [vmem:[%s5633_s1 + $0x108] ss:$16 sps:$4 sm:$0xff]  }
  0x89   : > { %2548 = vmatpush2.bf16.msra.mxu0 %v3922_v31  ;;  %v3981_v31 = vld [vmem:[%s5633_s1 + $0x2ec] ss:$16 sps:$4 sm:$0xff]  }
  0x8a   : > { %2621 = vmatpush2.bf16.msra.mxu1 %v3925_v32  ;;  %2663 = vmatprep.subr.bf16.mxu0 %v3930_v33  ;;  %v4242_v32 = vmov 0   ;;  %v3976_v33 = vld [vmem:[%s5633_s1 + $0x1e8] ss:$16 sps:$4 sm:$0xff]  }
  0x8b   : > { %2736 = vmatprep.subr.bf16.mxu1 %v3933_v37  ;;  %v3979_v37 = vld [vmem:[%s5633_s1 + $0x2e8] ss:$16 sps:$4 sm:$0xff]  }
  0x8c   : > { %2550 = vmatmul.mubr.bf16.vlgmr.msra.gmra.mxu0 %v4491_v5 }
  0x8d   : > { %2623 = vmatmul.mubr.bf16.vlgmr.msra.gmra.mxu1 %v4655_v21  ;;  %2664 = vmatpush1.bf16.msra.mxu0 %v3928_v38  ;;  %v3984_v38 = vld [vmem:[%s5633_s1 + $0x1cc] ss:$16 sps:$4 sm:$0xff]  }
  0x8e   : > { %2737 = vmatpush1.bf16.msra.mxu1 %v3931_v40  ;;  %2665 = vmatprep.subr.bf16.mxu0 %v3936_v43  ;;  %v3982_v40 = vld [vmem:[%s5633_s1 + $0x1c8] ss:$16 sps:$4 sm:$0xff]  }
  0x8f   : > { %2738 = vmatprep.subr.bf16.mxu1 %v3939_v44  ;;  %2559 = vmatprep.mubr.bf16.mxu0 %v4855_v45  ;;  %v3985_v43 = vld [vmem:[%s5633_s1 + $0x2c8] ss:$16 sps:$4 sm:$0xff]   ;;  %v3990_v44 = vld [vmem:[%s5633_s1 + $0x1ac] ss:$16 sps:$4 sm:$0xff]  }
  0x90   : > { %2632 = vmatprep.mubr.bf16.mxu1 %v4667_v26 }
  0x91   : > { %2666 = vmatpush1.bf16.msra.mxu0 %v3934_v46  ;;  %v3993_v46 = vld [vmem:[%s5633_s1 + $0x2ac] ss:$16 sps:$4 sm:$0xff]  }
  0x92   : > { %2739 = vmatpush1.bf16.msra.mxu1 %v3937_v49  ;;  %2667 = vmatprep.subr.bf16.mxu0 %v3942_v50  ;;  %v3988_v49 = vld [vmem:[%s5633_s1 + $0x1a8] ss:$16 sps:$4 sm:$0xff]  }
  0x93   : > { %2740 = vmatprep.subr.bf16.mxu1 %v3945_v16  ;;  %v3991_v50 = vld [vmem:[%s5633_s1 + $0x2a8] ss:$16 sps:$4 sm:$0xff]   ;;  %v3996_v16 = vld [vmem:[%s5633_s1 + $0x18c] ss:$16 sps:$4 sm:$0xff]  }
  0x94   : > { %2560 = vmatmul.mubr.bf16.gmra.mxu0 %v4875_v34 }
  0x95   : > { %2633 = vmatmul.mubr.bf16.gmra.mxu1 %v4708_v39  ;;  %2668 = vmatpush1.bf16.msra.mxu0 %v3940_v55  ;;  %v3999_v55 = vld [vmem:[%s5633_s1 + $0x28c] ss:$16 sps:$4 sm:$0xff]  }
  0x96   : > { %2741 = vmatpush1.bf16.msra.mxu1 %v3943_v59  ;;  %2669 = vmatprep.subr.bf16.mxu0 %v3948_v61  ;;  %v3994_v59 = vld [vmem:[%s5633_s1 + $0x188] ss:$16 sps:$4 sm:$0xff]  }
  0x97   : > { %2742 = vmatprep.subr.bf16.mxu1 %v3951_v47  ;;  %2569 = vmatprep.mubr.bf16.mxu0 %v4891_v48  ;;  %v3997_v61 = vld [vmem:[%s5633_s1 + $0x288] ss:$16 sps:$4 sm:$0xff]   ;;  %v4002_v47 = vld [vmem:[%s5633_s1 + $0x16c] ss:$16 sps:$4 sm:$0xff]  }
  0x98   : > { %2642 = vmatprep.mubr.bf16.mxu1 %v4719_v42 }
  0x99   : > { %2670 = vmatpush1.bf16.msra.mxu0 %v3946_v62  ;;  %v4005_v62 = vld [vmem:[%s5633_s1 + $0x26c] ss:$16 sps:$4 sm:$0xff]  }
  0x9a   : > { %2743 = vmatpush1.bf16.msra.mxu1 %v3949_v1  ;;  %2671 = vmatprep.subr.bf16.mxu0 %v3954_v7  ;;  %v4000_v1 = vld [vmem:[%s5633_s1 + $0x168] ss:$16 sps:$4 sm:$0xff]  }
  0x9b   : > { %2744 = vmatprep.subr.bf16.mxu1 %v3957_v36  ;;  %v4003_v7 = vld [vmem:[%s5633_s1 + $0x268] ss:$16 sps:$4 sm:$0xff]   ;;  %v4008_v36 = vld [vmem:[%s5633_s1 + $0x14c] ss:$16 sps:$4 sm:$0xff]  }
  0x9c   : > { %2570 = vmatmul.mubr.bf16.gmra.mxu0 %v4914_v8 }
  0x9d   : > { %2643 = vmatmul.mubr.bf16.gmra.mxu1 %v4755_v60  ;;  %2672 = vmatpush1.bf16.msra.mxu0 %v3952_v57  ;;  %v4011_v57 = vld [vmem:[%s5633_s1 + $0x24c] ss:$16 sps:$4 sm:$0xff]  }
  0x9e   : > { %2745 = vmatpush1.bf16.msra.mxu1 %v3955_v10  ;;  %2673 = vmatprep.subr.bf16.mxu0 %v3960_v11  ;;  %v4009_v10 = vld [vmem:[%s5633_s1 + $0x248] ss:$16 sps:$4 sm:$0xff]  }
  0x9f   : > { %2746 = vmatprep.subr.bf16.mxu1 %v3963_v3  ;;  %2579 = vmatprep.mubr.bf16.mxu0 %v4929_v6  ;;  %v418_v11 = vld [vmem:[#allocation2 + $0x92] sm:$0xff]  ;;  %v4014_v3 = vld [vmem:[%s5633_s1 + $0x12c] ss:$16 sps:$4 sm:$0xff]  }
  0xa0   : > { %2652 = vmatprep.mubr.bf16.mxu1 %v4932_v12 }
  0xa1   : > { %2674 = vmatpush1.bf16.msra.mxu0 %v3958_v13  ;;  %v4017_v13 = vld [vmem:[%s5633_s1 + $0x22c] ss:$16 sps:$4 sm:$0xff]  }
  0xa2   : > { %2747 = vmatpush1.bf16.msra.mxu1 %v3961_v14  ;;  %2675 = vmatprep.subr.bf16.mxu0 %v3966_v58  ;;  %v5064_v14 = vpack.c.bf16 %v418_v11, %v4916_v20  ;;  %v4012_v58 = vld [vmem:[%s5633_s1 + $0x128] ss:$16 sps:$4 sm:$0xff]   ;;  %v4023_v20 = vld [vmem:[%s5633_s1 + $0x20c] ss:$16 sps:$4 sm:$0xff]  }
  0xa3   : > { %2748 = vmatprep.subr.bf16.mxu1 %v3969_v15  ;;  %v4015_v15 = vld [vmem:[%s5633_s1 + $0x228] ss:$16 sps:$4 sm:$0xff]  }
  0xa4   : > { %2580 = vmatmul.mubr.bf16.gmra.mxu0 %v4952_v22  ;;  %v4066_v11 = vld [vmem:[%s5633_s1 + $0x308] ss:$16 sps:$4 sm:$0xff]  }
  0xa5   : > { %2653 = vmatmul.mubr.bf16.gmra.mxu1 %v4958_v17  ;;  %2676 = vmatpush1.bf16.msra.mxu0 %v3964_v25  ;;  %v4020_v25 = vld [vmem:[%s5633_s1 + $0x10c] ss:$16 sps:$4 sm:$0xff]  }
  0xa6   : > { %2749 = vmatpush1.bf16.msra.mxu1 %v3967_v28  ;;  %2677 = vmatprep.subr.bf16.mxu0 %v3972_v29  ;;  %v4021_v28 = vld [vmem:[%s5633_s1 + $0x208] ss:$16 sps:$4 sm:$0xff]   ;;  %v4026_v29 = vld [vmem:[%s5633_s1 + $0x3ec] ss:$16 sps:$4 sm:$0xff]  }
  0xa7   : > { %2750 = vmatprep.subr.bf16.mxu1 %v3975_v27  ;;  %2695 = vmatprep.mubr.bf16.mxu0 %v4242_v32  ;;  %v4029_v27 = vld [vmem:[%s5633_s1 + $0x4ec] ss:$16 sps:$4 sm:$0xff]  }
  0xa8   : > { %2768 = vmatprep.mubr.bf16.mxu1 %v4487_v4  ;;  %v3987_v4 = vld [vmem:[%s5633_s1 + $0x2cc] ss:$16 sps:$4 sm:$0xff]  }
  0xa9   : > { %2678 = vmatpush1.bf16.msra.mxu0 %v3970_v30  ;;  %v4024_v30 = vld [vmem:[%s5633_s1 + $0x3e8] ss:$16 sps:$4 sm:$0xff]  }
  0xaa   : > { %2751 = vmatpush1.bf16.msra.mxu1 %v3973_v52  ;;  %2809 = vmatprep.subr.bf16.mxu0 %v3981_v31  ;;  %v4027_v52 = vld [vmem:[%s5633_s1 + $0x4e8] ss:$16 sps:$4 sm:$0xff]  }
  0xab   : > { %2752 = vmatprep.subr.bf16.mxu1 %v3978_v53  ;;  %v4032_v53 = vld [vmem:[%s5633_s1 + $0x3cc] ss:$16 sps:$4 sm:$0xff]   ;;  %v4030_v31 = vld [vmem:[%s5633_s1 + $0x3c8] ss:$16 sps:$4 sm:$0xff]  }
  0xac   : > { %2696 = vmatmul.mubr.bf16.vlgmr.msra.gmra.mxu0 %v4663_v51 }
  0xad   : > { %2810 = vmatpush1.bf16.msra.mxu0 %v3979_v37  ;;  %2705 = vmatprep.mubr.bf16.mxu0 %v4242_v32  ;;  %v4038_v37 = vld [vmem:[%s5633_s1 + $0x3ac] ss:$16 sps:$4 sm:$0xff]  }
  0xae   : > { %2753 = vmatpush2.bf16.msra.mxu1 %v3976_v33  ;;  %2811 = vmatprep.subr.bf16.mxu0 %v3987_v4  ;;  %v4033_v33 = vld [vmem:[%s5633_s1 + $0x4c8] ss:$16 sps:$4 sm:$0xff]  }
  0xaf   : > { %2754 = vmatprep.subr.bf16.mxu1 %v3984_v38  ;;  %v4036_v38 = vld [vmem:[%s5633_s1 + $0x3a8] ss:$16 sps:$4 sm:$0xff]  }
  0xb0   : > { %v4039_v4 = vld [vmem:[%s5633_s1 + $0x4a8] ss:$16 sps:$4 sm:$0xff]  }
  0xb1   : > { %2812 = vmatpush1.bf16.msra.mxu0 %v3985_v43  ;;  %v4047_v43 = vld [vmem:[%s5633_s1 + $0x48c] ss:$16 sps:$4 sm:$0xff]  }
  0xb2   : > { %2755 = vmatpush2.bf16.msra.mxu1 %v3982_v40  ;;  %2813 = vmatprep.subr.bf16.mxu0 %v3993_v46  ;;  %v4044_v40 = vld [vmem:[%s5633_s1 + $0x38c] ss:$16 sps:$4 sm:$0xff]   ;;  %v4045_v46 = vld [vmem:[%s5633_s1 + $0x488] ss:$16 sps:$4 sm:$0xff]  }
  0xb3   : > { %2756 = vmatprep.subr.bf16.mxu1 %v3990_v44  ;;  %v4042_v44 = vld [vmem:[%s5633_s1 + $0x388] ss:$16 sps:$4 sm:$0xff]  }
  0xb4   : > { %2706 = vmatmul.mubr.bf16.gmra.mxu0 %v4715_v41 }
  0xb5   : > { %2814 = vmatpush1.bf16.msra.mxu0 %v3991_v50  ;;  %2715 = vmatprep.mubr.bf16.mxu0 %v4242_v32  ;;  %v4053_v50 = vld [vmem:[%s5633_s1 + $0x46c] ss:$16 sps:$4 sm:$0xff]  }
  0xb6   : > { %2757 = vmatpush2.bf16.msra.mxu1 %v3988_v49  ;;  %2815 = vmatprep.subr.bf16.mxu0 %v3999_v55  ;;  %v4050_v49 = vld [vmem:[%s5633_s1 + $0x36c] ss:$16 sps:$4 sm:$0xff]   ;;  %v4051_v55 = vld [vmem:[%s5633_s1 + $0x468] ss:$16 sps:$4 sm:$0xff]  }
  0xb7   : > { %2758 = vmatprep.subr.bf16.mxu1 %v3996_v16  ;;  %v4048_v16 = vld [vmem:[%s5633_s1 + $0x368] ss:$16 sps:$4 sm:$0xff]  }
  0xb9   : > { %2816 = vmatpush1.bf16.msra.mxu0 %v3997_v61  ;;  %v4059_v61 = vld [vmem:[%s5633_s1 + $0x44c] ss:$16 sps:$4 sm:$0xff]  }
  0xba   : > { %2759 = vmatpush2.bf16.msra.mxu1 %v3994_v59  ;;  %2817 = vmatprep.subr.bf16.mxu0 %v4005_v62  ;;  %v4056_v59 = vld [vmem:[%s5633_s1 + $0x34c] ss:$16 sps:$4 sm:$0xff]   ;;  %v4057_v62 = vld [vmem:[%s5633_s1 + $0x448] ss:$16 sps:$4 sm:$0xff]  }
  0xbb   : > { %2760 = vmatprep.subr.bf16.mxu1 %v4002_v47  ;;  %v4054_v47 = vld [vmem:[%s5633_s1 + $0x348] ss:$16 sps:$4 sm:$0xff]  }
  0xbc   : > { %2716 = vmatmul.mubr.bf16.gmra.mxu0 %v4765_v63 }
  0xbd   : > { %2818 = vmatpush1.bf16.msra.mxu0 %v4003_v7  ;;  %2725 = vmatprep.mubr.bf16.mxu0 %v4242_v32  ;;  %v4065_v7 = vld [vmem:[%s5633_s1 + $0x42c] ss:$16 sps:$4 sm:$0xff]  }
  0xbe   : > { %2761 = vmatpush2.bf16.msra.mxu1 %v4000_v1  ;;  %2819 = vmatprep.subr.bf16.mxu0 %v4011_v57  ;;  %v4062_v1 = vld [vmem:[%s5633_s1 + $0x32c] ss:$16 sps:$4 sm:$0xff]   ;;  %v4063_v57 = vld [vmem:[%s5633_s1 + $0x428] ss:$16 sps:$4 sm:$0xff]  }
  0xbf   : > { %2762 = vmatprep.subr.bf16.mxu1 %v4008_v36  ;;  %v4060_v36 = vld [vmem:[%s5633_s1 + $0x328] ss:$16 sps:$4 sm:$0xff]  }
  0xc1   : > { %2820 = vmatpush1.bf16.msra.mxu0 %v4009_v10  ;;  %v4071_v10 = vld [vmem:[%s5633_s1 + $0x40c] ss:$16 sps:$4 sm:$0xff]  }
  0xc2   : > { %2763 = vmatpush2.bf16.msra.mxu1 %v4006_v9  ;;  %2821 = vmatprep.subr.bf16.mxu0 %v4017_v13  ;;  %v4068_v9 = vld [vmem:[%s5633_s1 + $0x30c] ss:$16 sps:$4 sm:$0xff]  }
  0xc3   : > { %2764 = vmatprep.subr.bf16.mxu1 %v4014_v3  ;;  %v4069_v3 = vld [vmem:[%s5633_s1 + $0x408] ss:$16 sps:$4 sm:$0xff]   ;;  %v4074_v13 = vld [vmem:[%s5633_s1 + $0x5ec] ss:$16 sps:$4 sm:$0xff]  }
  0xc4   : > { %2726 = vmatmul.mubr.bf16.gmra.mxu0 %v5064_v14 }
  0xc5   : > { %2822 = vmatpush1.bf16.msra.mxu0 %v4015_v15  ;;  %2841 = vmatprep.mubr.bf16.mxu0 %v4527_v18  ;;  %v4035_v18 = vld [vmem:[%s5633_s1 + $0x4cc] ss:$16 sps:$4 sm:$0xff]   ;;  %v4072_v15 = vld [vmem:[%s5633_s1 + $0x5e8] ss:$16 sps:$4 sm:$0xff]  }
  0xc6   : > { %2765 = vmatpush2.bf16.msra.mxu1 %v4012_v58  ;;  %2823 = vmatprep.subr.bf16.mxu0 %v4023_v20  ;;  %v4077_v58 = vld [vmem:[%s5633_s1 + $0x6ec] ss:$16 sps:$4 sm:$0xff]  }
  0xc7   : > { %2766 = vmatprep.subr.bf16.mxu1 %v4020_v25  ;;  %v4075_v25 = vld [vmem:[%s5633_s1 + $0x6e8] ss:$16 sps:$4 sm:$0xff]   ;;  %v4080_v20 = vld [vmem:[%s5633_s1 + $0x5cc] ss:$16 sps:$4 sm:$0xff]  }
  0xc9   : > { %2824 = vmatpush1.bf16.msra.mxu0 %v4021_v28  ;;  %v4081_v28 = vld [vmem:[%s5633_s1 + $0x6c8] ss:$16 sps:$4 sm:$0xff]  }
  0xca   : > { %2767 = vmatpush2.bf16.msra.mxu1 %v4018_v2  ;;  %2825 = vmatprep.subr.bf16.mxu0 %v4026_v29  ;;  %v4078_v2 = vld [vmem:[%s5633_s1 + $0x5c8] ss:$16 sps:$4 sm:$0xff]   ;;  %v4086_v29 = vld [vmem:[%s5633_s1 + $0x5ac] ss:$16 sps:$4 sm:$0xff]  }
  0xcb   : > { %2882 = vmatprep.subr.bf16.mxu1 %v4029_v27  ;;  %v4084_v27 = vld [vmem:[%s5633_s1 + $0x5a8] ss:$16 sps:$4 sm:$0xff]  }
  0xcd   : > { %2769 = vmatmul.mubr.bf16.vlgmr.msra.gmra.mxu1 %v4539_v23  ;;  %2826 = vmatpush2.bf16.msra.mxu0 %v4024_v30  ;;  %v4041_v23 = vld [vmem:[%s5633_s1 + $0x4ac] ss:$16 sps:$4 sm:$0xff]   ;;  %v4087_v30 = vld [vmem:[%s5633_s1 + $0x6a8] ss:$16 sps:$4 sm:$0xff]  }
  0xce   : > { %2883 = vmatpush1.bf16.msra.mxu1 %v4027_v52  ;;  %2827 = vmatprep.subr.bf16.mxu0 %v4032_v53  ;;  %v4092_v52 = vld [vmem:[%s5633_s1 + $0x58c] ss:$16 sps:$4 sm:$0xff]   ;;  %v4090_v53 = vld [vmem:[%s5633_s1 + $0x588] ss:$16 sps:$4 sm:$0xff]  }
  0xcf   : > { %2884 = vmatprep.subr.bf16.mxu1 %v4035_v18  ;;  %2778 = vmatprep.mubr.bf16.mxu1 %v4607_v54  ;;  %v4093_v18 = vld [vmem:[%s5633_s1 + $0x688] ss:$16 sps:$4 sm:$0xff]  }
  0xd1   : > { %2828 = vmatpush2.bf16.msra.mxu0 %v4030_v31  ;;  %v4098_v31 = vld [vmem:[%s5633_s1 + $0x56c] ss:$16 sps:$4 sm:$0xff]  }
  0xd2   : > { %2885 = vmatpush1.bf16.msra.mxu1 %v4033_v33  ;;  %2829 = vmatprep.subr.bf16.mxu0 %v4038_v37  ;;  %v4101_v33 = vld [vmem:[%s5633_s1 + $0x66c] ss:$16 sps:$4 sm:$0xff]   ;;  %v4096_v37 = vld [vmem:[%s5633_s1 + $0x568] ss:$16 sps:$4 sm:$0xff]  }
  0xd3   : > { %2886 = vmatprep.subr.bf16.mxu1 %v4041_v23  ;;  %v4099_v23 = vld [vmem:[%s5633_s1 + $0x668] ss:$16 sps:$4 sm:$0xff]  }
  0xd5   : > { %2779 = vmatmul.mubr.bf16.gmra.mxu1 %v4655_v21  ;;  %2830 = vmatpush2.bf16.msra.mxu0 %v4036_v38  ;;  %v4104_v38 = vld [vmem:[%s5633_s1 + $0x54c] ss:$16 sps:$4 sm:$0xff]  }
  0xd6   : > { %2887 = vmatpush1.bf16.msra.mxu1 %v4039_v4  ;;  %2831 = vmatprep.subr.bf16.mxu0 %v4044_v40  ;;  %v4102_v4 = vld [vmem:[%s5633_s1 + $0x548] ss:$16 sps:$4 sm:$0xff]  }
  0xd7   : > { %2888 = vmatprep.subr.bf16.mxu1 %v4047_v43  ;;  %2788 = vmatprep.mubr.bf16.mxu1 %v4667_v26  ;;  %v4105_v40 = vld [vmem:[%s5633_s1 + $0x648] ss:$16 sps:$4 sm:$0xff]   ;;  %v4110_v43 = vld [vmem:[%s5633_s1 + $0x52c] ss:$16 sps:$4 sm:$0xff]  }
  0xd9   : > { %2832 = vmatpush2.bf16.msra.mxu0 %v4042_v44  ;;  %v4113_v44 = vld [vmem:[%s5633_s1 + $0x62c] ss:$16 sps:$4 sm:$0xff]  }
  0xda   : > { %2889 = vmatpush1.bf16.msra.mxu1 %v4045_v46  ;;  %2833 = vmatprep.subr.bf16.mxu0 %v4050_v49  ;;  %v4108_v46 = vld [vmem:[%s5633_s1 + $0x528] ss:$16 sps:$4 sm:$0xff]  }
  0xdb   : > { %2890 = vmatprep.subr.bf16.mxu1 %v4053_v50  ;;  %v4111_v49 = vld [vmem:[%s5633_s1 + $0x628] ss:$16 sps:$4 sm:$0xff]   ;;  %v4116_v50 = vld [vmem:[%s5633_s1 + $0x50c] ss:$16 sps:$4 sm:$0xff]  }
  0xdd   : > { %2789 = vmatmul.mubr.bf16.gmra.mxu1 %v4708_v39  ;;  %2834 = vmatpush2.bf16.msra.mxu0 %v4048_v16  ;;  %v4114_v16 = vld [vmem:[%s5633_s1 + $0x508] ss:$16 sps:$4 sm:$0xff]  }
  0xde   : > { %2891 = vmatpush1.bf16.msra.mxu1 %v4051_v55  ;;  %2835 = vmatprep.subr.bf16.mxu0 %v4056_v59  ;;  %v4117_v55 = vld [vmem:[%s5633_s1 + $0x608] ss:$16 sps:$4 sm:$0xff]   ;;  %v4122_v59 = vld [vmem:[%s5633_s1 + $0x7ec] ss:$16 sps:$4 sm:$0xff]  }
  0xdf   : > { %2892 = vmatprep.subr.bf16.mxu1 %v4059_v61  ;;  %2798 = vmatprep.mubr.bf16.mxu1 %v4719_v42  ;;  %v4125_v61 = vld [vmem:[%s5633_s1 + $0x8ec] ss:$16 sps:$4 sm:$0xff]  }
  0xe1   : > { %2836 = vmatpush2.bf16.msra.mxu0 %v4054_v47  ;;  %v4120_v47 = vld [vmem:[%s5633_s1 + $0x7e8] ss:$16 sps:$4 sm:$0xff]  }
  0xe2   : > { %2893 = vmatpush1.bf16.msra.mxu1 %v4057_v62  ;;  %2837 = vmatprep.subr.bf16.mxu0 %v4062_v1  ;;  %v4123_v62 = vld [vmem:[%s5633_s1 + $0x8e8] ss:$16 sps:$4 sm:$0xff]   ;;  %v4128_v1 = vld [vmem:[%s5633_s1 + $0x7cc] ss:$16 sps:$4 sm:$0xff]  }
  0xe3   : > { %2894 = vmatprep.subr.bf16.mxu1 %v4065_v7  ;;  %v4126_v7 = vld [vmem:[%s5633_s1 + $0x7c8] ss:$16 sps:$4 sm:$0xff]  }
  0xe5   : > { %2799 = vmatmul.mubr.bf16.gmra.mxu1 %v4755_v60  ;;  %2838 = vmatpush2.bf16.msra.mxu0 %v4060_v36  ;;  %v4129_v36 = vld [vmem:[%s5633_s1 + $0x8c8] ss:$16 sps:$4 sm:$0xff]  }
  0xe6   : > { %2895 = vmatpush1.bf16.msra.mxu1 %v4063_v57  ;;  %2839 = vmatprep.subr.bf16.mxu0 %v4068_v9  ;;  %v4134_v57 = vld [vmem:[%s5633_s1 + $0x7ac] ss:$16 sps:$4 sm:$0xff]   ;;  %v4132_v9 = vld [vmem:[%s5633_s1 + $0x7a8] ss:$16 sps:$4 sm:$0xff]  }
  0xe7   : > { %2896 = vmatprep.subr.bf16.mxu1 %v4071_v10  ;;  %2914 = vmatprep.mubr.bf16.mxu1 %v4769_v0  ;;  %v4083_v0 = vld [vmem:[%s5633_s1 + $0x6cc] ss:$16 sps:$4 sm:$0xff]   ;;  %v4135_v10 = vld [vmem:[%s5633_s1 + $0x8a8] ss:$16 sps:$4 sm:$0xff]  }
  0xe9   : > { %2840 = vmatpush2.bf16.msra.mxu0 %v4066_v11  ;;  %v4140_v11 = vld [vmem:[%s5633_s1 + $0x78c] ss:$16 sps:$4 sm:$0xff]  }
  0xea   : > { %2897 = vmatpush1.bf16.msra.mxu1 %v4069_v3  ;;  %2955 = vmatprep.subr.bf16.mxu0 %v4077_v58  ;;  %v4141_v58 = vld [vmem:[%s5633_s1 + $0x888] ss:$16 sps:$4 sm:$0xff]  }
  0xeb   : > { %2898 = vmatprep.subr.bf16.mxu1 %v4074_v13  ;;  %v4138_v13 = vld [vmem:[%s5633_s1 + $0x788] ss:$16 sps:$4 sm:$0xff]  }
  0xec   : > { %2842 = vmatmul.mubr.bf16.vlgmr.msra.gmra.mxu0 %v4542_v24  ;;  %v4089_v24 = vld [vmem:[%s5633_s1 + $0x6ac] ss:$16 sps:$4 sm:$0xff]  }
  0xed   : > { %2956 = vmatpush1.bf16.msra.mxu0 %v4075_v25  ;;  %2851 = vmatprep.mubr.bf16.mxu0 %v4652_v19  ;;  %v4095_v19 = vld [vmem:[%s5633_s1 + $0x68c] ss:$16 sps:$4 sm:$0xff]  }
  0xee   : > { %2899 = vmatpush2.bf16.msra.mxu1 %v4072_v15  ;;  %2957 = vmatprep.subr.bf16.mxu0 %v4083_v0  ;;  %v4149_v25 = vld [vmem:[%s5633_s1 + $0x86c] ss:$16 sps:$4 sm:$0xff]   ;;  %v4144_v0 = vld [vmem:[%s5633_s1 + $0x768] ss:$16 sps:$4 sm:$0xff]  }
  0xef   : > { %2900 = vmatprep.subr.bf16.mxu1 %v4080_v20 }
  0xf1   : > { %2958 = vmatpush1.bf16.msra.mxu0 %v4081_v28 }
  0xf2   : > { %2901 = vmatpush2.bf16.msra.mxu1 %v4078_v2  ;;  %2959 = vmatprep.subr.bf16.mxu0 %v4089_v24  ;;  %v4147_v2 = vld [vmem:[%s5633_s1 + $0x868] ss:$16 sps:$4 sm:$0xff]  }
  0xf3   : > { %2902 = vmatprep.subr.bf16.mxu1 %v4086_v29  ;;  %v4155_v29 = vld [vmem:[%s5633_s1 + $0x84c] ss:$16 sps:$4 sm:$0xff]  }
  0xf4   : > { %2852 = vmatmul.mubr.bf16.gmra.mxu0 %v4663_v51 }
  0xf5   : > { %2960 = vmatpush1.bf16.msra.mxu0 %v4087_v30  ;;  %2861 = vmatprep.mubr.bf16.mxu0 %v4697_v35  ;;  %v4107_v35 = vld [vmem:[%s5633_s1 + $0x64c] ss:$16 sps:$4 sm:$0xff]   ;;  %v4153_v30 = vld [vmem:[%s5633_s1 + $0x848] ss:$16 sps:$4 sm:$0xff]  }
  0xf6   : > { %2903 = vmatpush2.bf16.msra.mxu1 %v4084_v27  ;;  %2961 = vmatprep.subr.bf16.mxu0 %v4095_v19  ;;  %v4150_v27 = vld [vmem:[%s5633_s1 + $0x748] ss:$16 sps:$4 sm:$0xff]   ;;  %v4161_v19 = vld [vmem:[%s5633_s1 + $0x82c] ss:$16 sps:$4 sm:$0xff]  }
  0xf7   : > { %2904 = vmatprep.subr.bf16.mxu1 %v4092_v52 }
  0xf9   : > { %2962 = vmatpush1.bf16.msra.mxu0 %v4093_v18  ;;  %v4156_v18 = vld [vmem:[%s5633_s1 + $0x728] ss:$16 sps:$4 sm:$0xff]  }
  0xfa   : > { %2905 = vmatpush2.bf16.msra.mxu1 %v4090_v53  ;;  %2963 = vmatprep.subr.bf16.mxu0 %v4101_v33 }
  0xfb   : > { %2906 = vmatprep.subr.bf16.mxu1 %v4098_v31  ;;  %v4159_v31 = vld [vmem:[%s5633_s1 + $0x828] ss:$16 sps:$4 sm:$0xff]  }
  0xfc   : > { %2862 = vmatmul.mubr.bf16.gmra.mxu0 %v4715_v41 }
  0xfd   : > { %2964 = vmatpush1.bf16.msra.mxu0 %v4099_v23  ;;  %2871 = vmatprep.mubr.bf16.mxu0 %v4745_v56  ;;  %v4119_v56 = vld [vmem:[%s5633_s1 + $0x60c] ss:$16 sps:$4 sm:$0xff]  }
  0xfe   : > { %2907 = vmatpush2.bf16.msra.mxu1 %v4096_v37  ;;  %2965 = vmatprep.subr.bf16.mxu0 %v4107_v35  ;;  %v4167_v37 = vld [vmem:[%s5633_s1 + $0x80c] ss:$16 sps:$4 sm:$0xff]   ;;  %v4162_v35 = vld [vmem:[%s5633_s1 + $0x708] ss:$16 sps:$4 sm:$0xff]  }
  0xff   : > { %2908 = vmatprep.subr.bf16.mxu1 %v4104_v38 }
 0x101   : > { %2966 = vmatpush1.bf16.msra.mxu0 %v4105_v40 }
 0x102   : > { %2909 = vmatpush2.bf16.msra.mxu1 %v4102_v4  ;;  %2967 = vmatprep.subr.bf16.mxu0 %v4113_v44  ;;  %v4165_v4 = vld [vmem:[%s5633_s1 + $0x808] ss:$16 sps:$4 sm:$0xff]  }
 0x103   : > { %2910 = vmatprep.subr.bf16.mxu1 %v4110_v43 }
 0x104   : > { %2872 = vmatmul.mubr.bf16.gmra.mxu0 %v4765_v63 }
 0x105   : > { %2968 = vmatpush1.bf16.msra.mxu0 %v4111_v49  ;;  %2987 = vmatprep.mubr.bf16.mxu0 %v4607_v54  ;;  %v4131_v54 = vld [vmem:[%s5633_s1 + $0x8cc] ss:$16 sps:$4 sm:$0xff]  }
 0x106   : > { %2911 = vmatpush2.bf16.msra.mxu1 %v4108_v46  ;;  %2969 = vmatprep.subr.bf16.mxu0 %v4119_v56 }
 0x107   : > { %2912 = vmatprep.subr.bf16.mxu1 %v4116_v50 }
 0x109   : > { %2970 = vmatpush1.bf16.msra.mxu0 %v4117_v55 }
 0x10a   : > { %2913 = vmatpush2.bf16.msra.mxu1 %v4114_v16  ;;  %2971 = vmatprep.subr.bf16.mxu0 %v4122_v59 }
 0x10b   : > { %3028 = vmatprep.subr.bf16.mxu1 %v4125_v61 }
 0x10c   : > { %v5339_v3 = vpop.f32.mrf.mxu0 }
 0x10d   : > { %2915 = vmatmul.mubr.bf16.vlgmr.msra.gmra.mxu1 %v4491_v5  ;;  %2972 = vmatpush2.bf16.msra.mxu0 %v4120_v47  ;;  %v4137_v5 = vld [vmem:[%s5633_s1 + $0x8ac] ss:$16 sps:$4 sm:$0xff]   ;;  %v5347_v15 = vpop.f32.mrf.mxu1 }
 0x10e   : > { %3029 = vmatpush1.bf16.msra.mxu1 %v4123_v62  ;;  %2973 = vmatprep.subr.bf16.mxu0 %v4128_v1  ;;  %v5356_v20 = vpop.f32.mrf.mxu0 }
 0x10f   : > { %3030 = vmatprep.subr.bf16.mxu1 %v4131_v54  ;;  %2924 = vmatprep.mubr.bf16.mxu1 %v4855_v45  ;;  %v4143_v45 = vld [vmem:[%s5633_s1 + $0x88c] ss:$16 sps:$4 sm:$0xff]   ;;  %v5364_v28 = vpop.f32.mrf.mxu1 }
 0x110   : > { %v5373_v24 = vpop.f32.mrf.mxu0 }
 0x111   : > { %2974 = vmatpush2.bf16.msra.mxu0 %v4126_v7  ;;  %v5381_v52 = vpop.f32.mrf.mxu1 }
 0x112   : > { %3031 = vmatpush1.bf16.msra.mxu1 %v4129_v36  ;;  %2975 = vmatprep.subr.bf16.mxu0 %v4134_v57  ;;  %v5390_v53 = vpop.f32.mrf.mxu0 }
 0x113   : > { %3032 = vmatprep.subr.bf16.mxu1 %v4137_v5  ;;  %v5398_v33 = vpop.f32.mrf.mxu1 }
 0x114   : > { %v5406_v23 = vpop.f32.mrf.mxu0 }
 0x115   : > { %2925 = vmatmul.mubr.bf16.gmra.mxu1 %v4875_v34  ;;  %2976 = vmatpush2.bf16.msra.mxu0 %v4132_v9  ;;  %v4146_v34 = vld [vmem:[%s5633_s1 + $0x76c] ss:$16 sps:$4 sm:$0xff]   ;;  %v5409_v38 = vpop.f32.mrf.mxu1 }
 0x116   : > { %3033 = vmatpush1.bf16.msra.mxu1 %v4135_v10  ;;  %2977 = vmatprep.subr.bf16.mxu0 %v4140_v11  ;;  %v5417_v40 = vpop.f32.mrf.mxu0 }
 0x117   : > { %3034 = vmatprep.subr.bf16.mxu1 %v4143_v45  ;;  %2934 = vmatprep.mubr.bf16.mxu1 %v4891_v48  ;;  %v4152_v48 = vld [vmem:[%s5633_s1 + $0x74c] ss:$16 sps:$4 sm:$0xff]   ;;  %v5419_v43 = vpop.f32.mrf.mxu1 }
 0x119   : > { %2978 = vmatpush2.bf16.msra.mxu0 %v4138_v13  ;;  %v5424_v44 = vpop.f32.mrf.mxu1 }
 0x11a   : > { %3035 = vmatpush1.bf16.msra.mxu1 %v4141_v58  ;;  %2979 = vmatprep.subr.bf16.mxu0 %v4146_v34 }
 0x11b   : > { %3036 = vmatprep.subr.bf16.mxu1 %v4149_v25  ;;  %v5428_v49 = vpop.f32.mrf.mxu1 }
 0x11d   : > { %2935 = vmatmul.mubr.bf16.gmra.mxu1 %v4914_v8  ;;  %2980 = vmatpush2.bf16.msra.mxu0 %v4144_v0  ;;  %v4158_v8 = vld [vmem:[%s5633_s1 + $0x72c] ss:$16 sps:$4 sm:$0xff]   ;;  %v5436_v56 = vpop.f32.mrf.mxu1 }
 0x11e   : > { %3037 = vmatpush1.bf16.msra.mxu1 %v4147_v2  ;;  %2981 = vmatprep.subr.bf16.mxu0 %v4152_v48  ;;  %v2479_v48 = vadd.f32 %v5347_v15, %v5339_v3 }
 0x11f   : > { %3038 = vmatprep.subr.bf16.mxu1 %v4155_v29  ;;  %2944 = vmatprep.mubr.bf16.mxu1 %v4929_v6  ;;  %v4164_v6 = vld [vmem:[%s5633_s1 + $0x70c] ss:$16 sps:$4 sm:$0xff]   ;;  %v5440_v55 = vpop.f32.mrf.mxu1 }
 0x121   : > { %2982 = vmatpush2.bf16.msra.mxu0 %v4150_v27 }
 0x122   : > { %3039 = vmatpush1.bf16.msra.mxu1 %v4153_v30  ;;  %2983 = vmatprep.subr.bf16.mxu0 %v4158_v8  ;;  %v2481_v30 = vadd.f32 %v5364_v28, %v5356_v20 }
 0x123   : > { %3040 = vmatprep.subr.bf16.mxu1 %v4161_v19 }
 0x125   : > { %2945 = vmatmul.mubr.bf16.gmra.mxu1 %v4952_v22  ;;  %2984 = vmatpush2.bf16.msra.mxu0 %v4156_v18  ;;  %v5422_v22 = vpop.f32.mrf.mxu0  ;;  %v2483_v18 = vadd.f32 %v5381_v52, %v5373_v24  ;;  %v2491_v24 = vadd.f32 %v5419_v43, %v5417_v40 }
 0x126   : > { %3041 = vmatpush1.bf16.msra.mxu1 %v4159_v31  ;;  %2985 = vmatprep.subr.bf16.mxu0 %v4164_v6 }
 0x127   : > { %3042 = vmatprep.subr.bf16.mxu1 %v4167_v37  ;;  %3060 = vmatprep.mubr.bf16.mxu1 %v4242_v32  ;;  %v5426_v46 = vpop.f32.mrf.mxu0 }
 0x129   : > { %2986 = vmatpush2.bf16.msra.mxu0 %v4162_v35  ;;  %v5434_v50 = vpop.f32.mrf.mxu0  ;;  %v2485_v35 = vadd.f32 %v5398_v33, %v5390_v53  ;;  %v2493_v53 = vadd.f32 %v5424_v44, %v5422_v22 }
 0x12a   : > { %3043 = vmatpush1.bf16.msra.mxu1 %v4165_v4  ;;  %v2499_v43 = vadd.f32 %v5436_v56, %v5434_v50 }
 0x12b   : > { %v5438_v16 = vpop.f32.mrf.mxu0 }
 0x12c   : > { %2988 = vmatmul.mubr.bf16.vlgmr.msra.gmra.mxu0 %v4655_v21 }
 0x12d   : > { %3061 = vmatmul.mubr.bf16.vlgmr.msra.gmra.mxu1 %v4663_v51  ;;  %2997 = vmatprep.mubr.bf16.mxu0 %v4667_v26  ;;  %v5446_v21 = vpop.f32.mrf.mxu0  ;;  %v5448_v51 = vpop.f32.mrf.mxu1 }
 0x12e   : > { %3070 = vmatprep.mubr.bf16.mxu1 %v4242_v32 }
 0x12f   : > { %v5450_v26 = vpop.f32.mrf.mxu0  ;;  %v5452_v59 = vpop.f32.mrf.mxu1 }
 0x134   : > { %2998 = vmatmul.mubr.bf16.gmra.mxu0 %v4708_v39  ;;  %v5458_v39 = vpop.f32.mrf.mxu0 }
 0x135   : > { %3071 = vmatmul.mubr.bf16.gmra.mxu1 %v4715_v41  ;;  %3007 = vmatprep.mubr.bf16.mxu0 %v4719_v42  ;;  %v5460_v41 = vpop.f32.mrf.mxu1 }
 0x136   : > { %3080 = vmatprep.mubr.bf16.mxu1 %v4242_v32  ;;  %v5462_v42 = vpop.f32.mrf.mxu0 }
 0x137   : > { %v5464_v61 = vpop.f32.mrf.mxu1 }
 0x138   : > { %v5468_v47 = vpop.f32.mrf.mxu0 }
 0x13c   : > { %3008 = vmatmul.mubr.bf16.gmra.mxu0 %v4755_v60  ;;  %v5470_v60 = vpop.f32.mrf.mxu1 }
 0x13d   : > { %3081 = vmatmul.mubr.bf16.gmra.mxu1 %v4765_v63  ;;  %3017 = vmatprep.mubr.bf16.mxu0 %v4932_v12  ;;  %v5472_v63 = vpop.f32.mrf.mxu0 }
 0x13e   : > { %3090 = vmatprep.mubr.bf16.mxu1 %v4242_v32  ;;  %v5474_v12 = vpop.f32.mrf.mxu1 }
 0x13f   : > { %5637 = vst [vmem:[#allocation3_spill] sm:$0xff] %v5474_v12  ;;  %v2489_v12 = vadd.f32 %v5409_v38, %v5406_v23 }
 0x144   : > { %3018 = vmatmul.mubr.bf16.gmra.mxu0 %v4958_v17 }
 0x145   : > { %3091 = vmatmul.mubr.bf16.gmra.mxu1 %v5064_v14 }
 0x14c   : > { %v2551_v32 = vpop.f32.mrf.mxu0 }
 0x14d   : > { %v2624_v62 = vpop.f32.mrf.mxu1  ;;  %v2552_v8 = vadd.f32 %v2551_v32, %v2479_v48 }
 0x14e   : > { %v2553_v1 = vpop.f32.mrf.mxu0 }
 0x14f   : > { %v2626_v54 = vpop.f32.mrf.mxu1  ;;  %v2554_v31 = vadd.f32 %v2553_v1, %v2481_v30  ;;  %v2625_v3 = vadd.f32 %v2624_v62, %v2552_v8 }
 0x150   : > { %v2555_v7 = vpop.f32.mrf.mxu0 }
 0x151   : > { %v2628_v57 = vpop.f32.mrf.mxu1  ;;  %v2556_v15 = vadd.f32 %v2555_v7, %v2483_v18  ;;  %v2627_v20 = vadd.f32 %v2626_v54, %v2554_v31 }
 0x152   : > { %v2557_v36 = vpop.f32.mrf.mxu0 }
 0x153   : > { %v2630_v17 = vpop.f32.mrf.mxu1  ;;  %v2558_v28 = vadd.f32 %v2557_v36, %v2485_v35  ;;  %v2629_v52 = vadd.f32 %v2628_v57, %v2556_v15  ;;  %v2495_v36 = vadd.f32 %v5428_v49, %v5426_v46  ;;  %v2505_v35 = vadd.f32 %v5452_v59, %v5450_v26 }
 0x154   : > { %v2561_v5 = vpop.f32.mrf.mxu0  ;;  %v2511_v26 = vadd.f32 %v5464_v61, %v5462_v42 }
 0x155   : > { %v2634_v14 = vpop.f32.mrf.mxu1  ;;  %v2562_v1 = vadd.f32 %v2561_v5, %v2489_v12  ;;  %v2631_v62 = vadd.f32 %v2630_v17, %v2558_v28  ;;  %v2501_v17 = vadd.f32 %v5440_v55, %v5438_v16 }
 0x156   : > { %v2563_v9 = vpop.f32.mrf.mxu0 }
 0x157   : > { %v2636_v13 = vpop.f32.mrf.mxu1  ;;  %v2564_v7 = vadd.f32 %v2563_v9, %v2491_v24  ;;  %v2635_v8 = vadd.f32 %v2634_v14, %v2562_v1  ;;  %v5639_v24 = vld [vmem:[#allocation3_spill] sm:$0xff] }
 0x158   : > { %v2565_v10 = vpop.f32.mrf.mxu0 }
 0x159   : > { %v2638_v25 = vpop.f32.mrf.mxu1  ;;  %v2566_v18 = vadd.f32 %v2565_v10, %v2493_v53  ;;  %v2637_v22 = vadd.f32 %v2636_v13, %v2564_v7  ;;  %v2503_v10 = vadd.f32 %v5448_v51, %v5446_v21 }
 0x15a   : > { %v2567_v11 = vpop.f32.mrf.mxu0 }
 0x15b   : > { %v2640_v29 = vpop.f32.mrf.mxu1  ;;  %v2568_v44 = vadd.f32 %v2567_v11, %v2495_v36 }
 0x15c   : > { %v2571_v45 = vpop.f32.mrf.mxu0 }
 0x15d   : > { %v2644_v6 = vpop.f32.mrf.mxu1  ;;  %v2572_v46 = vadd.f32 %v2571_v45, %v2499_v43  ;;  %v2641_v56 = vadd.f32 %v2640_v29, %v2568_v44  ;;  %v2509_v45 = vadd.f32 %v5460_v41, %v5458_v39 }
 0x15e   : > { %v2573_v58 = vpop.f32.mrf.mxu0 }
 0x15f   : > { %v2646_v48 = vpop.f32.mrf.mxu1  ;;  %v2574_v14 = vadd.f32 %v2573_v58, %v2501_v17 }
 0x160   : > { %v5476_v34 = vpop.f32.mrf.mxu0 }
 0x161   : > { %v2648_v38 = vpop.f32.mrf.mxu1  ;;  %v2576_v16 = vadd.f32 %v5476_v34, %v2503_v10 }
 0x162   : > { %v5478_v0 = vpop.f32.mrf.mxu0 }
 0x163   : > { %v2650_v5 = vpop.f32.mrf.mxu1  ;;  %v2578_v58 = vadd.f32 %v5478_v0, %v2505_v35  ;;  %v2649_v41 = vadd.f32 %v2648_v38, %v2576_v16  ;;  %v2513_v0 = vadd.f32 %v5470_v60, %v5468_v47 }
 0x164   : > { %v5480_v2 = vpop.f32.mrf.mxu0 }
 0x165   : > { %v2654_v13 = vpop.f32.mrf.mxu1  ;;  %v2582_v34 = vadd.f32 %v5480_v2, %v2509_v45 }
 0x166   : > { %v5484_v27 = vpop.f32.mrf.mxu0 }
 0x167   : > { %v2656_v59 = vpop.f32.mrf.mxu1 }
 0x168   : > { %v5488_v19 = vpop.f32.mrf.mxu0 }
 0x169   : > { %5638 = vst [vmem:[#allocation4_spill] sm:$0xff] %v5488_v19  ;;  %v2658_v2 = vpop.f32.mrf.mxu1 }
 0x16a   : > { %v5492_v37 = vpop.f32.mrf.mxu0 }
 0x16b   : > { %v2660_v36 = vpop.f32.mrf.mxu1 }
 0x16c   : > { %v2697_v4 = vpop.f32.mrf.mxu0 }
 0x16d   : > { %v2698_v32 = vadd.f32 %v2697_v4, %v2625_v3  ;;  %v2645_v3 = vadd.f32 %v2644_v6, %v2572_v46 }
 0x16e   : > { %v2699_v19 = vpop.f32.mrf.mxu0 }
 0x16f   : > { %v2700_v30 = vadd.f32 %v2699_v19, %v2627_v20  ;;  %4168 = vtanh.f32 %v2698_v32  ;;  %v2639_v19 = vadd.f32 %v2638_v25, %v2566_v18  ;;  %v2647_v25 = vadd.f32 %v2646_v48, %v2574_v14 }
 0x170   : > { %v2701_v33 = vpop.f32.mrf.mxu0  ;;  %v2651_v32 = vadd.f32 %v2650_v5, %v2578_v58  ;;  %v2584_v48 = vadd.f32 %v5484_v27, %v2511_v26  ;;  %v5640_v53 = vld [vmem:[#allocation4_spill] sm:$0xff] }
 0x171   : > { %4170 = vtanh.f32 %v2700_v30  ;;  %v2702_v23 = vadd.f32 %v2701_v33, %v2629_v52  ;;  %v2515_v52 = vadd.f32 %v5639_v24, %v5472_v63  ;;  %v2655_v30 = vadd.f32 %v2654_v13, %v2582_v34 }
 0x172   : > { %v2703_v54 = vpop.f32.mrf.mxu0  ;;  %v2586_v33 = vadd.f32 %v5640_v53, %v2513_v0  ;;  %v2657_v27 = vadd.f32 %v2656_v59, %v2584_v48 }
 0x173   : > { %v2704_v40 = vadd.f32 %v2703_v54, %v2631_v62  ;;  %4172 = vtanh.f32 %v2702_v23  ;;  %v2588_v23 = vadd.f32 %v5492_v37, %v2515_v52 }
 0x174   : > { %v2707_v12 = vpop.f32.mrf.mxu0 }
 0x175   : > { %4174 = vtanh.f32 %v2704_v40  ;;  %v2708_v57 = vadd.f32 %v2707_v12, %v2635_v8  ;;  %v2659_v8 = vadd.f32 %v2658_v2, %v2586_v33 }
 0x176   : > { %v2709_v9 = vpop.f32.mrf.mxu0 }
 0x177   : > { %v2710_v49 = vadd.f32 %v2709_v9, %v2637_v22  ;;  %4176 = vtanh.f32 %v2708_v57  ;;  %v2661_v22 = vadd.f32 %v2660_v36, %v2588_v23 }
 0x178   : > { %v2711_v50 = vpop.f32.mrf.mxu0 }
 0x179   : > { %4178 = vtanh.f32 %v2710_v49  ;;  %v2712_v11 = vadd.f32 %v2711_v50, %v2639_v19 }
 0x17a   : > { %v2713_v31 = vpop.f32.mrf.mxu0 }
 0x17b   : > { %v2714_v55 = vadd.f32 %v2713_v31, %v2641_v56  ;;  %4180 = vtanh.f32 %v2712_v11 }
 0x17c   : > { %v2717_v21 = vpop.f32.mrf.mxu0  ;;  %v4169_v51 = vpop.eup %4168 }
 0x17d   : > { %4182 = vtanh.f32 %v2714_v55  ;;  %v2718_v29 = vadd.f32 %v2717_v21, %v2645_v3 }
 0x17e   : > { %v4171_v15 = vpop.eup %4170  ;;  %v2719_v39 = vpop.f32.mrf.mxu0 }
 0x17f   : > { %v3691_v6 = vpack.c.bf16 %v4171_v15, %v4169_v51  ;;  %v2720_v4 = vadd.f32 %v2719_v39, %v2647_v25  ;;  %4184 = vtanh.f32 %v2718_v29 }
 0x180   : > { %v2721_v20 = vpop.f32.mrf.mxu0  ;;  %v4173_v28 = vpop.eup %4172 }
 0x181   : > { %3229 = vst [vmem:[%s5520_s30] sm:$0xff] %v3691_v6  ;;  %4186 = vtanh.f32 %v2720_v4  ;;  %v2722_v42 = vadd.f32 %v2721_v20, %v2649_v41 }
 0x182   : > { %v4175_v61 = vpop.eup %4174  ;;  %v2723_v1 = vpop.f32.mrf.mxu0 }
 0x183   : > { %v3693_v47 = vpack.c.bf16 %v4175_v61, %v4173_v28  ;;  %v2724_v60 = vadd.f32 %v2723_v1, %v2651_v32  ;;  %4188 = vtanh.f32 %v2722_v42 }
 0x184   : > { %v2727_v62 = vpop.f32.mrf.mxu0  ;;  %v4177_v7 = vpop.eup %4176 }
 0x185   : > { %3231 = vst [vmem:[%s5520_s30 + $0x10] sm:$0xff] %v3693_v47  ;;  %4190 = vtanh.f32 %v2724_v60  ;;  %v2728_v38 = vadd.f32 %v2727_v62, %v2655_v30 }
 0x186   : > { %v4179_v54 = vpop.eup %4178  ;;  %v2729_v63 = vpop.f32.mrf.mxu0 }
 0x187   : > { %v3695_v18 = vpack.c.bf16 %v4179_v54, %v4177_v7  ;;  %v2730_v40 = vadd.f32 %v2729_v63, %v2657_v27  ;;  %4192 = vtanh.f32 %v2728_v38 }
 0x188   : > { %v2731_v43 = vpop.f32.mrf.mxu0  ;;  %v4181_v12 = vpop.eup %4180 }
 0x189   : > { %3233 = vst [vmem:[%s5520_s30 + $0x20] sm:$0xff] %v3695_v18  ;;  %4194 = vtanh.f32 %v2730_v40  ;;  %v2732_v44 = vadd.f32 %v2731_v43, %v2659_v8 }
 0x18a   : > { %v4183_v57 = vpop.eup %4182  ;;  %v2733_v37 = vpop.f32.mrf.mxu0 }
 0x18b   : > { %v3697_v5 = vpack.c.bf16 %v4183_v57, %v4181_v12  ;;  %v2734_v9 = vadd.f32 %v2733_v37, %v2661_v22  ;;  %4196 = vtanh.f32 %v2732_v44 }
 0x18c   : > { %v4185_v17 = vpop.eup %4184 }
 0x18d   : > { %3235 = vst [vmem:[%s5520_s30 + $0x30] sm:$0xff] %v3697_v5  ;;  %4198 = vtanh.f32 %v2734_v9  ;;  %v2770_v49 = vpop.f32.mrf.mxu1 }
 0x18e   : > { %v4187_v19 = vpop.eup %4186 }
 0x18f   : > { %v3699_v46 = vpack.c.bf16 %v4187_v19, %v4185_v17  ;;  %v2772_v14 = vpop.f32.mrf.mxu1 }
 0x190   : > { %v4189_v10 = vpop.eup %4188 }
 0x191   : > { %3237 = vst [vmem:[%s5520_s30 + $0x40] sm:$0xff] %v3699_v46  ;;  %v2774_v35 = vpop.f32.mrf.mxu1 }
 0x192   : > { %v4191_v50 = vpop.eup %4190 }
 0x193   : > { %v3701_v56 = vpack.c.bf16 %v4191_v50, %v4189_v10  ;;  %v2776_v45 = vpop.f32.mrf.mxu1 }
 0x194   : > { %v4193_v11 = vpop.eup %4192 }
 0x195   : > { %3239 = vst [vmem:[%s5520_s30 + $0x50] sm:$0xff] %v3701_v56  ;;  %v2780_v21 = vpop.f32.mrf.mxu1 }
 0x196   : > { %v4195_v13 = vpop.eup %4194 }
 0x197   : > { %v3703_v31 = vpack.c.bf16 %v4195_v13, %v4193_v11  ;;  %v5540_v51 = vpop.f32.mrf.mxu1 }
 0x198   : > { %v4197_v3 = vpop.eup %4196 }
 0x199   : > { %3241 = vst [vmem:[%s5520_s30 + $0x60] sm:$0xff] %v3703_v31  ;;  %v5542_v25 = vpop.f32.mrf.mxu1 }
 0x19a   : > { %v4199_v16 = vpop.eup %4198 }
 0x19b   : > { %v3705_v55 = vpack.c.bf16 %v4199_v16, %v4197_v3  ;;  %v5544_v58 = vpop.f32.mrf.mxu1 }
 0x19d   : > { %3243 = vst [vmem:[%s5520_s30 + $0x70] sm:$0xff] %v3705_v55  ;;  %v5546_v15 = vpop.f32.mrf.mxu1 }
 0x19f   : > { %v5548_v59 = vpop.f32.mrf.mxu1 }
 0x1a1   : > { %v5550_v41 = vpop.f32.mrf.mxu1 }
 0x1a3   : > { %v5552_v6 = vpop.f32.mrf.mxu1 }
 0x1a5   : > { %v5554_v0 = vpop.f32.mrf.mxu1 }
 0x1a7   : > { %v5556_v28 = vpop.f32.mrf.mxu1 }
 0x1a9   : > { %v5558_v48 = vpop.f32.mrf.mxu1 }
 0x1ab   : > { %v5560_v61 = vpop.f32.mrf.mxu1 }
 0x1ac   : > { %v2843_v29 = vpop.f32.mrf.mxu0 }
 0x1ad   : > { %v2844_v22 = vadd.f32 %v2843_v29, %v2770_v49 }
 0x1ae   : > { %v2845_v26 = vpop.f32.mrf.mxu0 }
 0x1af   : > { %v2846_v37 = vadd.f32 %v2845_v26, %v2772_v14 }
 0x1b0   : > { %v2847_v39 = vpop.f32.mrf.mxu0 }
 0x1b1   : > { %v2848_v19 = vadd.f32 %v2847_v39, %v2774_v35 }
 0x1b2   : > { %v2849_v34 = vpop.f32.mrf.mxu0 }
 0x1b3   : > { %v2850_v11 = vadd.f32 %v2849_v34, %v2776_v45 }
 0x1b4   : > { %v2853_v4 = vpop.f32.mrf.mxu0 }
 0x1b5   : > { %v2854_v49 = vadd.f32 %v2853_v4, %v2780_v21 }
 0x1b6   : > { %v2855_v20 = vpop.f32.mrf.mxu0 }
 0x1b7   : > { %v2856_v14 = vadd.f32 %v2855_v20, %v5540_v51 }
 0x1b8   : > { %v2857_v32 = vpop.f32.mrf.mxu0 }
 0x1b9   : > { %v2858_v34 = vadd.f32 %v2857_v32, %v5542_v25 }
 0x1ba   : > { %v2859_v42 = vpop.f32.mrf.mxu0 }
 0x1bb   : > { %v2860_v21 = vadd.f32 %v2859_v42, %v5544_v58 }
 0x1bc   : > { %v5562_v52 = vpop.f32.mrf.mxu0 }
 0x1be   : > { %v5564_v30 = vpop.f32.mrf.mxu0 }
 0x1bf   : > { %v2866_v32 = vadd.f32 %v5564_v30, %v5548_v59 }
 0x1c0   : > { %v5566_v47 = vpop.f32.mrf.mxu0 }
 0x1c2   : > { %v5568_v7 = vpop.f32.mrf.mxu0 }
 0x1c3   : > { %v2870_v59 = vadd.f32 %v5568_v7, %v5552_v6 }
 0x1c4   : > { %v5572_v38 = vpop.f32.mrf.mxu0 }
 0x1c6   : > { %v5578_v63 = vpop.f32.mrf.mxu0 }
 0x1c8   : > { %v5584_v40 = vpop.f32.mrf.mxu0 }
 0x1ca   : > { %v5590_v44 = vpop.f32.mrf.mxu0 }
 0x1cb   : > { %5642 = vst [vmem:[#allocation4_spill] sm:$0xff] %v5590_v44 }
 0x1cd   : > { %v2916_v24 = vpop.f32.mrf.mxu1 }
 0x1ce   : > { %v2917_v5 = vadd.f32 %v2916_v24, %v2844_v22 }
 0x1cf   : > { %v2918_v2 = vpop.f32.mrf.mxu1 }
 0x1d0   : > { %v2919_v46 = vadd.f32 %v2918_v2, %v2846_v37 }
 0x1d1   : > { %v2920_v1 = vpop.f32.mrf.mxu1 }
 0x1d2   : > { %v2921_v13 = vadd.f32 %v2920_v1, %v2848_v19 }
 0x1d3   : > { %v2922_v53 = vpop.f32.mrf.mxu1 }
 0x1d4   : > { %v2923_v29 = vadd.f32 %v2922_v53, %v2850_v11 }
 0x1d5   : > { %v2926_v33 = vpop.f32.mrf.mxu1 }
 0x1d6   : > { %v2927_v35 = vadd.f32 %v2926_v33, %v2854_v49 }
 0x1d7   : > { %v2928_v60 = vpop.f32.mrf.mxu1 }
 0x1d8   : > { %v2929_v1 = vadd.f32 %v2928_v60, %v2856_v14 }
 0x1d9   : > { %v2930_v62 = vpop.f32.mrf.mxu1 }
 0x1da   : > { %v2931_v51 = vadd.f32 %v2930_v62, %v2858_v34  ;;  %v5643_v34 = vld [vmem:[#allocation4_spill] sm:$0xff] }
 0x1db   : > { %v2932_v27 = vpop.f32.mrf.mxu1 }
 0x1dd   : > { %v5570_v23 = vpop.f32.mrf.mxu1 }
 0x1df   : > { %v5574_v54 = vpop.f32.mrf.mxu1 }
 0x1e1   : > { %v5576_v36 = vpop.f32.mrf.mxu1 }
 0x1e3   : > { %v5580_v8 = vpop.f32.mrf.mxu1 }
 0x1e5   : > { %v5582_v18 = vpop.f32.mrf.mxu1 }
 0x1e7   : > { %v5586_v43 = vpop.f32.mrf.mxu1 }
 0x1e9   : > { %v5588_v12 = vpop.f32.mrf.mxu1 }
 0x1ea   : > { %5641 = vst [vmem:[#allocation3_spill] sm:$0xff] %v5588_v12 }
 0x1eb   : > { %v5592_v57 = vpop.f32.mrf.mxu1 }
 0x1ec   : > { %v2989_v9 = vpop.f32.mrf.mxu0 }
 0x1ed   : > { %v3062_v17 = vpop.f32.mrf.mxu1  ;;  %v2990_v10 = vadd.f32 %v2989_v9, %v2917_v5 }
 0x1ee   : > { %v2991_v50 = vpop.f32.mrf.mxu0 }
 0x1ef   : > { %v3064_v56 = vpop.f32.mrf.mxu1  ;;  %v3063_v31 = vadd.f32 %v3062_v17, %v2990_v10  ;;  %v2992_v3 = vadd.f32 %v2991_v50, %v2919_v46  ;;  %v2933_v17 = vadd.f32 %v2932_v27, %v2860_v21 }
 0x1f0   : > { %v2993_v16 = vpop.f32.mrf.mxu0 }
 0x1f1   : > { %v3066_v55 = vpop.f32.mrf.mxu1  ;;  %v3065_v12 = vadd.f32 %v3064_v56, %v2992_v3  ;;  %v2994_v44 = vadd.f32 %v2993_v16, %v2921_v13  ;;  %4200 = vtanh.f32 %v3063_v31  ;;  %v2868_v56 = vadd.f32 %v5566_v47, %v5550_v41  ;;  %v5644_v21 = vld [vmem:[#allocation3_spill] sm:$0xff] }
 0x1f2   : > { %v2995_v26 = vpop.f32.mrf.mxu0  ;;  %v2874_v41 = vadd.f32 %v5572_v38, %v5554_v0 }
 0x1f3   : > { %v3068_v24 = vpop.f32.mrf.mxu1  ;;  %4202 = vtanh.f32 %v3065_v12  ;;  %v3067_v39 = vadd.f32 %v3066_v55, %v2994_v44  ;;  %v2996_v2 = vadd.f32 %v2995_v26, %v2923_v29  ;;  %v2864_v44 = vadd.f32 %v5562_v52, %v5546_v15 }
 0x1f4   : > { %v2999_v22 = vpop.f32.mrf.mxu0  ;;  %v2939_v15 = vadd.f32 %v5574_v54, %v2866_v32  ;;  %v2943_v55 = vadd.f32 %v5580_v8, %v2870_v59  ;;  %v2876_v29 = vadd.f32 %v5578_v63, %v5556_v28  ;;  %v2878_v8 = vadd.f32 %v5584_v40, %v5558_v48 }
 0x1f5   : > { %v3072_v45 = vpop.f32.mrf.mxu1  ;;  %v3069_v37 = vadd.f32 %v3068_v24, %v2996_v2  ;;  %v3000_v5 = vadd.f32 %v2999_v22, %v2927_v35  ;;  %4204 = vtanh.f32 %v3067_v39  ;;  %v2937_v60 = vadd.f32 %v5570_v23, %v2864_v44 }
 0x1f6   : > { %v3001_v4 = vpop.f32.mrf.mxu0  ;;  %v2941_v23 = vadd.f32 %v5576_v36, %v2868_v56  ;;  %v2947_v24 = vadd.f32 %v5582_v18, %v2874_v41  ;;  %v2949_v22 = vadd.f32 %v5586_v43, %v2876_v29 }
 0x1f7   : > { %v3074_v53 = vpop.f32.mrf.mxu1  ;;  %4206 = vtanh.f32 %v3069_v37  ;;  %v3073_v20 = vadd.f32 %v3072_v45, %v3000_v5  ;;  %v3002_v9 = vadd.f32 %v3001_v4, %v2929_v1  ;;  %v2880_v1 = vadd.f32 %v5643_v34, %v5560_v61 }
 0x1f8   : > { %v3003_v33 = vpop.f32.mrf.mxu0  ;;  %v2951_v4 = vadd.f32 %v5644_v21, %v2878_v8 }
 0x1f9   : > { %v3076_v12 = vpop.f32.mrf.mxu1  ;;  %v3075_v19 = vadd.f32 %v3074_v53, %v3002_v9  ;;  %v3004_v25 = vadd.f32 %v3003_v33, %v2931_v51  ;;  %4208 = vtanh.f32 %v3073_v20  ;;  %v2953_v20 = vadd.f32 %v5592_v57, %v2880_v1 }
 0x1fa   : > { %v3005_v58 = vpop.f32.mrf.mxu0 }
 0x1fb   : > { %v3078_v42 = vpop.f32.mrf.mxu1  ;;  %4210 = vtanh.f32 %v3075_v19  ;;  %v3077_v62 = vadd.f32 %v3076_v12, %v3004_v25  ;;  %v3006_v46 = vadd.f32 %v3005_v58, %v2933_v17 }
 0x1fc   : > { %v3009_v10 = vpop.f32.mrf.mxu0 }
 0x1fd   : > { %v3082_v50 = vpop.f32.mrf.mxu1  ;;  %v3079_v52 = vadd.f32 %v3078_v42, %v3006_v46  ;;  %v3010_v27 = vadd.f32 %v3009_v10, %v2937_v60  ;;  %4212 = vtanh.f32 %v3077_v62 }
 0x1fe   : > { %v3011_v30 = vpop.f32.mrf.mxu0  ;;  %v4201_v13 = vpop.eup %4200 }
 0x1ff   : > { %v3084_v11 = vpop.f32.mrf.mxu1  ;;  %4214 = vtanh.f32 %v3079_v52  ;;  %v3083_v31 = vadd.f32 %v3082_v50, %v3010_v27  ;;  %v3012_v3 = vadd.f32 %v3011_v30, %v2939_v15 }
 0x200   : > { %v4203_v16 = vpop.eup %4202  ;;  %v3013_v47 = vpop.f32.mrf.mxu0 }
 0x201   : > { %v3086_v54 = vpop.f32.mrf.mxu1  ;;  %v3692_v49 = vpack.c.bf16 %v4203_v16, %v4201_v13  ;;  %v3085_v6 = vadd.f32 %v3084_v11, %v3012_v3  ;;  %v3014_v7 = vadd.f32 %v3013_v47, %v2941_v23  ;;  %4216 = vtanh.f32 %v3083_v31 }
 0x202   : > { %v3015_v36 = vpop.f32.mrf.mxu0  ;;  %v4205_v26 = vpop.eup %4204 }
 0x203   : > { %v3088_v14 = vpop.f32.mrf.mxu1  ;;  %3230 = vst [vmem:[%s5520_s30 + $0x8] sm:$0xff] %v3692_v49  ;;  %4218 = vtanh.f32 %v3085_v6  ;;  %v3087_v35 = vadd.f32 %v3086_v54, %v3014_v7  ;;  %v3016_v0 = vadd.f32 %v3015_v36, %v2943_v55 }
 0x204   : > { %v4207_v38 = vpop.eup %4206  ;;  %v3019_v39 = vpop.f32.mrf.mxu0 }
 0x205   : > { %v3092_v2 = vpop.f32.mrf.mxu1  ;;  %v3694_v28 = vpack.c.bf16 %v4207_v38, %v4205_v26  ;;  %v3089_v63 = vadd.f32 %v3088_v14, %v3016_v0  ;;  %v3020_v45 = vadd.f32 %v3019_v39, %v2947_v24  ;;  %4220 = vtanh.f32 %v3087_v35 }
 0x206   : > { %v3021_v18 = vpop.f32.mrf.mxu0  ;;  %v4209_v5 = vpop.eup %4208 }
 0x207   : > { %v3094_v37 = vpop.f32.mrf.mxu1  ;;  %3232 = vst [vmem:[%s5520_s30 + $0x18] sm:$0xff] %v3694_v28  ;;  %4222 = vtanh.f32 %v3089_v63  ;;  %v3093_v48 = vadd.f32 %v3092_v2, %v3020_v45  ;;  %v3022_v40 = vadd.f32 %v3021_v18, %v2949_v22 }
 0x208   : > { %v4211_v53 = vpop.eup %4210  ;;  %v3023_v51 = vpop.f32.mrf.mxu0 }
 0x209   : > { %v3096_v43 = vpop.f32.mrf.mxu1  ;;  %v3696_v9 = vpack.c.bf16 %v4211_v53, %v4209_v5  ;;  %v3095_v33 = vadd.f32 %v3094_v37, %v3022_v40  ;;  %v3024_v61 = vadd.f32 %v3023_v51, %v2951_v4  ;;  %4224 = vtanh.f32 %v3093_v48 }
 0x20a   : > { %v3025_v12 = vpop.f32.mrf.mxu0  ;;  %v4213_v44 = vpop.eup %4212 }
 0x20b   : > { %3234 = vst [vmem:[%s5520_s30 + $0x28] sm:$0xff] %v3696_v9  ;;  %4226 = vtanh.f32 %v3095_v33  ;;  %v3097_v17 = vadd.f32 %v3096_v43, %v3024_v61  ;;  %v3026_v19 = vadd.f32 %v3025_v12, %v2953_v20  ;;  %v3098_v32 = vpop.f32.mrf.mxu1 }
 0x20c   : > { %v4215_v25 = vpop.eup %4214 }
 0x20d   : > { %v3698_v58 = vpack.c.bf16 %v4215_v25, %v4213_v44  ;;  %v3099_v42 = vadd.f32 %v3098_v32, %v3026_v19  ;;  %4228 = vtanh.f32 %v3097_v17 }
 0x20e   : > { %v4217_v57 = vpop.eup %4216 }
 0x20f   : > { %3236 = vst [vmem:[%s5520_s30 + $0x38] sm:$0xff] %v3698_v58  ;;  %4230 = vtanh.f32 %v3099_v42 }
 0x210   : > { %v4219_v60 = vpop.eup %4218 }
 0x211   : > { %v3700_v62 = vpack.c.bf16 %v4219_v60, %v4217_v57 }
 0x212   : > { %v4221_v46 = vpop.eup %4220 }
 0x213   : > { %3238 = vst [vmem:[%s5520_s30 + $0x48] sm:$0xff] %v3700_v62 }
 0x214   : > { %v4223_v10 = vpop.eup %4222 }
 0x215   : > { %v3702_v50 = vpack.c.bf16 %v4223_v10, %v4221_v46 }
 0x216   : > { %v4225_v56 = vpop.eup %4224 }
 0x217   : > { %3240 = vst [vmem:[%s5520_s30 + $0x58] sm:$0xff] %v3702_v50 }
 0x218   : > { %v4227_v15 = vpop.eup %4226 }
 0x219   : > { %v3704_v52 = vpack.c.bf16 %v4227_v15, %v4225_v56 }
 0x21a   : > { %v4229_v27 = vpop.eup %4228 }
 0x21b   : > { %3242 = vst [vmem:[%s5520_s30 + $0x68] sm:$0xff] %v3704_v52 }
 0x21c   : > { %v4231_v59 = vpop.eup %4230 }
 0x21d   : > { %v3706_v30 = vpack.c.bf16 %v4231_v59, %v4229_v27 }
 0x21f   : > { %3244 = vst [vmem:[%s5520_s30 + $0x78] sm:$0xff] %v3706_v30 }
 0x220 PF: > { %s14_s15 = sadd.s32 1, %s4239_s15  }
 0x221   : > { %p11_p4 = scmp.ge.s32.totalorder %s14_s15, 4  }
 0x223   :  { %13 = sbr.rel (!%p11_p4) target bundleno = 1 (0x1), region = 68 }

</bundles_post_ra>
